<compile_context>
chip_gen: v7x
topology: tpu7x:2x2x1
jax: 0.10.0
libtpu: 0.0.40
codegen_flags: <defaults>
</compile_context>

<pallas_src>
import functools

import jax
import jax.numpy as jnp
from jax.experimental import pallas as pl
from jax.experimental.pallas import tpu as pltpu


# --------------------------- MfA_Conv tap geometry ---------------------------

PAD = 3  # max padding over all branches (the dilation-3 "low" branch)

# (name, kh, kw, dilation, (pad_h, pad_w), output-column block index)
_BRANCHES = [
    ("high_h", 3, 1, 1, (1, 0), 0),
    ("high_w", 1, 3, 1, (0, 1), 1),
    ("low",    3, 3, 3, (3, 3), 2),
    ("basic",  3, 3, 1, (1, 1), 3),
]


def _tap_offsets():
    offs = set()
    for (_, kh, kw, d, (ph, pw), _) in _BRANCHES:
        for i in range(kh):
            for j in range(kw):
                offs.add((i * d + PAD - ph, j * d + PAD - pw))
    return sorted(offs)


_TAPS = _tap_offsets()                         # 17 unique taps (24 raw, 1 shared)
_TAP_INDEX = {o: t for t, o in enumerate(_TAPS)}


def build_tap_weights(weights, cin, planes):
    """Pack the 4 branch weights into one (n_taps, Cin, 4P) bf16 slab.

    weights: dict name -> (kh, kw, Cin, P) float32 (HWIO).  Branch outputs are
    concatenated on channels in order [high_h, high_w, low, basic].
    """
    cout = 4 * planes
    w_taps = jnp.zeros((len(_TAPS), cin, cout), jnp.float32)
    for (name, kh, kw, d, (ph, pw), bidx) in _BRANCHES:
        w = weights[name]
        for i in range(kh):
            for j in range(kw):
                t = _TAP_INDEX[(i * d + PAD - ph, j * d + PAD - pw)]
                w_taps = w_taps.at[t, :, bidx * planes:(bidx + 1) * planes].add(
                    w[i, j])
    return w_taps.astype(jnp.bfloat16)


# ------------------------------ Pallas kernels -------------------------------

def mfa_conv_pallas(x_pad, w_taps, ho, wo):
    """Fused 4-branch MfA_Conv (stride 1) + BN partial statistics.

    x_pad : (N, Ho+2*PAD, Wo+2*PAD, Cin)  bf16 or f32 (cast to bf16 in-kernel)
    w_taps: (T, Cin, Cout) bf16
    Returns (y, stats):  y (N, Ho, Wo, Cout) f32,
                         stats (N, 2, Cout) f32 per-image [sum, sum_sq].
    """
    n, hp, wp, cin = x_pad.shape
    t, _, cout = w_taps.shape

    def kernel(x_ref, w_ref, y_ref, st_ref):
        acc = jnp.zeros((ho * wo, cout), jnp.float32)
        for ti, (dy, dx) in enumerate(_TAPS):          # static tap loop
            win = x_ref[0, dy:dy + ho, dx:dx + wo, :].astype(jnp.bfloat16)
            win = win.reshape(ho * wo, cin)
            acc = acc + jnp.dot(win, w_ref[ti],
                                preferred_element_type=jnp.float32)
        y_ref[0] = acc.reshape(ho, wo, cout)
        s = jnp.sum(acc, axis=0, keepdims=True)
        ss = jnp.sum(acc * acc, axis=0, keepdims=True)
        st_ref[0] = jnp.concatenate([s, ss], axis=0)

    return pl.pallas_call(
        kernel,
        out_shape=(jax.ShapeDtypeStruct((n, ho, wo, cout), jnp.float32),
                   jax.ShapeDtypeStruct((n, 2, cout), jnp.float32)),
        grid=(n,),
        in_specs=[
            pl.BlockSpec((1, hp, wp, cin), lambda i: (i, 0, 0, 0)),
            pl.BlockSpec((t, cin, cout), lambda i: (0, 0, 0)),
        ],
        out_specs=(
            pl.BlockSpec((1, ho, wo, cout), lambda i: (i, 0, 0, 0)),
            pl.BlockSpec((1, 2, cout), lambda i: (i, 0, 0)),
        ),
        compiler_params=pltpu.CompilerParams(
            dimension_semantics=("parallel",)),
    )(x_pad, w_taps)


def bn_relu_pad_pallas(y, ss):
    """relu(y * scale + shift), written into a zero-padded (PAD) image.

    y : (N, Ho, Wo, C) f32,  ss: (2, C) f32 = [scale; shift].
    Returns (N, Ho+2*PAD, Wo+2*PAD, C) f32 -- ready to feed conv2.
    """
    n, ho, wo, c = y.shape
    hp, wp = ho + 2 * PAD, wo + 2 * PAD

    def kernel(y_ref, ss_ref, o_ref):
        scale = ss_ref[0:1, :].reshape(1, 1, c)
        shift = ss_ref[1:2, :].reshape(1, 1, c)
        o_ref[...] = jnp.zeros((1, hp, wp, c), o_ref.dtype)
        v = jnp.maximum(y_ref[0] * scale + shift, 0.0)
        o_ref[0, PAD:PAD + ho, PAD:PAD + wo, :] = v

    return pl.pallas_call(
        kernel,
        out_shape=jax.ShapeDtypeStruct((n, hp, wp, c), jnp.float32),
        grid=(n,),
        in_specs=[pl.BlockSpec((1, ho, wo, c), lambda i: (i, 0, 0, 0)),
                  pl.BlockSpec((2, c), lambda i: (0, 0))],
        out_specs=pl.BlockSpec((1, hp, wp, c), lambda i: (i, 0, 0, 0)),
        compiler_params=pltpu.CompilerParams(
            dimension_semantics=("parallel",)),
    )(y, ss)


def bn_add_relu_pallas(a, b, ss):
    """relu( a*sa + ba  +  b*sb + bb );  a, b: (N, Ho, Wo, C) f32, ss: (4, C)."""
    n, ho, wo, c = a.shape

    def kernel(a_ref, b_ref, ss_ref, o_ref):
        sa = ss_ref[0:1, :].reshape(1, 1, c)
        ba = ss_ref[1:2, :].reshape(1, 1, c)
        sb = ss_ref[2:3, :].reshape(1, 1, c)
        bb = ss_ref[3:4, :].reshape(1, 1, c)
        v = a_ref[0] * sa + ba + b_ref[0] * sb + bb
        o_ref[0] = jnp.maximum(v, 0.0)

    return pl.pallas_call(
        kernel,
        out_shape=jax.ShapeDtypeStruct((n, ho, wo, c), jnp.float32),
        grid=(n,),
        in_specs=[pl.BlockSpec((1, ho, wo, c), lambda i: (i, 0, 0, 0)),
                  pl.BlockSpec((1, ho, wo, c), lambda i: (i, 0, 0, 0)),
                  pl.BlockSpec((4, c), lambda i: (0, 0))],
        out_specs=pl.BlockSpec((1, ho, wo, c), lambda i: (i, 0, 0, 0)),
        compiler_params=pltpu.CompilerParams(
            dimension_semantics=("parallel",)),
    )(a, b, ss)


# ------------------------------- BN utilities --------------------------------

def _finish_bn(y, stats, bn_params, stride, eps=1e-5):
    """Return (possibly strided) conv output plus BN scale/shift.

    Training-mode batch statistics (biased variance), matching PyTorch's
    normalization.  TODO(synk): running_mean/var buffers are not updated.
    """
    gamma, beta = bn_params["gamma"], bn_params["beta"]
    if stride != 1:
        # TODO(synk): strided MfA_Conv is computed at stride 1 and subsampled;
        # BN stats are then recomputed in plain XLA over the subsampled output.
        y = y[:, ::stride, ::stride, :]
        mean = jnp.mean(y, axis=(0, 1, 2))
        var = jnp.var(y, axis=(0, 1, 2))
    else:
        count = y.shape[0] * y.shape[1] * y.shape[2]
        s = jnp.sum(stats[:, 0, :], axis=0)
        ss = jnp.sum(stats[:, 1, :], axis=0)
        mean = s / count
        var = jnp.maximum(ss / count - mean * mean, 0.0)
    scale = gamma * jax.lax.rsqrt(var + eps)
    shift = beta - mean * scale
    return y, scale, shift


# -------------------------------- BasicBlock ---------------------------------

def init_mfa_conv_params(key, cin, planes, scale=0.1):
    ws = {}
    for idx, (name, kh, kw, _, _, _) in enumerate(_BRANCHES):
        k = jax.random.fold_in(key, idx)
        ws[name] = scale * jax.random.normal(k, (kh, kw, cin, planes),
                                             jnp.float32)
    return ws


def init_bn_params(key, c):
    k1, k2 = jax.random.split(key)
    gamma = 1.0 + 0.1 * jax.random.normal(k1, (c,), jnp.float32)
    beta = 0.1 * jax.random.normal(k2, (c,), jnp.float32)
    return {"gamma": gamma, "beta": beta}


def init_basic_block_params(key, in_planes, planes, stride=1):
    keys = jax.random.split(key, 6)
    c_out = planes * 4
    params = {
        "conv1": init_mfa_conv_params(keys[0], in_planes, planes),
        "bn1": init_bn_params(keys[1], c_out),
        "conv2": init_mfa_conv_params(keys[2], c_out, planes),
        "bn2": init_bn_params(keys[3], c_out),
        "stride": stride,
        "planes": planes,
        "has_shortcut": (stride != 1 or in_planes != c_out),
    }
    if params["has_shortcut"]:
        params["conv_sc"] = init_mfa_conv_params(keys[4], in_planes, planes)
        params["bn_sc"] = init_bn_params(keys[5], c_out)
    return params


def basic_block_forward(x_nchw, params):
    stride = params["stride"]
    planes = params["planes"]
    cout = planes * 4

    x = jnp.transpose(x_nchw, (0, 2, 3, 1)).astype(jnp.float32)   # NCHW -> NHWC
    n, h, w, cin = x.shape

    # One shared zero-padded (bf16) input for conv1 and the shortcut conv.
    x_pad = jnp.pad(
        x, ((0, 0), (PAD, PAD), (PAD, PAD), (0, 0))).astype(jnp.bfloat16)

    # out = relu(bn1(conv1(x)))   -- conv + BN stats in one kernel.
    w1 = build_tap_weights(params["conv1"], cin, planes)
    y1, st1 = mfa_conv_pallas(x_pad, w1, h, w)
    y1, s1, b1 = _finish_bn(y1, st1, params["bn1"], stride)
    ho, wo = y1.shape[1], y1.shape[2]
    # bn1-apply + ReLU fused with zero-padding conv2's input.
    h_pad = bn_relu_pad_pallas(y1, jnp.stack([s1, b1], axis=0))

    # out = bn2(conv2(out))
    w2 = build_tap_weights(params["conv2"], cout, planes)
    y2, st2 = mfa_conv_pallas(h_pad, w2, ho, wo)
    _, s2, b2 = _finish_bn(y2, st2, params["bn2"], 1)

    # shortcut(x)
    if params["has_shortcut"]:
        wsc = build_tap_weights(params["conv_sc"], cin, planes)
        ysc, stsc = mfa_conv_pallas(x_pad, wsc, h, w)
        ysc, ssc, bsc = _finish_bn(ysc, stsc, params["bn_sc"], stride)
    else:
        ysc = x                              # identity (stride==1, cin==cout)
        ssc = jnp.ones((cout,), jnp.float32)
        bsc = jnp.zeros((cout,), jnp.float32)

    # out = relu(bn2(conv2) + bn_sc(shortcut))   -- one fused elementwise pass.
    out = bn_add_relu_pallas(y2, ysc, jnp.stack([s2, b2, ssc, bsc], axis=0))
    return jnp.transpose(out, (0, 3, 1, 2))                       # back to NCHW


# ------------------------------------ main ------------------------------------

if __name__ == "__main__":
    key = jax.random.PRNGKey(0)
    k_x, k_p = jax.random.split(key)

    # Small shapes: batch=2, in_planes=4, planes=4 (-> 16 out channels), 16x16.
    N, in_planes, H, W = 2, 4, 16, 16
    planes, stride = 4, 1
    x = jax.random.normal(k_x, (N, in_planes, H, W), jnp.float32)

    params = init_basic_block_params(k_p, in_planes, planes, stride)

    fwd = jax.jit(functools.partial(basic_block_forward, params=params))
    out = fwd(x)
    jax.block_until_ready(out)

    expected_shape = (N, planes * 4, H // stride, W // stride)
    assert out.shape == expected_shape, (out.shape, expected_shape)
    assert bool(jnp.all(jnp.isfinite(out)))
    assert bool(jnp.all(out >= 0.0))  # final ReLU
    print("KERNEL_OK")
</pallas_src>

<mosaic_0001>
module attributes {stable_mosaic.version = 11 : i64} {
  func.func @kernel(%arg0: i32, %arg1: memref<1x22x22x4xbf16, #tpu.memory_space<vmem>>, %arg2: memref<17x4x16xbf16, #tpu.memory_space<vmem>>, %arg3: memref<1x16x16x16xf32, #tpu.memory_space<vmem>>, %arg4: memref<1x2x16xf32, #tpu.memory_space<vmem>>) attributes {dimension_semantics = [#tpu.dimension_semantics<parallel>], iteration_bounds = array<i64: 2>, scalar_prefetch = 0 : i64, scratch_operands = 0 : i64, tpu.core_type = #tpu.core_type<tc>, window_params = [{transform_indices = @transform_0, window_bounds = array<i64: 1, 22, 22, 4>}, {pipeline_mode = #tpu.pipeline_mode<synchronous>, transform_indices = @transform_1, window_bounds = array<i64: 17, 4, 16>}, {transform_indices = @transform_2, window_bounds = array<i64: 1, 16, 16, 16>}, {transform_indices = @transform_3, window_bounds = array<i64: 1, 2, 16>}]} {
    %cst = arith.constant 0.000000e+00 : f32
    %0 = vector.broadcast %cst : f32 to vector<256x16xf32>
    %c0 = arith.constant 0 : index
    %c0_0 = arith.constant 0 : index
    %c0_1 = arith.constant 0 : index
    %c0_2 = arith.constant 0 : index
    %1 = vector.load %arg1[%c0, %c0_0, %c0_1, %c0_2] : memref<1x22x22x4xbf16, #tpu.memory_space<vmem>>, vector<1x16x16x4xbf16>
    %2 = vector.shape_cast %1 : vector<1x16x16x4xbf16> to vector<16x16x4xbf16>
    %3 = vector.shape_cast %2 : vector<16x16x4xbf16> to vector<256x4xbf16>
    %c0_3 = arith.constant 0 : index
    %c0_4 = arith.constant 0 : index
    %c0_5 = arith.constant 0 : index
    %4 = vector.load %arg2[%c0_3, %c0_4, %c0_5] : memref<17x4x16xbf16, #tpu.memory_space<vmem>>, vector<1x4x16xbf16>
    %5 = vector.shape_cast %4 : vector<1x4x16xbf16> to vector<4x16xbf16>
    %cst_6 = arith.constant dense<0.000000e+00> : vector<256x16xf32>
    %6 = tpu.matmul %3, %5, %cst_6 {dimension_numbers = #tpu.dot_dimension_numbers<[1], [0], [0], [1], [0, 0, 1, 1], [], []>} : vector<256x4xbf16>, vector<4x16xbf16>, vector<256x16xf32> -> vector<256x16xf32>
    %7 = arith.addf %0, %6 : vector<256x16xf32>
    %c0_7 = arith.constant 0 : index
    %c0_8 = arith.constant 0 : index
    %c3 = arith.constant 3 : index
    %c0_9 = arith.constant 0 : index
    %8 = vector.load %arg1[%c0_7, %c0_8, %c3, %c0_9] : memref<1x22x22x4xbf16, #tpu.memory_space<vmem>>, vector<1x16x16x4xbf16>
    %9 = vector.shape_cast %8 : vector<1x16x16x4xbf16> to vector<16x16x4xbf16>
    %10 = vector.shape_cast %9 : vector<16x16x4xbf16> to vector<256x4xbf16>
    %c1 = arith.constant 1 : index
    %c0_10 = arith.constant 0 : index
    %c0_11 = arith.constant 0 : index
    %11 = vector.load %arg2[%c1, %c0_10, %c0_11] : memref<17x4x16xbf16, #tpu.memory_space<vmem>>, vector<1x4x16xbf16>
    %12 = vector.shape_cast %11 : vector<1x4x16xbf16> to vector<4x16xbf16>
    %cst_12 = arith.constant dense<0.000000e+00> : vector<256x16xf32>
    %13 = tpu.matmul %10, %12, %cst_12 {dimension_numbers = #tpu.dot_dimension_numbers<[1], [0], [0], [1], [0, 0, 1, 1], [], []>} : vector<256x4xbf16>, vector<4x16xbf16>, vector<256x16xf32> -> vector<256x16xf32>
    %14 = arith.addf %7, %13 : vector<256x16xf32>
    %c0_13 = arith.constant 0 : index
    %c0_14 = arith.constant 0 : index
    %c6 = arith.constant 6 : index
    %c0_15 = arith.constant 0 : index
    %15 = vector.load %arg1[%c0_13, %c0_14, %c6, %c0_15] : memref<1x22x22x4xbf16, #tpu.memory_space<vmem>>, vector<1x16x16x4xbf16>
    %16 = vector.shape_cast %15 : vector<1x16x16x4xbf16> to vector<16x16x4xbf16>
    %17 = vector.shape_cast %16 : vector<16x16x4xbf16> to vector<256x4xbf16>
    %c2 = arith.constant 2 : index
    %c0_16 = arith.constant 0 : index
    %c0_17 = arith.constant 0 : index
    %18 = vector.load %arg2[%c2, %c0_16, %c0_17] : memref<17x4x16xbf16, #tpu.memory_space<vmem>>, vector<1x4x16xbf16>
    %19 = vector.shape_cast %18 : vector<1x4x16xbf16> to vector<4x16xbf16>
    %cst_18 = arith.constant dense<0.000000e+00> : vector<256x16xf32>
    %20 = tpu.matmul %17, %19, %cst_18 {dimension_numbers = #tpu.dot_dimension_numbers<[1], [0], [0], [1], [0, 0, 1, 1], [], []>} : vector<256x4xbf16>, vector<4x16xbf16>, vector<256x16xf32> -> vector<256x16xf32>
    %21 = arith.addf %14, %20 : vector<256x16xf32>
    %c0_19 = arith.constant 0 : index
    %c2_20 = arith.constant 2 : index
    %c2_21 = arith.constant 2 : index
    %c0_22 = arith.constant 0 : index
    %22 = vector.load %arg1[%c0_19, %c2_20, %c2_21, %c0_22] : memref<1x22x22x4xbf16, #tpu.memory_space<vmem>>, vector<1x16x16x4xbf16>
    %23 = vector.shape_cast %22 : vector<1x16x16x4xbf16> to vector<16x16x4xbf16>
    %24 = vector.shape_cast %23 : vector<16x16x4xbf16> to vector<256x4xbf16>
    %c3_23 = arith.constant 3 : index
    %c0_24 = arith.constant 0 : index
    %c0_25 = arith.constant 0 : index
    %25 = vector.load %arg2[%c3_23, %c0_24, %c0_25] : memref<17x4x16xbf16, #tpu.memory_space<vmem>>, vector<1x4x16xbf16>
    %26 = vector.shape_cast %25 : vector<1x4x16xbf16> to vector<4x16xbf16>
    %cst_26 = arith.constant dense<0.000000e+00> : vector<256x16xf32>
    %27 = tpu.matmul %24, %26, %cst_26 {dimension_numbers = #tpu.dot_dimension_numbers<[1], [0], [0], [1], [0, 0, 1, 1], [], []>} : vector<256x4xbf16>, vector<4x16xbf16>, vector<256x16xf32> -> vector<256x16xf32>
    %28 = arith.addf %21, %27 : vector<256x16xf32>
    %c0_27 = arith.constant 0 : index
    %c2_28 = arith.constant 2 : index
    %c3_29 = arith.constant 3 : index
    %c0_30 = arith.constant 0 : index
    %29 = vector.load %arg1[%c0_27, %c2_28, %c3_29, %c0_30] : memref<1x22x22x4xbf16, #tpu.memory_space<vmem>>, vector<1x16x16x4xbf16>
    %30 = vector.shape_cast %29 : vector<1x16x16x4xbf16> to vector<16x16x4xbf16>
    %31 = vector.shape_cast %30 : vector<16x16x4xbf16> to vector<256x4xbf16>
    %c4 = arith.constant 4 : index
    %c0_31 = arith.constant 0 : index
    %c0_32 = arith.constant 0 : index
    %32 = vector.load %arg2[%c4, %c0_31, %c0_32] : memref<17x4x16xbf16, #tpu.memory_space<vmem>>, vector<1x4x16xbf16>
    %33 = vector.shape_cast %32 : vector<1x4x16xbf16> to vector<4x16xbf16>
    %cst_33 = arith.constant dense<0.000000e+00> : vector<256x16xf32>
    %34 = tpu.matmul %31, %33, %cst_33 {dimension_numbers = #tpu.dot_dimension_numbers<[1], [0], [0], [1], [0, 0, 1, 1], [], []>} : vector<256x4xbf16>, vector<4x16xbf16>, vector<256x16xf32> -> vector<256x16xf32>
    %35 = arith.addf %28, %34 : vector<256x16xf32>
    %c0_34 = arith.constant 0 : index
    %c2_35 = arith.constant 2 : index
    %c4_36 = arith.constant 4 : index
    %c0_37 = arith.constant 0 : index
    %36 = vector.load %arg1[%c0_34, %c2_35, %c4_36, %c0_37] : memref<1x22x22x4xbf16, #tpu.memory_space<vmem>>, vector<1x16x16x4xbf16>
    %37 = vector.shape_cast %36 : vector<1x16x16x4xbf16> to vector<16x16x4xbf16>
    %38 = vector.shape_cast %37 : vector<16x16x4xbf16> to vector<256x4xbf16>
    %c5 = arith.constant 5 : index
    %c0_38 = arith.constant 0 : index
    %c0_39 = arith.constant 0 : index
    %39 = vector.load %arg2[%c5, %c0_38, %c0_39] : memref<17x4x16xbf16, #tpu.memory_space<vmem>>, vector<1x4x16xbf16>
    %40 = vector.shape_cast %39 : vector<1x4x16xbf16> to vector<4x16xbf16>
    %cst_40 = arith.constant dense<0.000000e+00> : vector<256x16xf32>
    %41 = tpu.matmul %38, %40, %cst_40 {dimension_numbers = #tpu.dot_dimension_numbers<[1], [0], [0], [1], [0, 0, 1, 1], [], []>} : vector<256x4xbf16>, vector<4x16xbf16>, vector<256x16xf32> -> vector<256x16xf32>
    %42 = arith.addf %35, %41 : vector<256x16xf32>
    %c0_41 = arith.constant 0 : index
    %c3_42 = arith.constant 3 : index
    %c0_43 = arith.constant 0 : index
    %c0_44 = arith.constant 0 : index
    %43 = vector.load %arg1[%c0_41, %c3_42, %c0_43, %c0_44] : memref<1x22x22x4xbf16, #tpu.memory_space<vmem>>, vector<1x16x16x4xbf16>
    %44 = vector.shape_cast %43 : vector<1x16x16x4xbf16> to vector<16x16x4xbf16>
    %45 = vector.shape_cast %44 : vector<16x16x4xbf16> to vector<256x4xbf16>
    %c6_45 = arith.constant 6 : index
    %c0_46 = arith.constant 0 : index
    %c0_47 = arith.constant 0 : index
    %46 = vector.load %arg2[%c6_45, %c0_46, %c0_47] : memref<17x4x16xbf16, #tpu.memory_space<vmem>>, vector<1x4x16xbf16>
    %47 = vector.shape_cast %46 : vector<1x4x16xbf16> to vector<4x16xbf16>
    %cst_48 = arith.constant dense<0.000000e+00> : vector<256x16xf32>
    %48 = tpu.matmul %45, %47, %cst_48 {dimension_numbers = #tpu.dot_dimension_numbers<[1], [0], [0], [1], [0, 0, 1, 1], [], []>} : vector<256x4xbf16>, vector<4x16xbf16>, vector<256x16xf32> -> vector<256x16xf32>
    %49 = arith.addf %42, %48 : vector<256x16xf32>
    %c0_49 = arith.constant 0 : index
    %c3_50 = arith.constant 3 : index
    %c2_51 = arith.constant 2 : index
    %c0_52 = arith.constant 0 : index
    %50 = vector.load %arg1[%c0_49, %c3_50, %c2_51, %c0_52] : memref<1x22x22x4xbf16, #tpu.memory_space<vmem>>, vector<1x16x16x4xbf16>
    %51 = vector.shape_cast %50 : vector<1x16x16x4xbf16> to vector<16x16x4xbf16>
    %52 = vector.shape_cast %51 : vector<16x16x4xbf16> to vector<256x4xbf16>
    %c7 = arith.constant 7 : index
    %c0_53 = arith.constant 0 : index
    %c0_54 = arith.constant 0 : index
    %53 = vector.load %arg2[%c7, %c0_53, %c0_54] : memref<17x4x16xbf16, #tpu.memory_space<vmem>>, vector<1x4x16xbf16>
    %54 = vector.shape_cast %53 : vector<1x4x16xbf16> to vector<4x16xbf16>
    %cst_55 = arith.constant dense<0.000000e+00> : vector<256x16xf32>
    %55 = tpu.matmul %52, %54, %cst_55 {dimension_numbers = #tpu.dot_dimension_numbers<[1], [0], [0], [1], [0, 0, 1, 1], [], []>} : vector<256x4xbf16>, vector<4x16xbf16>, vector<256x16xf32> -> vector<256x16xf32>
    %56 = arith.addf %49, %55 : vector<256x16xf32>
    %c0_56 = arith.constant 0 : index
    %c3_57 = arith.constant 3 : index
    %c3_58 = arith.constant 3 : index
    %c0_59 = arith.constant 0 : index
    %57 = vector.load %arg1[%c0_56, %c3_57, %c3_58, %c0_59] : memref<1x22x22x4xbf16, #tpu.memory_space<vmem>>, vector<1x16x16x4xbf16>
    %58 = vector.shape_cast %57 : vector<1x16x16x4xbf16> to vector<16x16x4xbf16>
    %59 = vector.shape_cast %58 : vector<16x16x4xbf16> to vector<256x4xbf16>
    %c8 = arith.constant 8 : index
    %c0_60 = arith.constant 0 : index
    %c0_61 = arith.constant 0 : index
    %60 = vector.load %arg2[%c8, %c0_60, %c0_61] : memref<17x4x16xbf16, #tpu.memory_space<vmem>>, vector<1x4x16xbf16>
    %61 = vector.shape_cast %60 : vector<1x4x16xbf16> to vector<4x16xbf16>
    %cst_62 = arith.constant dense<0.000000e+00> : vector<256x16xf32>
    %62 = tpu.matmul %59, %61, %cst_62 {dimension_numbers = #tpu.dot_dimension_numbers<[1], [0], [0], [1], [0, 0, 1, 1], [], []>} : vector<256x4xbf16>, vector<4x16xbf16>, vector<256x16xf32> -> vector<256x16xf32>
    %63 = arith.addf %56, %62 : vector<256x16xf32>
    %c0_63 = arith.constant 0 : index
    %c3_64 = arith.constant 3 : index
    %c4_65 = arith.constant 4 : index
    %c0_66 = arith.constant 0 : index
    %64 = vector.load %arg1[%c0_63, %c3_64, %c4_65, %c0_66] : memref<1x22x22x4xbf16, #tpu.memory_space<vmem>>, vector<1x16x16x4xbf16>
    %65 = vector.shape_cast %64 : vector<1x16x16x4xbf16> to vector<16x16x4xbf16>
    %66 = vector.shape_cast %65 : vector<16x16x4xbf16> to vector<256x4xbf16>
    %c9 = arith.constant 9 : index
    %c0_67 = arith.constant 0 : index
    %c0_68 = arith.constant 0 : index
    %67 = vector.load %arg2[%c9, %c0_67, %c0_68] : memref<17x4x16xbf16, #tpu.memory_space<vmem>>, vector<1x4x16xbf16>
    %68 = vector.shape_cast %67 : vector<1x4x16xbf16> to vector<4x16xbf16>
    %cst_69 = arith.constant dense<0.000000e+00> : vector<256x16xf32>
    %69 = tpu.matmul %66, %68, %cst_69 {dimension_numbers = #tpu.dot_dimension_numbers<[1], [0], [0], [1], [0, 0, 1, 1], [], []>} : vector<256x4xbf16>, vector<4x16xbf16>, vector<256x16xf32> -> vector<256x16xf32>
    %70 = arith.addf %63, %69 : vector<256x16xf32>
    %c0_70 = arith.constant 0 : index
    %c3_71 = arith.constant 3 : index
    %c6_72 = arith.constant 6 : index
    %c0_73 = arith.constant 0 : index
    %71 = vector.load %arg1[%c0_70, %c3_71, %c6_72, %c0_73] : memref<1x22x22x4xbf16, #tpu.memory_space<vmem>>, vector<1x16x16x4xbf16>
    %72 = vector.shape_cast %71 : vector<1x16x16x4xbf16> to vector<16x16x4xbf16>
    %73 = vector.shape_cast %72 : vector<16x16x4xbf16> to vector<256x4xbf16>
    %c10 = arith.constant 10 : index
    %c0_74 = arith.constant 0 : index
    %c0_75 = arith.constant 0 : index
    %74 = vector.load %arg2[%c10, %c0_74, %c0_75] : memref<17x4x16xbf16, #tpu.memory_space<vmem>>, vector<1x4x16xbf16>
    %75 = vector.shape_cast %74 : vector<1x4x16xbf16> to vector<4x16xbf16>
    %cst_76 = arith.constant dense<0.000000e+00> : vector<256x16xf32>
    %76 = tpu.matmul %73, %75, %cst_76 {dimension_numbers = #tpu.dot_dimension_numbers<[1], [0], [0], [1], [0, 0, 1, 1], [], []>} : vector<256x4xbf16>, vector<4x16xbf16>, vector<256x16xf32> -> vector<256x16xf32>
    %77 = arith.addf %70, %76 : vector<256x16xf32>
    %c0_77 = arith.constant 0 : index
    %c4_78 = arith.constant 4 : index
    %c2_79 = arith.constant 2 : index
    %c0_80 = arith.constant 0 : index
    %78 = vector.load %arg1[%c0_77, %c4_78, %c2_79, %c0_80] : memref<1x22x22x4xbf16, #tpu.memory_space<vmem>>, vector<1x16x16x4xbf16>
    %79 = vector.shape_cast %78 : vector<1x16x16x4xbf16> to vector<16x16x4xbf16>
    %80 = vector.shape_cast %79 : vector<16x16x4xbf16> to vector<256x4xbf16>
    %c11 = arith.constant 11 : index
    %c0_81 = arith.constant 0 : index
    %c0_82 = arith.constant 0 : index
    %81 = vector.load %arg2[%c11, %c0_81, %c0_82] : memref<17x4x16xbf16, #tpu.memory_space<vmem>>, vector<1x4x16xbf16>
    %82 = vector.shape_cast %81 : vector<1x4x16xbf16> to vector<4x16xbf16>
    %cst_83 = arith.constant dense<0.000000e+00> : vector<256x16xf32>
    %83 = tpu.matmul %80, %82, %cst_83 {dimension_numbers = #tpu.dot_dimension_numbers<[1], [0], [0], [1], [0, 0, 1, 1], [], []>} : vector<256x4xbf16>, vector<4x16xbf16>, vector<256x16xf32> -> vector<256x16xf32>
    %84 = arith.addf %77, %83 : vector<256x16xf32>
    %c0_84 = arith.constant 0 : index
    %c4_85 = arith.constant 4 : index
    %c3_86 = arith.constant 3 : index
    %c0_87 = arith.constant 0 : index
    %85 = vector.load %arg1[%c0_84, %c4_85, %c3_86, %c0_87] : memref<1x22x22x4xbf16, #tpu.memory_space<vmem>>, vector<1x16x16x4xbf16>
    %86 = vector.shape_cast %85 : vector<1x16x16x4xbf16> to vector<16x16x4xbf16>
    %87 = vector.shape_cast %86 : vector<16x16x4xbf16> to vector<256x4xbf16>
    %c12 = arith.constant 12 : index
    %c0_88 = arith.constant 0 : index
    %c0_89 = arith.constant 0 : index
    %88 = vector.load %arg2[%c12, %c0_88, %c0_89] : memref<17x4x16xbf16, #tpu.memory_space<vmem>>, vector<1x4x16xbf16>
    %89 = vector.shape_cast %88 : vector<1x4x16xbf16> to vector<4x16xbf16>
    %cst_90 = arith.constant dense<0.000000e+00> : vector<256x16xf32>
    %90 = tpu.matmul %87, %89, %cst_90 {dimension_numbers = #tpu.dot_dimension_numbers<[1], [0], [0], [1], [0, 0, 1, 1], [], []>} : vector<256x4xbf16>, vector<4x16xbf16>, vector<256x16xf32> -> vector<256x16xf32>
    %91 = arith.addf %84, %90 : vector<256x16xf32>
    %c0_91 = arith.constant 0 : index
    %c4_92 = arith.constant 4 : index
    %c4_93 = arith.constant 4 : index
    %c0_94 = arith.constant 0 : index
    %92 = vector.load %arg1[%c0_91, %c4_92, %c4_93, %c0_94] : memref<1x22x22x4xbf16, #tpu.memory_space<vmem>>, vector<1x16x16x4xbf16>
    %93 = vector.shape_cast %92 : vector<1x16x16x4xbf16> to vector<16x16x4xbf16>
    %94 = vector.shape_cast %93 : vector<16x16x4xbf16> to vector<256x4xbf16>
    %c13 = arith.constant 13 : index
    %c0_95 = arith.constant 0 : index
    %c0_96 = arith.constant 0 : index
    %95 = vector.load %arg2[%c13, %c0_95, %c0_96] : memref<17x4x16xbf16, #tpu.memory_space<vmem>>, vector<1x4x16xbf16>
    %96 = vector.shape_cast %95 : vector<1x4x16xbf16> to vector<4x16xbf16>
    %cst_97 = arith.constant dense<0.000000e+00> : vector<256x16xf32>
    %97 = tpu.matmul %94, %96, %cst_97 {dimension_numbers = #tpu.dot_dimension_numbers<[1], [0], [0], [1], [0, 0, 1, 1], [], []>} : vector<256x4xbf16>, vector<4x16xbf16>, vector<256x16xf32> -> vector<256x16xf32>
    %98 = arith.addf %91, %97 : vector<256x16xf32>
    %c0_98 = arith.constant 0 : index
    %c6_99 = arith.constant 6 : index
    %c0_100 = arith.constant 0 : index
    %c0_101 = arith.constant 0 : index
    %99 = vector.load %arg1[%c0_98, %c6_99, %c0_100, %c0_101] : memref<1x22x22x4xbf16, #tpu.memory_space<vmem>>, vector<1x16x16x4xbf16>
    %100 = vector.shape_cast %99 : vector<1x16x16x4xbf16> to vector<16x16x4xbf16>
    %101 = vector.shape_cast %100 : vector<16x16x4xbf16> to vector<256x4xbf16>
    %c14 = arith.constant 14 : index
    %c0_102 = arith.constant 0 : index
    %c0_103 = arith.constant 0 : index
    %102 = vector.load %arg2[%c14, %c0_102, %c0_103] : memref<17x4x16xbf16, #tpu.memory_space<vmem>>, vector<1x4x16xbf16>
    %103 = vector.shape_cast %102 : vector<1x4x16xbf16> to vector<4x16xbf16>
    %cst_104 = arith.constant dense<0.000000e+00> : vector<256x16xf32>
    %104 = tpu.matmul %101, %103, %cst_104 {dimension_numbers = #tpu.dot_dimension_numbers<[1], [0], [0], [1], [0, 0, 1, 1], [], []>} : vector<256x4xbf16>, vector<4x16xbf16>, vector<256x16xf32> -> vector<256x16xf32>
    %105 = arith.addf %98, %104 : vector<256x16xf32>
    %c0_105 = arith.constant 0 : index
    %c6_106 = arith.constant 6 : index
    %c3_107 = arith.constant 3 : index
    %c0_108 = arith.constant 0 : index
    %106 = vector.load %arg1[%c0_105, %c6_106, %c3_107, %c0_108] : memref<1x22x22x4xbf16, #tpu.memory_space<vmem>>, vector<1x16x16x4xbf16>
    %107 = vector.shape_cast %106 : vector<1x16x16x4xbf16> to vector<16x16x4xbf16>
    %108 = vector.shape_cast %107 : vector<16x16x4xbf16> to vector<256x4xbf16>
    %c15 = arith.constant 15 : index
    %c0_109 = arith.constant 0 : index
    %c0_110 = arith.constant 0 : index
    %109 = vector.load %arg2[%c15, %c0_109, %c0_110] : memref<17x4x16xbf16, #tpu.memory_space<vmem>>, vector<1x4x16xbf16>
    %110 = vector.shape_cast %109 : vector<1x4x16xbf16> to vector<4x16xbf16>
    %cst_111 = arith.constant dense<0.000000e+00> : vector<256x16xf32>
    %111 = tpu.matmul %108, %110, %cst_111 {dimension_numbers = #tpu.dot_dimension_numbers<[1], [0], [0], [1], [0, 0, 1, 1], [], []>} : vector<256x4xbf16>, vector<4x16xbf16>, vector<256x16xf32> -> vector<256x16xf32>
    %112 = arith.addf %105, %111 : vector<256x16xf32>
    %c0_112 = arith.constant 0 : index
    %c6_113 = arith.constant 6 : index
    %c6_114 = arith.constant 6 : index
    %c0_115 = arith.constant 0 : index
    %113 = vector.load %arg1[%c0_112, %c6_113, %c6_114, %c0_115] : memref<1x22x22x4xbf16, #tpu.memory_space<vmem>>, vector<1x16x16x4xbf16>
    %114 = vector.shape_cast %113 : vector<1x16x16x4xbf16> to vector<16x16x4xbf16>
    %115 = vector.shape_cast %114 : vector<16x16x4xbf16> to vector<256x4xbf16>
    %c16 = arith.constant 16 : index
    %c0_116 = arith.constant 0 : index
    %c0_117 = arith.constant 0 : index
    %116 = vector.load %arg2[%c16, %c0_116, %c0_117] : memref<17x4x16xbf16, #tpu.memory_space<vmem>>, vector<1x4x16xbf16>
    %117 = vector.shape_cast %116 : vector<1x4x16xbf16> to vector<4x16xbf16>
    %cst_118 = arith.constant dense<0.000000e+00> : vector<256x16xf32>
    %118 = tpu.matmul %115, %117, %cst_118 {dimension_numbers = #tpu.dot_dimension_numbers<[1], [0], [0], [1], [0, 0, 1, 1], [], []>} : vector<256x4xbf16>, vector<4x16xbf16>, vector<256x16xf32> -> vector<256x16xf32>
    %119 = arith.addf %112, %118 : vector<256x16xf32>
    %120 = vector.shape_cast %119 : vector<256x16xf32> to vector<16x16x16xf32>
    %c0_119 = arith.constant 0 : index
    %c0_120 = arith.constant 0 : index
    %c0_121 = arith.constant 0 : index
    %c0_122 = arith.constant 0 : index
    %121 = vector.load %arg3[%c0_119, %c0_120, %c0_121, %c0_122] : memref<1x16x16x16xf32, #tpu.memory_space<vmem>>, vector<1x16x16x16xf32>
    %122 = vector.shape_cast %121 : vector<1x16x16x16xf32> to vector<16x16x16xf32>
    %123 = vector.shape_cast %120 : vector<16x16x16xf32> to vector<1x16x16x16xf32>
    tpu.vector_store %arg3[%c0_119, %c0_120, %c0_121, %c0_122], %123 {strides = array<i32>} : memref<1x16x16x16xf32, #tpu.memory_space<vmem>>, vector<1x16x16x16xf32>,
    %cst_123 = arith.constant dense<0.000000e+00> : vector<16xf32>
    %124 = vector.multi_reduction <add>, %119, %cst_123 [0] : vector<256x16xf32> to vector<16xf32>
    %125 = vector.shape_cast %124 : vector<16xf32> to vector<1x16xf32>
    %126 = arith.mulf %119, %119 : vector<256x16xf32>
    %cst_124 = arith.constant dense<0.000000e+00> : vector<16xf32>
    %127 = vector.multi_reduction <add>, %126, %cst_124 [0] : vector<256x16xf32> to vector<16xf32>
    %128 = vector.shape_cast %127 : vector<16xf32> to vector<1x16xf32>
    %129 = tpu.concatenate %125, %128 in 0 : vector<1x16xf32>, vector<1x16xf32> -> vector<2x16xf32>
    %c0_125 = arith.constant 0 : index
    %c0_126 = arith.constant 0 : index
    %c0_127 = arith.constant 0 : index
    %130 = vector.load %arg4[%c0_125, %c0_126, %c0_127] : memref<1x2x16xf32, #tpu.memory_space<vmem>>, vector<1x2x16xf32>
    %131 = vector.shape_cast %130 : vector<1x2x16xf32> to vector<2x16xf32>
    %132 = vector.shape_cast %129 : vector<2x16xf32> to vector<1x2x16xf32>
    tpu.vector_store %arg4[%c0_125, %c0_126, %c0_127], %132 {strides = array<i32>} : memref<1x2x16xf32, #tpu.memory_space<vmem>>, vector<1x2x16xf32>,
    return
  }
  func.func @transform_0(%arg0: i32) -> (i32, i32, i32, i32) {
    %c0_i32 = arith.constant 0 : i32
    %c0_i32_0 = arith.constant 0 : i32
    %c0_i32_1 = arith.constant 0 : i32
    %c0_i32_2 = arith.constant 0 : i32
    return %arg0, %c0_i32, %c0_i32_0, %c0_i32_1 : i32, i32, i32, i32
  }
  func.func @transform_1(%arg0: i32) -> (i32, i32, i32) {
    %c0_i32 = arith.constant 0 : i32
    %c0_i32_0 = arith.constant 0 : i32
    %c0_i32_1 = arith.constant 0 : i32
    %c0_i32_2 = arith.constant 0 : i32
    return %c0_i32, %c0_i32_0, %c0_i32_1 : i32, i32, i32
  }
  func.func @transform_2(%arg0: i32) -> (i32, i32, i32, i32) {
    %c0_i32 = arith.constant 0 : i32
    %c0_i32_0 = arith.constant 0 : i32
    %c0_i32_1 = arith.constant 0 : i32
    %c0_i32_2 = arith.constant 0 : i32
    return %arg0, %c0_i32, %c0_i32_0, %c0_i32_1 : i32, i32, i32, i32
  }
  func.func @transform_3(%arg0: i32) -> (i32, i32, i32) {
    %c0_i32 = arith.constant 0 : i32
    %c0_i32_0 = arith.constant 0 : i32
    %c0_i32_1 = arith.constant 0 : i32
    return %arg0, %c0_i32, %c0_i32_0 : i32, i32, i32
  }
}

module attributes {stable_mosaic.version = 11 : i64} {
  func.func @kernel(%arg0: i32, %arg1: memref<1x16x16x16xf32, #tpu.memory_space<vmem>>, %arg2: memref<2x16xf32, #tpu.memory_space<vmem>>, %arg3: memref<1x22x22x16xf32, #tpu.memory_space<vmem>>) attributes {dimension_semantics = [#tpu.dimension_semantics<parallel>], iteration_bounds = array<i64: 2>, scalar_prefetch = 0 : i64, scratch_operands = 0 : i64, tpu.core_type = #tpu.core_type<tc>, window_params = [{transform_indices = @transform_0, window_bounds = array<i64: 1, 16, 16, 16>}, {pipeline_mode = #tpu.pipeline_mode<synchronous>, transform_indices = @transform_1, window_bounds = array<i64: 2, 16>}, {transform_indices = @transform_2, window_bounds = array<i64: 1, 22, 22, 16>}]} {
    %c0 = arith.constant 0 : index
    %c0_0 = arith.constant 0 : index
    %0 = vector.load %arg2[%c0, %c0_0] : memref<2x16xf32, #tpu.memory_space<vmem>>, vector<1x16xf32>
    %1 = vector.shape_cast %0 : vector<1x16xf32> to vector<1x1x16xf32>
    %c1 = arith.constant 1 : index
    %c0_1 = arith.constant 0 : index
    %2 = vector.load %arg2[%c1, %c0_1] : memref<2x16xf32, #tpu.memory_space<vmem>>, vector<1x16xf32>
    %3 = vector.shape_cast %2 : vector<1x16xf32> to vector<1x1x16xf32>
    %cst = arith.constant 0.000000e+00 : f32
    %4 = vector.broadcast %cst : f32 to vector<1x22x22x16xf32>
    %c0_2 = arith.constant 0 : index
    %c0_3 = arith.constant 0 : index
    %c0_4 = arith.constant 0 : index
    %c0_5 = arith.constant 0 : index
    %5 = vector.load %arg3[%c0_2, %c0_3, %c0_4, %c0_5] : memref<1x22x22x16xf32, #tpu.memory_space<vmem>>, vector<1x22x22x16xf32>
    tpu.vector_store %arg3[%c0_2, %c0_3, %c0_4, %c0_5], %4 {strides = array<i32>} : memref<1x22x22x16xf32, #tpu.memory_space<vmem>>, vector<1x22x22x16xf32>,
    %c0_6 = arith.constant 0 : index
    %c0_7 = arith.constant 0 : index
    %c0_8 = arith.constant 0 : index
    %c0_9 = arith.constant 0 : index
    %6 = vector.load %arg1[%c0_6, %c0_7, %c0_8, %c0_9] : memref<1x16x16x16xf32, #tpu.memory_space<vmem>>, vector<1x16x16x16xf32>
    %7 = vector.shape_cast %6 : vector<1x16x16x16xf32> to vector<16x16x16xf32>
    %8 = vector.broadcast %1 : vector<1x1x16xf32> to vector<16x16x16xf32>
    %9 = arith.mulf %7, %8 : vector<16x16x16xf32>
    %10 = vector.broadcast %3 : vector<1x1x16xf32> to vector<16x16x16xf32>
    %11 = arith.addf %9, %10 : vector<16x16x16xf32>
    %cst_10 = arith.constant 0.000000e+00 : f32
    %12 = vector.broadcast %cst_10 : f32 to vector<16x16x16xf32>
    %13 = arith.maximumf %11, %12 : vector<16x16x16xf32>
    %c0_11 = arith.constant 0 : index
    %c3 = arith.constant 3 : index
    %c3_12 = arith.constant 3 : index
    %c0_13 = arith.constant 0 : index
    %14 = vector.load %arg3[%c0_11, %c3, %c3_12, %c0_13] : memref<1x22x22x16xf32, #tpu.memory_space<vmem>>, vector<1x16x16x16xf32>
    %15 = vector.shape_cast %14 : vector<1x16x16x16xf32> to vector<16x16x16xf32>
    %16 = vector.shape_cast %13 : vector<16x16x16xf32> to vector<1x16x16x16xf32>
    tpu.vector_store %arg3[%c0_11, %c3, %c3_12, %c0_13], %16 {strides = array<i32>} : memref<1x22x22x16xf32, #tpu.memory_space<vmem>>, vector<1x16x16x16xf32>,
    return
  }
  func.func @transform_0(%arg0: i32) -> (i32, i32, i32, i32) {
    %c0_i32 = arith.constant 0 : i32
    %c0_i32_0 = arith.constant 0 : i32
    %c0_i32_1 = arith.constant 0 : i32
    %c0_i32_2 = arith.constant 0 : i32
    return %arg0, %c0_i32, %c0_i32_0, %c0_i32_1 : i32, i32, i32, i32
  }
  func.func @transform_1(%arg0: i32) -> (i32, i32) {
    %c0_i32 = arith.constant 0 : i32
    %c0_i32_0 = arith.constant 0 : i32
    %c0_i32_1 = arith.constant 0 : i32
    return %c0_i32, %c0_i32_0 : i32, i32
  }
  func.func @transform_2(%arg0: i32) -> (i32, i32, i32, i32) {
    %c0_i32 = arith.constant 0 : i32
    %c0_i32_0 = arith.constant 0 : i32
    %c0_i32_1 = arith.constant 0 : i32
    %c0_i32_2 = arith.constant 0 : i32
    return %arg0, %c0_i32, %c0_i32_0, %c0_i32_1 : i32, i32, i32, i32
  }
}

module attributes {stable_mosaic.version = 11 : i64} {
  func.func @kernel(%arg0: i32, %arg1: memref<1x22x22x16xf32, #tpu.memory_space<vmem>>, %arg2: memref<17x16x16xbf16, #tpu.memory_space<vmem>>, %arg3: memref<1x16x16x16xf32, #tpu.memory_space<vmem>>, %arg4: memref<1x2x16xf32, #tpu.memory_space<vmem>>) attributes {dimension_semantics = [#tpu.dimension_semantics<parallel>], iteration_bounds = array<i64: 2>, scalar_prefetch = 0 : i64, scratch_operands = 0 : i64, tpu.core_type = #tpu.core_type<tc>, window_params = [{transform_indices = @transform_0, window_bounds = array<i64: 1, 22, 22, 16>}, {pipeline_mode = #tpu.pipeline_mode<synchronous>, transform_indices = @transform_1, window_bounds = array<i64: 17, 16, 16>}, {transform_indices = @transform_2, window_bounds = array<i64: 1, 16, 16, 16>}, {transform_indices = @transform_3, window_bounds = array<i64: 1, 2, 16>}]} {
    %cst = arith.constant 0.000000e+00 : f32
    %0 = vector.broadcast %cst : f32 to vector<256x16xf32>
    %c0 = arith.constant 0 : index
    %c0_0 = arith.constant 0 : index
    %c0_1 = arith.constant 0 : index
    %c0_2 = arith.constant 0 : index
    %1 = vector.load %arg1[%c0, %c0_0, %c0_1, %c0_2] : memref<1x22x22x16xf32, #tpu.memory_space<vmem>>, vector<1x16x16x16xf32>
    %2 = vector.shape_cast %1 : vector<1x16x16x16xf32> to vector<16x16x16xf32>
    %3 = arith.truncf %2 : vector<16x16x16xf32> to vector<16x16x16xbf16>
    %4 = vector.shape_cast %3 : vector<16x16x16xbf16> to vector<256x16xbf16>
    %c0_3 = arith.constant 0 : index
    %c0_4 = arith.constant 0 : index
    %c0_5 = arith.constant 0 : index
    %5 = vector.load %arg2[%c0_3, %c0_4, %c0_5] : memref<17x16x16xbf16, #tpu.memory_space<vmem>>, vector<1x16x16xbf16>
    %6 = vector.shape_cast %5 : vector<1x16x16xbf16> to vector<16x16xbf16>
    %cst_6 = arith.constant dense<0.000000e+00> : vector<256x16xf32>
    %7 = tpu.matmul %4, %6, %cst_6 {dimension_numbers = #tpu.dot_dimension_numbers<[1], [0], [0], [1], [0, 0, 1, 1], [], []>} : vector<256x16xbf16>, vector<16x16xbf16>, vector<256x16xf32> -> vector<256x16xf32>
    %8 = arith.addf %0, %7 : vector<256x16xf32>
    %c0_7 = arith.constant 0 : index
    %c0_8 = arith.constant 0 : index
    %c3 = arith.constant 3 : index
    %c0_9 = arith.constant 0 : index
    %9 = vector.load %arg1[%c0_7, %c0_8, %c3, %c0_9] : memref<1x22x22x16xf32, #tpu.memory_space<vmem>>, vector<1x16x16x16xf32>
    %10 = vector.shape_cast %9 : vector<1x16x16x16xf32> to vector<16x16x16xf32>
    %11 = arith.truncf %10 : vector<16x16x16xf32> to vector<16x16x16xbf16>
    %12 = vector.shape_cast %11 : vector<16x16x16xbf16> to vector<256x16xbf16>
    %c1 = arith.constant 1 : index
    %c0_10 = arith.constant 0 : index
    %c0_11 = arith.constant 0 : index
    %13 = vector.load %arg2[%c1, %c0_10, %c0_11] : memref<17x16x16xbf16, #tpu.memory_space<vmem>>, vector<1x16x16xbf16>
    %14 = vector.shape_cast %13 : vector<1x16x16xbf16> to vector<16x16xbf16>
    %cst_12 = arith.constant dense<0.000000e+00> : vector<256x16xf32>
    %15 = tpu.matmul %12, %14, %cst_12 {dimension_numbers = #tpu.dot_dimension_numbers<[1], [0], [0], [1], [0, 0, 1, 1], [], []>} : vector<256x16xbf16>, vector<16x16xbf16>, vector<256x16xf32> -> vector<256x16xf32>
    %16 = arith.addf %8, %15 : vector<256x16xf32>
    %c0_13 = arith.constant 0 : index
    %c0_14 = arith.constant 0 : index
    %c6 = arith.constant 6 : index
    %c0_15 = arith.constant 0 : index
    %17 = vector.load %arg1[%c0_13, %c0_14, %c6, %c0_15] : memref<1x22x22x16xf32, #tpu.memory_space<vmem>>, vector<1x16x16x16xf32>
    %18 = vector.shape_cast %17 : vector<1x16x16x16xf32> to vector<16x16x16xf32>
    %19 = arith.truncf %18 : vector<16x16x16xf32> to vector<16x16x16xbf16>
    %20 = vector.shape_cast %19 : vector<16x16x16xbf16> to vector<256x16xbf16>
    %c2 = arith.constant 2 : index
    %c0_16 = arith.constant 0 : index
    %c0_17 = arith.constant 0 : index
    %21 = vector.load %arg2[%c2, %c0_16, %c0_17] : memref<17x16x16xbf16, #tpu.memory_space<vmem>>, vector<1x16x16xbf16>
    %22 = vector.shape_cast %21 : vector<1x16x16xbf16> to vector<16x16xbf16>
    %cst_18 = arith.constant dense<0.000000e+00> : vector<256x16xf32>
    %23 = tpu.matmul %20, %22, %cst_18 {dimension_numbers = #tpu.dot_dimension_numbers<[1], [0], [0], [1], [0, 0, 1, 1], [], []>} : vector<256x16xbf16>, vector<16x16xbf16>, vector<256x16xf32> -> vector<256x16xf32>
    %24 = arith.addf %16, %23 : vector<256x16xf32>
    %c0_19 = arith.constant 0 : index
    %c2_20 = arith.constant 2 : index
    %c2_21 = arith.constant 2 : index
    %c0_22 = arith.constant 0 : index
    %25 = vector.load %arg1[%c0_19, %c2_20, %c2_21, %c0_22] : memref<1x22x22x16xf32, #tpu.memory_space<vmem>>, vector<1x16x16x16xf32>
    %26 = vector.shape_cast %25 : vector<1x16x16x16xf32> to vector<16x16x16xf32>
    %27 = arith.truncf %26 : vector<16x16x16xf32> to vector<16x16x16xbf16>
    %28 = vector.shape_cast %27 : vector<16x16x16xbf16> to vector<256x16xbf16>
    %c3_23 = arith.constant 3 : index
    %c0_24 = arith.constant 0 : index
    %c0_25 = arith.constant 0 : index
    %29 = vector.load %arg2[%c3_23, %c0_24, %c0_25] : memref<17x16x16xbf16, #tpu.memory_space<vmem>>, vector<1x16x16xbf16>
    %30 = vector.shape_cast %29 : vector<1x16x16xbf16> to vector<16x16xbf16>
    %cst_26 = arith.constant dense<0.000000e+00> : vector<256x16xf32>
    %31 = tpu.matmul %28, %30, %cst_26 {dimension_numbers = #tpu.dot_dimension_numbers<[1], [0], [0], [1], [0, 0, 1, 1], [], []>} : vector<256x16xbf16>, vector<16x16xbf16>, vector<256x16xf32> -> vector<256x16xf32>
    %32 = arith.addf %24, %31 : vector<256x16xf32>
    %c0_27 = arith.constant 0 : index
    %c2_28 = arith.constant 2 : index
    %c3_29 = arith.constant 3 : index
    %c0_30 = arith.constant 0 : index
    %33 = vector.load %arg1[%c0_27, %c2_28, %c3_29, %c0_30] : memref<1x22x22x16xf32, #tpu.memory_space<vmem>>, vector<1x16x16x16xf32>
    %34 = vector.shape_cast %33 : vector<1x16x16x16xf32> to vector<16x16x16xf32>
    %35 = arith.truncf %34 : vector<16x16x16xf32> to vector<16x16x16xbf16>
    %36 = vector.shape_cast %35 : vector<16x16x16xbf16> to vector<256x16xbf16>
    %c4 = arith.constant 4 : index
    %c0_31 = arith.constant 0 : index
    %c0_32 = arith.constant 0 : index
    %37 = vector.load %arg2[%c4, %c0_31, %c0_32] : memref<17x16x16xbf16, #tpu.memory_space<vmem>>, vector<1x16x16xbf16>
    %38 = vector.shape_cast %37 : vector<1x16x16xbf16> to vector<16x16xbf16>
    %cst_33 = arith.constant dense<0.000000e+00> : vector<256x16xf32>
    %39 = tpu.matmul %36, %38, %cst_33 {dimension_numbers = #tpu.dot_dimension_numbers<[1], [0], [0], [1], [0, 0, 1, 1], [], []>} : vector<256x16xbf16>, vector<16x16xbf16>, vector<256x16xf32> -> vector<256x16xf32>
    %40 = arith.addf %32, %39 : vector<256x16xf32>
    %c0_34 = arith.constant 0 : index
    %c2_35 = arith.constant 2 : index
    %c4_36 = arith.constant 4 : index
    %c0_37 = arith.constant 0 : index
    %41 = vector.load %arg1[%c0_34, %c2_35, %c4_36, %c0_37] : memref<1x22x22x16xf32, #tpu.memory_space<vmem>>, vector<1x16x16x16xf32>
    %42 = vector.shape_cast %41 : vector<1x16x16x16xf32> to vector<16x16x16xf32>
    %43 = arith.truncf %42 : vector<16x16x16xf32> to vector<16x16x16xbf16>
    %44 = vector.shape_cast %43 : vector<16x16x16xbf16> to vector<256x16xbf16>
    %c5 = arith.constant 5 : index
    %c0_38 = arith.constant 0 : index
    %c0_39 = arith.constant 0 : index
    %45 = vector.load %arg2[%c5, %c0_38, %c0_39] : memref<17x16x16xbf16, #tpu.memory_space<vmem>>, vector<1x16x16xbf16>
    %46 = vector.shape_cast %45 : vector<1x16x16xbf16> to vector<16x16xbf16>
    %cst_40 = arith.constant dense<0.000000e+00> : vector<256x16xf32>
    %47 = tpu.matmul %44, %46, %cst_40 {dimension_numbers = #tpu.dot_dimension_numbers<[1], [0], [0], [1], [0, 0, 1, 1], [], []>} : vector<256x16xbf16>, vector<16x16xbf16>, vector<256x16xf32> -> vector<256x16xf32>
    %48 = arith.addf %40, %47 : vector<256x16xf32>
    %c0_41 = arith.constant 0 : index
    %c3_42 = arith.constant 3 : index
    %c0_43 = arith.constant 0 : index
    %c0_44 = arith.constant 0 : index
    %49 = vector.load %arg1[%c0_41, %c3_42, %c0_43, %c0_44] : memref<1x22x22x16xf32, #tpu.memory_space<vmem>>, vector<1x16x16x16xf32>
    %50 = vector.shape_cast %49 : vector<1x16x16x16xf32> to vector<16x16x16xf32>
    %51 = arith.truncf %50 : vector<16x16x16xf32> to vector<16x16x16xbf16>
    %52 = vector.shape_cast %51 : vector<16x16x16xbf16> to vector<256x16xbf16>
    %c6_45 = arith.constant 6 : index
    %c0_46 = arith.constant 0 : index
    %c0_47 = arith.constant 0 : index
    %53 = vector.load %arg2[%c6_45, %c0_46, %c0_47] : memref<17x16x16xbf16, #tpu.memory_space<vmem>>, vector<1x16x16xbf16>
    %54 = vector.shape_cast %53 : vector<1x16x16xbf16> to vector<16x16xbf16>
    %cst_48 = arith.constant dense<0.000000e+00> : vector<256x16xf32>
    %55 = tpu.matmul %52, %54, %cst_48 {dimension_numbers = #tpu.dot_dimension_numbers<[1], [0], [0], [1], [0, 0, 1, 1], [], []>} : vector<256x16xbf16>, vector<16x16xbf16>, vector<256x16xf32> -> vector<256x16xf32>
    %56 = arith.addf %48, %55 : vector<256x16xf32>
    %c0_49 = arith.constant 0 : index
    %c3_50 = arith.constant 3 : index
    %c2_51 = arith.constant 2 : index
    %c0_52 = arith.constant 0 : index
    %57 = vector.load %arg1[%c0_49, %c3_50, %c2_51, %c0_52] : memref<1x22x22x16xf32, #tpu.memory_space<vmem>>, vector<1x16x16x16xf32>
    %58 = vector.shape_cast %57 : vector<1x16x16x16xf32> to vector<16x16x16xf32>
    %59 = arith.truncf %58 : vector<16x16x16xf32> to vector<16x16x16xbf16>
    %60 = vector.shape_cast %59 : vector<16x16x16xbf16> to vector<256x16xbf16>
    %c7 = arith.constant 7 : index
    %c0_53 = arith.constant 0 : index
    %c0_54 = arith.constant 0 : index
    %61 = vector.load %arg2[%c7, %c0_53, %c0_54] : memref<17x16x16xbf16, #tpu.memory_space<vmem>>, vector<1x16x16xbf16>
    %62 = vector.shape_cast %61 : vector<1x16x16xbf16> to vector<16x16xbf16>
    %cst_55 = arith.constant dense<0.000000e+00> : vector<256x16xf32>
    %63 = tpu.matmul %60, %62, %cst_55 {dimension_numbers = #tpu.dot_dimension_numbers<[1], [0], [0], [1], [0, 0, 1, 1], [], []>} : vector<256x16xbf16>, vector<16x16xbf16>, vector<256x16xf32> -> vector<256x16xf32>
    %64 = arith.addf %56, %63 : vector<256x16xf32>
    %c0_56 = arith.constant 0 : index
    %c3_57 = arith.constant 3 : index
    %c3_58 = arith.constant 3 : index
    %c0_59 = arith.constant 0 : index
    %65 = vector.load %arg1[%c0_56, %c3_57, %c3_58, %c0_59] : memref<1x22x22x16xf32, #tpu.memory_space<vmem>>, vector<1x16x16x16xf32>
    %66 = vector.shape_cast %65 : vector<1x16x16x16xf32> to vector<16x16x16xf32>
    %67 = arith.truncf %66 : vector<16x16x16xf32> to vector<16x16x16xbf16>
    %68 = vector.shape_cast %67 : vector<16x16x16xbf16> to vector<256x16xbf16>
    %c8 = arith.constant 8 : index
    %c0_60 = arith.constant 0 : index
    %c0_61 = arith.constant 0 : index
    %69 = vector.load %arg2[%c8, %c0_60, %c0_61] : memref<17x16x16xbf16, #tpu.memory_space<vmem>>, vector<1x16x16xbf16>
    %70 = vector.shape_cast %69 : vector<1x16x16xbf16> to vector<16x16xbf16>
    %cst_62 = arith.constant dense<0.000000e+00> : vector<256x16xf32>
    %71 = tpu.matmul %68, %70, %cst_62 {dimension_numbers = #tpu.dot_dimension_numbers<[1], [0], [0], [1], [0, 0, 1, 1], [], []>} : vector<256x16xbf16>, vector<16x16xbf16>, vector<256x16xf32> -> vector<256x16xf32>
    %72 = arith.addf %64, %71 : vector<256x16xf32>
    %c0_63 = arith.constant 0 : index
    %c3_64 = arith.constant 3 : index
    %c4_65 = arith.constant 4 : index
    %c0_66 = arith.constant 0 : index
    %73 = vector.load %arg1[%c0_63, %c3_64, %c4_65, %c0_66] : memref<1x22x22x16xf32, #tpu.memory_space<vmem>>, vector<1x16x16x16xf32>
    %74 = vector.shape_cast %73 : vector<1x16x16x16xf32> to vector<16x16x16xf32>
    %75 = arith.truncf %74 : vector<16x16x16xf32> to vector<16x16x16xbf16>
    %76 = vector.shape_cast %75 : vector<16x16x16xbf16> to vector<256x16xbf16>
    %c9 = arith.constant 9 : index
    %c0_67 = arith.constant 0 : index
    %c0_68 = arith.constant 0 : index
    %77 = vector.load %arg2[%c9, %c0_67, %c0_68] : memref<17x16x16xbf16, #tpu.memory_space<vmem>>, vector<1x16x16xbf16>
    %78 = vector.shape_cast %77 : vector<1x16x16xbf16> to vector<16x16xbf16>
    %cst_69 = arith.constant dense<0.000000e+00> : vector<256x16xf32>
    %79 = tpu.matmul %76, %78, %cst_69 {dimension_numbers = #tpu.dot_dimension_numbers<[1], [0], [0], [1], [0, 0, 1, 1], [], []>} : vector<256x16xbf16>, vector<16x16xbf16>, vector<256x16xf32> -> vector<256x16xf32>
    %80 = arith.addf %72, %79 : vector<256x16xf32>
    %c0_70 = arith.constant 0 : index
    %c3_71 = arith.constant 3 : index
    %c6_72 = arith.constant 6 : index
    %c0_73 = arith.constant 0 : index
    %81 = vector.load %arg1[%c0_70, %c3_71, %c6_72, %c0_73] : memref<1x22x22x16xf32, #tpu.memory_space<vmem>>, vector<1x16x16x16xf32>
    %82 = vector.shape_cast %81 : vector<1x16x16x16xf32> to vector<16x16x16xf32>
    %83 = arith.truncf %82 : vector<16x16x16xf32> to vector<16x16x16xbf16>
    %84 = vector.shape_cast %83 : vector<16x16x16xbf16> to vector<256x16xbf16>
    %c10 = arith.constant 10 : index
    %c0_74 = arith.constant 0 : index
    %c0_75 = arith.constant 0 : index
    %85 = vector.load %arg2[%c10, %c0_74, %c0_75] : memref<17x16x16xbf16, #tpu.memory_space<vmem>>, vector<1x16x16xbf16>
    %86 = vector.shape_cast %85 : vector<1x16x16xbf16> to vector<16x16xbf16>
    %cst_76 = arith.constant dense<0.000000e+00> : vector<256x16xf32>
    %87 = tpu.matmul %84, %86, %cst_76 {dimension_numbers = #tpu.dot_dimension_numbers<[1], [0], [0], [1], [0, 0, 1, 1], [], []>} : vector<256x16xbf16>, vector<16x16xbf16>, vector<256x16xf32> -> vector<256x16xf32>
    %88 = arith.addf %80, %87 : vector<256x16xf32>
    %c0_77 = arith.constant 0 : index
    %c4_78 = arith.constant 4 : index
    %c2_79 = arith.constant 2 : index
    %c0_80 = arith.constant 0 : index
    %89 = vector.load %arg1[%c0_77, %c4_78, %c2_79, %c0_80] : memref<1x22x22x16xf32, #tpu.memory_space<vmem>>, vector<1x16x16x16xf32>
    %90 = vector.shape_cast %89 : vector<1x16x16x16xf32> to vector<16x16x16xf32>
    %91 = arith.truncf %90 : vector<16x16x16xf32> to vector<16x16x16xbf16>
    %92 = vector.shape_cast %91 : vector<16x16x16xbf16> to vector<256x16xbf16>
    %c11 = arith.constant 11 : index
    %c0_81 = arith.constant 0 : index
    %c0_82 = arith.constant 0 : index
    %93 = vector.load %arg2[%c11, %c0_81, %c0_82] : memref<17x16x16xbf16, #tpu.memory_space<vmem>>, vector<1x16x16xbf16>
    %94 = vector.shape_cast %93 : vector<1x16x16xbf16> to vector<16x16xbf16>
    %cst_83 = arith.constant dense<0.000000e+00> : vector<256x16xf32>
    %95 = tpu.matmul %92, %94, %cst_83 {dimension_numbers = #tpu.dot_dimension_numbers<[1], [0], [0], [1], [0, 0, 1, 1], [], []>} : vector<256x16xbf16>, vector<16x16xbf16>, vector<256x16xf32> -> vector<256x16xf32>
    %96 = arith.addf %88, %95 : vector<256x16xf32>
    %c0_84 = arith.constant 0 : index
    %c4_85 = arith.constant 4 : index
    %c3_86 = arith.constant 3 : index
    %c0_87 = arith.constant 0 : index
    %97 = vector.load %arg1[%c0_84, %c4_85, %c3_86, %c0_87] : memref<1x22x22x16xf32, #tpu.memory_space<vmem>>, vector<1x16x16x16xf32>
    %98 = vector.shape_cast %97 : vector<1x16x16x16xf32> to vector<16x16x16xf32>
    %99 = arith.truncf %98 : vector<16x16x16xf32> to vector<16x16x16xbf16>
    %100 = vector.shape_cast %99 : vector<16x16x16xbf16> to vector<256x16xbf16>
    %c12 = arith.constant 12 : index
    %c0_88 = arith.constant 0 : index
    %c0_89 = arith.constant 0 : index
    %101 = vector.load %arg2[%c12, %c0_88, %c0_89] : memref<17x16x16xbf16, #tpu.memory_space<vmem>>, vector<1x16x16xbf16>
    %102 = vector.shape_cast %101 : vector<1x16x16xbf16> to vector<16x16xbf16>
    %cst_90 = arith.constant dense<0.000000e+00> : vector<256x16xf32>
    %103 = tpu.matmul %100, %102, %cst_90 {dimension_numbers = #tpu.dot_dimension_numbers<[1], [0], [0], [1], [0, 0, 1, 1], [], []>} : vector<256x16xbf16>, vector<16x16xbf16>, vector<256x16xf32> -> vector<256x16xf32>
    %104 = arith.addf %96, %103 : vector<256x16xf32>
    %c0_91 = arith.constant 0 : index
    %c4_92 = arith.constant 4 : index
    %c4_93 = arith.constant 4 : index
    %c0_94 = arith.constant 0 : index
    %105 = vector.load %arg1[%c0_91, %c4_92, %c4_93, %c0_94] : memref<1x22x22x16xf32, #tpu.memory_space<vmem>>, vector<1x16x16x16xf32>
    %106 = vector.shape_cast %105 : vector<1x16x16x16xf32> to vector<16x16x16xf32>
    %107 = arith.truncf %106 : vector<16x16x16xf32> to vector<16x16x16xbf16>
    %108 = vector.shape_cast %107 : vector<16x16x16xbf16> to vector<256x16xbf16>
    %c13 = arith.constant 13 : index
    %c0_95 = arith.constant 0 : index
    %c0_96 = arith.constant 0 : index
    %109 = vector.load %arg2[%c13, %c0_95, %c0_96] : memref<17x16x16xbf16, #tpu.memory_space<vmem>>, vector<1x16x16xbf16>
    %110 = vector.shape_cast %109 : vector<1x16x16xbf16> to vector<16x16xbf16>
    %cst_97 = arith.constant dense<0.000000e+00> : vector<256x16xf32>
    %111 = tpu.matmul %108, %110, %cst_97 {dimension_numbers = #tpu.dot_dimension_numbers<[1], [0], [0], [1], [0, 0, 1, 1], [], []>} : vector<256x16xbf16>, vector<16x16xbf16>, vector<256x16xf32> -> vector<256x16xf32>
    %112 = arith.addf %104, %111 : vector<256x16xf32>
    %c0_98 = arith.constant 0 : index
    %c6_99 = arith.constant 6 : index
    %c0_100 = arith.constant 0 : index
    %c0_101 = arith.constant 0 : index
    %113 = vector.load %arg1[%c0_98, %c6_99, %c0_100, %c0_101] : memref<1x22x22x16xf32, #tpu.memory_space<vmem>>, vector<1x16x16x16xf32>
    %114 = vector.shape_cast %113 : vector<1x16x16x16xf32> to vector<16x16x16xf32>
    %115 = arith.truncf %114 : vector<16x16x16xf32> to vector<16x16x16xbf16>
    %116 = vector.shape_cast %115 : vector<16x16x16xbf16> to vector<256x16xbf16>
    %c14 = arith.constant 14 : index
    %c0_102 = arith.constant 0 : index
    %c0_103 = arith.constant 0 : index
    %117 = vector.load %arg2[%c14, %c0_102, %c0_103] : memref<17x16x16xbf16, #tpu.memory_space<vmem>>, vector<1x16x16xbf16>
    %118 = vector.shape_cast %117 : vector<1x16x16xbf16> to vector<16x16xbf16>
    %cst_104 = arith.constant dense<0.000000e+00> : vector<256x16xf32>
    %119 = tpu.matmul %116, %118, %cst_104 {dimension_numbers = #tpu.dot_dimension_numbers<[1], [0], [0], [1], [0, 0, 1, 1], [], []>} : vector<256x16xbf16>, vector<16x16xbf16>, vector<256x16xf32> -> vector<256x16xf32>
    %120 = arith.addf %112, %119 : vector<256x16xf32>
    %c0_105 = arith.constant 0 : index
    %c6_106 = arith.constant 6 : index
    %c3_107 = arith.constant 3 : index
    %c0_108 = arith.constant 0 : index
    %121 = vector.load %arg1[%c0_105, %c6_106, %c3_107, %c0_108] : memref<1x22x22x16xf32, #tpu.memory_space<vmem>>, vector<1x16x16x16xf32>
    %122 = vector.shape_cast %121 : vector<1x16x16x16xf32> to vector<16x16x16xf32>
    %123 = arith.truncf %122 : vector<16x16x16xf32> to vector<16x16x16xbf16>
    %124 = vector.shape_cast %123 : vector<16x16x16xbf16> to vector<256x16xbf16>
    %c15 = arith.constant 15 : index
    %c0_109 = arith.constant 0 : index
    %c0_110 = arith.constant 0 : index
    %125 = vector.load %arg2[%c15, %c0_109, %c0_110] : memref<17x16x16xbf16, #tpu.memory_space<vmem>>, vector<1x16x16xbf16>
    %126 = vector.shape_cast %125 : vector<1x16x16xbf16> to vector<16x16xbf16>
    %cst_111 = arith.constant dense<0.000000e+00> : vector<256x16xf32>
    %127 = tpu.matmul %124, %126, %cst_111 {dimension_numbers = #tpu.dot_dimension_numbers<[1], [0], [0], [1], [0, 0, 1, 1], [], []>} : vector<256x16xbf16>, vector<16x16xbf16>, vector<256x16xf32> -> vector<256x16xf32>
    %128 = arith.addf %120, %127 : vector<256x16xf32>
    %c0_112 = arith.constant 0 : index
    %c6_113 = arith.constant 6 : index
    %c6_114 = arith.constant 6 : index
    %c0_115 = arith.constant 0 : index
    %129 = vector.load %arg1[%c0_112, %c6_113, %c6_114, %c0_115] : memref<1x22x22x16xf32, #tpu.memory_space<vmem>>, vector<1x16x16x16xf32>
    %130 = vector.shape_cast %129 : vector<1x16x16x16xf32> to vector<16x16x16xf32>
    %131 = arith.truncf %130 : vector<16x16x16xf32> to vector<16x16x16xbf16>
    %132 = vector.shape_cast %131 : vector<16x16x16xbf16> to vector<256x16xbf16>
    %c16 = arith.constant 16 : index
    %c0_116 = arith.constant 0 : index
    %c0_117 = arith.constant 0 : index
    %133 = vector.load %arg2[%c16, %c0_116, %c0_117] : memref<17x16x16xbf16, #tpu.memory_space<vmem>>, vector<1x16x16xbf16>
    %134 = vector.shape_cast %133 : vector<1x16x16xbf16> to vector<16x16xbf16>
    %cst_118 = arith.constant dense<0.000000e+00> : vector<256x16xf32>
    %135 = tpu.matmul %132, %134, %cst_118 {dimension_numbers = #tpu.dot_dimension_numbers<[1], [0], [0], [1], [0, 0, 1, 1], [], []>} : vector<256x16xbf16>, vector<16x16xbf16>, vector<256x16xf32> -> vector<256x16xf32>
    %136 = arith.addf %128, %135 : vector<256x16xf32>
    %137 = vector.shape_cast %136 : vector<256x16xf32> to vector<16x16x16xf32>
    %c0_119 = arith.constant 0 : index
    %c0_120 = arith.constant 0 : index
    %c0_121 = arith.constant 0 : index
    %c0_122 = arith.constant 0 : index
    %138 = vector.load %arg3[%c0_119, %c0_120, %c0_121, %c0_122] : memref<1x16x16x16xf32, #tpu.memory_space<vmem>>, vector<1x16x16x16xf32>
    %139 = vector.shape_cast %138 : vector<1x16x16x16xf32> to vector<16x16x16xf32>
    %140 = vector.shape_cast %137 : vector<16x16x16xf32> to vector<1x16x16x16xf32>
    tpu.vector_store %arg3[%c0_119, %c0_120, %c0_121, %c0_122], %140 {strides = array<i32>} : memref<1x16x16x16xf32, #tpu.memory_space<vmem>>, vector<1x16x16x16xf32>,
    %cst_123 = arith.constant dense<0.000000e+00> : vector<16xf32>
    %141 = vector.multi_reduction <add>, %136, %cst_123 [0] : vector<256x16xf32> to vector<16xf32>
    %142 = vector.shape_cast %141 : vector<16xf32> to vector<1x16xf32>
    %143 = arith.mulf %136, %136 : vector<256x16xf32>
    %cst_124 = arith.constant dense<0.000000e+00> : vector<16xf32>
    %144 = vector.multi_reduction <add>, %143, %cst_124 [0] : vector<256x16xf32> to vector<16xf32>
    %145 = vector.shape_cast %144 : vector<16xf32> to vector<1x16xf32>
    %146 = tpu.concatenate %142, %145 in 0 : vector<1x16xf32>, vector<1x16xf32> -> vector<2x16xf32>
    %c0_125 = arith.constant 0 : index
    %c0_126 = arith.constant 0 : index
    %c0_127 = arith.constant 0 : index
    %147 = vector.load %arg4[%c0_125, %c0_126, %c0_127] : memref<1x2x16xf32, #tpu.memory_space<vmem>>, vector<1x2x16xf32>
    %148 = vector.shape_cast %147 : vector<1x2x16xf32> to vector<2x16xf32>
    %149 = vector.shape_cast %146 : vector<2x16xf32> to vector<1x2x16xf32>
    tpu.vector_store %arg4[%c0_125, %c0_126, %c0_127], %149 {strides = array<i32>} : memref<1x2x16xf32, #tpu.memory_space<vmem>>, vector<1x2x16xf32>,
    return
  }
  func.func @transform_0(%arg0: i32) -> (i32, i32, i32, i32) {
    %c0_i32 = arith.constant 0 : i32
    %c0_i32_0 = arith.constant 0 : i32
    %c0_i32_1 = arith.constant 0 : i32
    %c0_i32_2 = arith.constant 0 : i32
    return %arg0, %c0_i32, %c0_i32_0, %c0_i32_1 : i32, i32, i32, i32
  }
  func.func @transform_1(%arg0: i32) -> (i32, i32, i32) {
    %c0_i32 = arith.constant 0 : i32
    %c0_i32_0 = arith.constant 0 : i32
    %c0_i32_1 = arith.constant 0 : i32
    %c0_i32_2 = arith.constant 0 : i32
    return %c0_i32, %c0_i32_0, %c0_i32_1 : i32, i32, i32
  }
  func.func @transform_2(%arg0: i32) -> (i32, i32, i32, i32) {
    %c0_i32 = arith.constant 0 : i32
    %c0_i32_0 = arith.constant 0 : i32
    %c0_i32_1 = arith.constant 0 : i32
    %c0_i32_2 = arith.constant 0 : i32
    return %arg0, %c0_i32, %c0_i32_0, %c0_i32_1 : i32, i32, i32, i32
  }
  func.func @transform_3(%arg0: i32) -> (i32, i32, i32) {
    %c0_i32 = arith.constant 0 : i32
    %c0_i32_0 = arith.constant 0 : i32
    %c0_i32_1 = arith.constant 0 : i32
    return %arg0, %c0_i32, %c0_i32_0 : i32, i32, i32
  }
}

module attributes {stable_mosaic.version = 11 : i64} {
  func.func @kernel(%arg0: i32, %arg1: memref<1x16x16x16xf32, #tpu.memory_space<vmem>>, %arg2: memref<1x16x16x16xf32, #tpu.memory_space<vmem>>, %arg3: memref<4x16xf32, #tpu.memory_space<vmem>>, %arg4: memref<1x16x16x16xf32, #tpu.memory_space<vmem>>) attributes {dimension_semantics = [#tpu.dimension_semantics<parallel>], iteration_bounds = array<i64: 2>, scalar_prefetch = 0 : i64, scratch_operands = 0 : i64, tpu.core_type = #tpu.core_type<tc>, window_params = [{transform_indices = @transform_0, window_bounds = array<i64: 1, 16, 16, 16>}, {transform_indices = @transform_1, window_bounds = array<i64: 1, 16, 16, 16>}, {pipeline_mode = #tpu.pipeline_mode<synchronous>, transform_indices = @transform_2, window_bounds = array<i64: 4, 16>}, {transform_indices = @transform_3, window_bounds = array<i64: 1, 16, 16, 16>}]} {
    %c0 = arith.constant 0 : index
    %c0_0 = arith.constant 0 : index
    %0 = vector.load %arg3[%c0, %c0_0] : memref<4x16xf32, #tpu.memory_space<vmem>>, vector<1x16xf32>
    %1 = vector.shape_cast %0 : vector<1x16xf32> to vector<1x1x16xf32>
    %c1 = arith.constant 1 : index
    %c0_1 = arith.constant 0 : index
    %2 = vector.load %arg3[%c1, %c0_1] : memref<4x16xf32, #tpu.memory_space<vmem>>, vector<1x16xf32>
    %3 = vector.shape_cast %2 : vector<1x16xf32> to vector<1x1x16xf32>
    %c2 = arith.constant 2 : index
    %c0_2 = arith.constant 0 : index
    %4 = vector.load %arg3[%c2, %c0_2] : memref<4x16xf32, #tpu.memory_space<vmem>>, vector<1x16xf32>
    %5 = vector.shape_cast %4 : vector<1x16xf32> to vector<1x1x16xf32>
    %c3 = arith.constant 3 : index
    %c0_3 = arith.constant 0 : index
    %6 = vector.load %arg3[%c3, %c0_3] : memref<4x16xf32, #tpu.memory_space<vmem>>, vector<1x16xf32>
    %7 = vector.shape_cast %6 : vector<1x16xf32> to vector<1x1x16xf32>
    %c0_4 = arith.constant 0 : index
    %c0_5 = arith.constant 0 : index
    %c0_6 = arith.constant 0 : index
    %c0_7 = arith.constant 0 : index
    %8 = vector.load %arg1[%c0_4, %c0_5, %c0_6, %c0_7] : memref<1x16x16x16xf32, #tpu.memory_space<vmem>>, vector<1x16x16x16xf32>
    %9 = vector.shape_cast %8 : vector<1x16x16x16xf32> to vector<16x16x16xf32>
    %10 = vector.broadcast %1 : vector<1x1x16xf32> to vector<16x16x16xf32>
    %11 = arith.mulf %9, %10 : vector<16x16x16xf32>
    %12 = vector.broadcast %3 : vector<1x1x16xf32> to vector<16x16x16xf32>
    %13 = arith.addf %11, %12 : vector<16x16x16xf32>
    %c0_8 = arith.constant 0 : index
    %c0_9 = arith.constant 0 : index
    %c0_10 = arith.constant 0 : index
    %c0_11 = arith.constant 0 : index
    %14 = vector.load %arg2[%c0_8, %c0_9, %c0_10, %c0_11] : memref<1x16x16x16xf32, #tpu.memory_space<vmem>>, vector<1x16x16x16xf32>
    %15 = vector.shape_cast %14 : vector<1x16x16x16xf32> to vector<16x16x16xf32>
    %16 = vector.broadcast %5 : vector<1x1x16xf32> to vector<16x16x16xf32>
    %17 = arith.mulf %15, %16 : vector<16x16x16xf32>
    %18 = arith.addf %13, %17 : vector<16x16x16xf32>
    %19 = vector.broadcast %7 : vector<1x1x16xf32> to vector<16x16x16xf32>
    %20 = arith.addf %18, %19 : vector<16x16x16xf32>
    %cst = arith.constant 0.000000e+00 : f32
    %21 = vector.broadcast %cst : f32 to vector<16x16x16xf32>
    %22 = arith.maximumf %20, %21 : vector<16x16x16xf32>
    %c0_12 = arith.constant 0 : index
    %c0_13 = arith.constant 0 : index
    %c0_14 = arith.constant 0 : index
    %c0_15 = arith.constant 0 : index
    %23 = vector.load %arg4[%c0_12, %c0_13, %c0_14, %c0_15] : memref<1x16x16x16xf32, #tpu.memory_space<vmem>>, vector<1x16x16x16xf32>
    %24 = vector.shape_cast %23 : vector<1x16x16x16xf32> to vector<16x16x16xf32>
    %25 = vector.shape_cast %22 : vector<16x16x16xf32> to vector<1x16x16x16xf32>
    tpu.vector_store %arg4[%c0_12, %c0_13, %c0_14, %c0_15], %25 {strides = array<i32>} : memref<1x16x16x16xf32, #tpu.memory_space<vmem>>, vector<1x16x16x16xf32>,
    return
  }
  func.func @transform_0(%arg0: i32) -> (i32, i32, i32, i32) {
    %c0_i32 = arith.constant 0 : i32
    %c0_i32_0 = arith.constant 0 : i32
    %c0_i32_1 = arith.constant 0 : i32
    %c0_i32_2 = arith.constant 0 : i32
    return %arg0, %c0_i32, %c0_i32_0, %c0_i32_1 : i32, i32, i32, i32
  }
  func.func @transform_1(%arg0: i32) -> (i32, i32, i32, i32) {
    %c0_i32 = arith.constant 0 : i32
    %c0_i32_0 = arith.constant 0 : i32
    %c0_i32_1 = arith.constant 0 : i32
    %c0_i32_2 = arith.constant 0 : i32
    return %arg0, %c0_i32, %c0_i32_0, %c0_i32_1 : i32, i32, i32, i32
  }
  func.func @transform_2(%arg0: i32) -> (i32, i32) {
    %c0_i32 = arith.constant 0 : i32
    %c0_i32_0 = arith.constant 0 : i32
    %c0_i32_1 = arith.constant 0 : i32
    return %c0_i32, %c0_i32_0 : i32, i32
  }
  func.func @transform_3(%arg0: i32) -> (i32, i32, i32, i32) {
    %c0_i32 = arith.constant 0 : i32
    %c0_i32_0 = arith.constant 0 : i32
    %c0_i32_1 = arith.constant 0 : i32
    %c0_i32_2 = arith.constant 0 : i32
    return %arg0, %c0_i32, %c0_i32_0, %c0_i32_1 : i32, i32, i32, i32
  }
}

</mosaic_0001>

<bundles_post_ra>
// kernel: basic_block_forward.6
= control target key start
LH: loop header
LB: loop body
LE: loop exit
PB: predicated region body
PF: predicated region fallthrough
CT: control target
= control target key end

     0   :  { %s517_s9 = smov 0   ;;  %s915_s0 = inlined_call_operand.vmem [shape: f32[2,16,16,16], index: 0, kind: input, shape index: {}]   ;;  %s916_s1 = inlined_call_operand.vmem [shape: f32[2,16], index: 1, kind: input, shape index: {}]   ;;  %s917_s2 = inlined_call_operand.vmem [shape: f32[2,22,22,16], index: 2, kind: output, shape index: {}]  }
   0x1 LB: > { %s438_s10 = sadd.s32 4294967295, %s499_s9   ;;  %p442_p0 = scmp.ge.s32.totalorder %s499_s9, 1  ;;  %s499_s9 = sphi %s517_s9, %s12_s9  }
   0x2   : > { %p112_p1 = scmp.lt.s32.totalorder %s499_s9, 3 }
   0x4   : > { %p113_p2 = pnand %p442_p0, %p112_p1 }
   0x5   : > { %p134_p3 = scmp.lt.s32.totalorder (!%p113_p2), %s438_s10, 1  ;;  %vm146_vm0 = vcmask (!%p113_p2), 130048   ;;  %vm149_vm1 = vcmask (!%p113_p2), 128000   ;;  %v528_v0 = vld [vmem:[%s916_s1] ss:$0 sm:$0xff] (!%p113_p2)  ;;  %v501_v5 = vmov (!%p113_p2), 0.0  }
   0x6   : > { %116 = sbr.rel (%p113_p2) target bundleno = 66 (0x42), region = 28  ;;  %v538_v1 = vld [vmem:[%s916_s1 + $0x1] ss:$0 sm:$0xff] (!%p113_p2) }
   0xd   : > { %s919_s10 = smov (!%p134_p3, %s438_s10), 1 }
   0xe   : > { %s483_s11 = smul.u32 528, %s919_s10  ;;  %s482_s12 = sshll.u32 %s919_s10, 8 }
   0xf   : > { %s533_s17 = scalar_lea.vmem %s915_s0, %s482_s12 }
  0x10   : > { %s543_s22 = scalar_lea.vmem %s917_s2, %s483_s11  ;;  %v546_v2 = vld [vmem:[%s533_s17] sm:$0xff]  ;;  %v549_v3 = vld [vmem:[%s533_s17 + $0x8] sm:$0xff]  ;;  %v552_v4 = vld [vmem:[%s533_s17 + $0x10] sm:$0xff] }
  0x11   : > { %157 = vst.msk [vmem:[%s543_s22 + $0x48] sm:$0xff] %vm146_vm0, %v501_v5  ;;  %147 = vst.msk [vmem:[%s543_s22] sm:$0xff] %vm146_vm0, %v501_v5  ;;  %v250_v6 = vmul.f32 %v528_v0, %v546_v2  ;;  %v251_v7 = vmul.f32 %v528_v0, %v549_v3  ;;  %v252_v8 = vmul.f32 %v528_v0, %v552_v4  ;;  %v217_v9 = vld [vmem:[%s533_s17 + $0x18] sm:$0xff]  ;;  %v218_v10 = vld [vmem:[%s533_s17 + $0x20] sm:$0xff] }
  0x12   : > { %148 = vst.msk [vmem:[%s543_s22 + $0x8] sm:$0xff] %vm146_vm0, %v501_v5  ;;  %151 = vst.msk [vmem:[%s543_s22 + $0x18] sm:$0xff] %vm146_vm0, %v501_v5  ;;  %v219_v11 = vld [vmem:[%s533_s17 + $0x28] sm:$0xff]  ;;  %v253_v12 = vmul.f32 %v528_v0, %v217_v9  ;;  %v254_v13 = vmul.f32 %v528_v0, %v218_v10  ;;  %v220_v15 = vld [vmem:[%s533_s17 + $0x30] sm:$0xff] }
  0x13   : > { %152 = vst.msk [vmem:[%s543_s22 + $0x20] sm:$0xff] %vm146_vm0, %v501_v5  ;;  %154 = vst.msk [vmem:[%s543_s22 + $0x30] sm:$0xff] %vm146_vm0, %v501_v5  ;;  %v255_v14 = vmul.f32 %v528_v0, %v219_v11  ;;  %v221_v16 = vld [vmem:[%s533_s17 + $0x38] sm:$0xff]  ;;  %v286_v17 = vadd.f32 %v538_v1, %v250_v6  ;;  %v287_v18 = vadd.f32 %v538_v1, %v251_v7  ;;  %v222_v25 = vld [vmem:[%s533_s17 + $0x40] sm:$0xff] }
  0x14   : > { %155 = vst.msk [vmem:[%s543_s22 + $0x38] sm:$0xff] %vm146_vm0, %v501_v5  ;;  %158 = vst.msk [vmem:[%s543_s22 + $0x50] sm:$0xff] %vm146_vm0, %v501_v5  ;;  %v288_v19 = vadd.f32 %v538_v1, %v252_v8  ;;  %v256_v20 = vmul.f32 %v528_v0, %v220_v15  ;;  %v289_v21 = vadd.f32 %v538_v1, %v253_v12  ;;  %v223_v26 = vld [vmem:[%s533_s17 + $0x48] sm:$0xff]  ;;  %v224_v27 = vld [vmem:[%s533_s17 + $0x50] sm:$0xff] }
  0x15   : > { %160 = vst.msk [vmem:[%s543_s22 + $0x60] sm:$0xff] %vm146_vm0, %v501_v5  ;;  %161 = vst.msk [vmem:[%s543_s22 + $0x68] sm:$0xff] %vm146_vm0, %v501_v5  ;;  %v290_v22 = vadd.f32 %v538_v1, %v254_v13  ;;  %v291_v23 = vadd.f32 %v538_v1, %v255_v14  ;;  %v257_v24 = vmul.f32 %v528_v0, %v221_v16  ;;  %v318_v28 = vmax.f32 %v286_v17, 0.0  ;;  %v225_v32 = vld [vmem:[%s533_s17 + $0x58] sm:$0xff]  ;;  %v226_v33 = vld [vmem:[%s533_s17 + $0x60] sm:$0xff] }
  0x16   : > { %163 = vst.msk [vmem:[%s543_s22 + $0x78] sm:$0xff] %vm146_vm0, %v501_v5  ;;  %164 = vst.msk [vmem:[%s543_s22 + $0x80] sm:$0xff] %vm146_vm0, %v501_v5  ;;  %v319_v29 = vmax.f32 %v287_v18, 0.0  ;;  %v320_v30 = vmax.f32 %v288_v19, 0.0  ;;  %v292_v31 = vadd.f32 %v538_v1, %v256_v20  ;;  %v227_v34 = vld [vmem:[%s533_s17 + $0x68] sm:$0xff]  ;;  %v321_v35 = vmax.f32 %v289_v21, 0.0 }
  0x17   : > { %166 = vst.msk [vmem:[%s543_s22 + $0x90] sm:$0xff] %vm146_vm0, %v501_v5  ;;  %167 = vst.msk [vmem:[%s543_s22 + $0x98] sm:$0xff] %vm146_vm0, %v501_v5  ;;  %v322_v36 = vmax.f32 %v290_v22, 0.0  ;;  %v323_v37 = vmax.f32 %v291_v23, 0.0  ;;  %v293_v38 = vadd.f32 %v538_v1, %v257_v24  ;;  %v228_v39 = vld [vmem:[%s533_s17 + $0x70] sm:$0xff]  ;;  %v258_v41 = vmul.f32 %v528_v0, %v222_v25  ;;  %v229_v44 = vld [vmem:[%s533_s17 + $0x78] sm:$0xff] }
  0x18   : > { %169 = vst.msk [vmem:[%s543_s22 + $0xa8] sm:$0xff] %vm146_vm0, %v501_v5  ;;  %170 = vst.msk [vmem:[%s543_s22 + $0xb0] sm:$0xff] %vm146_vm0, %v501_v5  ;;  %v324_v40 = vmax.f32 %v292_v31, 0.0  ;;  %v259_v42 = vmul.f32 %v528_v0, %v223_v26  ;;  %v260_v43 = vmul.f32 %v528_v0, %v224_v27  ;;  %v261_v46 = vmul.f32 %v528_v0, %v225_v32  ;;  %v230_v57 = vld [vmem:[%s533_s17 + $0x80] sm:$0xff]  ;;  %v231_v58 = vld [vmem:[%s533_s17 + $0x88] sm:$0xff] }
  0x19   : > { %172 = vst.msk [vmem:[%s543_s22 + $0xc0] sm:$0xff] %vm146_vm0, %v501_v5  ;;  %173 = vst.msk [vmem:[%s543_s22 + $0xc8] sm:$0xff] %vm146_vm0, %v501_v5  ;;  %v325_v45 = vmax.f32 %v293_v38, 0.0  ;;  %v262_v47 = vmul.f32 %v528_v0, %v226_v33  ;;  %v263_v48 = vmul.f32 %v528_v0, %v227_v34  ;;  %v294_v49 = vadd.f32 %v538_v1, %v258_v41  ;;  %v232_v59 = vld [vmem:[%s533_s17 + $0x90] sm:$0xff]  ;;  %v233_v2 = vld [vmem:[%s533_s17 + $0x98] sm:$0xff] }
  0x1a   : > { %175 = vst.msk [vmem:[%s543_s22 + $0xd8] sm:$0xff] %vm146_vm0, %v501_v5  ;;  %176 = vst.msk [vmem:[%s543_s22 + $0xe0] sm:$0xff] %vm146_vm0, %v501_v5  ;;  %v295_v50 = vadd.f32 %v538_v1, %v259_v42  ;;  %v296_v51 = vadd.f32 %v538_v1, %v260_v43  ;;  %v264_v52 = vmul.f32 %v528_v0, %v228_v39  ;;  %v234_v3 = vld [vmem:[%s533_s17 + $0xa0] sm:$0xff]  ;;  %v235_v4 = vld [vmem:[%s533_s17 + $0xa8] sm:$0xff] }
  0x1b   : > { %178 = vst.msk [vmem:[%s543_s22 + $0xf0] sm:$0xff] %vm146_vm0, %v501_v5  ;;  %179 = vst.msk [vmem:[%s543_s22 + $0xf8] sm:$0xff] %vm146_vm0, %v501_v5  ;;  %v297_v53 = vadd.f32 %v538_v1, %v261_v46  ;;  %v298_v54 = vadd.f32 %v538_v1, %v262_v47  ;;  %v299_v55 = vadd.f32 %v538_v1, %v263_v48  ;;  %v326_v60 = vmax.f32 %v294_v49, 0.0  ;;  %v236_v9 = vld [vmem:[%s533_s17 + $0xb0] sm:$0xff]  ;;  %v237_v14 = vld [vmem:[%s533_s17 + $0xb8] sm:$0xff] }
  0x1c   : > { %181 = vst.msk [vmem:[%s543_s22 + $0x108] sm:$0xff] %vm146_vm0, %v501_v5  ;;  %182 = vst.msk [vmem:[%s543_s22 + $0x110] sm:$0xff] %vm146_vm0, %v501_v5  ;;  %v265_v56 = vmul.f32 %v528_v0, %v229_v44  ;;  %v327_v61 = vmax.f32 %v295_v50, 0.0  ;;  %v328_v62 = vmax.f32 %v296_v51, 0.0  ;;  %v300_v63 = vadd.f32 %v538_v1, %v264_v52  ;;  %v238_v27 = vld [vmem:[%s533_s17 + $0xc0] sm:$0xff]  ;;  %v241_v34 = vld [vmem:[%s533_s17 + $0xd8] sm:$0xff] }
  0x1d   : > { %184 = vst.msk [vmem:[%s543_s22 + $0x120] sm:$0xff] %vm146_vm0, %v501_v5  ;;  %185 = vst.msk [vmem:[%s543_s22 + $0x128] sm:$0xff] %vm146_vm0, %v501_v5  ;;  %v330_v6 = vmax.f32 %v298_v54, 0.0  ;;  %v331_v7 = vmax.f32 %v299_v55, 0.0  ;;  %v266_v11 = vmul.f32 %v528_v0, %v230_v57  ;;  %v267_v12 = vmul.f32 %v528_v0, %v231_v58  ;;  %v244_v41 = vld [vmem:[%s533_s17 + $0xf0] sm:$0xff]  ;;  %v245_v46 = vld [vmem:[%s533_s17 + $0xf8] sm:$0xff] }
  0x1e   : > { %187 = vst.msk [vmem:[%s543_s22 + $0x138] sm:$0xff] %vm146_vm0, %v501_v5  ;;  %188 = vst.msk [vmem:[%s543_s22 + $0x140] sm:$0xff] %vm146_vm0, %v501_v5  ;;  %v301_v8 = vadd.f32 %v538_v1, %v265_v56  ;;  %v332_v10 = vmax.f32 %v300_v63, 0.0  ;;  %v268_v13 = vmul.f32 %v528_v0, %v232_v59  ;;  %v269_v16 = vmul.f32 %v528_v0, %v233_v2 }
  0x1f   : > { %190 = vst.msk [vmem:[%s543_s22 + $0x150] sm:$0xff] %vm146_vm0, %v501_v5  ;;  %191 = vst.msk [vmem:[%s543_s22 + $0x158] sm:$0xff] %vm146_vm0, %v501_v5  ;;  %v270_v17 = vmul.f32 %v528_v0, %v234_v3  ;;  %v271_v18 = vmul.f32 %v528_v0, %v235_v4  ;;  %v302_v19 = vadd.f32 %v538_v1, %v266_v11 }
  0x20   : > { %193 = vst.msk [vmem:[%s543_s22 + $0x168] sm:$0xff] %vm146_vm0, %v501_v5  ;;  %194 = vst.msk [vmem:[%s543_s22 + $0x170] sm:$0xff] %vm146_vm0, %v501_v5  ;;  %v333_v15 = vmax.f32 %v301_v8, 0.0  ;;  %v303_v20 = vadd.f32 %v538_v1, %v267_v12  ;;  %v304_v21 = vadd.f32 %v538_v1, %v268_v13  ;;  %v272_v22 = vmul.f32 %v528_v0, %v236_v9 }
  0x21   : > { %196 = vst.msk [vmem:[%s543_s22 + $0x180] sm:$0xff] %vm146_vm0, %v501_v5  ;;  %197 = vst.msk [vmem:[%s543_s22 + $0x188] sm:$0xff] %vm146_vm0, %v501_v5  ;;  %v305_v23 = vadd.f32 %v538_v1, %v269_v16  ;;  %v306_v24 = vadd.f32 %v538_v1, %v270_v17  ;;  %v307_v25 = vadd.f32 %v538_v1, %v271_v18 }
  0x22   : > { %199 = vst.msk [vmem:[%s543_s22 + $0x198] sm:$0xff] %vm146_vm0, %v501_v5  ;;  %200 = vst.msk [vmem:[%s543_s22 + $0x1a0] sm:$0xff] %vm146_vm0, %v501_v5  ;;  %v273_v26 = vmul.f32 %v528_v0, %v237_v14  ;;  %v335_v31 = vmax.f32 %v303_v20, 0.0  ;;  %v336_v32 = vmax.f32 %v304_v21, 0.0  ;;  %v308_v33 = vadd.f32 %v538_v1, %v272_v22 }
  0x23   : > { %202 = vst.msk [vmem:[%s543_s22 + $0x1b0] sm:$0xff] %vm146_vm0, %v501_v5  ;;  %203 = vst.msk [vmem:[%s543_s22 + $0x1b8] sm:$0xff] %vm146_vm0, %v501_v5  ;;  %v338_v38 = vmax.f32 %v306_v24, 0.0  ;;  %v339_v39 = vmax.f32 %v307_v25, 0.0  ;;  %v274_v43 = vmul.f32 %v528_v0, %v238_v27  ;;  %v277_v48 = vmul.f32 %v528_v0, %v241_v34 }
  0x24   : > { %205 = vst.msk [vmem:[%s543_s22 + $0x1c8] sm:$0xff] %vm146_vm0, %v501_v5  ;;  %206 = vst.msk [vmem:[%s543_s22 + $0x1d0] sm:$0xff] %vm146_vm0, %v501_v5  ;;  %v340_v42 = vmax.f32 %v308_v33, 0.0  ;;  %v280_v54 = vmul.f32 %v528_v0, %v244_v41  ;;  %v281_v58 = vmul.f32 %v528_v0, %v245_v46 }
  0x25   : > { %208 = vst.msk [vmem:[%s543_s22 + $0x1e0] sm:$0xff] %vm146_vm0, %v501_v5  ;;  %209 = vst.msk [vmem:[%s543_s22 + $0x1e8] sm:$0xff] %vm146_vm0, %v501_v5  ;;  %v310_v51 = vadd.f32 %v538_v1, %v274_v43  ;;  %v313_v55 = vadd.f32 %v538_v1, %v277_v48 }
  0x26   : > { %211 = vst.msk [vmem:[%s543_s22 + $0x1f8] sm:$0xff] %vm146_vm0, %v501_v5  ;;  %212 = vst.msk [vmem:[%s543_s22 + $0x200] sm:$0xff] %vm146_vm0, %v501_v5  ;;  %v317_v4 = vadd.f32 %v538_v1, %v281_v58 }
  0x27   : > { %159 = vst.msk [vmem:[%s543_s22 + $0x58] sm:$0x3f] %vm149_vm1, %v501_v5  ;;  %150 = vst.msk [vmem:[%s543_s22 + $0x10] sm:$0x3f] %vm149_vm1, %v501_v5  ;;  %v342_v59 = vmax.f32 %v310_v51, 0.0  ;;  %v345_v63 = vmax.f32 %v313_v55, 0.0 }
  0x28   : > { %153 = vst.msk [vmem:[%s543_s22 + $0x28] sm:$0x3f] %vm149_vm1, %v501_v5  ;;  %156 = vst.msk [vmem:[%s543_s22 + $0x40] sm:$0x3f] %vm149_vm1, %v501_v5 }
  0x29   : > { %162 = vst.msk [vmem:[%s543_s22 + $0x70] sm:$0x3f] %vm149_vm1, %v501_v5  ;;  %165 = vst.msk [vmem:[%s543_s22 + $0x88] sm:$0x3f] %vm149_vm1, %v501_v5 }
  0x2a   : > { %168 = vst.msk [vmem:[%s543_s22 + $0xa0] sm:$0x3f] %vm149_vm1, %v501_v5  ;;  %171 = vst.msk [vmem:[%s543_s22 + $0xb8] sm:$0x3f] %vm149_vm1, %v501_v5 }
  0x2b   : > { %174 = vst.msk [vmem:[%s543_s22 + $0xd0] sm:$0x3f] %vm149_vm1, %v501_v5  ;;  %177 = vst.msk [vmem:[%s543_s22 + $0xe8] sm:$0x3f] %vm149_vm1, %v501_v5 }
  0x2c   : > { %180 = vst.msk [vmem:[%s543_s22 + $0x100] sm:$0x3f] %vm149_vm1, %v501_v5  ;;  %183 = vst.msk [vmem:[%s543_s22 + $0x118] sm:$0x3f] %vm149_vm1, %v501_v5 }
  0x2d   : > { %186 = vst.msk [vmem:[%s543_s22 + $0x130] sm:$0x3f] %vm149_vm1, %v501_v5  ;;  %189 = vst.msk [vmem:[%s543_s22 + $0x148] sm:$0x3f] %vm149_vm1, %v501_v5 }
  0x2e   : > { %192 = vst.msk [vmem:[%s543_s22 + $0x160] sm:$0x3f] %vm149_vm1, %v501_v5  ;;  %195 = vst.msk [vmem:[%s543_s22 + $0x178] sm:$0x3f] %vm149_vm1, %v501_v5 }
  0x2f   : > { %198 = vst.msk [vmem:[%s543_s22 + $0x190] sm:$0x3f] %vm149_vm1, %v501_v5  ;;  %201 = vst.msk [vmem:[%s543_s22 + $0x1a8] sm:$0x3f] %vm149_vm1, %v501_v5 }
  0x30   : > { %204 = vst.msk [vmem:[%s543_s22 + $0x1c0] sm:$0x3f] %vm149_vm1, %v501_v5  ;;  %207 = vst.msk [vmem:[%s543_s22 + $0x1d8] sm:$0x3f] %vm149_vm1, %v501_v5 }
  0x31   : > { %210 = vst.msk [vmem:[%s543_s22 + $0x1f0] sm:$0x3f] %vm149_vm1, %v501_v5  ;;  %213 = vst.msk [vmem:[%s543_s22 + $0x208] sm:$0x3f] %vm149_vm1, %v501_v5  ;;  %v329_v5 = vmax.f32 %v297_v53, 0.0 }
  0x32   : > { %448 = vst.msk [vmem:[%s543_s22 + $0x4b] sm:$0xff] %vm146_vm0, %v318_v28  ;;  %449 = vst.msk [vmem:[%s543_s22 + $0x53] sm:$0xff] %vm146_vm0, %v319_v29  ;;  %v239_v28 = vld [vmem:[%s533_s17 + $0xc8] sm:$0xff]  ;;  %v240_v29 = vld [vmem:[%s533_s17 + $0xd0] sm:$0xff] }
  0x33   : > { %450 = vst.msk [vmem:[%s543_s22 + $0x63] sm:$0xff] %vm146_vm0, %v320_v30  ;;  %451 = vst.msk [vmem:[%s543_s22 + $0x6b] sm:$0xff] %vm146_vm0, %v321_v35  ;;  %v334_v30 = vmax.f32 %v302_v19, 0.0  ;;  %v242_v35 = vld [vmem:[%s533_s17 + $0xe0] sm:$0xff]  ;;  %v275_v44 = vmul.f32 %v528_v0, %v239_v28 }
  0x34   : > { %452 = vst.msk [vmem:[%s543_s22 + $0x7b] sm:$0xff] %vm146_vm0, %v322_v36  ;;  %453 = vst.msk [vmem:[%s543_s22 + $0x83] sm:$0xff] %vm146_vm0, %v323_v37  ;;  %v243_v36 = vld [vmem:[%s533_s17 + $0xe8] sm:$0xff]  ;;  %v337_v37 = vmax.f32 %v305_v23, 0.0  ;;  %v278_v49 = vmul.f32 %v528_v0, %v242_v35 }
  0x35   : > { %454 = vst.msk [vmem:[%s543_s22 + $0x93] sm:$0xff] %vm146_vm0, %v324_v40  ;;  %455 = vst.msk [vmem:[%s543_s22 + $0x9b] sm:$0xff] %vm146_vm0, %v325_v45  ;;  %v309_v40 = vadd.f32 %v538_v1, %v273_v26  ;;  %v276_v45 = vmul.f32 %v528_v0, %v240_v29  ;;  %v279_v50 = vmul.f32 %v528_v0, %v243_v36  ;;  %v349_v0 = vmax.f32 %v317_v4, 0.0 }
  0x36   : > { %456 = vst.msk [vmem:[%s543_s22 + $0xab] sm:$0xff] %vm146_vm0, %v326_v60  ;;  %457 = vst.msk [vmem:[%s543_s22 + $0xb3] sm:$0xff] %vm146_vm0, %v327_v61  ;;  %v311_v52 = vadd.f32 %v538_v1, %v275_v44  ;;  %v314_v56 = vadd.f32 %v538_v1, %v278_v49 }
  0x37   : > { %458 = vst.msk [vmem:[%s543_s22 + $0xc3] sm:$0xff] %vm146_vm0, %v328_v62  ;;  %459 = vst.msk [vmem:[%s543_s22 + $0xcb] sm:$0xff] %vm146_vm0, %v329_v5  ;;  %v341_v47 = vmax.f32 %v309_v40, 0.0  ;;  %v312_v53 = vadd.f32 %v538_v1, %v276_v45  ;;  %v315_v57 = vadd.f32 %v538_v1, %v279_v50  ;;  %v316_v62 = vadd.f32 %v538_v1, %v280_v54 }
  0x38   : > { %460 = vst.msk [vmem:[%s543_s22 + $0xdb] sm:$0xff] %vm146_vm0, %v330_v6  ;;  %461 = vst.msk [vmem:[%s543_s22 + $0xe3] sm:$0xff] %vm146_vm0, %v331_v7  ;;  %v343_v60 = vmax.f32 %v311_v52, 0.0  ;;  %v346_v2 = vmax.f32 %v314_v56, 0.0 }
  0x39   : > { %462 = vst.msk [vmem:[%s543_s22 + $0xf3] sm:$0xff] %vm146_vm0, %v332_v10  ;;  %463 = vst.msk [vmem:[%s543_s22 + $0xfb] sm:$0xff] %vm146_vm0, %v333_v15  ;;  %v344_v61 = vmax.f32 %v312_v53, 0.0  ;;  %v347_v3 = vmax.f32 %v315_v57, 0.0  ;;  %v348_v5 = vmax.f32 %v316_v62, 0.0 }
  0x3a   : > { %464 = vst.msk [vmem:[%s543_s22 + $0x10b] sm:$0xff] %vm146_vm0, %v334_v30  ;;  %465 = vst.msk [vmem:[%s543_s22 + $0x113] sm:$0xff] %vm146_vm0, %v335_v31 }
  0x3b   : > { %466 = vst.msk [vmem:[%s543_s22 + $0x123] sm:$0xff] %vm146_vm0, %v336_v32  ;;  %467 = vst.msk [vmem:[%s543_s22 + $0x12b] sm:$0xff] %vm146_vm0, %v337_v37 }
  0x3c   : > { %468 = vst.msk [vmem:[%s543_s22 + $0x13b] sm:$0xff] %vm146_vm0, %v338_v38  ;;  %469 = vst.msk [vmem:[%s543_s22 + $0x143] sm:$0xff] %vm146_vm0, %v339_v39 }
  0x3d   : > { %470 = vst.msk [vmem:[%s543_s22 + $0x153] sm:$0xff] %vm146_vm0, %v340_v42  ;;  %471 = vst.msk [vmem:[%s543_s22 + $0x15b] sm:$0xff] %vm146_vm0, %v341_v47 }
  0x3e   : > { %472 = vst.msk [vmem:[%s543_s22 + $0x16b] sm:$0xff] %vm146_vm0, %v342_v59  ;;  %473 = vst.msk [vmem:[%s543_s22 + $0x173] sm:$0xff] %vm146_vm0, %v343_v60 }
  0x3f   : > { %474 = vst.msk [vmem:[%s543_s22 + $0x183] sm:$0xff] %vm146_vm0, %v344_v61  ;;  %475 = vst.msk [vmem:[%s543_s22 + $0x18b] sm:$0xff] %vm146_vm0, %v345_v63 }
  0x40   : > { %476 = vst.msk [vmem:[%s543_s22 + $0x19b] sm:$0xff] %vm146_vm0, %v346_v2  ;;  %477 = vst.msk [vmem:[%s543_s22 + $0x1a3] sm:$0xff] %vm146_vm0, %v347_v3 }
  0x41   : > { %478 = vst.msk [vmem:[%s543_s22 + $0x1b3] sm:$0xff] %vm146_vm0, %v348_v5  ;;  %479 = vst.msk [vmem:[%s543_s22 + $0x1bb] sm:$0xff] %vm146_vm0, %v349_v0 }
  0x42 PF: > { %s12_s9 = sadd.s32 1, %s499_s9  }
  0x43   : > { %p9_p4 = scmp.ge.s32.totalorder %s12_s9, 4  }
  0x45   :  { %11 = sbr.rel (!%p9_p4) target bundleno = 1 (0x1), region = 59 }

// kernel: basic_block_forward.9
= control target key start
LH: loop header
LB: loop body
LE: loop exit
PB: predicated region body
PF: predicated region fallthrough
CT: control target
= control target key end

     0   :  { %s623_s12 = smov 0   ;;  %s930_s0 = inlined_call_operand.vmem [shape: f32[2,16,16,16], index: 0, kind: input, shape index: {}]   ;;  %s931_s1 = inlined_call_operand.vmem [shape: f32[2,16,16,16], index: 1, kind: input, shape index: {}]   ;;  %s932_s2 = inlined_call_operand.vmem [shape: f32[4,16], index: 2, kind: input, shape index: {}]   ;;  %s933_s3 = inlined_call_operand.vmem [shape: f32[2,16,16,16], index: 3, kind: output, shape index: {}]  }
   0x1 LB: > { %s567_s13 = sadd.s32 4294967295, %s601_s12   ;;  %p571_p0 = scmp.ge.s32.totalorder %s601_s12, 1  ;;  %s601_s12 = sphi %s623_s12, %s13_s12  }
   0x2   : > { %p147_p1 = scmp.lt.s32.totalorder %s601_s12, 3 }
   0x4   : > { %p148_p2 = pnand %p571_p0, %p147_p1 }
   0x5   : > { %p176_p3 = scmp.lt.s32.totalorder (!%p148_p2), %s567_s13, 1  ;;  %v636_v0 = vld [vmem:[%s932_s2] ss:$0 sm:$0xff] (!%p148_p2)  ;;  %v641_v1 = vld [vmem:[%s932_s2 + $0x2] ss:$0 sm:$0xff] (!%p148_p2)  ;;  %vm467_vm0 = vcmask (!%p148_p2), 130048  }
   0x6   : > { %151 = sbr.rel (%p148_p2) target bundleno = 72 (0x48), region = 32  ;;  %v658_v2 = vld [vmem:[%s932_s2 + $0x1] ss:$0 sm:$0xff] (!%p148_p2)  ;;  %v685_v25 = vld [vmem:[%s932_s2 + $0x3] ss:$0 sm:$0xff] (!%p148_p2) }
   0xd   : > { %s935_s13 = smov (!%p176_p3, %s567_s13), 1 }
   0xe   : > { %s631_s14 = sshll.u32 %s935_s13, 8 }
   0xf   : > { %s647_s21 = scalar_lea.vmem %s930_s0, %s631_s14  ;;  %s653_s24 = scalar_lea.vmem %s931_s1, %s631_s14 }
  0x10   : > { %v195_v3 = vld [vmem:[%s647_s21] sm:$0xff]  ;;  %v196_v5 = vld [vmem:[%s647_s21 + $0x8] sm:$0xff]  ;;  %v197_v10 = vld [vmem:[%s647_s21 + $0x10] sm:$0xff]  ;;  %s706_s4 = scalar_lea.vmem %s933_s3, %s631_s14 }
  0x11   : > { %v299_v4 = vld [vmem:[%s653_s24] sm:$0xff]  ;;  %v231_v6 = vmul.f32 %v636_v0, %v195_v3  ;;  %v232_v8 = vmul.f32 %v636_v0, %v196_v5  ;;  %v300_v9 = vld [vmem:[%s653_s24 + $0x8] sm:$0xff]  ;;  %v301_v11 = vld [vmem:[%s653_s24 + $0x10] sm:$0xff]  ;;  %v233_v13 = vmul.f32 %v636_v0, %v197_v10 }
  0x12   : > { %v335_v7 = vmul.f32 %v641_v1, %v299_v4  ;;  %v336_v12 = vmul.f32 %v641_v1, %v300_v9  ;;  %v337_v14 = vmul.f32 %v641_v1, %v301_v11  ;;  %v198_v15 = vld [vmem:[%s647_s21 + $0x18] sm:$0xff]  ;;  %v199_v17 = vld [vmem:[%s647_s21 + $0x20] sm:$0xff]  ;;  %v200_v23 = vld [vmem:[%s647_s21 + $0x28] sm:$0xff] }
  0x13   : > { %v302_v16 = vld [vmem:[%s653_s24 + $0x18] sm:$0xff]  ;;  %v267_v18 = vadd.f32 %v658_v2, %v231_v6  ;;  %v268_v19 = vadd.f32 %v658_v2, %v232_v8  ;;  %v234_v20 = vmul.f32 %v636_v0, %v198_v15  ;;  %v303_v22 = vld [vmem:[%s653_s24 + $0x20] sm:$0xff]  ;;  %v304_v24 = vld [vmem:[%s653_s24 + $0x28] sm:$0xff]  ;;  %v269_v26 = vadd.f32 %v658_v2, %v233_v13 }
  0x14   : > { %v338_v21 = vmul.f32 %v641_v1, %v302_v16  ;;  %v235_v27 = vmul.f32 %v636_v0, %v199_v17  ;;  %v339_v28 = vmul.f32 %v641_v1, %v303_v22  ;;  %v236_v29 = vmul.f32 %v636_v0, %v200_v23  ;;  %v201_v30 = vld [vmem:[%s647_s21 + $0x30] sm:$0xff]  ;;  %v202_v40 = vld [vmem:[%s647_s21 + $0x38] sm:$0xff]  ;;  %v203_v50 = vld [vmem:[%s647_s21 + $0x40] sm:$0xff] }
  0x15   : > { %v305_v31 = vld [vmem:[%s653_s24 + $0x30] sm:$0xff]  ;;  %v367_v32 = vadd.f32 %v335_v7, %v267_v18  ;;  %v368_v33 = vadd.f32 %v336_v12, %v268_v19  ;;  %v270_v34 = vadd.f32 %v658_v2, %v234_v20  ;;  %v340_v35 = vmul.f32 %v641_v1, %v304_v24  ;;  %v306_v49 = vld [vmem:[%s653_s24 + $0x38] sm:$0xff]  ;;  %v307_v55 = vld [vmem:[%s653_s24 + $0x40] sm:$0xff] }
  0x16   : > { %v369_v36 = vadd.f32 %v337_v14, %v269_v26  ;;  %v271_v37 = vadd.f32 %v658_v2, %v235_v27  ;;  %v272_v38 = vadd.f32 %v658_v2, %v236_v29  ;;  %v237_v39 = vmul.f32 %v636_v0, %v201_v30  ;;  %v204_v60 = vld [vmem:[%s647_s21 + $0x48] sm:$0xff]  ;;  %v205_v5 = vld [vmem:[%s647_s21 + $0x50] sm:$0xff]  ;;  %v206_v7 = vld [vmem:[%s647_s21 + $0x58] sm:$0xff] }
  0x17   : > { %v403_v41 = vadd.f32 %v685_v25, %v367_v32  ;;  %v404_v42 = vadd.f32 %v685_v25, %v368_v33  ;;  %v370_v43 = vadd.f32 %v338_v21, %v270_v34  ;;  %v341_v44 = vmul.f32 %v641_v1, %v305_v31  ;;  %v308_v61 = vld [vmem:[%s653_s24 + $0x48] sm:$0xff]  ;;  %v309_v6 = vld [vmem:[%s653_s24 + $0x50] sm:$0xff]  ;;  %v310_v12 = vld [vmem:[%s653_s24 + $0x58] sm:$0xff] }
  0x18   : > { %v405_v45 = vadd.f32 %v685_v25, %v369_v36  ;;  %v371_v46 = vadd.f32 %v339_v28, %v271_v37  ;;  %v372_v47 = vadd.f32 %v340_v35, %v272_v38  ;;  %v273_v48 = vadd.f32 %v658_v2, %v237_v39  ;;  %v207_v17 = vld [vmem:[%s647_s21 + $0x60] sm:$0xff]  ;;  %v208_v23 = vld [vmem:[%s647_s21 + $0x68] sm:$0xff]  ;;  %v209_v34 = vld [vmem:[%s647_s21 + $0x70] sm:$0xff] }
  0x19   : > { %v435_v51 = vmax.f32 %v403_v41, 0.0  ;;  %v436_v52 = vmax.f32 %v404_v42, 0.0  ;;  %v406_v53 = vadd.f32 %v685_v25, %v370_v43  ;;  %v238_v54 = vmul.f32 %v636_v0, %v202_v40  ;;  %v311_v18 = vld [vmem:[%s653_s24 + $0x60] sm:$0xff]  ;;  %v312_v29 = vld [vmem:[%s653_s24 + $0x68] sm:$0xff]  ;;  %v313_v39 = vld [vmem:[%s653_s24 + $0x70] sm:$0xff] }
  0x1a   : > { %v437_v56 = vmax.f32 %v405_v45, 0.0  ;;  %v407_v57 = vadd.f32 %v685_v25, %v371_v46  ;;  %v408_v58 = vadd.f32 %v685_v25, %v372_v47  ;;  %v373_v59 = vadd.f32 %v341_v44, %v273_v48  ;;  %v210_v44 = vld [vmem:[%s647_s21 + $0x78] sm:$0xff] }
  0x1b   : > { %468 = vst.msk [vmem:[%s706_s4] sm:$0xff] %vm467_vm0, %v435_v51  ;;  %469 = vst.msk [vmem:[%s706_s4 + $0x8] sm:$0xff] %vm467_vm0, %v436_v52  ;;  %v438_v62 = vmax.f32 %v406_v53, 0.0  ;;  %v274_v63 = vadd.f32 %v658_v2, %v238_v54  ;;  %v342_v3 = vmul.f32 %v641_v1, %v306_v49  ;;  %v239_v4 = vmul.f32 %v636_v0, %v203_v50  ;;  %v314_v49 = vld [vmem:[%s653_s24 + $0x78] sm:$0xff]  ;;  %v211_v54 = vld [vmem:[%s647_s21 + $0x80] sm:$0xff] }
  0x1c   : > { %470 = vst.msk [vmem:[%s706_s4 + $0x10] sm:$0xff] %vm467_vm0, %v437_v56  ;;  %v439_v8 = vmax.f32 %v407_v57, 0.0  ;;  %v440_v9 = vmax.f32 %v408_v58, 0.0  ;;  %v409_v10 = vadd.f32 %v685_v25, %v373_v59  ;;  %v343_v11 = vmul.f32 %v641_v1, %v307_v55  ;;  %v315_v59 = vld [vmem:[%s653_s24 + $0x80] sm:$0xff] }
  0x1d   : > { %471 = vst.msk [vmem:[%s706_s4 + $0x18] sm:$0xff] %vm467_vm0, %v438_v62  ;;  %v374_v13 = vadd.f32 %v342_v3, %v274_v63  ;;  %v275_v14 = vadd.f32 %v658_v2, %v239_v4  ;;  %v240_v15 = vmul.f32 %v636_v0, %v204_v60  ;;  %v344_v16 = vmul.f32 %v641_v1, %v308_v61  ;;  %v212_v60 = vld [vmem:[%s647_s21 + $0x88] sm:$0xff] }
  0x1e   : > { %472 = vst.msk [vmem:[%s706_s4 + $0x20] sm:$0xff] %vm467_vm0, %v439_v8  ;;  %473 = vst.msk [vmem:[%s706_s4 + $0x28] sm:$0xff] %vm467_vm0, %v440_v9  ;;  %v441_v19 = vmax.f32 %v409_v10, 0.0  ;;  %v241_v20 = vmul.f32 %v636_v0, %v205_v5  ;;  %v345_v21 = vmul.f32 %v641_v1, %v309_v6  ;;  %v242_v22 = vmul.f32 %v636_v0, %v206_v7  ;;  %v316_v61 = vld [vmem:[%s653_s24 + $0x88] sm:$0xff]  ;;  %v213_v9 = vld [vmem:[%s647_s21 + $0x90] sm:$0xff] }
  0x1f   : > { %v410_v24 = vadd.f32 %v685_v25, %v374_v13  ;;  %v375_v26 = vadd.f32 %v343_v11, %v275_v14  ;;  %v276_v27 = vadd.f32 %v658_v2, %v240_v15  ;;  %v346_v28 = vmul.f32 %v641_v1, %v310_v12  ;;  %v317_v10 = vld [vmem:[%s653_s24 + $0x90] sm:$0xff]  ;;  %v214_v11 = vld [vmem:[%s647_s21 + $0x98] sm:$0xff] }
  0x20   : > { %474 = vst.msk [vmem:[%s706_s4 + $0x30] sm:$0xff] %vm467_vm0, %v441_v19  ;;  %v277_v30 = vadd.f32 %v658_v2, %v241_v20  ;;  %v278_v31 = vadd.f32 %v658_v2, %v242_v22  ;;  %v243_v32 = vmul.f32 %v636_v0, %v207_v17  ;;  %v347_v33 = vmul.f32 %v641_v1, %v311_v18 }
  0x21   : > { %v442_v35 = vmax.f32 %v410_v24, 0.0  ;;  %v411_v36 = vadd.f32 %v685_v25, %v375_v26  ;;  %v376_v37 = vadd.f32 %v344_v16, %v276_v27  ;;  %v244_v38 = vmul.f32 %v636_v0, %v208_v23  ;;  %v318_v16 = vld [vmem:[%s653_s24 + $0x98] sm:$0xff]  ;;  %v319_v27 = vld [vmem:[%s653_s24 + $0xa0] sm:$0xff] }
  0x22   : > { %v377_v40 = vadd.f32 %v345_v21, %v277_v30  ;;  %v378_v41 = vadd.f32 %v346_v28, %v278_v31  ;;  %v279_v42 = vadd.f32 %v658_v2, %v243_v32  ;;  %v348_v43 = vmul.f32 %v641_v1, %v312_v29  ;;  %v215_v21 = vld [vmem:[%s647_s21 + $0xa0] sm:$0xff]  ;;  %v216_v28 = vld [vmem:[%s647_s21 + $0xa8] sm:$0xff] }
  0x23   : > { %475 = vst.msk [vmem:[%s706_s4 + $0x38] sm:$0xff] %vm467_vm0, %v442_v35  ;;  %v443_v45 = vmax.f32 %v411_v36, 0.0  ;;  %v412_v46 = vadd.f32 %v685_v25, %v376_v37  ;;  %v280_v47 = vadd.f32 %v658_v2, %v244_v38  ;;  %v245_v48 = vmul.f32 %v636_v0, %v209_v34  ;;  %v320_v37 = vld [vmem:[%s653_s24 + $0xa8] sm:$0xff]  ;;  %v217_v38 = vld [vmem:[%s647_s21 + $0xb0] sm:$0xff] }
  0x24   : > { %v413_v50 = vadd.f32 %v685_v25, %v377_v40  ;;  %v414_v51 = vadd.f32 %v685_v25, %v378_v41  ;;  %v379_v52 = vadd.f32 %v347_v33, %v279_v42  ;;  %v349_v53 = vmul.f32 %v641_v1, %v313_v39 }
  0x25   : > { %476 = vst.msk [vmem:[%s706_s4 + $0x40] sm:$0xff] %vm467_vm0, %v443_v45  ;;  %v444_v55 = vmax.f32 %v412_v46, 0.0  ;;  %v380_v56 = vadd.f32 %v348_v43, %v280_v47  ;;  %v281_v57 = vadd.f32 %v658_v2, %v245_v48  ;;  %v246_v58 = vmul.f32 %v636_v0, %v210_v44  ;;  %v321_v47 = vld [vmem:[%s653_s24 + $0xb0] sm:$0xff]  ;;  %v218_v48 = vld [vmem:[%s647_s21 + $0xb8] sm:$0xff] }
  0x26   : > { %v445_v62 = vmax.f32 %v413_v50, 0.0  ;;  %v446_v63 = vmax.f32 %v414_v51, 0.0  ;;  %v415_v3 = vadd.f32 %v685_v25, %v379_v52  ;;  %v350_v4 = vmul.f32 %v641_v1, %v314_v49 }
  0x27   : > { %477 = vst.msk [vmem:[%s706_s4 + $0x48] sm:$0xff] %vm467_vm0, %v444_v55  ;;  %v416_v5 = vadd.f32 %v685_v25, %v380_v56  ;;  %v381_v6 = vadd.f32 %v349_v53, %v281_v57  ;;  %v282_v7 = vadd.f32 %v658_v2, %v246_v58  ;;  %v247_v8 = vmul.f32 %v636_v0, %v211_v54  ;;  %v322_v53 = vld [vmem:[%s653_s24 + $0xb8] sm:$0xff]  ;;  %v219_v58 = vld [vmem:[%s647_s21 + $0xc0] sm:$0xff] }
  0x28   : > { %478 = vst.msk [vmem:[%s706_s4 + $0x50] sm:$0xff] %vm467_vm0, %v445_v62  ;;  %479 = vst.msk [vmem:[%s706_s4 + $0x58] sm:$0xff] %vm467_vm0, %v446_v63  ;;  %v447_v12 = vmax.f32 %v415_v3, 0.0  ;;  %v351_v13 = vmul.f32 %v641_v1, %v315_v59  ;;  %v248_v14 = vmul.f32 %v636_v0, %v212_v60  ;;  %v352_v15 = vmul.f32 %v641_v1, %v316_v61  ;;  %v323_v63 = vld [vmem:[%s653_s24 + $0xc0] sm:$0xff]  ;;  %v220_v3 = vld [vmem:[%s647_s21 + $0xc8] sm:$0xff] }
  0x29   : > { %v448_v17 = vmax.f32 %v416_v5, 0.0  ;;  %v417_v18 = vadd.f32 %v685_v25, %v381_v6  ;;  %v382_v19 = vadd.f32 %v350_v4, %v282_v7  ;;  %v283_v20 = vadd.f32 %v658_v2, %v247_v8  ;;  %v324_v4 = vld [vmem:[%s653_s24 + $0xc8] sm:$0xff] }
  0x2a   : > { %480 = vst.msk [vmem:[%s706_s4 + $0x60] sm:$0xff] %vm467_vm0, %v447_v12  ;;  %v284_v22 = vadd.f32 %v658_v2, %v248_v14  ;;  %v249_v23 = vmul.f32 %v636_v0, %v213_v9  ;;  %v353_v24 = vmul.f32 %v641_v1, %v317_v10  ;;  %v250_v26 = vmul.f32 %v636_v0, %v214_v11  ;;  %v325_v14 = vld [vmem:[%s653_s24 + $0xd0] sm:$0xff] }
  0x2b   : > { %481 = vst.msk [vmem:[%s706_s4 + $0x68] sm:$0xff] %vm467_vm0, %v448_v17  ;;  %v449_v29 = vmax.f32 %v417_v18, 0.0  ;;  %v418_v30 = vadd.f32 %v685_v25, %v382_v19  ;;  %v383_v31 = vadd.f32 %v351_v13, %v283_v20  ;;  %v354_v32 = vmul.f32 %v641_v1, %v318_v16  ;;  %v221_v13 = vld [vmem:[%s647_s21 + $0xd0] sm:$0xff]  ;;  %v326_v20 = vld [vmem:[%s653_s24 + $0xd8] sm:$0xff] }
  0x2c   : > { %v384_v33 = vadd.f32 %v352_v15, %v284_v22  ;;  %v285_v34 = vadd.f32 %v658_v2, %v249_v23  ;;  %v286_v35 = vadd.f32 %v658_v2, %v250_v26  ;;  %v251_v36 = vmul.f32 %v636_v0, %v215_v21  ;;  %v222_v15 = vld [vmem:[%s647_s21 + $0xd8] sm:$0xff]  ;;  %v223_v26 = vld [vmem:[%s647_s21 + $0xe0] sm:$0xff] }
  0x2d   : > { %482 = vst.msk [vmem:[%s706_s4 + $0x70] sm:$0xff] %vm467_vm0, %v449_v29  ;;  %v450_v39 = vmax.f32 %v418_v30, 0.0  ;;  %v419_v40 = vadd.f32 %v685_v25, %v383_v31  ;;  %v355_v41 = vmul.f32 %v641_v1, %v319_v27  ;;  %v252_v42 = vmul.f32 %v636_v0, %v216_v28  ;;  %v327_v31 = vld [vmem:[%s653_s24 + $0xe0] sm:$0xff] }
  0x2e   : > { %v420_v43 = vadd.f32 %v685_v25, %v384_v33  ;;  %v385_v44 = vadd.f32 %v353_v24, %v285_v34  ;;  %v386_v45 = vadd.f32 %v354_v32, %v286_v35  ;;  %v287_v46 = vadd.f32 %v658_v2, %v251_v36  ;;  %v224_v32 = vld [vmem:[%s647_s21 + $0xe8] sm:$0xff] }
  0x2f   : > { %483 = vst.msk [vmem:[%s706_s4 + $0x78] sm:$0xff] %vm467_vm0, %v450_v39  ;;  %v451_v49 = vmax.f32 %v419_v40, 0.0  ;;  %v288_v50 = vadd.f32 %v658_v2, %v252_v42  ;;  %v356_v51 = vmul.f32 %v641_v1, %v320_v37  ;;  %v253_v52 = vmul.f32 %v636_v0, %v217_v38  ;;  %v225_v42 = vld [vmem:[%s647_s21 + $0xf0] sm:$0xff] }
  0x30   : > { %v452_v54 = vmax.f32 %v420_v43, 0.0  ;;  %v421_v55 = vadd.f32 %v685_v25, %v385_v44  ;;  %v422_v56 = vadd.f32 %v685_v25, %v386_v45  ;;  %v387_v57 = vadd.f32 %v355_v41, %v287_v46  ;;  %v328_v41 = vld [vmem:[%s653_s24 + $0xe8] sm:$0xff] }
  0x31   : > { %484 = vst.msk [vmem:[%s706_s4 + $0x80] sm:$0xff] %vm467_vm0, %v451_v49  ;;  %v388_v59 = vadd.f32 %v356_v51, %v288_v50  ;;  %v289_v60 = vadd.f32 %v658_v2, %v253_v52  ;;  %v357_v61 = vmul.f32 %v641_v1, %v321_v47  ;;  %v254_v62 = vmul.f32 %v636_v0, %v218_v48  ;;  %v329_v51 = vld [vmem:[%s653_s24 + $0xf0] sm:$0xff]  ;;  %v226_v52 = vld [vmem:[%s647_s21 + $0xf8] sm:$0xff] }
  0x32   : > { %485 = vst.msk [vmem:[%s706_s4 + $0x88] sm:$0xff] %vm467_vm0, %v452_v54  ;;  %v453_v5 = vmax.f32 %v421_v55, 0.0  ;;  %v454_v6 = vmax.f32 %v422_v56, 0.0  ;;  %v423_v7 = vadd.f32 %v685_v25, %v387_v57  ;;  %v358_v8 = vmul.f32 %v641_v1, %v322_v53  ;;  %v330_v57 = vld [vmem:[%s653_s24 + $0xf8] sm:$0xff] }
  0x33   : > { %v424_v9 = vadd.f32 %v685_v25, %v388_v59  ;;  %v389_v10 = vadd.f32 %v357_v61, %v289_v60  ;;  %v290_v11 = vadd.f32 %v658_v2, %v254_v62  ;;  %v255_v12 = vmul.f32 %v636_v0, %v219_v58 }
  0x34   : > { %486 = vst.msk [vmem:[%s706_s4 + $0x90] sm:$0xff] %vm467_vm0, %v453_v5  ;;  %487 = vst.msk [vmem:[%s706_s4 + $0x98] sm:$0xff] %vm467_vm0, %v454_v6  ;;  %v455_v16 = vmax.f32 %v423_v7, 0.0  ;;  %v359_v17 = vmul.f32 %v641_v1, %v323_v63  ;;  %v256_v18 = vmul.f32 %v636_v0, %v220_v3  ;;  %v360_v19 = vmul.f32 %v641_v1, %v324_v4 }
  0x35   : > { %v456_v21 = vmax.f32 %v424_v9, 0.0  ;;  %v425_v22 = vadd.f32 %v685_v25, %v389_v10  ;;  %v390_v23 = vadd.f32 %v358_v8, %v290_v11  ;;  %v291_v24 = vadd.f32 %v658_v2, %v255_v12 }
  0x36   : > { %488 = vst.msk [vmem:[%s706_s4 + $0xa0] sm:$0xff] %vm467_vm0, %v455_v16  ;;  %v292_v27 = vadd.f32 %v658_v2, %v256_v18  ;;  %v257_v28 = vmul.f32 %v636_v0, %v221_v13  ;;  %v361_v29 = vmul.f32 %v641_v1, %v325_v14  ;;  %v258_v30 = vmul.f32 %v636_v0, %v222_v15 }
  0x37   : > { %489 = vst.msk [vmem:[%s706_s4 + $0xa8] sm:$0xff] %vm467_vm0, %v456_v21  ;;  %v457_v33 = vmax.f32 %v425_v22, 0.0  ;;  %v426_v34 = vadd.f32 %v685_v25, %v390_v23  ;;  %v391_v35 = vadd.f32 %v359_v17, %v291_v24  ;;  %v362_v36 = vmul.f32 %v641_v1, %v326_v20 }
  0x38   : > { %v392_v37 = vadd.f32 %v360_v19, %v292_v27  ;;  %v293_v38 = vadd.f32 %v658_v2, %v257_v28  ;;  %v294_v39 = vadd.f32 %v658_v2, %v258_v30  ;;  %v259_v40 = vmul.f32 %v636_v0, %v223_v26 }
  0x39   : > { %490 = vst.msk [vmem:[%s706_s4 + $0xb0] sm:$0xff] %vm467_vm0, %v457_v33  ;;  %v458_v43 = vmax.f32 %v426_v34, 0.0  ;;  %v427_v44 = vadd.f32 %v685_v25, %v391_v35  ;;  %v363_v45 = vmul.f32 %v641_v1, %v327_v31  ;;  %v260_v46 = vmul.f32 %v636_v0, %v224_v32 }
  0x3a   : > { %v428_v47 = vadd.f32 %v685_v25, %v392_v37  ;;  %v393_v48 = vadd.f32 %v361_v29, %v293_v38  ;;  %v394_v49 = vadd.f32 %v362_v36, %v294_v39  ;;  %v295_v50 = vadd.f32 %v658_v2, %v259_v40 }
  0x3b   : > { %491 = vst.msk [vmem:[%s706_s4 + $0xb8] sm:$0xff] %vm467_vm0, %v458_v43  ;;  %v459_v53 = vmax.f32 %v427_v44, 0.0  ;;  %v296_v54 = vadd.f32 %v658_v2, %v260_v46  ;;  %v364_v55 = vmul.f32 %v641_v1, %v328_v41  ;;  %v261_v56 = vmul.f32 %v636_v0, %v225_v42 }
  0x3c   : > { %v460_v58 = vmax.f32 %v428_v47, 0.0  ;;  %v429_v59 = vadd.f32 %v685_v25, %v393_v48  ;;  %v430_v60 = vadd.f32 %v685_v25, %v394_v49  ;;  %v395_v61 = vadd.f32 %v363_v45, %v295_v50 }
  0x3d   : > { %492 = vst.msk [vmem:[%s706_s4 + $0xc0] sm:$0xff] %vm467_vm0, %v459_v53  ;;  %v396_v62 = vadd.f32 %v364_v55, %v296_v54  ;;  %v297_v63 = vadd.f32 %v658_v2, %v261_v56  ;;  %v365_v3 = vmul.f32 %v641_v1, %v329_v51  ;;  %v262_v4 = vmul.f32 %v636_v0, %v226_v52 }
  0x3e   : > { %493 = vst.msk [vmem:[%s706_s4 + $0xc8] sm:$0xff] %vm467_vm0, %v460_v58  ;;  %v461_v5 = vmax.f32 %v429_v59, 0.0  ;;  %v462_v6 = vmax.f32 %v430_v60, 0.0  ;;  %v431_v7 = vadd.f32 %v685_v25, %v395_v61  ;;  %v366_v8 = vmul.f32 %v641_v1, %v330_v57 }
  0x3f   : > { %v432_v9 = vadd.f32 %v685_v25, %v396_v62  ;;  %v397_v10 = vadd.f32 %v365_v3, %v297_v63  ;;  %v298_v11 = vadd.f32 %v658_v2, %v262_v4 }
  0x40   : > { %494 = vst.msk [vmem:[%s706_s4 + $0xd0] sm:$0xff] %vm467_vm0, %v461_v5  ;;  %495 = vst.msk [vmem:[%s706_s4 + $0xd8] sm:$0xff] %vm467_vm0, %v462_v6  ;;  %v463_v0 = vmax.f32 %v431_v7, 0.0 }
  0x41   : > { %v464_v12 = vmax.f32 %v432_v9, 0.0  ;;  %v433_v13 = vadd.f32 %v685_v25, %v397_v10  ;;  %v398_v14 = vadd.f32 %v366_v8, %v298_v11 }
  0x42   : > { %496 = vst.msk [vmem:[%s706_s4 + $0xe0] sm:$0xff] %vm467_vm0, %v463_v0 }
  0x43   : > { %497 = vst.msk [vmem:[%s706_s4 + $0xe8] sm:$0xff] %vm467_vm0, %v464_v12  ;;  %v465_v1 = vmax.f32 %v433_v13, 0.0  ;;  %v434_v15 = vadd.f32 %v685_v25, %v398_v14 }
  0x45   : > { %498 = vst.msk [vmem:[%s706_s4 + $0xf0] sm:$0xff] %vm467_vm0, %v465_v1  ;;  %v466_v16 = vmax.f32 %v434_v15, 0.0 }
  0x47   : > { %499 = vst.msk [vmem:[%s706_s4 + $0xf8] sm:$0xff] %vm467_vm0, %v466_v16 }
  0x48 PF: > { %s13_s12 = sadd.s32 1, %s601_s12  }
  0x49   : > { %p10_p4 = scmp.ge.s32.totalorder %s13_s12, 4  }
  0x4b   :  { %12 = sbr.rel (!%p10_p4) target bundleno = 1 (0x1), region = 65 }

// kernel: basic_block_forward.7
= control target key start
LH: loop header
LB: loop body
LE: loop exit
PB: predicated region body
PF: predicated region fallthrough
CT: control target
= control target key end

     0   :  { %s7698_s12 = smov 0   ;;  %s8833_s0 = inlined_call_operand.vmem [shape: f32[2,22,22,16], index: 0, kind: input, shape index: {}]   ;;  %s8834_s1 = inlined_call_operand.vmem [shape: bf16[17,16,16], index: 1, kind: input, shape index: {}]   ;;  %s8835_s2 = inlined_call_operand.vmem [shape: f32[2,16,16,16], index: 2, kind: output, shape index: {0}]   ;;  %s8836_s3 = inlined_call_operand.vmem [shape: f32[2,2,16], index: 3, kind: output, shape index: {1}]  }
   0x1 LB: > { %s5481_s13 = sadd.s32 4294967295, %s7676_s12   ;;  %p5485_p0 = scmp.ge.s32.totalorder %s7676_s12, 1  ;;  %s7676_s12 = sphi %s7698_s12, %s14_s12  }
   0x2   : > { %p140_p1 = scmp.lt.s32.totalorder %s7676_s12, 3 }
   0x4   : > { %p141_p2 = pnand %p5485_p0, %p140_p1 }
   0x5   : > { %v7652_v0 = vld [vmem:[%s8834_s1 + $0x8] sm:$0xff] (!%p141_p2)   ;;  %p168_p3 = scmp.lt.s32.totalorder (!%p141_p2), %s5481_s13, 1  ;;  %v7653_v1 = vld [vmem:[%s8834_s1 + $0x40] sm:$0xff] (!%p141_p2)   ;;  %vm290_vm0 = vcmask (!%p141_p2), 130048   ;;  %v7735_v11 = vld [vmem:[%s8834_s1 + $0x50] sm:$0xff] (!%p141_p2)   ;;  %vm5391_vm1 = vcmask (!%p141_p2), 1040384  }
   0x6   : > { %144 = sbr.rel (%p141_p2) target bundleno = 798 (0x31e), region = 28  ;;  %6551 = vmatprep.subr.bf16.mxu1 (!%p141_p2), %v7652_v0  ;;  %v7654_v2 = vld [vmem:[%s8834_s1] sm:$0xff] (!%p141_p2)   ;;  %6823 = vmatprep.subr.bf16.mxu0 (!%p141_p2), %v7653_v1  ;;  %v7655_v3 = vld [vmem:[%s8834_s1 + $0x48] sm:$0xff] (!%p141_p2)   ;;  %v7753_v23 = vld [vmem:[%s8834_s1 + $0x10] sm:$0xff] (!%p141_p2)   ;;  %vm5393_vm2 = vcmask (!%p141_p2), 123904  }
   0x7   : > { %6552 = vmatpush3.bf16.msra.mxu1 (!%p141_p2), %v7652_v0  ;;  %6824 = vmatpush3.bf16.msra.mxu0 (!%p141_p2), %v7653_v1  ;;  %v7813_v48 = vld [vmem:[%s8834_s1 + $0x58] sm:$0xff] (!%p141_p2)  }
   0x8   : > { %6585 = vmatprep.subr.bf16.mxu1 (!%p141_p2), %v7654_v2  ;;  %6857 = vmatprep.subr.bf16.mxu0 (!%p141_p2), %v7655_v3 }
   0xd   : > { %s8838_s13 = smov (!%p168_p3, %s5481_s13), 1 }
   0xe   : > { %s7643_s22 = smul.u32 528, %s8838_s13  ;;  %s5489_s6 = sshll.u32 %s8838_s13, 1 }
   0xf   : > { %s181_s9 = scalar_lea.vmem %s8836_s3, %s5489_s6 }
  0x10   : > { %s7724_s25 = scalar_lea.vmem %s8833_s0, %s7643_s22 }
  0x11   : > { %v233_v4 = vld [vmem:[%s7724_s25 + $0x3] sm:$0xff]  ;;  %v234_v5 = vld [vmem:[%s7724_s25 + $0xb] sm:$0xff]  ;;  %v5801_v8 = vld [vmem:[%s7724_s25 + $0x53] sm:$0xff] }
  0x12   : > { %v5800_v6 = vld [vmem:[%s7724_s25 + $0x4b] sm:$0xff]  ;;  %v265_v7 = vpack.c.bf16 %v234_v5, %v233_v4  ;;  %v235_v9 = vld [vmem:[%s7724_s25 + $0x1b] sm:$0xff]  ;;  %v236_v10 = vld [vmem:[%s7724_s25 + $0x23] sm:$0xff] }
  0x13   : > { %v2537_v12 = vpack.c.bf16 %v5801_v8, %v5800_v6  ;;  %v266_v13 = vpack.c.bf16 %v236_v10, %v235_v9  ;;  %v5802_v14 = vld [vmem:[%s7724_s25 + $0x63] sm:$0xff]  ;;  %v5803_v15 = vld [vmem:[%s7724_s25 + $0x6b] sm:$0xff]  ;;  %v237_v16 = vld [vmem:[%s7724_s25 + $0x33] sm:$0xff] }
  0x14   : > { %6553 = vmatprep.mubr.msk.bf16.mxu1 %vm290_vm0, %v265_v7  ;;  %v7741_v17 = vpack.c.bf16 %v5803_v15, %v5802_v14  ;;  %v238_v18 = vld [vmem:[%s7724_s25 + $0x3b] sm:$0xff]  ;;  %v5805_v20 = vld [vmem:[%s7724_s25 + $0x83] sm:$0xff]  ;;  %v5806_v24 = vld [vmem:[%s7724_s25 + $0x93] sm:$0xff] }
  0x15   : > { %v5804_v19 = vld [vmem:[%s7724_s25 + $0x7b] sm:$0xff]  ;;  %6825 = vmatprep.mubr.msk.bf16.mxu0 %vm290_vm0, %v2537_v12  ;;  %6554 = vmatmul.mubr.msk.bf16.vlgmr.msra.gmra.mrb[0].mxu1 %vm290_vm0, %v266_v13  ;;  %v267_v21 = vpack.c.bf16 %v238_v18, %v237_v16  ;;  %v5808_v26 = vld [vmem:[%s7724_s25 + $0xab] sm:$0xff]  ;;  %v5809_v27 = vld [vmem:[%s7724_s25 + $0xb3] sm:$0xff] }
  0x16   : > { %v7748_v22 = vpack.c.bf16 %v5805_v20, %v5804_v19  ;;  %6586 = vmatpush3.bf16.msra.mxu1 %v7654_v2  ;;  %6826 = vmatmul.mubr.msk.bf16.vlgmr.msra.gmra.mrb[0].mxu0 %vm290_vm0, %v7741_v17  ;;  %v5807_v25 = vld [vmem:[%s7724_s25 + $0x9b] sm:$0xff]  ;;  %v7768_v29 = vpack.c.bf16 %v5809_v27, %v5808_v26  ;;  %v5810_v30 = vld [vmem:[%s7724_s25 + $0xc3] sm:$0xff]  ;;  %v5811_v31 = vld [vmem:[%s7724_s25 + $0xcb] sm:$0xff] }
  0x17   : > { %6858 = vmatpush3.bf16.msra.mxu0 %v7655_v3  ;;  %6557 = vmatprep.mubr.msk.bf16.mxu1 %vm290_vm0, %v267_v21  ;;  %v7766_v28 = vpack.c.bf16 %v5807_v25, %v5806_v24  ;;  %v5812_v32 = vld [vmem:[%s7724_s25 + $0xdb] sm:$0xff]  ;;  %v5813_v33 = vld [vmem:[%s7724_s25 + $0xe3] sm:$0xff]  ;;  %v7781_v34 = vpack.c.bf16 %v5811_v31, %v5810_v30  ;;  %v5814_v36 = vld [vmem:[%s7724_s25 + $0xf3] sm:$0xff] }
  0x18   : > { %6829 = vmatprep.mubr.msk.bf16.mxu0 %vm290_vm0, %v7748_v22  ;;  %6891 = vmatprep.subr.bf16.mxu0 %v7735_v11  ;;  %v7783_v35 = vpack.c.bf16 %v5813_v33, %v5812_v32  ;;  %v5815_v37 = vld [vmem:[%s7724_s25 + $0xfb] sm:$0xff]  ;;  %v5851_v38 = vld [vmem:[%s7724_s25 + $0x4c] sm:$0xff]  ;;  %v5853_v42 = vld [vmem:[%s7724_s25 + $0x64] sm:$0xff] }
  0x19   : > { %6619 = vmatprep.subr.bf16.mxu1 %v7753_v23  ;;  %v5852_v39 = vld [vmem:[%s7724_s25 + $0x54] sm:$0xff]  ;;  %v7797_v40 = vpack.c.bf16 %v5815_v37, %v5814_v36  ;;  %v5854_v43 = vld [vmem:[%s7724_s25 + $0x6c] sm:$0xff]  ;;  %v5855_v44 = vld [vmem:[%s7724_s25 + $0x7c] sm:$0xff] }
  0x1a   : > { %v2835_v41 = vpack.c.bf16 %v5852_v39, %v5851_v38  ;;  %v5856_v45 = vld [vmem:[%s7724_s25 + $0x84] sm:$0xff]  ;;  %v2836_v46 = vpack.c.bf16 %v5854_v43, %v5853_v42  ;;  %v256_v50 = vld [vmem:[%s7724_s25 + $0x113] sm:$0xff]  ;;  %v5858_v52 = vld [vmem:[%s7724_s25 + $0x9c] sm:$0xff] }
  0x1b   : > { %v2837_v47 = vpack.c.bf16 %v5856_v45, %v5855_v44  ;;  %v255_v49 = vld [vmem:[%s7724_s25 + $0x10b] sm:$0xff]  ;;  %v5857_v51 = vld [vmem:[%s7724_s25 + $0x94] sm:$0xff]  ;;  %v257_v53 = vld [vmem:[%s7724_s25 + $0x123] sm:$0xff] }
  0x1c   : > { %v258_v54 = vld [vmem:[%s7724_s25 + $0x12b] sm:$0xff]  ;;  %v5860_v56 = vld [vmem:[%s7724_s25 + $0xb4] sm:$0xff]  ;;  %v7831_v57 = vpack.c.bf16 %v256_v50, %v255_v49  ;;  %v2838_v58 = vpack.c.bf16 %v5858_v52, %v5857_v51  ;;  %v260_v62 = vld [vmem:[%s7724_s25 + $0x143] sm:$0xff] }
  0x1d   : > { %6558 = vmatmul.mubr.msk.bf16.gmra.mrb[4].mxu1 %vm290_vm0, %v2537_v12  ;;  %v5859_v55 = vld [vmem:[%s7724_s25 + $0xac] sm:$0xff]  ;;  %v7833_v59 = vpack.c.bf16 %v258_v54, %v257_v53  ;;  %v259_v61 = vld [vmem:[%s7724_s25 + $0x13b] sm:$0xff]  ;;  %v5861_v63 = vld [vmem:[%s7724_s25 + $0xc4] sm:$0xff] }
  0x1e   : > { %6830 = vmatmul.mubr.msk.bf16.gmra.mrb[4].mxu0 %vm290_vm0, %v7766_v28  ;;  %6561 = vmatprep.mubr.msk.bf16.mxu1 %vm290_vm0, %v7741_v17  ;;  %v2839_v60 = vpack.c.bf16 %v5860_v56, %v5859_v55  ;;  %v5862_v0 = vld [vmem:[%s7724_s25 + $0xcc] sm:$0xff]  ;;  %v262_v2 = vld [vmem:[%s7724_s25 + $0x15b] sm:$0xff]  ;;  %v5864_v4 = vld [vmem:[%s7724_s25 + $0xe4] sm:$0xff]  ;;  %v7849_v5 = vpack.c.bf16 %v260_v62, %v259_v61 }
  0x1f   : > { %6833 = vmatprep.mubr.msk.bf16.mxu0 %vm290_vm0, %v7768_v29  ;;  %v261_v1 = vld [vmem:[%s7724_s25 + $0x153] sm:$0xff]  ;;  %v5863_v3 = vld [vmem:[%s7724_s25 + $0xdc] sm:$0xff]  ;;  %v2840_v6 = vpack.c.bf16 %v5862_v0, %v5861_v63  ;;  %v263_v9 = vld [vmem:[%s7724_s25 + $0x16b] sm:$0xff] }
  0x20   : > { %v7851_v7 = vpack.c.bf16 %v262_v2, %v261_v1  ;;  %v2841_v8 = vpack.c.bf16 %v5864_v4, %v5863_v3  ;;  %v264_v10 = vld [vmem:[%s7724_s25 + $0x173] sm:$0xff]  ;;  %v5866_v12 = vld [vmem:[%s7724_s25 + $0xfc] sm:$0xff]  ;;  %v184_v14 = vld [vmem:[%s7724_s25 + $0x8] sm:$0xff] }
  0x21   : > { %v183_v13 = vld [vmem:[%s7724_s25] sm:$0xff]  ;;  %v5867_v15 = vld [vmem:[%s7724_s25 + $0x10c] sm:$0xff]  ;;  %v5868_v16 = vld [vmem:[%s7724_s25 + $0x114] sm:$0xff]  ;;  %v7867_v18 = vpack.c.bf16 %v264_v10, %v263_v9 }
  0x22   : > { %v215_v20 = vpack.c.bf16 %v184_v14, %v183_v13  ;;  %v2843_v21 = vpack.c.bf16 %v5868_v16, %v5867_v15  ;;  %v185_v24 = vld [vmem:[%s7724_s25 + $0x18] sm:$0xff]  ;;  %v186_v25 = vld [vmem:[%s7724_s25 + $0x20] sm:$0xff]  ;;  %v5870_v27 = vld [vmem:[%s7724_s25 + $0x12c] sm:$0xff] }
  0x23   : > { %v5869_v26 = vld [vmem:[%s7724_s25 + $0x124] sm:$0xff]  ;;  %v187_v30 = vld [vmem:[%s7724_s25 + $0x30] sm:$0xff]  ;;  %v188_v31 = vld [vmem:[%s7724_s25 + $0x38] sm:$0xff]  ;;  %v216_v36 = vpack.c.bf16 %v186_v25, %v185_v24 }
  0x24   : > { %v5871_v32 = vld [vmem:[%s7724_s25 + $0x13c] sm:$0xff]  ;;  %v5872_v33 = vld [vmem:[%s7724_s25 + $0x144] sm:$0xff]  ;;  %v2844_v37 = vpack.c.bf16 %v5870_v27, %v5869_v26  ;;  %v217_v38 = vpack.c.bf16 %v188_v31, %v187_v30  ;;  %v190_v43 = vld [vmem:[%s7724_s25 + $0x50] sm:$0xff] }
  0x25   : > { %6562 = vmatmul.mubr.msk.bf16.gmra.mrb[8].mxu1 %vm290_vm0, %v7748_v22  ;;  %v2845_v39 = vpack.c.bf16 %v5872_v33, %v5871_v32  ;;  %v189_v42 = vld [vmem:[%s7724_s25 + $0x48] sm:$0xff]  ;;  %v5873_v44 = vld [vmem:[%s7724_s25 + $0x154] sm:$0xff]  ;;  %v5874_v45 = vld [vmem:[%s7724_s25 + $0x15c] sm:$0xff] }
  0x26   : > { %6834 = vmatmul.mubr.msk.bf16.gmra.mrb[8].mxu0 %vm290_vm0, %v7781_v34  ;;  %6565 = vmatprep.mubr.msk.bf16.mxu1 %vm290_vm0, %v7766_v28  ;;  %v5875_v49 = vld [vmem:[%s7724_s25 + $0x16c] sm:$0xff]  ;;  %v218_v50 = vpack.c.bf16 %v190_v43, %v189_v42  ;;  %v2846_v51 = vpack.c.bf16 %v5874_v45, %v5873_v44  ;;  %v193_v54 = vld [vmem:[%s7724_s25 + $0x78] sm:$0xff]  ;;  %v194_v55 = vld [vmem:[%s7724_s25 + $0x80] sm:$0xff] }
  0x27   : > { %6837 = vmatprep.mubr.msk.bf16.mxu0 %vm290_vm0, %v7783_v35  ;;  %v5877_v56 = vld [vmem:[%s7724_s25 + $0x184] sm:$0xff]  ;;  %v196_v61 = vld [vmem:[%s7724_s25 + $0x98] sm:$0xff]  ;;  %v220_v0 = vpack.c.bf16 %v194_v55, %v193_v54  ;;  %v5905_v25 = vld [vmem:[%s7724_s25 + $0x6e] sm:$0xff] }
  0x28   : > { %v5879_v62 = vld [vmem:[%s7724_s25 + $0x19c] sm:$0xff]  ;;  %v5880_v63 = vld [vmem:[%s7724_s25 + $0x1a4] sm:$0xff]  ;;  %v203_v26 = vld [vmem:[%s7724_s25 + $0xf0] sm:$0xff] }
  0x29   : > { %v2849_v3 = vpack.c.bf16 %v5880_v63, %v5879_v62  ;;  %v197_v4 = vld [vmem:[%s7724_s25 + $0xa8] sm:$0xff]  ;;  %v5882_v9 = vld [vmem:[%s7724_s25 + $0x1bc] sm:$0xff]  ;;  %v206_v42 = vld [vmem:[%s7724_s25 + $0x110] sm:$0xff] }
  0x2a   : > { %v199_v10 = vld [vmem:[%s7724_s25 + $0xc0] sm:$0xff]  ;;  %v5903_v13 = vld [vmem:[%s7724_s25 + $0x56] sm:$0xff]  ;;  %v5913_v55 = vld [vmem:[%s7724_s25 + $0xce] sm:$0xff] }
  0x2b   : > { %v5904_v24 = vld [vmem:[%s7724_s25 + $0x66] sm:$0xff]  ;;  %v204_v27 = vld [vmem:[%s7724_s25 + $0xf8] sm:$0xff] }
  0x2c   : > { %v5906_v30 = vld [vmem:[%s7724_s25 + $0x7e] sm:$0xff]  ;;  %v5907_v31 = vld [vmem:[%s7724_s25 + $0x86] sm:$0xff]  ;;  %v7940_v33 = vpack.c.bf16 %v5905_v25, %v5904_v24  ;;  %v5908_v43 = vld [vmem:[%s7724_s25 + $0x96] sm:$0xff] }
  0x2d   : > { %6566 = vmatmul.mubr.msk.bf16.gmra.mrb[12].mxu1 %vm290_vm0, %v7768_v29  ;;  %v5909_v44 = vld [vmem:[%s7724_s25 + $0x9e] sm:$0xff]  ;;  %v5912_v54 = vld [vmem:[%s7724_s25 + $0xc6] sm:$0xff]  ;;  %v5921_v24 = vld [vmem:[%s7724_s25 + $0x12e] sm:$0xff] }
  0x2e   : > { %6838 = vmatmul.mubr.msk.bf16.gmra.mrb[12].mxu0 %vm290_vm0, %v7797_v40  ;;  %6569 = vmatprep.mubr.msk.bf16.mxu1 %vm290_vm0, %v7781_v34  ;;  %v207_v45 = vld [vmem:[%s7724_s25 + $0x120] sm:$0xff]  ;;  %v7983_v63 = vpack.c.bf16 %v5913_v55, %v5912_v54  ;;  %v719_v25 = vld [vmem:[%s7724_s25 + $0x36] sm:$0xff] }
  0x2f   : > { %6859 = vmatprep.mubr.msk.bf16.mxu0 %vm290_vm0, %v2835_v41  ;;  %v7885_v41 = vld [vmem:[%s8834_s1 + $0x18] sm:$0xff]   ;;  %v5953_v55 = vld [vmem:[%s7724_s25 + $0x62] sm:$0xff] }
  0x35   : > { %6570 = vmatmul.mubr.msk.bf16.gmra.mrb[16].mxu1 %vm290_vm0, %v7783_v35 }
  0x36   : > { %6860 = vmatmul.mubr.msk.bf16.vlgmr.msra.gmra.mrb[0].mxu0 %vm290_vm0, %v2836_v46  ;;  %6573 = vmatprep.mubr.msk.bf16.mxu1 %vm290_vm0, %v7797_v40  ;;  %v191_v46 = vld [vmem:[%s7724_s25 + $0x60] sm:$0xff] }
  0x37   : > { %6892 = vmatpush3.bf16.msra.mxu0 %v7735_v11  ;;  %6863 = vmatprep.mubr.msk.bf16.mxu0 %vm290_vm0, %v2837_v47  ;;  %v5865_v11 = vld [vmem:[%s7724_s25 + $0xf4] sm:$0xff]  ;;  %v192_v47 = vld [vmem:[%s7724_s25 + $0x68] sm:$0xff] }
  0x38   : > { %6925 = vmatprep.subr.bf16.mxu0 %v7813_v48  ;;  %v2842_v19 = vpack.c.bf16 %v5866_v12, %v5865_v11  ;;  %v219_v52 = vpack.c.bf16 %v192_v47, %v191_v46  ;;  %v200_v11 = vld [vmem:[%s7724_s25 + $0xc8] sm:$0xff] }
  0x39   : > { %v5902_v12 = vld [vmem:[%s7724_s25 + $0x4e] sm:$0xff]  ;;  %v223_v16 = vpack.c.bf16 %v200_v11, %v199_v10  ;;  %v5919_v11 = vld [vmem:[%s7724_s25 + $0x116] sm:$0xff] }
  0x3a   : > { %v208_v46 = vld [vmem:[%s7724_s25 + $0x128] sm:$0xff] }
  0x3b   : > { %v5910_v47 = vld [vmem:[%s7724_s25 + $0xae] sm:$0xff] }
  0x3c   : > { %v5918_v10 = vld [vmem:[%s7724_s25 + $0x10e] sm:$0xff] }
  0x3d   : > { %6574 = vmatmul.mubr.msk.bf16.gmra.mrb[20].mxu1 %vm290_vm0, %v7831_v57 }
  0x3e   : > { %6864 = vmatmul.mubr.msk.bf16.gmra.mrb[4].mxu0 %vm290_vm0, %v2838_v58  ;;  %6577 = vmatprep.mubr.msk.bf16.mxu1 %vm290_vm0, %v7833_v59  ;;  %v5878_v58 = vld [vmem:[%s7724_s25 + $0x18c] sm:$0xff] }
  0x3f   : > { %6867 = vmatprep.mubr.msk.bf16.mxu0 %vm290_vm0, %v2839_v60  ;;  %v195_v60 = vld [vmem:[%s7724_s25 + $0x90] sm:$0xff]  ;;  %v2848_v1 = vpack.c.bf16 %v5878_v58, %v5877_v56  ;;  %v212_v58 = vld [vmem:[%s7724_s25 + $0x158] sm:$0xff] }
  0x40   : > { %v221_v2 = vpack.c.bf16 %v196_v61, %v195_v60  ;;  %v211_v56 = vld [vmem:[%s7724_s25 + $0x150] sm:$0xff]  ;;  %v5914_v60 = vld [vmem:[%s7724_s25 + $0xde] sm:$0xff]  ;;  %v5915_v61 = vld [vmem:[%s7724_s25 + $0xe6] sm:$0xff] }
  0x45   : > { %6578 = vmatmul.mubr.msk.bf16.gmra.mrb[24].mxu1 %vm290_vm0, %v7849_v5 }
  0x46   : > { %6868 = vmatmul.mubr.msk.bf16.gmra.mrb[8].mxu0 %vm290_vm0, %v2840_v6  ;;  %6581 = vmatprep.mubr.msk.bf16.mxu1 %vm290_vm0, %v7851_v7  ;;  %v198_v6 = vld [vmem:[%s7724_s25 + $0xb0] sm:$0xff] }
  0x47   : > { %6871 = vmatprep.mubr.msk.bf16.mxu0 %vm290_vm0, %v2841_v8  ;;  %v5881_v8 = vld [vmem:[%s7724_s25 + $0x1b4] sm:$0xff]  ;;  %v222_v14 = vpack.c.bf16 %v198_v6, %v197_v4  ;;  %v5917_v6 = vld [vmem:[%s7724_s25 + $0xfe] sm:$0xff] }
  0x48   : > { %v2850_v15 = vpack.c.bf16 %v5882_v9, %v5881_v8  ;;  %v5916_v4 = vld [vmem:[%s7724_s25 + $0xf6] sm:$0xff]  ;;  %v715_v8 = vld [vmem:[%s7724_s25 + $0x6] sm:$0xff]  ;;  %v716_v9 = vld [vmem:[%s7724_s25 + $0xe] sm:$0xff] }
  0x4d   : > { %6582 = vmatmul.mubr.msk.bf16.gmra.mrb[28].mxu1 %vm290_vm0, %v7867_v18 }
  0x4e   : > { %6872 = vmatmul.mubr.msk.bf16.gmra.mrb[12].mxu0 %vm290_vm0, %v2842_v19  ;;  %6587 = vmatprep.mubr.msk.bf16.mxu1 %vm290_vm0, %v215_v20  ;;  %v7925_v19 = vpack.c.bf16 %v5903_v13, %v5902_v12  ;;  %v201_v20 = vld [vmem:[%s7724_s25 + $0xd8] sm:$0xff]  ;;  %v8001_v13 = vpack.c.bf16 %v5917_v6, %v5916_v4  ;;  %v5961_v4 = vld [vmem:[%s7724_s25 + $0xc2] sm:$0xff]  ;;  %v5962_v6 = vld [vmem:[%s7724_s25 + $0xca] sm:$0xff] }
  0x4f   : > { %6875 = vmatprep.mubr.msk.bf16.mxu0 %vm290_vm0, %v2843_v21  ;;  %v202_v21 = vld [vmem:[%s7724_s25 + $0xe0] sm:$0xff] }
  0x50   : > { %v224_v32 = vpack.c.bf16 %v202_v21, %v201_v20  ;;  %v718_v20 = vld [vmem:[%s7724_s25 + $0x26] sm:$0xff] }
  0x51   : > { %v5920_v21 = vld [vmem:[%s7724_s25 + $0x126] sm:$0xff] }
  0x55   : > { %6588 = vmatmul.mubr.msk.bf16.vlgmr.msra.gmra.mrb[0].mxu1 %vm290_vm0, %v216_v36  ;;  %v225_v36 = vpack.c.bf16 %v204_v27, %v203_v26  ;;  %v720_v26 = vld [vmem:[%s7724_s25 + $0x3e] sm:$0xff] }
  0x56   : > { %6620 = vmatpush3.bf16.msra.mxu1 %v7753_v23  ;;  %6876 = vmatmul.mubr.msk.bf16.gmra.mrb[16].mxu0 %vm290_vm0, %v2844_v37  ;;  %v5876_v23 = vld [vmem:[%s7724_s25 + $0x174] sm:$0xff]  ;;  %v7942_v37 = vpack.c.bf16 %v5907_v31, %v5906_v30  ;;  %v5922_v27 = vld [vmem:[%s7724_s25 + $0x13e] sm:$0xff]  ;;  %v5923_v30 = vld [vmem:[%s7724_s25 + $0x146] sm:$0xff] }
  0x57   : > { %6591 = vmatprep.mubr.msk.bf16.mxu1 %vm290_vm0, %v217_v38  ;;  %6879 = vmatprep.mubr.msk.bf16.mxu0 %vm290_vm0, %v2845_v39  ;;  %v2847_v53 = vpack.c.bf16 %v5876_v23, %v5875_v49  ;;  %v7947_v38 = vld [vmem:[%s8834_s1 + $0x60] sm:$0xff]   ;;  %v205_v39 = vld [vmem:[%s7724_s25 + $0x108] sm:$0xff]  ;;  %v5911_v49 = vld [vmem:[%s7724_s25 + $0xb6] sm:$0xff] }
  0x58   : > { %6653 = vmatprep.subr.bf16.mxu1 %v7885_v41  ;;  %v226_v23 = vpack.c.bf16 %v206_v42, %v205_v39  ;;  %v8019_v39 = vpack.c.bf16 %v5923_v30, %v5922_v27  ;;  %v8024_v42 = vld [vmem:[%s8834_s1 + $0x20] sm:$0xff]   ;;  %v5547_v30 = vld [vmem:[%s7724_s25 + $0x4a] sm:$0xff] }
  0x5d   : > { %6592 = vmatmul.mubr.msk.bf16.gmra.mrb[4].mxu1 %vm290_vm0, %v218_v50  ;;  %v7965_v50 = vpack.c.bf16 %v5909_v44, %v5908_v43  ;;  %v5924_v43 = vld [vmem:[%s7724_s25 + $0x156] sm:$0xff]  ;;  %v5925_v44 = vld [vmem:[%s7724_s25 + $0x15e] sm:$0xff] }
  0x5e   : > { %6880 = vmatmul.mubr.msk.bf16.gmra.mrb[20].mxu0 %vm290_vm0, %v2846_v51  ;;  %6595 = vmatprep.mubr.msk.bf16.mxu1 %vm290_vm0, %v219_v52  ;;  %v7967_v51 = vpack.c.bf16 %v5911_v49, %v5910_v47  ;;  %v209_v52 = vld [vmem:[%s7724_s25 + $0x138] sm:$0xff]  ;;  %v3144_v47 = vpack.c.bf16 %v5925_v44, %v5924_v43 }
  0x5f   : > { %6883 = vmatprep.mubr.msk.bf16.mxu0 %vm290_vm0, %v2847_v53  ;;  %v210_v53 = vld [vmem:[%s7724_s25 + $0x140] sm:$0xff] }
  0x60   : > { %v228_v62 = vpack.c.bf16 %v210_v53, %v209_v52  ;;  %v5931_v52 = vld [vmem:[%s7724_s25 + $0x1a6] sm:$0xff]  ;;  %v5974_v43 = vld [vmem:[%s7724_s25 + $0x15a] sm:$0xff] }
  0x65   : > { %6596 = vmatmul.mubr.msk.bf16.gmra.mrb[8].mxu1 %vm290_vm0, %v220_v0  ;;  %v229_v0 = vpack.c.bf16 %v212_v58, %v211_v56  ;;  %v5954_v56 = vld [vmem:[%s7724_s25 + $0x6a] sm:$0xff] }
  0x66   : > { %6884 = vmatmul.mubr.msk.bf16.gmra.mrb[24].mxu0 %vm290_vm0, %v2848_v1  ;;  %6599 = vmatprep.mubr.msk.bf16.mxu1 %vm290_vm0, %v221_v2  ;;  %v7985_v1 = vpack.c.bf16 %v5915_v61, %v5914_v60  ;;  %v213_v2 = vld [vmem:[%s7724_s25 + $0x168] sm:$0xff]  ;;  %v8060_v60 = vpack.c.bf16 %v5954_v56, %v5953_v55  ;;  %v5957_v61 = vld [vmem:[%s7724_s25 + $0x92] sm:$0xff] }
  0x67   : > { %6887 = vmatprep.mubr.msk.bf16.mxu0 %vm290_vm0, %v2849_v3  ;;  %v214_v3 = vld [vmem:[%s7724_s25 + $0x170] sm:$0xff] }
  0x68   : > { %v230_v12 = vpack.c.bf16 %v214_v3, %v213_v2  ;;  %v5960_v3 = vld [vmem:[%s7724_s25 + $0xb2] sm:$0xff] }
  0x6d   : > { %6600 = vmatmul.mubr.msk.bf16.gmra.mrb[12].mxu1 %vm290_vm0, %v222_v14  ;;  %v747_v14 = vpack.c.bf16 %v716_v9, %v715_v8  ;;  %v3436_v8 = vpack.c.bf16 %v5962_v6, %v5961_v4  ;;  %v5964_v9 = vld [vmem:[%s7724_s25 + $0xe2] sm:$0xff] }
  0x6e   : > { %6888 = vmatmul.mubr.msk.bf16.gmra.mrb[28].mxu0 %vm290_vm0, %v2850_v15  ;;  %6603 = vmatprep.mubr.msk.bf16.mxu1 %vm290_vm0, %v223_v16  ;;  %v8003_v15 = vpack.c.bf16 %v5919_v11, %v5918_v10  ;;  %v717_v16 = vld [vmem:[%s7724_s25 + $0x1e] sm:$0xff]  ;;  %v5965_v10 = vld [vmem:[%s7724_s25 + $0xf2] sm:$0xff] }
  0x6f   : > { %6893 = vmatprep.mubr.msk.bf16.mxu0 %vm290_vm0, %v7925_v19  ;;  %v748_v31 = vpack.c.bf16 %v718_v20, %v717_v16  ;;  %v5966_v11 = vld [vmem:[%s7724_s25 + $0xfa] sm:$0xff]  ;;  %v5545_v16 = vld [vmem:[%s7724_s25 + $0x32] sm:$0xff] }
  0x70   : > { %v5546_v20 = vld [vmem:[%s7724_s25 + $0x3a] sm:$0xff] }
  0x75   : > { %6604 = vmatmul.mubr.msk.bf16.gmra.mrb[16].mxu1 %vm290_vm0, %v224_v32  ;;  %v3142_v32 = vpack.c.bf16 %v5921_v24, %v5920_v21  ;;  %v5969_v21 = vld [vmem:[%s7724_s25 + $0x122] sm:$0xff]  ;;  %v5970_v24 = vld [vmem:[%s7724_s25 + $0x12a] sm:$0xff] }
  0x76   : > { %6894 = vmatmul.mubr.msk.bf16.vlgmr.msra.gmra.mrb[0].mxu0 %vm290_vm0, %v7940_v33  ;;  %6607 = vmatprep.mubr.msk.bf16.mxu1 %vm290_vm0, %v225_v36  ;;  %v749_v36 = vpack.c.bf16 %v720_v26, %v719_v25  ;;  %v1046_v26 = vpack.c.bf16 %v5546_v20, %v5545_v16  ;;  %v3440_v27 = vpack.c.bf16 %v5970_v24, %v5969_v21  ;;  %v5610_v16 = vld [vmem:[%s7724_s25 + $0xdb] sm:$0xff]  ;;  %v5611_v20 = vld [vmem:[%s7724_s25 + $0xe3] sm:$0xff]  ;;  %v6034_v21 = vld [vmem:[%s7724_s25 + $0x1cb] sm:$0xff] }
  0x77   : > { %6926 = vmatpush3.bf16.msra.mxu0 %v7813_v48  ;;  %6897 = vmatprep.mubr.msk.bf16.mxu0 %vm290_vm0, %v7942_v37  ;;  %v227_v48 = vpack.c.bf16 %v208_v46, %v207_v45  ;;  %v5926_v45 = vld [vmem:[%s7724_s25 + $0x16e] sm:$0xff]  ;;  %v5927_v46 = vld [vmem:[%s7724_s25 + $0x176] sm:$0xff] }
  0x78   : > { %6959 = vmatprep.subr.bf16.mxu0 %v7947_v38  ;;  %v8037_v49 = vpack.c.bf16 %v5927_v46, %v5926_v45  ;;  %v6035_v24 = vld [vmem:[%s7724_s25 + $0x1d3] sm:$0xff] }
  0x7d   : > { %6608 = vmatmul.mubr.msk.bf16.gmra.mrb[20].mxu1 %vm290_vm0, %v226_v23  ;;  %v5929_v23 = vld [vmem:[%s7724_s25 + $0x18e] sm:$0xff] }
  0x7e   : > { %6898 = vmatmul.mubr.msk.bf16.gmra.mrb[4].mxu0 %vm290_vm0, %v7965_v50  ;;  %6611 = vmatprep.mubr.msk.bf16.mxu1 %vm290_vm0, %v227_v48  ;;  %v5930_v48 = vld [vmem:[%s7724_s25 + $0x19e] sm:$0xff] }
  0x7f   : > { %6901 = vmatprep.mubr.msk.bf16.mxu0 %vm290_vm0, %v7967_v51  ;;  %v3147_v54 = vpack.c.bf16 %v5931_v52, %v5930_v48  ;;  %v5978_v48 = vld [vmem:[%s7724_s25 + $0x18a] sm:$0xff] }
  0x85   : > { %6612 = vmatmul.mubr.msk.bf16.gmra.mrb[24].mxu1 %vm290_vm0, %v228_v62  ;;  %v5958_v62 = vld [vmem:[%s7724_s25 + $0x9a] sm:$0xff] }
  0x86   : > { %6902 = vmatmul.mubr.msk.bf16.gmra.mrb[8].mxu0 %vm290_vm0, %v7983_v63  ;;  %6615 = vmatprep.mubr.msk.bf16.mxu1 %vm290_vm0, %v229_v0  ;;  %v8075_v2 = vpack.c.bf16 %v5958_v62, %v5957_v61 }
  0x87   : > { %6905 = vmatprep.mubr.msk.bf16.mxu0 %vm290_vm0, %v7985_v1 }
  0x8d   : > { %6616 = vmatmul.mubr.msk.bf16.gmra.mrb[28].mxu1 %vm290_vm0, %v230_v12 }
  0x8e   : > { %6906 = vmatmul.mubr.msk.bf16.gmra.mrb[12].mxu0 %vm290_vm0, %v8001_v13  ;;  %6621 = vmatprep.mubr.msk.bf16.mxu1 %vm290_vm0, %v747_v14  ;;  %v5967_v14 = vld [vmem:[%s7724_s25 + $0x10a] sm:$0xff] }
  0x8f   : > { %6909 = vmatprep.mubr.msk.bf16.mxu0 %vm290_vm0, %v8003_v15 }
  0x95   : > { %6622 = vmatmul.mubr.msk.bf16.vlgmr.msra.gmra.mrb[0].mxu1 %vm290_vm0, %v748_v31  ;;  %v5548_v31 = vld [vmem:[%s7724_s25 + $0x52] sm:$0xff] }
  0x96   : > { %6654 = vmatpush3.bf16.msra.mxu1 %v7885_v41  ;;  %6910 = vmatmul.mubr.msk.bf16.gmra.mrb[16].mxu0 %vm290_vm0, %v3142_v32  ;;  %v5928_v41 = vld [vmem:[%s7724_s25 + $0x186] sm:$0xff]  ;;  %v1047_v44 = vpack.c.bf16 %v5548_v31, %v5547_v30  ;;  %v8263_v31 = vpack.c.bf16 %v5611_v20, %v5610_v16  ;;  %v6073_v16 = vld [vmem:[%s7724_s25 + $0x13c] sm:$0xff] }
  0x97   : > { %6625 = vmatprep.mubr.msk.bf16.mxu1 %vm290_vm0, %v749_v36  ;;  %6913 = vmatprep.mubr.msk.bf16.mxu0 %vm290_vm0, %v8019_v39  ;;  %v3146_v53 = vpack.c.bf16 %v5929_v23, %v5928_v41  ;;  %v5972_v36 = vld [vmem:[%s7724_s25 + $0x142] sm:$0xff]  ;;  %v5976_v41 = vld [vmem:[%s7724_s25 + $0x172] sm:$0xff] }
  0x98   : > { %6687 = vmatprep.subr.bf16.mxu1 %v8024_v42  ;;  %v5977_v23 = vld [vmem:[%s7724_s25 + $0x182] sm:$0xff]  ;;  %v6056_v30 = vld [vmem:[%s7724_s25 + $0x6c] sm:$0xff] }
  0x99   : > { %v6074_v20 = vld [vmem:[%s7724_s25 + $0x144] sm:$0xff] }
  0x9d   : > { %6626 = vmatmul.mubr.msk.bf16.gmra.mrb[4].mxu1 %vm290_vm0, %v7925_v19  ;;  %v5932_v19 = vld [vmem:[%s7724_s25 + $0x1b6] sm:$0xff] }
  0x9e   : > { %6914 = vmatmul.mubr.msk.bf16.gmra.mrb[20].mxu0 %vm290_vm0, %v3144_v47  ;;  %6629 = vmatprep.mubr.msk.bf16.mxu1 %vm290_vm0, %v7940_v33  ;;  %v5933_v33 = vld [vmem:[%s7724_s25 + $0x1be] sm:$0xff] }
  0x9f   : > { %6917 = vmatprep.mubr.msk.bf16.mxu0 %vm290_vm0, %v8037_v49  ;;  %v3148_v58 = vpack.c.bf16 %v5933_v33, %v5932_v19  ;;  %v5981_v19 = vld [vmem:[%s7724_s25 + $0x1b2] sm:$0xff]  ;;  %v5982_v33 = vld [vmem:[%s7724_s25 + $0x1ba] sm:$0xff] }
  0xa0   : > { %v3446_v56 = vpack.c.bf16 %v5982_v33, %v5981_v19  ;;  %v5618_v19 = vld [vmem:[%s7724_s25 + $0x13b] sm:$0xff]  ;;  %v5619_v33 = vld [vmem:[%s7724_s25 + $0x143] sm:$0xff] }
  0xa5   : > { %6630 = vmatmul.mubr.msk.bf16.gmra.mrb[8].mxu1 %vm290_vm0, %v7942_v37  ;;  %v5955_v37 = vld [vmem:[%s7724_s25 + $0x7a] sm:$0xff] }
  0xa6   : > { %6918 = vmatmul.mubr.msk.bf16.gmra.mrb[24].mxu0 %vm290_vm0, %v3146_v53  ;;  %6633 = vmatprep.mubr.msk.bf16.mxu1 %vm290_vm0, %v7965_v50  ;;  %v5956_v50 = vld [vmem:[%s7724_s25 + $0x82] sm:$0xff]  ;;  %v3444_v53 = vpack.c.bf16 %v5978_v48, %v5977_v23 }
  0xa7   : > { %6921 = vmatprep.mubr.msk.bf16.mxu0 %vm290_vm0, %v3147_v54  ;;  %v8073_v0 = vpack.c.bf16 %v5956_v50, %v5955_v37  ;;  %v5980_v54 = vld [vmem:[%s7724_s25 + $0x1a2] sm:$0xff]  ;;  %v8167_v50 = vld [vmem:[%s8834_s1 + $0x70] sm:$0xff]  }
  0xa8   : > { %v6060_v23 = vld [vmem:[%s7724_s25 + $0x9c] sm:$0xff] }
  0xad   : > { %6634 = vmatmul.mubr.msk.bf16.gmra.mrb[12].mxu1 %vm290_vm0, %v7967_v51  ;;  %v8080_v51 = vld [vmem:[%s8834_s1 + $0x68] sm:$0xff]  }
  0xae   : > { %6922 = vmatmul.mubr.msk.bf16.gmra.mrb[28].mxu0 %vm290_vm0, %v3148_v58  ;;  %6637 = vmatprep.mubr.msk.bf16.mxu1 %vm290_vm0, %v7983_v63  ;;  %v5959_v63 = vld [vmem:[%s7724_s25 + $0xaa] sm:$0xff] }
  0xaf   : > { %6927 = vmatprep.mubr.msk.bf16.mxu0 %vm290_vm0, %v8060_v60  ;;  %v5983_v58 = vld [vmem:[%s7724_s25 + $0x1ca] sm:$0xff] }
  0xb5   : > { %6638 = vmatmul.mubr.msk.bf16.gmra.mrb[16].mxu1 %vm290_vm0, %v7985_v1  ;;  %v3435_v1 = vpack.c.bf16 %v5960_v3, %v5959_v63  ;;  %v6028_v63 = vld [vmem:[%s7724_s25 + $0x183] sm:$0xff]  ;;  %v6029_v3 = vld [vmem:[%s7724_s25 + $0x18b] sm:$0xff] }
  0xb6   : > { %6928 = vmatmul.mubr.msk.bf16.vlgmr.msra.gmra.mrb[0].mxu0 %vm290_vm0, %v8073_v0  ;;  %6641 = vmatprep.mubr.msk.bf16.mxu1 %vm290_vm0, %v8001_v13  ;;  %v3438_v13 = vpack.c.bf16 %v5966_v11, %v5965_v10  ;;  %v8222_v6 = vpack.c.bf16 %v6029_v3, %v6028_v63  ;;  %v5609_v10 = vld [vmem:[%s7724_s25 + $0xcb] sm:$0xff]  ;;  %v6032_v11 = vld [vmem:[%s7724_s25 + $0x1b3] sm:$0xff] }
  0xb7   : > { %6960 = vmatpush3.bf16.msra.mxu0 %v7947_v38  ;;  %6931 = vmatprep.mubr.msk.bf16.mxu0 %vm290_vm0, %v8075_v2  ;;  %v5963_v38 = vld [vmem:[%s7724_s25 + $0xda] sm:$0xff]  ;;  %v6069_v63 = vld [vmem:[%s7724_s25 + $0x10c] sm:$0xff] }
  0xb8   : > { %6993 = vmatprep.subr.bf16.mxu0 %v8080_v51  ;;  %v3437_v12 = vpack.c.bf16 %v5964_v9, %v5963_v38  ;;  %v6031_v38 = vld [vmem:[%s7724_s25 + $0x1a3] sm:$0xff]  ;;  %v6070_v3 = vld [vmem:[%s7724_s25 + $0x114] sm:$0xff] }
  0xb9   : > { %v5608_v9 = vld [vmem:[%s7724_s25 + $0xc3] sm:$0xff] }
  0xbd   : > { %6642 = vmatmul.mubr.msk.bf16.gmra.mrb[20].mxu1 %vm290_vm0, %v8003_v15  ;;  %v5968_v15 = vld [vmem:[%s7724_s25 + $0x112] sm:$0xff] }
  0xbe   : > { %6932 = vmatmul.mubr.msk.bf16.gmra.mrb[4].mxu0 %vm290_vm0, %v3435_v1  ;;  %6645 = vmatprep.mubr.msk.bf16.mxu1 %vm290_vm0, %v3142_v32  ;;  %v3439_v25 = vpack.c.bf16 %v5968_v15, %v5967_v14  ;;  %v5971_v32 = vld [vmem:[%s7724_s25 + $0x13a] sm:$0xff]  ;;  %v8243_v14 = vpack.c.bf16 %v5609_v10, %v5608_v9 }
  0xbf   : > { %6935 = vmatprep.mubr.msk.bf16.mxu0 %vm290_vm0, %v3436_v8  ;;  %v3441_v45 = vpack.c.bf16 %v5972_v36, %v5971_v32  ;;  %v8265_v32 = vpack.c.bf16 %v6035_v24, %v6034_v21  ;;  %v6075_v21 = vld [vmem:[%s7724_s25 + $0x154] sm:$0xff]  ;;  %v6076_v24 = vld [vmem:[%s7724_s25 + $0x15c] sm:$0xff] }
  0xc5   : > { %6646 = vmatmul.mubr.msk.bf16.gmra.mrb[24].mxu1 %vm290_vm0, %v8019_v39  ;;  %v5973_v39 = vld [vmem:[%s7724_s25 + $0x152] sm:$0xff] }
  0xc6   : > { %6936 = vmatmul.mubr.msk.bf16.gmra.mrb[8].mxu0 %vm290_vm0, %v3437_v12  ;;  %6649 = vmatprep.mubr.msk.bf16.mxu1 %vm290_vm0, %v3144_v47  ;;  %v3442_v46 = vpack.c.bf16 %v5974_v43, %v5973_v39  ;;  %v8130_v47 = vld [vmem:[%s8834_s1 + $0x28] sm:$0xff]  }
  0xc7   : > { %6939 = vmatprep.mubr.msk.bf16.mxu0 %vm290_vm0, %v3438_v13  ;;  %v5614_v43 = vld [vmem:[%s7724_s25 + $0x10b] sm:$0xff] }
  0xcd   : > { %6650 = vmatmul.mubr.msk.bf16.gmra.mrb[28].mxu1 %vm290_vm0, %v8037_v49  ;;  %v5975_v49 = vld [vmem:[%s7724_s25 + $0x16a] sm:$0xff] }
  0xce   : > { %6940 = vmatmul.mubr.msk.bf16.gmra.mrb[12].mxu0 %vm290_vm0, %v3439_v25  ;;  %6655 = vmatprep.mubr.msk.bf16.mxu1 %vm290_vm0, %v1046_v26  ;;  %v3443_v52 = vpack.c.bf16 %v5976_v41, %v5975_v49  ;;  %v5613_v26 = vld [vmem:[%s7724_s25 + $0xfb] sm:$0xff]  ;;  %v5617_v49 = vld [vmem:[%s7724_s25 + $0x12b] sm:$0xff] }
  0xcf   : > { %6943 = vmatprep.mubr.msk.bf16.mxu0 %vm290_vm0, %v3440_v27  ;;  %v6059_v41 = vld [vmem:[%s7724_s25 + $0x94] sm:$0xff] }
  0xd5   : > { %6656 = vmatmul.mubr.msk.bf16.vlgmr.msra.gmra.mrb[0].mxu1 %vm290_vm0, %v1047_v44  ;;  %v5615_v44 = vld [vmem:[%s7724_s25 + $0x113] sm:$0xff] }
  0xd6   : > { %6688 = vmatpush3.bf16.msra.mxu1 %v8024_v42  ;;  %6944 = vmatmul.mubr.msk.bf16.gmra.mrb[16].mxu0 %vm290_vm0, %v3441_v45  ;;  %v5979_v42 = vld [vmem:[%s7724_s25 + $0x19a] sm:$0xff]  ;;  %v8287_v48 = vpack.c.bf16 %v5615_v44, %v5614_v43  ;;  %v6077_v43 = vld [vmem:[%s7724_s25 + $0x16c] sm:$0xff] }
  0xd7   : > { %6659 = vmatprep.mubr.msk.bf16.mxu1 %vm290_vm0, %v8060_v60  ;;  %6947 = vmatprep.mubr.msk.bf16.mxu0 %vm290_vm0, %v3442_v46  ;;  %v3445_v55 = vpack.c.bf16 %v5980_v54, %v5979_v42  ;;  %v5984_v60 = vld [vmem:[%s7724_s25 + $0x1d2] sm:$0xff]  ;;  %v8293_v42 = vpack.c.bf16 %v6060_v23, %v6059_v41  ;;  %v6084_v23 = vld [vmem:[%s7724_s25 + $0x1bc] sm:$0xff] }
  0xd8   : > { %6721 = vmatprep.subr.bf16.mxu1 %v8130_v47  ;;  %v3447_v37 = vpack.c.bf16 %v5984_v60, %v5983_v58  ;;  %v8298_v54 = vld [vmem:[%s8834_s1 + $0x78] sm:$0xff]  }
  0xd9   : > { %v5620_v58 = vld [vmem:[%s7724_s25 + $0x153] sm:$0xff]  ;;  %v5621_v60 = vld [vmem:[%s7724_s25 + $0x15b] sm:$0xff] }
  0xda   : > { %v6078_v44 = vld [vmem:[%s7724_s25 + $0x174] sm:$0xff] }
  0xdb   : > { %v6083_v41 = vld [vmem:[%s7724_s25 + $0x1b4] sm:$0xff] }
  0xdd   : > { %6660 = vmatmul.mubr.msk.bf16.gmra.mrb[4].mxu1 %vm290_vm0, %v8073_v0  ;;  %v8204_v0 = vld [vmem:[%s8834_s1 + $0x30] sm:$0xff]  }
  0xde   : > { %6948 = vmatmul.mubr.msk.bf16.gmra.mrb[20].mxu0 %vm290_vm0, %v3443_v52  ;;  %6663 = vmatprep.mubr.msk.bf16.mxu1 %vm290_vm0, %v8075_v2  ;;  %v5604_v2 = vld [vmem:[%s7724_s25 + $0x93] sm:$0xff] }
  0xdf   : > { %6951 = vmatprep.mubr.msk.bf16.mxu0 %vm290_vm0, %v3444_v53 }
  0xe5   : > { %6664 = vmatmul.mubr.msk.bf16.gmra.mrb[8].mxu1 %vm290_vm0, %v3435_v1  ;;  %v5607_v1 = vld [vmem:[%s7724_s25 + $0xb3] sm:$0xff] }
  0xe6   : > { %6952 = vmatmul.mubr.msk.bf16.gmra.mrb[24].mxu0 %vm290_vm0, %v3445_v55  ;;  %6667 = vmatprep.mubr.msk.bf16.mxu1 %vm290_vm0, %v3436_v8  ;;  %v6030_v8 = vld [vmem:[%s7724_s25 + $0x19b] sm:$0xff] }
  0xe7   : > { %6955 = vmatprep.mubr.msk.bf16.mxu0 %vm290_vm0, %v3446_v56  ;;  %v6062_v56 = vld [vmem:[%s7724_s25 + $0xb4] sm:$0xff] }
  0xed   : > { %6668 = vmatmul.mubr.msk.bf16.gmra.mrb[12].mxu1 %vm290_vm0, %v3437_v12 }
  0xee   : > { %6956 = vmatmul.mubr.msk.bf16.gmra.mrb[28].mxu0 %vm290_vm0, %v3447_v37  ;;  %6671 = vmatprep.mubr.msk.bf16.mxu1 %vm290_vm0, %v3438_v13  ;;  %v8241_v13 = vpack.c.bf16 %v6031_v38, %v6030_v8  ;;  %v6063_v37 = vld [vmem:[%s7724_s25 + $0xc4] sm:$0xff]  ;;  %v6072_v8 = vld [vmem:[%s7724_s25 + $0x12c] sm:$0xff]  ;;  %v4035_v38 = vpack.c.bf16 %v6070_v3, %v6069_v63 }
  0xef   : > { %6961 = vmatprep.mubr.msk.bf16.mxu0 %vm290_vm0, %v7741_v17  ;;  %v5596_v17 = vld [vmem:[%s7724_s25 + $0x33] sm:$0xff] }
  0xf0   : > { %v6117_v3 = vld [vmem:[%s7724_s25 + $0x110] sm:$0xff] }
  0xf5   : > { %6672 = vmatmul.mubr.msk.bf16.gmra.mrb[16].mxu1 %vm290_vm0, %v3439_v25  ;;  %v5612_v25 = vld [vmem:[%s7724_s25 + $0xf3] sm:$0xff] }
  0xf6   : > { %6962 = vmatmul.mubr.msk.bf16.vlgmr.msra.gmra.mrb[0].mxu0 %vm290_vm0, %v7748_v22  ;;  %6675 = vmatprep.mubr.msk.bf16.mxu1 %vm290_vm0, %v3440_v27  ;;  %v5597_v22 = vld [vmem:[%s7724_s25 + $0x3b] sm:$0xff]  ;;  %v6055_v27 = vld [vmem:[%s7724_s25 + $0x64] sm:$0xff]  ;;  %v8267_v36 = vpack.c.bf16 %v5613_v26, %v5612_v25  ;;  %v4037_v26 = vpack.c.bf16 %v6074_v20, %v6073_v16 }
  0xf7   : > { %6994 = vmatpush3.bf16.msra.mxu0 %v8080_v51  ;;  %6965 = vmatprep.mubr.msk.bf16.mxu0 %vm290_vm0, %v7766_v28  ;;  %v1344_v28 = vpack.c.bf16 %v5597_v22, %v5596_v17  ;;  %v5605_v51 = vld [vmem:[%s7724_s25 + $0x9b] sm:$0xff]  ;;  %v8269_v39 = vpack.c.bf16 %v6056_v30, %v6055_v27  ;;  %v6064_v17 = vld [vmem:[%s7724_s25 + $0xcc] sm:$0xff]  ;;  %v8318_v22 = vpack.c.bf16 %v5619_v33, %v5618_v19 }
  0xf8   : > { %7027 = vmatprep.subr.bf16.mxu0 %v8167_v50  ;;  %v8220_v4 = vpack.c.bf16 %v5605_v51, %v5604_v2  ;;  %v4038_v27 = vpack.c.bf16 %v6076_v24, %v6075_v21  ;;  %v8368_v30 = vld [vmem:[%s8834_s1 + $0x38] sm:$0xff]   ;;  %v4042_v33 = vpack.c.bf16 %v6084_v23, %v6083_v41 }
  0xf9   : > { %v6123_v16 = vld [vmem:[%s7724_s25 + $0x158] sm:$0xff] }
  0xfa   : > { %v6128_v23 = vld [vmem:[%s7724_s25 + $0x198] sm:$0xff] }
  0xfd   : > { %6676 = vmatmul.mubr.msk.bf16.gmra.mrb[20].mxu1 %vm290_vm0, %v3441_v45  ;;  %v6057_v45 = vld [vmem:[%s7724_s25 + $0x7c] sm:$0xff] }
  0xfe   : > { %6966 = vmatmul.mubr.msk.bf16.gmra.mrb[4].mxu0 %vm290_vm0, %v7768_v29  ;;  %6679 = vmatprep.mubr.msk.bf16.mxu1 %vm290_vm0, %v3442_v46  ;;  %v5598_v29 = vld [vmem:[%s7724_s25 + $0x4b] sm:$0xff] }
  0xff   : > { %6969 = vmatprep.mubr.msk.bf16.mxu0 %vm290_vm0, %v7781_v34  ;;  %v5599_v34 = vld [vmem:[%s7724_s25 + $0x53] sm:$0xff]  ;;  %v6058_v46 = vld [vmem:[%s7724_s25 + $0x84] sm:$0xff] }
 0x100   : > { %v1345_v61 = vpack.c.bf16 %v5599_v34, %v5598_v29  ;;  %v8324_v29 = vpack.c.bf16 %v6064_v17, %v6063_v37  ;;  %v5622_v34 = vld [vmem:[%s7724_s25 + $0x16b] sm:$0xff] }
 0x101   : > { %v6108_v37 = vld [vmem:[%s7724_s25 + $0xa8] sm:$0xff]  ;;  %v6109_v17 = vld [vmem:[%s7724_s25 + $0xb0] sm:$0xff] }
 0x105   : > { %6680 = vmatmul.mubr.msk.bf16.gmra.mrb[24].mxu1 %vm290_vm0, %v3443_v52  ;;  %v8289_v52 = vpack.c.bf16 %v6058_v46, %v6057_v45  ;;  %v6079_v45 = vld [vmem:[%s7724_s25 + $0x184] sm:$0xff]  ;;  %v6080_v46 = vld [vmem:[%s7724_s25 + $0x18c] sm:$0xff] }
 0x106   : > { %6970 = vmatmul.mubr.msk.bf16.gmra.mrb[8].mxu0 %vm290_vm0, %v7783_v35  ;;  %6683 = vmatprep.mubr.msk.bf16.mxu1 %vm290_vm0, %v3444_v53  ;;  %v5600_v35 = vld [vmem:[%s7724_s25 + $0x63] sm:$0xff] }
 0x107   : > { %6973 = vmatprep.mubr.msk.bf16.mxu0 %vm290_vm0, %v7797_v40  ;;  %v5601_v40 = vld [vmem:[%s7724_s25 + $0x6b] sm:$0xff] }
 0x108   : > { %v1346_v62 = vpack.c.bf16 %v5601_v40, %v5600_v35  ;;  %v5623_v35 = vld [vmem:[%s7724_s25 + $0x173] sm:$0xff]  ;;  %v6065_v40 = vld [vmem:[%s7724_s25 + $0xdc] sm:$0xff] }
 0x10d   : > { %6684 = vmatmul.mubr.msk.bf16.gmra.mrb[28].mxu1 %vm290_vm0, %v3445_v55  ;;  %v6061_v55 = vld [vmem:[%s7724_s25 + $0xac] sm:$0xff] }
 0x10e   : > { %6974 = vmatmul.mubr.msk.bf16.gmra.mrb[12].mxu0 %vm290_vm0, %v7831_v57  ;;  %6689 = vmatprep.mubr.msk.bf16.mxu1 %vm290_vm0, %v1344_v28  ;;  %v5602_v57 = vld [vmem:[%s7724_s25 + $0x7b] sm:$0xff]  ;;  %v8320_v28 = vpack.c.bf16 %v6062_v56, %v6061_v55  ;;  %v6106_v55 = vld [vmem:[%s7724_s25 + $0x90] sm:$0xff] }
 0x10f   : > { %6977 = vmatprep.mubr.msk.bf16.mxu0 %vm290_vm0, %v7833_v59  ;;  %v5603_v59 = vld [vmem:[%s7724_s25 + $0x83] sm:$0xff]  ;;  %v6107_v56 = vld [vmem:[%s7724_s25 + $0x98] sm:$0xff] }
 0x115   : > { %6690 = vmatmul.mubr.msk.bf16.vlgmr.msra.gmra.mrb[0].mxu1 %vm290_vm0, %v1345_v61  ;;  %v6066_v61 = vld [vmem:[%s7724_s25 + $0xe4] sm:$0xff] }
 0x116   : > { %6722 = vmatpush3.bf16.msra.mxu1 %v8130_v47  ;;  %6978 = vmatmul.mubr.msk.bf16.gmra.mrb[16].mxu0 %vm290_vm0, %v7849_v5  ;;  %v1347_v5 = vpack.c.bf16 %v5603_v59, %v5602_v57  ;;  %v5616_v47 = vld [vmem:[%s7724_s25 + $0x123] sm:$0xff]  ;;  %v8340_v59 = vpack.c.bf16 %v5623_v35, %v5622_v34  ;;  %v4033_v2 = vpack.c.bf16 %v6066_v61, %v6065_v40  ;;  %v6112_v61 = vld [vmem:[%s7724_s25 + $0xd8] sm:$0xff] }
 0x117   : > { %6693 = vmatprep.mubr.msk.bf16.mxu1 %vm290_vm0, %v1346_v62  ;;  %6981 = vmatprep.mubr.msk.bf16.mxu0 %vm290_vm0, %v7851_v7  ;;  %v5606_v7 = vld [vmem:[%s7724_s25 + $0xab] sm:$0xff]  ;;  %v8291_v53 = vpack.c.bf16 %v5617_v49, %v5616_v47  ;;  %v6067_v62 = vld [vmem:[%s7724_s25 + $0xf4] sm:$0xff]  ;;  %v6068_v57 = vld [vmem:[%s7724_s25 + $0xfc] sm:$0xff]  ;;  %v4039_v47 = vpack.c.bf16 %v6078_v44, %v6077_v43  ;;  %v4040_v49 = vpack.c.bf16 %v6080_v46, %v6079_v45 }
 0x118   : > { %6755 = vmatprep.subr.bf16.mxu1 %v8204_v0  ;;  %v8239_v12 = vpack.c.bf16 %v5607_v1, %v5606_v7  ;;  %v4034_v51 = vpack.c.bf16 %v6068_v57, %v6067_v62  ;;  %v5648_v7 = vld [vmem:[%s7724_s25 + $0x3c] sm:$0xff]  ;;  %v6071_v1 = vld [vmem:[%s7724_s25 + $0x124] sm:$0xff]  ;;  %v8412_v34 = vpack.c.bf16 %v6109_v17, %v6108_v37  ;;  %v6114_v57 = vld [vmem:[%s7724_s25 + $0xf0] sm:$0xff] }
 0x119   : > { %v4036_v10 = vpack.c.bf16 %v6072_v8, %v6071_v1  ;;  %v8419_v40 = vld [vmem:[%s8834_s1 + $0x80] sm:$0xff]   ;;  %v6125_v43 = vld [vmem:[%s7724_s25 + $0x170] sm:$0xff]  ;;  %v5702_v44 = vld [vmem:[%s7724_s25 + $0x78] sm:$0xff] }
 0x11a   : > { %v6113_v62 = vld [vmem:[%s7724_s25 + $0xe0] sm:$0xff]  ;;  %v6135_v17 = vld [vmem:[%s7724_s25 + $0x1e8] sm:$0xff] }
 0x11b   : > { %v5703_v45 = vld [vmem:[%s7724_s25 + $0x80] sm:$0xff] }
 0x11c   : > { %v6126_v46 = vld [vmem:[%s7724_s25 + $0x180] sm:$0xff] }
 0x11d   : > { %6694 = vmatmul.mubr.msk.bf16.gmra.mrb[4].mxu1 %vm290_vm0, %v1347_v5  ;;  %v5647_v5 = vld [vmem:[%s7724_s25 + $0x34] sm:$0xff]  ;;  %v6134_v37 = vld [vmem:[%s7724_s25 + $0x1e0] sm:$0xff] }
 0x11e   : > { %6982 = vmatmul.mubr.msk.bf16.gmra.mrb[20].mxu0 %vm290_vm0, %v7867_v18  ;;  %6697 = vmatprep.mubr.msk.bf16.mxu1 %vm290_vm0, %v8220_v4  ;;  %v6033_v18 = vld [vmem:[%s7724_s25 + $0x1bb] sm:$0xff]  ;;  %v1642_v9 = vpack.c.bf16 %v5648_v7, %v5647_v5  ;;  %v6119_v7 = vld [vmem:[%s7724_s25 + $0x128] sm:$0xff] }
 0x11f   : > { %6985 = vmatprep.mubr.msk.bf16.mxu0 %vm290_vm0, %v8222_v6  ;;  %v8245_v15 = vpack.c.bf16 %v6033_v18, %v6032_v11  ;;  %v5649_v11 = vld [vmem:[%s7724_s25 + $0x4c] sm:$0xff]  ;;  %v5650_v18 = vld [vmem:[%s7724_s25 + $0x54] sm:$0xff]  ;;  %v6118_v5 = vld [vmem:[%s7724_s25 + $0x120] sm:$0xff] }
 0x120   : > { %v1643_v25 = vpack.c.bf16 %v5650_v18, %v5649_v11  ;;  %v8449_v8 = vpack.c.bf16 %v6119_v7, %v6118_v5  ;;  %v5699_v11 = vld [vmem:[%s7724_s25 + $0x50] sm:$0xff]  ;;  %v5759_v7 = vld [vmem:[%s7724_s25 + $0xc2] sm:$0xff] }
 0x121   : > { %v6122_v18 = vld [vmem:[%s7724_s25 + $0x150] sm:$0xff] }
 0x122   : > { %v4335_v24 = vpack.c.bf16 %v6123_v16, %v6122_v18  ;;  %v5763_v18 = vld [vmem:[%s7724_s25 + $0xf2] sm:$0xff]  ;;  %v6187_v16 = vld [vmem:[%s7724_s25 + $0x1fb] sm:$0xff] }
 0x125   : > { %6698 = vmatmul.mubr.msk.bf16.gmra.mrb[8].mxu1 %vm290_vm0, %v8239_v12 }
 0x126   : > { %6986 = vmatmul.mubr.msk.bf16.gmra.mrb[24].mxu0 %vm290_vm0, %v8241_v13  ;;  %6701 = vmatprep.mubr.msk.bf16.mxu1 %vm290_vm0, %v8243_v14 }
 0x127   : > { %6989 = vmatprep.mubr.msk.bf16.mxu0 %vm290_vm0, %v8245_v15 }
 0x12d   : > { %6702 = vmatmul.mubr.msk.bf16.gmra.mrb[12].mxu1 %vm290_vm0, %v8263_v31 }
 0x12e   : > { %6990 = vmatmul.mubr.msk.bf16.gmra.mrb[28].mxu0 %vm290_vm0, %v8265_v32  ;;  %6705 = vmatprep.mubr.msk.bf16.mxu1 %vm290_vm0, %v8267_v36 }
 0x12f   : > { %6995 = vmatprep.mubr.msk.bf16.mxu0 %vm290_vm0, %v8269_v39 }
 0x135   : > { %6706 = vmatmul.mubr.msk.bf16.gmra.mrb[16].mxu1 %vm290_vm0, %v8287_v48 }
 0x136   : > { %6996 = vmatmul.mubr.msk.bf16.vlgmr.msra.gmra.mrb[0].mxu0 %vm290_vm0, %v8289_v52  ;;  %6709 = vmatprep.mubr.msk.bf16.mxu1 %vm290_vm0, %v8291_v53 }
 0x137   : > { %7028 = vmatpush3.bf16.msra.mxu0 %v8167_v50  ;;  %6999 = vmatprep.mubr.msk.bf16.mxu0 %vm290_vm0, %v8293_v42  ;;  %v8322_v50 = vpack.c.bf16 %v5621_v60, %v5620_v58  ;;  %v8401_v60 = vpack.c.bf16 %v6107_v56, %v6106_v55  ;;  %v6132_v56 = vld [vmem:[%s7724_s25 + $0x1c8] sm:$0xff] }
 0x138   : > { %7061 = vmatprep.subr.bf16.mxu0 %v8298_v54 }
 0x13d   : > { %6710 = vmatmul.mubr.msk.bf16.gmra.mrb[20].mxu1 %vm290_vm0, %v8318_v22 }
 0x13e   : > { %7000 = vmatmul.mubr.msk.bf16.gmra.mrb[4].mxu0 %vm290_vm0, %v8320_v28  ;;  %6713 = vmatprep.mubr.msk.bf16.mxu1 %vm290_vm0, %v8322_v50 }
 0x13f   : > { %7003 = vmatprep.mubr.msk.bf16.mxu0 %vm290_vm0, %v8324_v29 }
 0x145   : > { %6714 = vmatmul.mubr.msk.bf16.gmra.mrb[24].mxu1 %vm290_vm0, %v8340_v59 }
 0x146   : > { %7004 = vmatmul.mubr.msk.bf16.gmra.mrb[8].mxu0 %vm290_vm0, %v4033_v2  ;;  %6717 = vmatprep.mubr.msk.bf16.mxu1 %vm290_vm0, %v8222_v6 }
 0x147   : > { %7007 = vmatprep.mubr.msk.bf16.mxu0 %vm290_vm0, %v4034_v51 }
 0x14d   : > { %6718 = vmatmul.mubr.msk.bf16.gmra.mrb[28].mxu1 %vm290_vm0, %v8241_v13 }
 0x14e   : > { %7008 = vmatmul.mubr.msk.bf16.gmra.mrb[12].mxu0 %vm290_vm0, %v4035_v38  ;;  %6723 = vmatprep.mubr.msk.bf16.mxu1 %vm290_vm0, %v1642_v9  ;;  %v6121_v9 = vld [vmem:[%s7724_s25 + $0x140] sm:$0xff] }
 0x14f   : > { %7011 = vmatprep.mubr.msk.bf16.mxu0 %vm290_vm0, %v4036_v10 }
 0x155   : > { %6724 = vmatmul.mubr.msk.bf16.vlgmr.msra.gmra.mrb[0].mxu1 %vm290_vm0, %v1643_v25  ;;  %v5700_v25 = vld [vmem:[%s7724_s25 + $0x60] sm:$0xff] }
 0x156   : > { %6756 = vmatpush3.bf16.msra.mxu1 %v8204_v0  ;;  %7012 = vmatmul.mubr.msk.bf16.gmra.mrb[16].mxu0 %vm290_vm0, %v4037_v26  ;;  %v6081_v0 = vld [vmem:[%s7724_s25 + $0x19c] sm:$0xff] }
 0x157   : > { %6727 = vmatprep.mubr.msk.bf16.mxu1 %vm290_vm0, %v8269_v39  ;;  %7015 = vmatprep.mubr.msk.bf16.mxu0 %vm290_vm0, %v4038_v27  ;;  %v6082_v39 = vld [vmem:[%s7724_s25 + $0x1a4] sm:$0xff] }
 0x158   : > { %6789 = vmatprep.subr.bf16.mxu1 %v8368_v30  ;;  %v4041_v19 = vpack.c.bf16 %v6082_v39, %v6081_v0  ;;  %v1943_v39 = vpack.c.bf16 %v5703_v45, %v5702_v44  ;;  %v5767_v45 = vld [vmem:[%s7724_s25 + $0x122] sm:$0xff] }
 0x15d   : > { %6728 = vmatmul.mubr.msk.bf16.gmra.mrb[4].mxu1 %vm290_vm0, %v8289_v52  ;;  %v6085_v52 = vld [vmem:[%s7724_s25 + $0x1cc] sm:$0xff] }
 0x15e   : > { %7016 = vmatmul.mubr.msk.bf16.gmra.mrb[20].mxu0 %vm290_vm0, %v4039_v47  ;;  %6731 = vmatprep.mubr.msk.bf16.mxu1 %vm290_vm0, %v8293_v42  ;;  %v6086_v42 = vld [vmem:[%s7724_s25 + $0x1d4] sm:$0xff] }
 0x15f   : > { %7019 = vmatprep.mubr.msk.bf16.mxu0 %vm290_vm0, %v4040_v49  ;;  %v4043_v58 = vpack.c.bf16 %v6086_v42, %v6085_v52  ;;  %v6131_v52 = vld [vmem:[%s7724_s25 + $0x1b8] sm:$0xff]  ;;  %v7669_v42 = vld [vmem:[%s8834_s1 + $0x40] sm:$0xff]  }
 0x165   : > { %6732 = vmatmul.mubr.msk.bf16.gmra.mrb[8].mxu1 %vm290_vm0, %v8320_v28  ;;  %v6110_v28 = vld [vmem:[%s7724_s25 + $0xc0] sm:$0xff] }
 0x166   : > { %7020 = vmatmul.mubr.msk.bf16.gmra.mrb[24].mxu0 %vm290_vm0, %v4041_v19  ;;  %6735 = vmatprep.mubr.msk.bf16.mxu1 %vm290_vm0, %v8324_v29  ;;  %v6111_v29 = vld [vmem:[%s7724_s25 + $0xc8] sm:$0xff] }
 0x167   : > { %7023 = vmatprep.mubr.msk.bf16.mxu0 %vm290_vm0, %v4042_v33  ;;  %v8414_v35 = vpack.c.bf16 %v6111_v29, %v6110_v28  ;;  %v6130_v33 = vld [vmem:[%s7724_s25 + $0x1b0] sm:$0xff]  ;;  %v4341_v29 = vpack.c.bf16 %v6135_v17, %v6134_v37 }
 0x168   : > { %v4339_v55 = vpack.c.bf16 %v6131_v52, %v6130_v33  ;;  %v5773_v37 = vld [vmem:[%s7724_s25 + $0x16a] sm:$0xff]  ;;  %v5774_v17 = vld [vmem:[%s7724_s25 + $0x172] sm:$0xff] }
 0x16d   : > { %6736 = vmatmul.mubr.msk.bf16.gmra.mrb[12].mxu1 %vm290_vm0, %v4033_v2  ;;  %v6115_v2 = vld [vmem:[%s7724_s25 + $0xf8] sm:$0xff] }
 0x16e   : > { %7024 = vmatmul.mubr.msk.bf16.gmra.mrb[28].mxu0 %vm290_vm0, %v4043_v58  ;;  %6739 = vmatprep.mubr.msk.bf16.mxu1 %vm290_vm0, %v4034_v51  ;;  %v8433_v51 = vpack.c.bf16 %v6113_v62, %v6112_v61  ;;  %v8435_v63 = vpack.c.bf16 %v6115_v2, %v6114_v57  ;;  %v6133_v58 = vld [vmem:[%s7724_s25 + $0x1d0] sm:$0xff] }
 0x16f   : > { %7029 = vmatprep.mubr.msk.bf16.mxu0 %vm290_vm0, %v8401_v60  ;;  %v4340_v28 = vpack.c.bf16 %v6133_v58, %v6132_v56  ;;  %v5755_v2 = vld [vmem:[%s7724_s25 + $0x92] sm:$0xff]  ;;  %v6214_v56 = vld [vmem:[%s7724_s25 + $0xde] sm:$0xff]  ;;  %v6215_v58 = vld [vmem:[%s7724_s25 + $0xe6] sm:$0xff] }
 0x175   : > { %6740 = vmatmul.mubr.msk.bf16.gmra.mrb[16].mxu1 %vm290_vm0, %v4035_v38  ;;  %v6120_v38 = vld [vmem:[%s7724_s25 + $0x138] sm:$0xff] }
 0x176   : > { %7030 = vmatmul.mubr.msk.bf16.vlgmr.msra.gmra.mrb[0].mxu0 %vm290_vm0, %v8412_v34  ;;  %6743 = vmatprep.mubr.msk.bf16.mxu1 %vm290_vm0, %v4036_v10  ;;  %v5698_v10 = vld [vmem:[%s7724_s25 + $0x48] sm:$0xff]  ;;  %v4334_v20 = vpack.c.bf16 %v6121_v9, %v6120_v38 }
 0x177   : > { %7062 = vmatpush3.bf16.msra.mxu0 %v8298_v54  ;;  %7033 = vmatprep.mubr.msk.bf16.mxu0 %vm290_vm0, %v8414_v35  ;;  %v6116_v54 = vld [vmem:[%s7724_s25 + $0x108] sm:$0xff]  ;;  %v1941_v21 = vpack.c.bf16 %v5699_v11, %v5698_v10 }
 0x178   : > { %7095 = vmatprep.subr.bf16.mxu0 %v8419_v40  ;;  %v8447_v1 = vpack.c.bf16 %v6117_v3, %v6116_v54  ;;  %v5758_v54 = vld [vmem:[%s7724_s25 + $0xb2] sm:$0xff]  ;;  %v6185_v38 = vld [vmem:[%s7724_s25 + $0x1e3] sm:$0xff] }
 0x179   : > { %v6186_v9 = vld [vmem:[%s7724_s25 + $0x1eb] sm:$0xff] }
 0x17a   : > { %v4639_v11 = vpack.c.bf16 %v6186_v9, %v6185_v38 }
 0x17d   : > { %6744 = vmatmul.mubr.msk.bf16.gmra.mrb[20].mxu1 %vm290_vm0, %v4037_v26  ;;  %v5701_v26 = vld [vmem:[%s7724_s25 + $0x68] sm:$0xff] }
 0x17e   : > { %7034 = vmatmul.mubr.msk.bf16.gmra.mrb[4].mxu0 %vm290_vm0, %v8433_v51  ;;  %6747 = vmatprep.mubr.msk.bf16.mxu1 %vm290_vm0, %v4038_v27  ;;  %v6124_v27 = vld [vmem:[%s7724_s25 + $0x168] sm:$0xff] }
 0x17f   : > { %7037 = vmatprep.mubr.msk.bf16.mxu0 %vm290_vm0, %v8435_v63  ;;  %v4336_v0 = vpack.c.bf16 %v6125_v43, %v6124_v27 }
 0x185   : > { %6748 = vmatmul.mubr.msk.bf16.gmra.mrb[24].mxu1 %vm290_vm0, %v4039_v47  ;;  %v6127_v47 = vld [vmem:[%s7724_s25 + $0x188] sm:$0xff] }
 0x186   : > { %7038 = vmatmul.mubr.msk.bf16.gmra.mrb[8].mxu0 %vm290_vm0, %v8447_v1  ;;  %6751 = vmatprep.mubr.msk.bf16.mxu1 %vm290_vm0, %v4040_v49  ;;  %v1942_v49 = vpack.c.bf16 %v5701_v26, %v5700_v25  ;;  %v4337_v41 = vpack.c.bf16 %v6127_v47, %v6126_v46  ;;  %v6208_v25 = vld [vmem:[%s7724_s25 + $0x96] sm:$0xff]  ;;  %v6209_v26 = vld [vmem:[%s7724_s25 + $0x9e] sm:$0xff]  ;;  %v5768_v46 = vld [vmem:[%s7724_s25 + $0x12a] sm:$0xff] }
 0x187   : > { %7041 = vmatprep.mubr.msk.bf16.mxu0 %vm290_vm0, %v8449_v8  ;;  %v4923_v44 = vpack.c.bf16 %v6209_v26, %v6208_v25  ;;  %v6210_v47 = vld [vmem:[%s7724_s25 + $0xae] sm:$0xff]  ;;  %v6233_v25 = vld [vmem:[%s7724_s25 + $0x1be] sm:$0xff] }
 0x18d   : > { %6752 = vmatmul.mubr.msk.bf16.gmra.mrb[28].mxu1 %vm290_vm0, %v4041_v19  ;;  %v6129_v19 = vld [vmem:[%s7724_s25 + $0x1a0] sm:$0xff] }
 0x18e   : > { %7042 = vmatmul.mubr.msk.bf16.gmra.mrb[12].mxu0 %vm290_vm0, %v4334_v20  ;;  %6757 = vmatprep.mubr.msk.bf16.mxu1 %vm290_vm0, %v1941_v21  ;;  %v5765_v21 = vld [vmem:[%s7724_s25 + $0x10a] sm:$0xff] }
 0x18f   : > { %7045 = vmatprep.mubr.msk.bf16.mxu0 %vm290_vm0, %v4335_v24 }
 0x195   : > { %6758 = vmatmul.mubr.msk.bf16.vlgmr.msra.gmra.mrb[0].mxu1 %vm290_vm0, %v1942_v49  ;;  %v6211_v49 = vld [vmem:[%s7724_s25 + $0xb6] sm:$0xff] }
 0x196   : > { %6790 = vmatpush3.bf16.msra.mxu1 %v8368_v30  ;;  %7046 = vmatmul.mubr.msk.bf16.gmra.mrb[16].mxu0 %vm290_vm0, %v4336_v0  ;;  %v4338_v30 = vpack.c.bf16 %v6129_v19, %v6128_v23  ;;  %v6213_v23 = vld [vmem:[%s7724_s25 + $0xce] sm:$0xff]  ;;  %v2248_v19 = vpack.c.bf16 %v5768_v46, %v5767_v45  ;;  %v4924_v33 = vpack.c.bf16 %v6211_v49, %v6210_v47  ;;  %v5829_v45 = vld [vmem:[%s7724_s25 + $0x1a3] sm:$0xff] }
 0x197   : > { %6761 = vmatprep.mubr.msk.bf16.mxu1 %vm290_vm0, %v1943_v39  ;;  %7049 = vmatprep.mubr.msk.bf16.mxu0 %vm290_vm0, %v4337_v41  ;;  %v5770_v39 = vld [vmem:[%s7724_s25 + $0x142] sm:$0xff]  ;;  %v6237_v47 = vld [vmem:[%s7724_s25 + $0x1ee] sm:$0xff] }
 0x198   : > { %7129 = vmatprep.subr.bf16.mxu1 %v7669_v42  ;;  %v6236_v46 = vld [vmem:[%s7724_s25 + $0x1e6] sm:$0xff] }
 0x19d   : > { %6762 = vmatmul.mubr.msk.bf16.gmra.mrb[4].mxu1 %vm290_vm0, %v8401_v60  ;;  %v6136_v60 = vld [vmem:[%s7724_s25 + $0x1f8] sm:$0xff] }
 0x19e   : > { %7050 = vmatmul.mubr.msk.bf16.gmra.mrb[20].mxu0 %vm290_vm0, %v4338_v30  ;;  %6765 = vmatprep.mubr.msk.bf16.mxu1 %vm290_vm0, %v8412_v34  ;;  %v6137_v34 = vld [vmem:[%s7724_s25 + $0x200] sm:$0xff] }
 0x19f   : > { %7053 = vmatprep.mubr.msk.bf16.mxu0 %vm290_vm0, %v4339_v55  ;;  %v4342_v61 = vpack.c.bf16 %v6137_v34, %v6136_v60  ;;  %v4926_v34 = vpack.c.bf16 %v6215_v58, %v6214_v56 }
 0x1a5   : > { %6766 = vmatmul.mubr.msk.bf16.gmra.mrb[8].mxu1 %vm290_vm0, %v8414_v35  ;;  %v5753_v35 = vld [vmem:[%s7724_s25 + $0x7a] sm:$0xff] }
 0x1a6   : > { %7054 = vmatmul.mubr.msk.bf16.gmra.mrb[24].mxu0 %vm290_vm0, %v4340_v28  ;;  %6769 = vmatprep.mubr.msk.bf16.mxu1 %vm290_vm0, %v8433_v51  ;;  %v5756_v51 = vld [vmem:[%s7724_s25 + $0x9a] sm:$0xff] }
 0x1a7   : > { %7057 = vmatprep.mubr.msk.bf16.mxu0 %vm290_vm0, %v4341_v29  ;;  %v2242_v3 = vpack.c.bf16 %v5756_v51, %v5755_v2  ;;  %v6216_v28 = vld [vmem:[%s7724_s25 + $0xf6] sm:$0xff]  ;;  %v6217_v29 = vld [vmem:[%s7724_s25 + $0xfe] sm:$0xff] }
 0x1ad   : > { %6770 = vmatmul.mubr.msk.bf16.gmra.mrb[12].mxu1 %vm290_vm0, %v8435_v63  ;;  %v5757_v63 = vld [vmem:[%s7724_s25 + $0xaa] sm:$0xff] }
 0x1ae   : > { %7058 = vmatmul.mubr.msk.bf16.gmra.mrb[28].mxu0 %vm290_vm0, %v4342_v61  ;;  %6773 = vmatprep.mubr.msk.bf16.mxu1 %vm290_vm0, %v8447_v1  ;;  %v2243_v5 = vpack.c.bf16 %v5758_v54, %v5757_v63  ;;  %v5760_v1 = vld [vmem:[%s7724_s25 + $0xca] sm:$0xff]  ;;  %v2251_v61 = vpack.c.bf16 %v5774_v17, %v5773_v37 }
 0x1af   : > { %7063 = vmatprep.mubr.msk.bf16.mxu0 %vm290_vm0, %v8220_v4  ;;  %v5749_v4 = vld [vmem:[%s7724_s25 + $0x4a] sm:$0xff]  ;;  %v2244_v10 = vpack.c.bf16 %v5760_v1, %v5759_v7  ;;  %v6222_v7 = vld [vmem:[%s7724_s25 + $0x13e] sm:$0xff] }
 0x1b0   : > { %v6223_v1 = vld [vmem:[%s7724_s25 + $0x146] sm:$0xff] }
 0x1b1   : > { %v4930_v9 = vpack.c.bf16 %v6223_v1, %v6222_v7 }
 0x1b5   : > { %6774 = vmatmul.mubr.msk.bf16.gmra.mrb[16].mxu1 %vm290_vm0, %v8449_v8  ;;  %v5762_v8 = vld [vmem:[%s7724_s25 + $0xe2] sm:$0xff] }
 0x1b6   : > { %7064 = vmatmul.mubr.msk.bf16.vlgmr.msra.gmra.mrb[0].mxu0 %vm290_vm0, %v8239_v12  ;;  %6777 = vmatprep.mubr.msk.bf16.mxu1 %vm290_vm0, %v4334_v20  ;;  %v5750_v12 = vld [vmem:[%s7724_s25 + $0x52] sm:$0xff]  ;;  %v6188_v20 = vld [vmem:[%s7724_s25 + $0x203] sm:$0xff] }
 0x1b7   : > { %7096 = vmatpush3.bf16.msra.mxu0 %v8419_v40  ;;  %7067 = vmatprep.mubr.msk.bf16.mxu0 %vm290_vm0, %v8243_v14  ;;  %v2239_v14 = vpack.c.bf16 %v5750_v12, %v5749_v4  ;;  %v5754_v40 = vld [vmem:[%s7724_s25 + $0x82] sm:$0xff]  ;;  %v4640_v27 = vpack.c.bf16 %v6188_v20, %v6187_v16  ;;  %v4927_v4 = vpack.c.bf16 %v6217_v29, %v6216_v28 }
 0x1b8   : > { %v2241_v57 = vpack.c.bf16 %v5754_v40, %v5753_v35  ;;  %v5775_v12 = vld [vmem:[%s7724_s25 + $0x182] sm:$0xff]  ;;  %v5777_v35 = vld [vmem:[%s7724_s25 + $0x19a] sm:$0xff] }
 0x1b9   : > { %v5778_v40 = vld [vmem:[%s7724_s25 + $0x1a2] sm:$0xff] }
 0x1ba   : > { %v2253_v63 = vpack.c.bf16 %v5778_v40, %v5777_v35 }
 0x1bd   : > { %6778 = vmatmul.mubr.msk.bf16.gmra.mrb[20].mxu1 %vm290_vm0, %v4335_v24  ;;  %v5766_v24 = vld [vmem:[%s7724_s25 + $0x112] sm:$0xff] }
 0x1be   : > { %7068 = vmatmul.mubr.msk.bf16.gmra.mrb[4].mxu0 %vm290_vm0, %v8263_v31  ;;  %6781 = vmatprep.mubr.msk.bf16.mxu1 %vm290_vm0, %v4336_v0  ;;  %v5751_v31 = vld [vmem:[%s7724_s25 + $0x62] sm:$0xff]  ;;  %v2247_v43 = vpack.c.bf16 %v5766_v24, %v5765_v21  ;;  %v5769_v0 = vld [vmem:[%s7724_s25 + $0x13a] sm:$0xff] }
 0x1bf   : > { %7071 = vmatprep.mubr.msk.bf16.mxu0 %vm290_vm0, %v8267_v36  ;;  %v5752_v36 = vld [vmem:[%s7724_s25 + $0x6a] sm:$0xff]  ;;  %v2249_v52 = vpack.c.bf16 %v5770_v39, %v5769_v0  ;;  %v6232_v24 = vld [vmem:[%s7724_s25 + $0x1b6] sm:$0xff]  ;;  %v4937_v39 = vpack.c.bf16 %v6237_v47, %v6236_v46 }
 0x1c0   : > { %v2240_v62 = vpack.c.bf16 %v5752_v36, %v5751_v31  ;;  %v6218_v31 = vld [vmem:[%s7724_s25 + $0x10e] sm:$0xff]  ;;  %v6219_v36 = vld [vmem:[%s7724_s25 + $0x116] sm:$0xff]  ;;  %v6231_v21 = vld [vmem:[%s7724_s25 + $0x1a6] sm:$0xff] }
 0x1c1   : > { %v4928_v51 = vpack.c.bf16 %v6219_v36, %v6218_v31 }
 0x1c5   : > { %6782 = vmatmul.mubr.msk.bf16.gmra.mrb[24].mxu1 %vm290_vm0, %v4337_v41  ;;  %v6212_v41 = vld [vmem:[%s7724_s25 + $0xc6] sm:$0xff] }
 0x1c6   : > { %7072 = vmatmul.mubr.msk.bf16.gmra.mrb[8].mxu0 %vm290_vm0, %v8287_v48  ;;  %6785 = vmatprep.mubr.msk.bf16.mxu1 %vm290_vm0, %v4338_v30  ;;  %v5771_v30 = vld [vmem:[%s7724_s25 + $0x152] sm:$0xff] }
 0x1c7   : > { %7075 = vmatprep.mubr.msk.bf16.mxu0 %vm290_vm0, %v8291_v53 }
 0x1cd   : > { %6786 = vmatmul.mubr.msk.bf16.gmra.mrb[28].mxu1 %vm290_vm0, %v4339_v55  ;;  %v5772_v55 = vld [vmem:[%s7724_s25 + $0x15a] sm:$0xff] }
 0x1ce   : > { %7076 = vmatmul.mubr.msk.bf16.gmra.mrb[12].mxu0 %vm290_vm0, %v8318_v22  ;;  %6791 = vmatprep.mubr.msk.bf16.mxu1 %vm290_vm0, %v2239_v14  ;;  %v2250_v60 = vpack.c.bf16 %v5772_v55, %v5771_v30  ;;  %v5776_v14 = vld [vmem:[%s7724_s25 + $0x18a] sm:$0xff] }
 0x1cf   : > { %7079 = vmatprep.mubr.msk.bf16.mxu0 %vm290_vm0, %v8322_v50  ;;  %v2252_v2 = vpack.c.bf16 %v5776_v14, %v5775_v12 }
 0x1d5   : > { %6792 = vmatmul.mubr.msk.bf16.vlgmr.msra.gmra.mrb[0].mxu1 %vm290_vm0, %v2240_v62  ;;  %v6220_v62 = vld [vmem:[%s7724_s25 + $0x126] sm:$0xff] }
 0x1d6   : > { %7130 = vmatpush3.bf16.msra.mxu1 %v7669_v42  ;;  %7080 = vmatmul.mubr.msk.bf16.gmra.mrb[16].mxu0 %vm290_vm0, %v8340_v59  ;;  %v4925_v42 = vpack.c.bf16 %v6213_v23, %v6212_v41  ;;  %v5831_v41 = vld [vmem:[%s7724_s25 + $0x1bb] sm:$0xff] }
 0x1d7   : > { %6795 = vmatprep.mubr.msk.bf16.mxu1 %vm290_vm0, %v2241_v57  ;;  %7083 = vmatprep.mubr.msk.bf16.mxu0 %vm290_vm0, %v8222_v6  ;;  %v5761_v6 = vld [vmem:[%s7724_s25 + $0xda] sm:$0xff]  ;;  %v6221_v57 = vld [vmem:[%s7724_s25 + $0x12e] sm:$0xff] }
 0x1d8   : > { %v4929_v54 = vpack.c.bf16 %v6221_v57, %v6220_v62  ;;  %v6238_v23 = vld [vmem:[%s7724_s25 + $0x1fe] sm:$0xff] }
 0x1dd   : > { %6796 = vmatmul.mubr.msk.bf16.gmra.mrb[4].mxu1 %vm290_vm0, %v2242_v3  ;;  %v5779_v3 = vld [vmem:[%s7724_s25 + $0x1b2] sm:$0xff] }
 0x1de   : > { %7084 = vmatmul.mubr.msk.bf16.gmra.mrb[20].mxu0 %vm290_vm0, %v8241_v13  ;;  %6799 = vmatprep.mubr.msk.bf16.mxu1 %vm290_vm0, %v2243_v5  ;;  %v2245_v13 = vpack.c.bf16 %v5762_v8, %v5761_v6  ;;  %v5780_v5 = vld [vmem:[%s7724_s25 + $0x1ba] sm:$0xff] }
 0x1df   : > { %7087 = vmatprep.mubr.msk.bf16.mxu0 %vm290_vm0, %v8245_v15  ;;  %v5764_v15 = vld [vmem:[%s7724_s25 + $0xfa] sm:$0xff]  ;;  %v2254_v38 = vpack.c.bf16 %v5780_v5, %v5779_v3 }
 0x1e0   : > { %v6224_v6 = vld [vmem:[%s7724_s25 + $0x156] sm:$0xff]  ;;  %v6225_v8 = vld [vmem:[%s7724_s25 + $0x15e] sm:$0xff] }
 0x1e5   : > { %6800 = vmatmul.mubr.msk.bf16.gmra.mrb[8].mxu1 %vm290_vm0, %v2244_v10  ;;  %v4931_v10 = vpack.c.bf16 %v6225_v8, %v6224_v6 }
 0x1e6   : > { %7088 = vmatmul.mubr.msk.bf16.gmra.mrb[24].mxu0 %vm290_vm0, %v8265_v32  ;;  %6803 = vmatprep.mubr.msk.bf16.mxu1 %vm290_vm0, %v2245_v13  ;;  %v2246_v32 = vpack.c.bf16 %v5764_v15, %v5763_v18  ;;  %v6226_v13 = vld [vmem:[%s7724_s25 + $0x16e] sm:$0xff]  ;;  %v6228_v18 = vld [vmem:[%s7724_s25 + $0x186] sm:$0xff] }
 0x1e7   : > { %7091 = vmatprep.mubr.msk.bf16.mxu0 %vm290_vm0, %v4639_v11  ;;  %v6227_v11 = vld [vmem:[%s7724_s25 + $0x176] sm:$0xff]  ;;  %v6229_v15 = vld [vmem:[%s7724_s25 + $0x18e] sm:$0xff] }
 0x1e8   : > { %v4932_v16 = vpack.c.bf16 %v6227_v11, %v6226_v13  ;;  %v4933_v20 = vpack.c.bf16 %v6229_v15, %v6228_v18 }
 0x1ed   : > { %6804 = vmatmul.mubr.msk.bf16.gmra.mrb[12].mxu1 %vm290_vm0, %v2246_v32  ;;  %v4935_v32 = vpack.c.bf16 %v6233_v25, %v6232_v24 }
 0x1ee   : > { %7092 = vmatmul.mubr.msk.bf16.gmra.mrb[28].mxu0 %vm290_vm0, %v4640_v27  ;;  %6807 = vmatprep.mubr.msk.bf16.mxu1 %vm290_vm0, %v2247_v43  ;;  %v6234_v27 = vld [vmem:[%s7724_s25 + $0x1ce] sm:$0xff]  ;;  %v6235_v43 = vld [vmem:[%s7724_s25 + $0x1d6] sm:$0xff] }
 0x1ef   : > { %7097 = vmatprep.mubr.msk.bf16.mxu0 %vm290_vm0, %v4923_v44  ;;  %v5828_v44 = vld [vmem:[%s7724_s25 + $0x19b] sm:$0xff]  ;;  %v4936_v49 = vpack.c.bf16 %v6235_v43, %v6234_v27 }
 0x1f0   : > { %v2551_v0 = vpack.c.bf16 %v5829_v45, %v5828_v44 }
 0x1f5   : > { %6808 = vmatmul.mubr.msk.bf16.gmra.mrb[16].mxu1 %vm290_vm0, %v2248_v19  ;;  %v6239_v19 = vld [vmem:[%s7724_s25 + $0x206] sm:$0xff] }
 0x1f6   : > { %7098 = vmatmul.mubr.msk.bf16.vlgmr.msra.gmra.mrb[0].mxu0 %vm290_vm0, %v4924_v33  ;;  %6811 = vmatprep.mubr.msk.bf16.mxu1 %vm290_vm0, %v2249_v52  ;;  %v4938_v52 = vpack.c.bf16 %v6239_v19, %v6238_v23 }
 0x1f7   : > { %7101 = vmatprep.mubr.msk.bf16.mxu0 %vm290_vm0, %v4925_v42 }
 0x1fd   : > { %6812 = vmatmul.mubr.msk.bf16.gmra.mrb[20].mxu1 %vm290_vm0, %v2250_v60 }
 0x1fe   : > { %7102 = vmatmul.mubr.msk.bf16.gmra.mrb[4].mxu0 %vm290_vm0, %v4926_v34  ;;  %6815 = vmatprep.mubr.msk.bf16.mxu1 %vm290_vm0, %v2251_v61 }
 0x1ff   : > { %7105 = vmatprep.mubr.msk.bf16.mxu0 %vm290_vm0, %v4927_v4 }
 0x205   : > { %6816 = vmatmul.mubr.msk.bf16.gmra.mrb[24].mxu1 %vm290_vm0, %v2252_v2 }
 0x206   : > { %7106 = vmatmul.mubr.msk.bf16.gmra.mrb[8].mxu0 %vm290_vm0, %v4928_v51  ;;  %6819 = vmatprep.mubr.msk.bf16.mxu1 %vm290_vm0, %v2253_v63 }
 0x207   : > { %7109 = vmatprep.mubr.msk.bf16.mxu0 %vm290_vm0, %v4929_v54 }
 0x20d   : > { %6820 = vmatmul.mubr.msk.bf16.gmra.mrb[28].mxu1 %vm290_vm0, %v2254_v38 }
 0x20e   : > { %7110 = vmatmul.mubr.msk.bf16.gmra.mrb[12].mxu0 %vm290_vm0, %v4930_v9  ;;  %6841 = vmatprep.mubr.msk.bf16.mxu1 %vm290_vm0, %v8287_v48  ;;  %v6230_v48 = vld [vmem:[%s7724_s25 + $0x19e] sm:$0xff] }
 0x20f   : > { %7113 = vmatprep.mubr.msk.bf16.mxu0 %vm290_vm0, %v4931_v10  ;;  %v4934_v26 = vpack.c.bf16 %v6231_v21, %v6230_v48 }
 0x215   : > { %6842 = vmatmul.mubr.msk.bf16.vlgmr.msra.gmra.mrb[16].mxu1 %vm290_vm0, %v8291_v53  ;;  %v5826_v53 = vld [vmem:[%s7724_s25 + $0x183] sm:$0xff] }
 0x216   : > { %7114 = vmatmul.mubr.msk.bf16.gmra.mrb[16].mxu0 %vm290_vm0, %v4932_v16  ;;  %6845 = vmatprep.mubr.msk.bf16.mxu1 %vm290_vm0, %v8318_v22  ;;  %v5827_v22 = vld [vmem:[%s7724_s25 + $0x18b] sm:$0xff] }
 0x217   : > { %7117 = vmatprep.mubr.msk.bf16.mxu0 %vm290_vm0, %v4933_v20 }
 0x21d   : > { %6846 = vmatmul.mubr.msk.bf16.gmra.mrb[20].mxu1 %vm290_vm0, %v8322_v50  ;;  %v2550_v50 = vpack.c.bf16 %v5827_v22, %v5826_v53 }
 0x21e   : > { %7118 = vmatmul.mubr.msk.bf16.gmra.mrb[20].mxu0 %vm290_vm0, %v4934_v26  ;;  %6849 = vmatprep.mubr.msk.bf16.mxu1 %vm290_vm0, %v8340_v59  ;;  %v5830_v59 = vld [vmem:[%s7724_s25 + $0x1b3] sm:$0xff]  ;;  %s6261_s25 = sshll.u32 %s8838_s13, 8 }
 0x21f   : > { %7121 = vmatprep.mubr.msk.bf16.mxu0 %vm290_vm0, %v4935_v32  ;;  %v2552_v33 = vpack.c.bf16 %v5831_v41, %v5830_v59  ;;  %s8688_s5 = scalar_lea.vmem %s8835_s2, %s6261_s25 }
 0x225   : > { %6850 = vmatmul.mubr.msk.bf16.gmra.mrb[24].mxu1 %vm290_vm0, %v2550_v50 }
 0x226   : > { %7122 = vmatmul.mubr.msk.bf16.gmra.mrb[24].mxu0 %vm290_vm0, %v4936_v49  ;;  %6853 = vmatprep.mubr.msk.bf16.mxu1 %vm290_vm0, %v2551_v0 }
 0x227   : > { %7125 = vmatprep.mubr.msk.bf16.mxu0 %vm290_vm0, %v4937_v39 }
 0x22d   : > { %6854 = vmatmul.mubr.msk.bf16.gmra.mrb[28].mxu1 %vm290_vm0, %v2552_v33 }
 0x22e   : > { %7126 = vmatmul.mubr.msk.bf16.gmra.mrb[28].mxu0 %vm290_vm0, %v4938_v52 }
 0x2a8   : > { %v6793_v42 = vpop.f32.mrb[0].mxu1 }
 0x2a9   : > { %v2346_v30 = vpop.f32.mrb[1].mxu1 }
 0x2aa   : > { %v6794_v55 = vpop.f32.mrb[2].mxu1 }
 0x2ab   : > { %v2349_v56 = vpop.f32.mrb[3].mxu1 }
 0x2b0   : > { %v6797_v58 = vpop.f32.mrb[4].mxu1 }
 0x2b1   : > { %v2362_v37 = vpop.f32.mrb[5].mxu1 }
 0x2b2   : > { %v6798_v17 = vpop.f32.mrb[6].mxu1 }
 0x2b3   : > { %v2365_v28 = vpop.f32.mrb[7].mxu1 }
 0x2b8   : > { %v8668_v29 = vpop.f32.mrb[8].mxu1 }
 0x2b9   : > { %v8670_v60 = vpop.f32.mrb[9].mxu1 }
 0x2ba   : > { %v8672_v34 = vpop.f32.mrb[10].mxu1 }
 0x2bb   : > { %v8674_v61 = vpop.f32.mrb[11].mxu1 }
 0x2c0   : > { %v8676_v4 = vpop.f32.mrb[12].mxu1 }
 0x2c1   : > { %v8678_v12 = vpop.f32.mrb[13].mxu1 }
 0x2c2   : > { %v8680_v14 = vpop.f32.mrb[14].mxu1 }
 0x2c3   : > { %v8682_v31 = vpop.f32.mrb[15].mxu1 }
 0x2c9   : > { %v7099_v36 = vpop.f32.mrb[0].mxu0 }
 0x2ca   : > { %v7131_v35 = vadd.f32 %v7099_v36, %v6793_v42  ;;  %v5030_v40 = vpop.f32.mrb[1].mxu0 }
 0x2cb   : > { %v7132_v62 = vadd.f32 %v5030_v40, %v2346_v30  ;;  %v7100_v57 = vpop.f32.mrb[2].mxu0 }
 0x2cc   : > { %5191 = vst.msk [vmem:[%s8688_s5 + $0x10] sm:$0xff] %vm290_vm0, %v7131_v35  ;;  %v7133_v2 = vadd.f32 %v7100_v57, %v6794_v55  ;;  %v5033_v51 = vpop.f32.mrb[3].mxu0  ;;  %v5292_v3 = vmul.f32 %v7131_v35, %v7131_v35  ;;  %v5224_v38 = vsel %vm290_vm0, %v7131_v35, 0.0 }
 0x2cd   : > { %5189 = vst.msk [vmem:[%s8688_s5] sm:$0xff] %vm290_vm0, %v7132_v62  ;;  %v5290_v63 = vmul.f32 %v7132_v62, %v7132_v62  ;;  %v7134_v54 = vadd.f32 %v5033_v51, %v2349_v56  ;;  %v5221_v5 = vsel %vm290_vm0, %v7132_v62, 0.0 }
 0x2ce   : > { %5192 = vst.msk [vmem:[%s8688_s5 + $0x18] sm:$0xff] %vm290_vm0, %v7133_v2  ;;  %v5293_v6 = vmul.f32 %v7133_v2, %v7133_v2  ;;  %v5325_v20 = vsel %vm290_vm0, %v5292_v3, 0.0  ;;  %v5226_v48 = vsel %vm290_vm0, %v7133_v2, 0.0 }
 0x2cf   : > { %5190 = vst.msk [vmem:[%s8688_s5 + $0x8] sm:$0xff] %vm290_vm0, %v7134_v54  ;;  %v5222_v7 = vsel %vm290_vm0, %v7134_v54, 0.0  ;;  %v5291_v1 = vmul.f32 %v7134_v54, %v7134_v54  ;;  %v5322_v9 = vsel %vm290_vm0, %v5290_v63, 0.0 }
 0x2d0   : > { %v5223_v8 = vadd.f32 %v5222_v7, %v5221_v5  ;;  %v5327_v25 = vsel %vm290_vm0, %v5293_v6, 0.0 }
 0x2d1   : > { %v5323_v10 = vsel %vm290_vm0, %v5291_v1, 0.0  ;;  %v7103_v13 = vpop.f32.mrb[4].mxu0 }
 0x2d2   : > { %v5225_v11 = vadd.f32 %v5224_v38, %v5223_v8  ;;  %v5324_v18 = vadd.f32 %v5323_v10, %v5322_v9  ;;  %v7135_v15 = vadd.f32 %v7103_v13, %v6797_v58  ;;  %v5046_v16 = vpop.f32.mrb[5].mxu0 }
 0x2d3   : > { %v7136_v21 = vadd.f32 %v5046_v16, %v2362_v37  ;;  %v7104_v24 = vpop.f32.mrb[6].mxu0 }
 0x2d4   : > { %v5326_v26 = vadd.f32 %v5325_v20, %v5324_v18  ;;  %5195 = vst.msk [vmem:[%s8688_s5 + $0x30] sm:$0xff] %vm290_vm0, %v7135_v15  ;;  %v5227_v32 = vadd.f32 %v5226_v48, %v5225_v11  ;;  %v5049_v53 = vpop.f32.mrb[7].mxu0  ;;  %v7137_v43 = vadd.f32 %v7104_v24, %v6798_v17  ;;  %v5296_v49 = vmul.f32 %v7135_v15, %v7135_v15 }
 0x2d5   : > { %5193 = vst.msk [vmem:[%s8688_s5 + $0x20] sm:$0xff] %vm290_vm0, %v7136_v21  ;;  %v5228_v22 = vsel %vm290_vm0, %v7136_v21, 0.0  ;;  %v5294_v27 = vmul.f32 %v7136_v21, %v7136_v21  ;;  %v7138_v44 = vadd.f32 %v5049_v53, %v2365_v28  ;;  %v5232_v41 = vsel %vm290_vm0, %v7135_v15, 0.0 }
 0x2d6   : > { %v5229_v45 = vadd.f32 %v5228_v22, %v5227_v32  ;;  %v5328_v46 = vadd.f32 %v5327_v25, %v5326_v26  ;;  %5196 = vst.msk [vmem:[%s8688_s5 + $0x38] sm:$0xff] %vm290_vm0, %v7137_v43  ;;  %v5297_v19 = vmul.f32 %v7137_v43, %v7137_v43  ;;  %v5234_v55 = vsel %vm290_vm0, %v7137_v43, 0.0 }
 0x2d7   : > { %v5329_v47 = vsel %vm290_vm0, %v5294_v27, 0.0  ;;  %5194 = vst.msk [vmem:[%s8688_s5 + $0x28] sm:$0xff] %vm290_vm0, %v7138_v44  ;;  %v5230_v50 = vsel %vm290_vm0, %v7138_v44, 0.0  ;;  %v5295_v59 = vmul.f32 %v7138_v44, %v7138_v44  ;;  %v5333_v17 = vsel %vm290_vm0, %v5296_v49, 0.0 }
 0x2d8   : > { %v5330_v0 = vadd.f32 %v5329_v47, %v5328_v46  ;;  %v5231_v39 = vadd.f32 %v5230_v50, %v5229_v45 }
 0x2d9   : > { %v7107_v23 = vpop.f32.mrb[8].mxu0  ;;  %v5331_v52 = vsel %vm290_vm0, %v5295_v59, 0.0 }
 0x2da   : > { %v5233_v33 = vadd.f32 %v5232_v41, %v5231_v39  ;;  %v7139_v42 = vadd.f32 %v7107_v23, %v8668_v29  ;;  %v5062_v30 = vpop.f32.mrb[9].mxu0  ;;  %v5332_v56 = vadd.f32 %v5331_v52, %v5330_v0 }
 0x2db   : > { %v7140_v58 = vadd.f32 %v5062_v30, %v8670_v60  ;;  %v7108_v37 = vpop.f32.mrb[10].mxu0  ;;  %v5335_v60 = vsel %vm290_vm0, %v5297_v19, 0.0 }
 0x2dc   : > { %5199 = vst.msk [vmem:[%s8688_s5 + $0x50] sm:$0xff] %vm290_vm0, %v7139_v42  ;;  %v5235_v28 = vadd.f32 %v5234_v55, %v5233_v33  ;;  %v7141_v36 = vadd.f32 %v7108_v37, %v8672_v34  ;;  %v5065_v35 = vpop.f32.mrb[11].mxu0  ;;  %v5334_v40 = vadd.f32 %v5333_v17, %v5332_v56  ;;  %v5300_v3 = vmul.f32 %v7139_v42, %v7139_v42 }
 0x2dd   : > { %5197 = vst.msk [vmem:[%s8688_s5 + $0x40] sm:$0xff] %vm290_vm0, %v7140_v58  ;;  %v5236_v29 = vsel %vm290_vm0, %v7140_v58, 0.0  ;;  %v5298_v62 = vmul.f32 %v7140_v58, %v7140_v58  ;;  %v7142_v57 = vadd.f32 %v5065_v35, %v8674_v61  ;;  %v5240_v7 = vsel %vm290_vm0, %v7139_v42, 0.0 }
 0x2de   : > { %v5237_v2 = vadd.f32 %v5236_v29, %v5235_v28  ;;  %5200 = vst.msk [vmem:[%s8688_s5 + $0x58] sm:$0xff] %vm290_vm0, %v7141_v36  ;;  %v5336_v51 = vadd.f32 %v5335_v60, %v5334_v40  ;;  %v5301_v8 = vmul.f32 %v7141_v36, %v7141_v36  ;;  %v5242_v13 = vsel %vm290_vm0, %v7141_v36, 0.0 }
 0x2df   : > { %v5337_v63 = vsel %vm290_vm0, %v5298_v62, 0.0  ;;  %5198 = vst.msk [vmem:[%s8688_s5 + $0x48] sm:$0xff] %vm290_vm0, %v7142_v57  ;;  %v5238_v34 = vsel %vm290_vm0, %v7142_v57, 0.0  ;;  %v5299_v54 = vmul.f32 %v7142_v57, %v7142_v57  ;;  %v5341_v16 = vsel %vm290_vm0, %v5300_v3, 0.0 }
 0x2e0   : > { %v5239_v5 = vadd.f32 %v5238_v34, %v5237_v2  ;;  %v5338_v1 = vadd.f32 %v5337_v63, %v5336_v51 }
 0x2e1   : > { %v5339_v61 = vsel %vm290_vm0, %v5299_v54, 0.0  ;;  %v7111_v6 = vpop.f32.mrb[12].mxu0 }
 0x2e2   : > { %v5241_v38 = vadd.f32 %v5240_v7, %v5239_v5  ;;  %v7143_v9 = vadd.f32 %v7111_v6, %v8676_v4  ;;  %v5078_v10 = vpop.f32.mrb[13].mxu0  ;;  %v5340_v11 = vadd.f32 %v5339_v61, %v5338_v1 }
 0x2e3   : > { %v7144_v18 = vadd.f32 %v5078_v10, %v8678_v12  ;;  %v7112_v15 = vpop.f32.mrb[14].mxu0  ;;  %v5343_v12 = vsel %vm290_vm0, %v5301_v8, 0.0 }
 0x2e4   : > { %5203 = vst.msk [vmem:[%s8688_s5 + $0x70] sm:$0xff] %vm290_vm0, %v7143_v9  ;;  %v5243_v20 = vadd.f32 %v5242_v13, %v5241_v38  ;;  %v7145_v48 = vadd.f32 %v7112_v15, %v8680_v14  ;;  %v5081_v21 = vpop.f32.mrb[15].mxu0  ;;  %v5342_v24 = vadd.f32 %v5341_v16, %v5340_v11  ;;  %v5304_v43 = vmul.f32 %v7143_v9, %v7143_v9 }
 0x2e5   : > { %5201 = vst.msk [vmem:[%s8688_s5 + $0x60] sm:$0xff] %vm290_vm0, %v7144_v18  ;;  %v5244_v4 = vsel %vm290_vm0, %v7144_v18, 0.0  ;;  %v5302_v25 = vmul.f32 %v7144_v18, %v7144_v18  ;;  %v7146_v26 = vadd.f32 %v5081_v21, %v8682_v31  ;;  %v5248_v46 = vsel %vm290_vm0, %v7143_v9, 0.0 }
 0x2e6   : > { %v5245_v32 = vadd.f32 %v5244_v4, %v5243_v20  ;;  %5204 = vst.msk [vmem:[%s8688_s5 + $0x78] sm:$0xff] %vm290_vm0, %v7145_v48  ;;  %v5344_v53 = vadd.f32 %v5343_v12, %v5342_v24  ;;  %v5305_v0 = vmul.f32 %v7145_v48, %v7145_v48  ;;  %v5250_v19 = vsel %vm290_vm0, %v7145_v48, 0.0 }
 0x2e7   : > { %v5345_v22 = vsel %vm290_vm0, %v5302_v25, 0.0  ;;  %5202 = vst.msk [vmem:[%s8688_s5 + $0x68] sm:$0xff] %vm290_vm0, %v7146_v26  ;;  %v5246_v14 = vsel %vm290_vm0, %v7146_v26, 0.0  ;;  %v5303_v27 = vmul.f32 %v7146_v26, %v7146_v26  ;;  %v5349_v55 = vsel %vm290_vm0, %v5304_v43, 0.0 }
 0x2e8   : > { %v5247_v44 = vadd.f32 %v5246_v14, %v5245_v32  ;;  %v6843_v45 = vpop.f32.mrb[16].mxu1  ;;  %v5346_v31 = vadd.f32 %v5345_v22, %v5344_v53  ;;  %v5351_v40 = vsel %vm290_vm0, %v5305_v0, 0.0 }
 0x2e9   : > { %v5347_v47 = vsel %vm290_vm0, %v5303_v27, 0.0  ;;  %v7115_v50 = vpop.f32.mrb[16].mxu0  ;;  %v2708_v49 = vpop.f32.mrb[17].mxu1 }
 0x2ea   : > { %v5249_v39 = vadd.f32 %v5248_v46, %v5247_v44  ;;  %v7147_v59 = vadd.f32 %v7115_v50, %v6843_v45  ;;  %v5094_v41 = vpop.f32.mrb[17].mxu0  ;;  %v6844_v23 = vpop.f32.mrb[18].mxu1  ;;  %v5348_v33 = vadd.f32 %v5347_v47, %v5346_v31 }
 0x2eb   : > { %v7148_v52 = vadd.f32 %v5094_v41, %v2708_v49  ;;  %v7116_v42 = vpop.f32.mrb[18].mxu0  ;;  %v2711_v30 = vpop.f32.mrb[19].mxu1 }
 0x2ec   : > { %5207 = vst.msk [vmem:[%s8688_s5 + $0x90] sm:$0xff] %vm290_vm0, %v7147_v59  ;;  %v5251_v56 = vadd.f32 %v5250_v19, %v5249_v39  ;;  %v7149_v58 = vadd.f32 %v7116_v42, %v6844_v23  ;;  %v5097_v37 = vpop.f32.mrb[19].mxu0  ;;  %v5350_v17 = vadd.f32 %v5349_v55, %v5348_v33  ;;  %v5308_v51 = vmul.f32 %v7147_v59, %v7147_v59 }
 0x2ed   : > { %5205 = vst.msk [vmem:[%s8688_s5 + $0x80] sm:$0xff] %vm290_vm0, %v7148_v52  ;;  %v5252_v28 = vsel %vm290_vm0, %v7148_v52, 0.0  ;;  %v5306_v36 = vmul.f32 %v7148_v52, %v7148_v52  ;;  %v7150_v35 = vadd.f32 %v5097_v37, %v2711_v30  ;;  %v5256_v54 = vsel %vm290_vm0, %v7147_v59, 0.0 }
 0x2ee   : > { %v5253_v29 = vadd.f32 %v5252_v28, %v5251_v56  ;;  %5208 = vst.msk [vmem:[%s8688_s5 + $0x98] sm:$0xff] %vm290_vm0, %v7149_v58  ;;  %v5352_v62 = vadd.f32 %v5351_v40, %v5350_v17  ;;  %v5309_v61 = vmul.f32 %v7149_v58, %v7149_v58  ;;  %v5258_v10 = vsel %vm290_vm0, %v7149_v58, 0.0 }
 0x2ef   : > { %v5353_v57 = vsel %vm290_vm0, %v5306_v36, 0.0  ;;  %5206 = vst.msk [vmem:[%s8688_s5 + $0x88] sm:$0xff] %vm290_vm0, %v7150_v35  ;;  %v5254_v60 = vsel %vm290_vm0, %v7150_v35, 0.0  ;;  %v5307_v2 = vmul.f32 %v7150_v35, %v7150_v35  ;;  %v5357_v16 = vsel %vm290_vm0, %v5308_v51, 0.0 }
 0x2f0   : > { %v5255_v63 = vadd.f32 %v5254_v60, %v5253_v29  ;;  %v6847_v34 = vpop.f32.mrb[20].mxu1  ;;  %v5354_v3 = vadd.f32 %v5353_v57, %v5352_v62  ;;  %v5359_v12 = vsel %vm290_vm0, %v5309_v61, 0.0 }
 0x2f1   : > { %v5355_v5 = vsel %vm290_vm0, %v5307_v2, 0.0  ;;  %v7119_v7 = vpop.f32.mrb[20].mxu0  ;;  %v2724_v1 = vpop.f32.mrb[21].mxu1 }
 0x2f2   : > { %v5257_v6 = vadd.f32 %v5256_v54, %v5255_v63  ;;  %v7151_v8 = vadd.f32 %v7119_v7, %v6847_v34  ;;  %v5110_v38 = vpop.f32.mrb[21].mxu0  ;;  %v6848_v9 = vpop.f32.mrb[22].mxu1  ;;  %v5356_v13 = vadd.f32 %v5355_v5, %v5354_v3 }
 0x2f3   : > { %v7152_v11 = vadd.f32 %v5110_v38, %v2724_v1  ;;  %v7120_v18 = vpop.f32.mrb[22].mxu0  ;;  %v2727_v15 = vpop.f32.mrb[23].mxu1 }
 0x2f4   : > { %5211 = vst.msk [vmem:[%s8688_s5 + $0xb0] sm:$0xff] %vm290_vm0, %v7151_v8  ;;  %v5259_v20 = vadd.f32 %v5258_v10, %v5257_v6  ;;  %v7153_v48 = vadd.f32 %v7120_v18, %v6848_v9  ;;  %v5113_v21 = vpop.f32.mrb[23].mxu0  ;;  %v5358_v24 = vadd.f32 %v5357_v16, %v5356_v13  ;;  %v5312_v43 = vmul.f32 %v7151_v8, %v7151_v8 }
 0x2f5   : > { %5209 = vst.msk [vmem:[%s8688_s5 + $0xa0] sm:$0xff] %vm290_vm0, %v7152_v11  ;;  %v5260_v4 = vsel %vm290_vm0, %v7152_v11, 0.0  ;;  %v5310_v25 = vmul.f32 %v7152_v11, %v7152_v11  ;;  %v7154_v26 = vadd.f32 %v5113_v21, %v2727_v15  ;;  %v5264_v46 = vsel %vm290_vm0, %v7151_v8, 0.0 }
 0x2f6   : > { %v5261_v32 = vadd.f32 %v5260_v4, %v5259_v20  ;;  %5212 = vst.msk [vmem:[%s8688_s5 + $0xb8] sm:$0xff] %vm290_vm0, %v7153_v48  ;;  %v5360_v53 = vadd.f32 %v5359_v12, %v5358_v24  ;;  %v5313_v0 = vmul.f32 %v7153_v48, %v7153_v48  ;;  %v5266_v19 = vsel %vm290_vm0, %v7153_v48, 0.0 }
 0x2f7   : > { %v5361_v22 = vsel %vm290_vm0, %v5310_v25, 0.0  ;;  %5210 = vst.msk [vmem:[%s8688_s5 + $0xa8] sm:$0xff] %vm290_vm0, %v7154_v26  ;;  %v5262_v14 = vsel %vm290_vm0, %v7154_v26, 0.0  ;;  %v5311_v27 = vmul.f32 %v7154_v26, %v7154_v26  ;;  %v5365_v55 = vsel %vm290_vm0, %v5312_v43, 0.0 }
 0x2f8   : > { %v5263_v44 = vadd.f32 %v5262_v14, %v5261_v32  ;;  %v6851_v45 = vpop.f32.mrb[24].mxu1  ;;  %v5362_v31 = vadd.f32 %v5361_v22, %v5360_v53  ;;  %v5367_v40 = vsel %vm290_vm0, %v5313_v0, 0.0 }
 0x2f9   : > { %v5363_v47 = vsel %vm290_vm0, %v5311_v27, 0.0  ;;  %v7123_v50 = vpop.f32.mrb[24].mxu0  ;;  %v2740_v49 = vpop.f32.mrb[25].mxu1 }
 0x2fa   : > { %v5265_v39 = vadd.f32 %v5264_v46, %v5263_v44  ;;  %v7155_v59 = vadd.f32 %v7123_v50, %v6851_v45  ;;  %v5126_v41 = vpop.f32.mrb[25].mxu0  ;;  %v6852_v23 = vpop.f32.mrb[26].mxu1  ;;  %v5364_v33 = vadd.f32 %v5363_v47, %v5362_v31 }
 0x2fb   : > { %v7156_v52 = vadd.f32 %v5126_v41, %v2740_v49  ;;  %v7124_v42 = vpop.f32.mrb[26].mxu0  ;;  %v2743_v30 = vpop.f32.mrb[27].mxu1 }
 0x2fc   : > { %5215 = vst.msk [vmem:[%s8688_s5 + $0xd0] sm:$0xff] %vm290_vm0, %v7155_v59  ;;  %v5267_v56 = vadd.f32 %v5266_v19, %v5265_v39  ;;  %v7157_v58 = vadd.f32 %v7124_v42, %v6852_v23  ;;  %v5129_v37 = vpop.f32.mrb[27].mxu0  ;;  %v5366_v17 = vadd.f32 %v5365_v55, %v5364_v33  ;;  %v5316_v51 = vmul.f32 %v7155_v59, %v7155_v59 }
 0x2fd   : > { %5213 = vst.msk [vmem:[%s8688_s5 + $0xc0] sm:$0xff] %vm290_vm0, %v7156_v52  ;;  %v5268_v28 = vsel %vm290_vm0, %v7156_v52, 0.0  ;;  %v5314_v36 = vmul.f32 %v7156_v52, %v7156_v52  ;;  %v7158_v35 = vadd.f32 %v5129_v37, %v2743_v30  ;;  %v5272_v54 = vsel %vm290_vm0, %v7155_v59, 0.0 }
 0x2fe   : > { %v5269_v29 = vadd.f32 %v5268_v28, %v5267_v56  ;;  %5216 = vst.msk [vmem:[%s8688_s5 + $0xd8] sm:$0xff] %vm290_vm0, %v7157_v58  ;;  %v5368_v62 = vadd.f32 %v5367_v40, %v5366_v17  ;;  %v5317_v61 = vmul.f32 %v7157_v58, %v7157_v58  ;;  %v5274_v10 = vsel %vm290_vm0, %v7157_v58, 0.0 }
 0x2ff   : > { %v5369_v57 = vsel %vm290_vm0, %v5314_v36, 0.0  ;;  %5214 = vst.msk [vmem:[%s8688_s5 + $0xc8] sm:$0xff] %vm290_vm0, %v7158_v35  ;;  %v5270_v60 = vsel %vm290_vm0, %v7158_v35, 0.0  ;;  %v5315_v2 = vmul.f32 %v7158_v35, %v7158_v35  ;;  %v5373_v16 = vsel %vm290_vm0, %v5316_v51, 0.0 }
 0x300   : > { %v5271_v63 = vadd.f32 %v5270_v60, %v5269_v29  ;;  %v6855_v34 = vpop.f32.mrb[28].mxu1  ;;  %v5370_v3 = vadd.f32 %v5369_v57, %v5368_v62  ;;  %v5375_v12 = vsel %vm290_vm0, %v5317_v61, 0.0 }
 0x301   : > { %v5371_v5 = vsel %vm290_vm0, %v5315_v2, 0.0  ;;  %v7127_v7 = vpop.f32.mrb[28].mxu0  ;;  %v2756_v1 = vpop.f32.mrb[29].mxu1 }
 0x302   : > { %v5273_v6 = vadd.f32 %v5272_v54, %v5271_v63  ;;  %v7159_v8 = vadd.f32 %v7127_v7, %v6855_v34  ;;  %v5142_v38 = vpop.f32.mrb[29].mxu0  ;;  %v6856_v9 = vpop.f32.mrb[30].mxu1  ;;  %v5372_v13 = vadd.f32 %v5371_v5, %v5370_v3 }
 0x303   : > { %v7160_v11 = vadd.f32 %v5142_v38, %v2756_v1  ;;  %v7128_v18 = vpop.f32.mrb[30].mxu0  ;;  %v2759_v15 = vpop.f32.mrb[31].mxu1 }
 0x304   : > { %5219 = vst.msk [vmem:[%s8688_s5 + $0xf0] sm:$0xff] %vm290_vm0, %v7159_v8  ;;  %v5275_v20 = vadd.f32 %v5274_v10, %v5273_v6  ;;  %v7161_v48 = vadd.f32 %v7128_v18, %v6856_v9  ;;  %v5145_v21 = vpop.f32.mrb[31].mxu0  ;;  %v5374_v24 = vadd.f32 %v5373_v16, %v5372_v13  ;;  %v5320_v43 = vmul.f32 %v7159_v8, %v7159_v8 }
 0x305   : > { %5217 = vst.msk [vmem:[%s8688_s5 + $0xe0] sm:$0xff] %vm290_vm0, %v7160_v11  ;;  %v5276_v4 = vsel %vm290_vm0, %v7160_v11, 0.0  ;;  %v5318_v25 = vmul.f32 %v7160_v11, %v7160_v11  ;;  %v7162_v26 = vadd.f32 %v5145_v21, %v2759_v15  ;;  %v5280_v45 = vsel %vm290_vm0, %v7159_v8, 0.0 }
 0x306   : > { %v5277_v32 = vadd.f32 %v5276_v4, %v5275_v20  ;;  %5220 = vst.msk [vmem:[%s8688_s5 + $0xf8] sm:$0xff] %vm290_vm0, %v7161_v48  ;;  %v5376_v53 = vadd.f32 %v5375_v12, %v5374_v24  ;;  %v5321_v47 = vmul.f32 %v7161_v48, %v7161_v48  ;;  %v5282_v49 = vsel %vm290_vm0, %v7161_v48, 0.0 }
 0x307   : > { %v5377_v22 = vsel %vm290_vm0, %v5318_v25, 0.0  ;;  %5218 = vst.msk [vmem:[%s8688_s5 + $0xe8] sm:$0xff] %vm290_vm0, %v7162_v26  ;;  %v5278_v14 = vsel %vm290_vm0, %v7162_v26, 0.0  ;;  %v5319_v27 = vmul.f32 %v7162_v26, %v7162_v26  ;;  %v5381_v39 = vsel %vm290_vm0, %v5320_v43, 0.0 }
 0x308   : > { %v5279_v44 = vadd.f32 %v5278_v14, %v5277_v32  ;;  %v5378_v46 = vadd.f32 %v5377_v22, %v5376_v53  ;;  %v5383_v23 = vsel %vm290_vm0, %v5321_v47, 0.0 }
 0x309   : > { %v5379_v31 = vsel %vm290_vm0, %v5319_v27, 0.0 }
 0x30a   : > { %v5281_v50 = vadd.f32 %v5280_v45, %v5279_v44  ;;  %v5380_v0 = vadd.f32 %v5379_v31, %v5378_v46 }
 0x30c   : > { %v5283_v59 = vadd.f32 %v5282_v49, %v5281_v50  ;;  %v5382_v41 = vadd.f32 %v5381_v39, %v5380_v0 }
 0x30e   : > { %v5284_v19 = vrot.slane %v5283_v59, 4  ;;  %v5384_v33 = vadd.f32 %v5383_v23, %v5382_v41 }
 0x310   : > { %v5285_v52 = vadd.f32 %v5284_v19, %v5283_v59  ;;  %v5385_v42 = vrot.slane %v5384_v33, 4 }
 0x312   : > { %v5286_v30 = vrot.slane %v5285_v52, 2  ;;  %v5386_v55 = vadd.f32 %v5385_v42, %v5384_v33 }
 0x314   : > { %v5287_v56 = vadd.f32 %v5286_v30, %v5285_v52  ;;  %v5387_v58 = vrot.slane %v5386_v55, 2 }
 0x316   : > { %v5288_v37 = vrot.slane %v5287_v56, 1  ;;  %v5388_v17 = vadd.f32 %v5387_v58, %v5386_v55 }
 0x318   : > { %v5389_v28 = vrot.slane %v5388_v17, 1  ;;  %v5289_v36 = vadd.f32 %v5288_v37, %v5287_v56 }
 0x31a   : > { %v5390_v35 = vadd.f32 %v5389_v28, %v5388_v17 }
 0x31c   : > { %v5392_v40 = vsel %vm5391_vm1, %v5289_v36, %v5390_v35 }
 0x31d   : > { %5394 = vst.msk [vmem:[%s181_s9] sm:$0x3] %vm5393_vm2, %v5392_v40 }
 0x31e PF: > { %s14_s12 = sadd.s32 1, %s7676_s12  }
 0x31f   : > { %p11_p4 = scmp.ge.s32.totalorder %s14_s12, 4  }
 0x321   :  { %13 = sbr.rel (!%p11_p4) target bundleno = 1 (0x1), region = 90 }

// kernel: basic_block_forward.8
= control target key start
LH: loop header
LB: loop body
LE: loop exit
PB: predicated region body
PF: predicated region fallthrough
CT: control target
= control target key end

     0   :  { %s12390_s12 = smov 0   ;;  %s16335_s0 = inlined_call_operand.vmem [shape: bf16[2,22,22,4], index: 0, kind: input, shape index: {}]   ;;  %s16336_s1 = inlined_call_operand.vmem [shape: bf16[17,4,16], index: 1, kind: input, shape index: {}]   ;;  %s16337_s2 = inlined_call_operand.vmem [shape: f32[2,16,16,16], index: 2, kind: output, shape index: {0}]   ;;  %s16338_s3 = inlined_call_operand.vmem [shape: f32[2,2,16], index: 3, kind: output, shape index: {1}]  }
   0x1 LB: > { %s9635_s13 = sadd.s32 4294967295, %s12368_s12   ;;  %p9639_p0 = scmp.ge.s32.totalorder %s12368_s12, 1  ;;  %s12368_s12 = sphi %s12390_s12, %s14_s12  }
   0x2   : > { %p140_p1 = scmp.lt.s32.totalorder %s12368_s12, 3 }
   0x4   : > { %p141_p2 = pnand %p9639_p0, %p140_p1 }
   0x6   : > { %144 = sbr.rel (%p141_p2) target bundleno = 940 (0x3ac), region = 28 }
   0xd   : > { %v9644_v0 = vld [vmem:[%s16336_s1 + $0x2] sm:$0x3]  ;;  %vm798_vm0 = vcmask 1041408   ;;  %v10147_v1 = vld [vmem:[%s16336_s1 + $0x10] sm:$0x3]  ;;  %p168_p3 = scmp.lt.s32.totalorder %s9635_s13, 1 }
   0xe   : > { %12148 = vmatprep.subr.msk.bf16.mxu1 %vm798_vm0, %v9644_v0  ;;  %12156 = vmatprep.subr.msk.bf16.mxu0 %vm798_vm0, %v10147_v1  ;;  %v800_v2 = vsel %vm798_vm0, %v9644_v0, 0  ;;  %v12408_v3 = vsel %vm798_vm0, %v10147_v1, 0  ;;  %v215_v4 = vld [vmem:[%s16336_s1] sm:$0x3]  ;;  %v10212_v5 = vld [vmem:[%s16336_s1 + $0x12] sm:$0x3] }
   0xf   : > { %16411 = vst [vmem:[#allocation2_spill] sm:$0xff] %v12408_v3  ;;  %11057 = vmatpush3.bf16.msra.mxu1 %v800_v2  ;;  %11329 = vmatpush3.bf16.msra.mxu0 %v12408_v3  ;;  %s16599_s13 = smov (!%p168_p3, %s9635_s13), 1  ;;  %vm248_vm1 = vsmask.f32 2304  ;;  %vm249_vm2 = vsmask.f32 6416 }
  0x10   : > { %12149 = vmatprep.subr.msk.bf16.mxu1 %vm798_vm0, %v215_v4  ;;  %12158 = vmatprep.subr.msk.bf16.mxu0 %vm798_vm0, %v10212_v5  ;;  %s12166_s22 = smul.u32 264, %s16599_s13  ;;  %vm749_vm3 = vcmask 31744   ;;  %v12435_v17 = vsel %vm798_vm0, %v215_v4, 0  ;;  %v12438_v18 = vsel %vm798_vm0, %v10212_v5, 0  ;;  %vm12448_vm4 = vmor %vm248_vm1, %vm249_vm2  ;;  %v16412_v33 = vmov 0  ;;  %s9643_s6 = sshll.u32 %s16599_s13, 1 }
  0x11   : > { %v16413_v33 = vsel %vm12448_vm4, 4294967295, %v16412_v33  ;;  %v12463_v56 = vld [vmem:[%s16336_s1 + $0x14] sm:$0x3]  ;;  %vm3041_vm5 = vcmask 1045508   ;;  %vm1319_vm7 = vcmask 1040384   ;;  %vm1320_vm8 = vcmask 1044484   ;;  %s181_s9 = scalar_lea.vmem %s16338_s3, %s9643_s6 }
  0x12   : > { %s12425_s25 = scalar_lea.vmem %s16335_s0, %s12166_s22  ;;  %16414 = vst [vmem:[#allocation3_spill] sm:$0xff] %v16413_v33  ;;  %vm12674_vm6 = vmor %vm798_vm0, %vm3041_vm5  ;;  %vm1825_vm10 = vcmask 1042432   ;;  %vm1826_vm11 = vcmask 1046532   ;;  %vm9342_vm13 = vcmask 130048   ;;  %vm9547_vm14 = vcmask 123904  }
  0x13   : > { %v184_v6 = vld [vmem:[%s12425_s25 + $0x4] sm:$0xf]  ;;  %v216_v7 = vld [vmem:[%s12425_s25] sm:$0xe]  ;;  %v217_v8 = vld [vmem:[%s12425_s25 + $0x8] sm:$0x3] }
  0x14   : > { %v252_v9 = vshrl.u32 %v216_v7, 16  ;;  %v255_v10 = vshll.u32 %v216_v7, 16  ;;  %v261_v11 = vshrl.u32 %v184_v6, 16  ;;  %v264_v12 = vshll.u32 %v184_v6, 16  ;;  %v10034_v13 = vld [vmem:[%s12425_s25 + $0x24] sm:$0xe]  ;;  %vm13026_vm9 = vmor %vm1319_vm7, %vm1320_vm8 }
  0x15   : > { %v271_v14 = vshrl.u32 %v217_v8, 16  ;;  %v274_v15 = vshll.u32 %v217_v8, 16  ;;  %v12432_v16 = vld [vmem:[%s12425_s25 + $0x28] sm:$0xf]  ;;  %v12441_v23 = vld [vmem:[%s12425_s25 + $0x2c] sm:$0x3]  ;;  %vm13502_vm12 = vmor %vm1825_vm10, %vm1826_vm11 }
  0x16   : > { %v254_v19 = vrot.slane %v252_v9, 5  ;;  %v257_v20 = vrot.slane %v255_v10, 6  ;;  %v263_v21 = vrot.slane %v261_v11, 5  ;;  %v266_v22 = vrot.slane %v264_v12, 6  ;;  %v218_v32 = vld [vmem:[%s12425_s25 + $0xc] sm:$0xe] }
  0x17   : > { %v273_v24 = vrot.slane %v271_v14, 5  ;;  %v276_v25 = vrot.slane %v274_v15, 6  ;;  %v4327_v26 = vshrl.u32 %v10034_v13, 16  ;;  %v4330_v27 = vshll.u32 %v10034_v13, 16  ;;  %v186_v45 = vld [vmem:[%s12425_s25 + $0x10] sm:$0xf] }
  0x18   : > { %v258_v28 = vor.u32 %v257_v20, %v254_v19  ;;  %v267_v29 = vor.u32 %v266_v22, %v263_v21  ;;  %v4336_v30 = vshrl.u32 %v12432_v16, 16  ;;  %v4339_v31 = vshll.u32 %v12432_v16, 16  ;;  %v219_v50 = vld [vmem:[%s12425_s25 + $0x14] sm:$0x3]  ;;  %v10037_v61 = vld [vmem:[%s12425_s25 + $0x30] sm:$0xe] }
  0x19   : > { %v277_v34 = vor.u32 %v276_v25, %v273_v24  ;;  %v4329_v35 = vrot.slane %v4327_v26, 5  ;;  %v4332_v36 = vrot.slane %v4330_v27, 6  ;;  %v4346_v37 = vshrl.u32 %v12441_v23, 16  ;;  %v12470_v6 = vld [vmem:[%s12425_s25 + $0x34] sm:$0xf] }
  0x1a   : > { %v259_v38 = vrot.slane %v258_v28, 4  ;;  %v269_v39 = vrot.slane %v267_v29, 4  ;;  %v4338_v40 = vrot.slane %v4336_v30, 5  ;;  %v4341_v41 = vrot.slane %v4339_v31, 6  ;;  %v12479_v11 = vld [vmem:[%s12425_s25 + $0x38] sm:$0x3] }
  0x1b   : > { %v4333_v42 = vor.u32 %v4332_v36, %v4329_v35  ;;  %v4348_v43 = vrot.slane %v4346_v37, 5  ;;  %v4349_v44 = vshll.u32 %v12441_v23, 16  ;;  %v280_v46 = vshrl.u32 %v218_v32, 16  ;;  %v220_v25 = vld [vmem:[%s12425_s25 + $0x18] sm:$0xe] }
  0x1c   : > { %v268_v47 = vsel %vm12448_vm4, %v259_v38, %v267_v29  ;;  %v278_v48 = vsel %vm12448_vm4, %v269_v39, %v277_v34  ;;  %v4342_v49 = vor.u32 %v4341_v41, %v4338_v40  ;;  %v283_v51 = vshll.u32 %v218_v32, 16  ;;  %v188_v35 = vld [vmem:[%s12425_s25 + $0x1c] sm:$0xf]  ;;  %v221_v39 = vld [vmem:[%s12425_s25 + $0x20] sm:$0x3] }
  0x1d   : > { %v9645_v52 = vcombine.low %v268_v47, %v278_v48  ;;  %v4334_v53 = vrot.slane %v4333_v42, 4  ;;  %v4351_v54 = vrot.slane %v4349_v44, 6  ;;  %v282_v55 = vrot.slane %v280_v46, 5  ;;  %v10256_v33 = vld [vmem:[%s12425_s25 + $0x68] sm:$0x7] }
  0x1e   : > { %v4344_v57 = vrot.slane %v4342_v49, 4  ;;  %v285_v58 = vrot.slane %v283_v51, 6  ;;  %v289_v59 = vshrl.u32 %v186_v45, 16  ;;  %v292_v60 = vshll.u32 %v186_v45, 16 }
  0x1f   : > { %11058 = vmatprep.mubr.msk.bf16.mxu1 %vm749_vm3, %v9645_v52  ;;  %v4343_v62 = vsel %vm12448_vm4, %v4334_v53, %v4342_v49  ;;  %v4352_v63 = vor.u32 %v4351_v54, %v4348_v43  ;;  %v299_v0 = vshrl.u32 %v219_v50, 16  ;;  %v302_v1 = vshll.u32 %v219_v50, 16  ;;  %v10040_v49 = vld [vmem:[%s12425_s25 + $0x3c] sm:$0xe] }
  0x20   : > { %v286_v2 = vor.u32 %v285_v58, %v282_v55  ;;  %v291_v4 = vrot.slane %v289_v59, 5  ;;  %v294_v5 = vrot.slane %v292_v60, 6  ;;  %v12474_v7 = vsel %vm798_vm0, %v12463_v56, 0  ;;  %v12500_v59 = vld [vmem:[%s12425_s25 + $0x40] sm:$0xf] }
  0x21   : > { %v4353_v8 = vsel %vm12448_vm4, %v4344_v57, %v4352_v63  ;;  %v301_v9 = vrot.slane %v299_v0, 5  ;;  %v304_v10 = vrot.slane %v302_v1, 6  ;;  %v4355_v12 = vshrl.u32 %v10037_v61, 16  ;;  %v12505_v63 = vld [vmem:[%s12425_s25 + $0x44] sm:$0x3] }
  0x22   : > { %v10148_v13 = vcombine.low %v4343_v62, %v4353_v8  ;;  %v287_v14 = vrot.slane %v286_v2, 4  ;;  %v295_v15 = vor.u32 %v294_v5, %v291_v4  ;;  %v4358_v19 = vshll.u32 %v10037_v61, 16 }
  0x23   : > { %v305_v20 = vor.u32 %v304_v10, %v301_v9  ;;  %v4357_v21 = vrot.slane %v4355_v12, 5  ;;  %v4364_v22 = vshrl.u32 %v12470_v6, 16  ;;  %v4367_v24 = vshll.u32 %v12470_v6, 16  ;;  %v222_v12 = vld [vmem:[%s12425_s25 + $0x24] sm:$0xe] }
  0x24   : > { %11330 = vmatprep.mubr.msk.bf16.mxu0 %vm749_vm3, %v10148_v13  ;;  %v296_v26 = vsel %vm12448_vm4, %v287_v14, %v295_v15  ;;  %v297_v27 = vrot.slane %v295_v15, 4  ;;  %v4360_v28 = vrot.slane %v4358_v19, 6  ;;  %v4374_v29 = vshrl.u32 %v12479_v11, 16 }
  0x25   : > { %v4366_v30 = vrot.slane %v4364_v22, 5  ;;  %v4369_v31 = vrot.slane %v4367_v24, 6  ;;  %v4377_v32 = vshll.u32 %v12479_v11, 16  ;;  %v5128_v34 = vrot.slane %v12479_v11, 6 }
  0x26   : > { %v306_v36 = vsel %vm12448_vm4, %v297_v27, %v305_v20  ;;  %v4361_v37 = vor.u32 %v4360_v28, %v4357_v21  ;;  %v4376_v38 = vrot.slane %v4374_v29, 5  ;;  %v308_v40 = vshrl.u32 %v220_v25, 16  ;;  %v223_v29 = vld [vmem:[%s12425_s25 + $0x2c] sm:$0x3] }
  0x27   : > { %v9646_v41 = vcombine.low %v296_v26, %v306_v36  ;;  %v4370_v42 = vor.u32 %v4369_v31, %v4366_v30  ;;  %v4379_v43 = vrot.slane %v4377_v32, 6  ;;  %v311_v44 = vshll.u32 %v220_v25, 16  ;;  %v190_v25 = vld [vmem:[%s12425_s25 + $0x28] sm:$0xf] }
  0x28   : > { %v4362_v45 = vrot.slane %v4361_v37, 4  ;;  %v310_v46 = vrot.slane %v308_v40, 5  ;;  %v317_v47 = vshrl.u32 %v188_v35, 16  ;;  %v320_v48 = vshll.u32 %v188_v35, 16  ;;  %v10043_v40 = vld [vmem:[%s12425_s25 + $0x48] sm:$0xe] }
  0x29   : > { %11059 = vmatmul.mubr.msk.bf16.vlgmr.msra.gmra.mrb[0].mxu1 %vm749_vm3, %v9646_v41  ;;  %v4372_v50 = vrot.slane %v4370_v42, 4  ;;  %v4380_v51 = vor.u32 %v4379_v43, %v4376_v38  ;;  %v313_v52 = vrot.slane %v311_v44, 6  ;;  %v327_v53 = vshrl.u32 %v221_v39, 16 }
  0x2a   : > { %11091 = vmatpush3.bf16.msra.mxu1 %v12435_v17  ;;  %v4371_v54 = vsel %vm12448_vm4, %v4362_v45, %v4370_v42  ;;  %v319_v55 = vrot.slane %v317_v47, 5  ;;  %v322_v57 = vrot.slane %v320_v48, 6  ;;  %v330_v58 = vshll.u32 %v221_v39, 16  ;;  %v12527_v48 = vld [vmem:[%s12425_s25 + $0x4c] sm:$0xf] }
  0x2b   : > { %v4381_v60 = vsel %vm12448_vm4, %v4372_v50, %v4380_v51  ;;  %v314_v61 = vor.u32 %v313_v52, %v310_v46  ;;  %v329_v62 = vrot.slane %v327_v53, 5  ;;  %v4383_v0 = vshrl.u32 %v10040_v49, 16  ;;  %v12532_v52 = vld [vmem:[%s12425_s25 + $0x50] sm:$0x3] }
  0x2c   : > { %v10149_v1 = vcombine.low %v4371_v54, %v4381_v60  ;;  %v323_v2 = vor.u32 %v322_v57, %v319_v55  ;;  %v332_v17 = vrot.slane %v330_v58, 6  ;;  %v4386_v4 = vshll.u32 %v10040_v49, 16 }
  0x2d   : > { %v315_v5 = vrot.slane %v314_v61, 4  ;;  %v4385_v8 = vrot.slane %v4383_v0, 5  ;;  %v4392_v9 = vshrl.u32 %v12500_v59, 16  ;;  %v4395_v10 = vshll.u32 %v12500_v59, 16 }
  0x2e   : > { %11331 = vmatmul.mubr.msk.bf16.vlgmr.msra.gmra.mrb[0].mxu0 %vm749_vm3, %v10149_v1  ;;  %v325_v13 = vrot.slane %v323_v2, 4  ;;  %v333_v14 = vor.u32 %v332_v17, %v329_v62  ;;  %v4388_v15 = vrot.slane %v4386_v4, 6  ;;  %v4402_v19 = vshrl.u32 %v12505_v63, 16  ;;  %v224_v1 = vld [vmem:[%s12425_s25 + $0x30] sm:$0xe] }
  0x2f   : > { %11363 = vmatpush3.bf16.msra.mxu0 %v12438_v18  ;;  %v324_v20 = vsel %vm12448_vm4, %v315_v5, %v323_v2  ;;  %v4394_v21 = vrot.slane %v4392_v9, 5  ;;  %v4397_v22 = vrot.slane %v4395_v10, 6  ;;  %v4405_v24 = vshll.u32 %v12505_v63, 16 }
  0x30   : > { %v334_v26 = vsel %vm12448_vm4, %v325_v13, %v333_v14  ;;  %v4389_v27 = vor.u32 %v4388_v15, %v4385_v8  ;;  %v4404_v28 = vrot.slane %v4402_v19, 5  ;;  %v336_v30 = vshrl.u32 %v222_v12, 16  ;;  %12159 = vmatprep.subr.msk.bf16.mxu0 %vm798_vm0, %v12463_v56  ;;  %v192_v13 = vld [vmem:[%s12425_s25 + $0x34] sm:$0xf] }
  0x31   : > { %v9647_v18 = vcombine.low %v324_v20, %v334_v26  ;;  %v4398_v31 = vor.u32 %v4397_v22, %v4394_v21  ;;  %v4407_v32 = vrot.slane %v4405_v24, 6  ;;  %v339_v35 = vshll.u32 %v222_v12, 16  ;;  %v225_v20 = vld [vmem:[%s12425_s25 + $0x38] sm:$0x3] }
  0x32   : > { %v4390_v36 = vrot.slane %v4389_v27, 4  ;;  %v338_v37 = vrot.slane %v336_v30, 5  ;;  %v345_v38 = vshrl.u32 %v190_v25, 16  ;;  %v348_v39 = vshll.u32 %v190_v25, 16 }
  0x33   : > { %11062 = vmatprep.mubr.msk.bf16.mxu1 %vm749_vm3, %v9647_v18  ;;  %v4400_v41 = vrot.slane %v4398_v31, 4  ;;  %v4408_v42 = vor.u32 %v4407_v32, %v4404_v28  ;;  %v341_v43 = vrot.slane %v339_v35, 6  ;;  %v355_v44 = vshrl.u32 %v223_v29, 16  ;;  %v10046_v18 = vld [vmem:[%s12425_s25 + $0x54] sm:$0xe] }
  0x34   : > { %v4399_v56 = vsel %vm12448_vm4, %v4390_v36, %v4398_v31  ;;  %v347_v45 = vrot.slane %v345_v38, 5  ;;  %v350_v46 = vrot.slane %v348_v39, 6  ;;  %v358_v47 = vshll.u32 %v223_v29, 16 }
  0x35   : > { %v4409_v49 = vsel %vm12448_vm4, %v4400_v41, %v4408_v42  ;;  %v342_v50 = vor.u32 %v341_v43, %v338_v37  ;;  %v357_v51 = vrot.slane %v355_v44, 5  ;;  %v4411_v53 = vshrl.u32 %v10043_v40, 16  ;;  %v12551_v41 = vld [vmem:[%s12425_s25 + $0x58] sm:$0xf] }
  0x36   : > { %v10150_v54 = vcombine.low %v4399_v56, %v4409_v49  ;;  %v351_v55 = vor.u32 %v350_v46, %v347_v45  ;;  %v360_v57 = vrot.slane %v358_v47, 6  ;;  %v4414_v58 = vshll.u32 %v10043_v40, 16  ;;  %v12556_v56 = vld [vmem:[%s12425_s25 + $0x5c] sm:$0x3] }
  0x37   : > { %v343_v60 = vrot.slane %v342_v50, 4  ;;  %v4413_v61 = vrot.slane %v4411_v53, 5  ;;  %v4420_v62 = vshrl.u32 %v12527_v48, 16  ;;  %v4423_v0 = vshll.u32 %v12527_v48, 16 }
  0x38   : > { %11334 = vmatprep.mubr.msk.bf16.mxu0 %vm749_vm3, %v10150_v54  ;;  %v353_v2 = vrot.slane %v351_v55, 4  ;;  %v361_v17 = vor.u32 %v360_v57, %v357_v51  ;;  %v4416_v4 = vrot.slane %v4414_v58, 6  ;;  %v4430_v5 = vshrl.u32 %v12532_v52, 16  ;;  %v226_v57 = vld [vmem:[%s12425_s25 + $0x3c] sm:$0xe] }
  0x39   : > { %v352_v8 = vsel %vm12448_vm4, %v343_v60, %v351_v55  ;;  %v4422_v9 = vrot.slane %v4420_v62, 5  ;;  %v4425_v10 = vrot.slane %v4423_v0, 6  ;;  %v4433_v12 = vshll.u32 %v12532_v52, 16 }
  0x3a   : > { %v362_v14 = vsel %vm12448_vm4, %v353_v2, %v361_v17  ;;  %v4417_v15 = vor.u32 %v4416_v4, %v4413_v61  ;;  %v4432_v19 = vrot.slane %v4430_v5, 5  ;;  %v364_v21 = vshrl.u32 %v224_v1, 16  ;;  %v12567_v4 = vld [vmem:[%s12425_s25 + $0x40] sm:$0xf] }
  0x3b   : > { %v9648_v22 = vcombine.low %v352_v8, %v362_v14  ;;  %v4426_v24 = vor.u32 %v4425_v10, %v4422_v9  ;;  %v4435_v25 = vrot.slane %v4433_v12, 6  ;;  %v367_v26 = vshll.u32 %v224_v1, 16  ;;  %v227_v10 = vld [vmem:[%s12425_s25 + $0x44] sm:$0x3] }
  0x3c   : > { %v4418_v27 = vrot.slane %v4417_v15, 4  ;;  %v366_v28 = vrot.slane %v364_v21, 5  ;;  %v373_v29 = vshrl.u32 %v192_v13, 16  ;;  %v376_v30 = vshll.u32 %v192_v13, 16 }
  0x3d   : > { %11063 = vmatmul.mubr.msk.bf16.gmra.mrb[4].mxu1 %vm749_vm3, %v9648_v22  ;;  %v4428_v31 = vrot.slane %v4426_v24, 4  ;;  %v4436_v32 = vor.u32 %v4435_v25, %v4432_v19  ;;  %v369_v35 = vrot.slane %v367_v26, 6  ;;  %v383_v36 = vshrl.u32 %v225_v20, 16  ;;  %v10049_v25 = vld [vmem:[%s12425_s25 + $0x60] sm:$0xe] }
  0x3e   : > { %v4427_v37 = vsel %vm12448_vm4, %v4418_v27, %v4426_v24  ;;  %v375_v38 = vrot.slane %v373_v29, 5  ;;  %v378_v39 = vrot.slane %v376_v30, 6  ;;  %v386_v40 = vshll.u32 %v225_v20, 16 }
  0x3f   : > { %v4437_v42 = vsel %vm12448_vm4, %v4428_v31, %v4436_v32  ;;  %v370_v43 = vor.u32 %v369_v35, %v366_v28  ;;  %v385_v44 = vrot.slane %v383_v36, 5  ;;  %v4439_v45 = vshrl.u32 %v10046_v18, 16  ;;  %v12579_v35 = vld [vmem:[%s12425_s25 + $0x64] sm:$0xf] }
  0x40   : > { %v10151_v46 = vcombine.low %v4427_v37, %v4437_v42  ;;  %v379_v47 = vor.u32 %v378_v39, %v375_v38  ;;  %v388_v49 = vrot.slane %v386_v40, 6  ;;  %v4442_v50 = vshll.u32 %v10046_v18, 16  ;;  %v12584_v39 = vld [vmem:[%s12425_s25 + $0x68] sm:$0x3] }
  0x41   : > { %v371_v51 = vrot.slane %v370_v43, 4  ;;  %v4441_v53 = vrot.slane %v4439_v45, 5  ;;  %v4448_v54 = vshrl.u32 %v12551_v41, 16  ;;  %v4451_v55 = vshll.u32 %v12551_v41, 16 }
  0x42   : > { %11335 = vmatmul.mubr.msk.bf16.gmra.mrb[4].mxu0 %vm749_vm3, %v10151_v46  ;;  %v381_v58 = vrot.slane %v379_v47, 4  ;;  %v389_v60 = vor.u32 %v388_v49, %v385_v44  ;;  %v4444_v61 = vrot.slane %v4442_v50, 6  ;;  %v4458_v62 = vshrl.u32 %v12556_v56, 16 }
  0x43   : > { %v380_v0 = vsel %vm12448_vm4, %v371_v51, %v379_v47  ;;  %v4450_v1 = vrot.slane %v4448_v54, 5  ;;  %v4453_v2 = vrot.slane %v4451_v55, 6  ;;  %v4461_v17 = vshll.u32 %v12556_v56, 16  ;;  %v228_v51 = vld [vmem:[%s12425_s25 + $0x48] sm:$0xe] }
  0x44   : > { %v390_v5 = vsel %vm12448_vm4, %v381_v58, %v389_v60  ;;  %v4445_v8 = vor.u32 %v4444_v61, %v4441_v53  ;;  %v4460_v9 = vrot.slane %v4458_v62, 5  ;;  %v392_v12 = vshrl.u32 %v226_v57, 16  ;;  %v12592_v58 = vld [vmem:[%s12425_s25 + $0x4c] sm:$0xf] }
  0x45   : > { %v9649_v13 = vcombine.low %v380_v0, %v390_v5  ;;  %v4454_v14 = vor.u32 %v4453_v2, %v4450_v1  ;;  %v4463_v15 = vrot.slane %v4461_v17, 6  ;;  %v395_v19 = vshll.u32 %v226_v57, 16  ;;  %v12600_v1 = vld [vmem:[%s16336_s1 + $0x4] sm:$0x3] }
  0x46   : > { %v4446_v20 = vrot.slane %v4445_v8, 4  ;;  %v394_v21 = vrot.slane %v392_v12, 5  ;;  %v401_v22 = vshrl.u32 %v12567_v4, 16  ;;  %v404_v24 = vshll.u32 %v12567_v4, 16  ;;  %v229_v8 = vld [vmem:[%s12425_s25 + $0x50] sm:$0x3]  ;;  %12150 = vmatprep.subr.msk.bf16.mxu1 %vm798_vm0, %v12600_v1 }
  0x47   : > { %11066 = vmatprep.mubr.msk.bf16.mxu1 %vm749_vm3, %v9649_v13  ;;  %v4456_v26 = vrot.slane %v4454_v14, 4  ;;  %v4464_v27 = vor.u32 %v4463_v15, %v4460_v9  ;;  %v397_v28 = vrot.slane %v395_v19, 6  ;;  %v411_v29 = vshrl.u32 %v227_v10, 16 }
  0x48   : > { %v4455_v30 = vsel %vm12448_vm4, %v4446_v20, %v4454_v14  ;;  %v403_v18 = vrot.slane %v401_v22, 5  ;;  %v406_v31 = vrot.slane %v404_v24, 6  ;;  %v414_v32 = vshll.u32 %v227_v10, 16  ;;  %v10052_v22 = vld [vmem:[%s12425_s25 + $0x6c] sm:$0xe] }
  0x49   : > { %v4465_v36 = vsel %vm12448_vm4, %v4456_v26, %v4464_v27  ;;  %v398_v37 = vor.u32 %v397_v28, %v394_v21  ;;  %v413_v38 = vrot.slane %v411_v29, 5  ;;  %v4467_v40 = vshrl.u32 %v10049_v25, 16 }
  0x4a   : > { %v10152_v42 = vcombine.low %v4455_v30, %v4465_v36  ;;  %v407_v43 = vor.u32 %v406_v31, %v403_v18  ;;  %v416_v44 = vrot.slane %v414_v32, 6  ;;  %v4470_v45 = vshll.u32 %v10049_v25, 16  ;;  %v12614_v31 = vld [vmem:[%s12425_s25 + $0x70] sm:$0xf] }
  0x4b   : > { %v399_v46 = vrot.slane %v398_v37, 4  ;;  %v4469_v47 = vrot.slane %v4467_v40, 5  ;;  %v4476_v49 = vshrl.u32 %v12579_v35, 16  ;;  %v4479_v50 = vshll.u32 %v12579_v35, 16 }
  0x4c   : > { %11338 = vmatprep.mubr.msk.bf16.mxu0 %vm749_vm3, %v10152_v42  ;;  %v409_v53 = vrot.slane %v407_v43, 4  ;;  %v417_v54 = vor.u32 %v416_v44, %v413_v38  ;;  %v4472_v55 = vrot.slane %v4470_v45, 6  ;;  %v4486_v57 = vshrl.u32 %v12584_v39, 16  ;;  %v12619_v38 = vld [vmem:[%s12425_s25 + $0x74] sm:$0x3] }
  0x4d   : > { %v408_v60 = vsel %vm12448_vm4, %v399_v46, %v407_v43  ;;  %v4478_v61 = vrot.slane %v4476_v49, 5  ;;  %v4481_v62 = vrot.slane %v4479_v50, 6  ;;  %v4489_v0 = vshll.u32 %v12584_v39, 16 }
  0x4e   : > { %v418_v2 = vsel %vm12448_vm4, %v409_v53, %v417_v54  ;;  %v4473_v17 = vor.u32 %v4472_v55, %v4469_v47  ;;  %v4488_v5 = vrot.slane %v4486_v57, 5  ;;  %v420_v9 = vshrl.u32 %v228_v51, 16 }
  0x4f   : > { %v9650_v10 = vcombine.low %v408_v60, %v418_v2  ;;  %v4482_v12 = vor.u32 %v4481_v62, %v4478_v61  ;;  %v4491_v13 = vrot.slane %v4489_v0, 6  ;;  %v423_v14 = vshll.u32 %v228_v51, 16  ;;  %v230_v51 = vld [vmem:[%s12425_s25 + $0x54] sm:$0xe]  ;;  %v12630_v2 = vld [vmem:[%s12425_s25 + $0x58] sm:$0xf] }
  0x50   : > { %v4474_v15 = vrot.slane %v4473_v17, 4  ;;  %v422_v19 = vrot.slane %v420_v9, 5  ;;  %v429_v20 = vshrl.u32 %v12592_v58, 16  ;;  %v432_v21 = vshll.u32 %v12592_v58, 16  ;;  %v231_v9 = vld [vmem:[%s12425_s25 + $0x5c] sm:$0x3] }
  0x51   : > { %11067 = vmatmul.mubr.msk.bf16.gmra.mrb[8].mxu1 %vm749_vm3, %v9650_v10  ;;  %v4484_v24 = vrot.slane %v4482_v12, 4  ;;  %v4492_v25 = vor.u32 %v4491_v13, %v4488_v5  ;;  %v425_v26 = vrot.slane %v423_v14, 6  ;;  %v439_v27 = vshrl.u32 %v229_v8, 16 }
  0x52   : > { %v4483_v28 = vsel %vm12448_vm4, %v4474_v15, %v4482_v12  ;;  %v431_v29 = vrot.slane %v429_v20, 5  ;;  %v434_v30 = vrot.slane %v432_v21, 6  ;;  %v442_v18 = vshll.u32 %v229_v8, 16 }
  0x53   : > { %v4493_v32 = vsel %vm12448_vm4, %v4484_v24, %v4492_v25  ;;  %v426_v36 = vor.u32 %v425_v26, %v422_v19  ;;  %v441_v37 = vrot.slane %v439_v27, 5  ;;  %v4495_v40 = vshrl.u32 %v10052_v22, 16  ;;  %v10055_v24 = vld [vmem:[%s12425_s25 + $0x78] sm:$0xe] }
  0x54   : > { %v10153_v42 = vcombine.low %v4483_v28, %v4493_v32  ;;  %v435_v43 = vor.u32 %v434_v30, %v431_v29  ;;  %v444_v44 = vrot.slane %v442_v18, 6  ;;  %v4498_v45 = vshll.u32 %v10052_v22, 16 }
  0x55   : > { %v427_v46 = vrot.slane %v426_v36, 4  ;;  %v4497_v47 = vrot.slane %v4495_v40, 5  ;;  %v4504_v49 = vshrl.u32 %v12614_v31, 16  ;;  %v4507_v50 = vshll.u32 %v12614_v31, 16  ;;  %v12642_v36 = vld [vmem:[%s12425_s25 + $0x7c] sm:$0xf] }
  0x56   : > { %11339 = vmatmul.mubr.msk.bf16.gmra.mrb[8].mxu0 %vm749_vm3, %v10153_v42  ;;  %v437_v53 = vrot.slane %v435_v43, 4  ;;  %v445_v54 = vor.u32 %v444_v44, %v441_v37  ;;  %v4500_v55 = vrot.slane %v4498_v45, 6  ;;  %v4514_v57 = vshrl.u32 %v12619_v38, 16 }
  0x57   : > { %v436_v60 = vsel %vm12448_vm4, %v427_v46, %v435_v43  ;;  %v4506_v61 = vrot.slane %v4504_v49, 5  ;;  %v4509_v62 = vrot.slane %v4507_v50, 6  ;;  %v4517_v0 = vshll.u32 %v12619_v38, 16  ;;  %v12647_v43 = vld [vmem:[%s12425_s25 + $0x80] sm:$0x3] }
  0x58   : > { %v446_v17 = vsel %vm12448_vm4, %v437_v53, %v445_v54  ;;  %v4501_v5 = vor.u32 %v4500_v55, %v4497_v47  ;;  %v4516_v8 = vrot.slane %v4514_v57, 5  ;;  %v448_v10 = vshrl.u32 %v230_v51, 16  ;;  %v232_v55 = vld [vmem:[%s12425_s25 + $0x60] sm:$0xe] }
  0x59   : > { %v9651_v12 = vcombine.low %v436_v60, %v446_v17  ;;  %v4510_v13 = vor.u32 %v4509_v62, %v4506_v61  ;;  %v4519_v14 = vrot.slane %v4517_v0, 6  ;;  %v451_v15 = vshll.u32 %v230_v51, 16 }
  0x5a   : > { %v4502_v19 = vrot.slane %v4501_v5, 4  ;;  %v450_v20 = vrot.slane %v448_v10, 5  ;;  %v457_v21 = vshrl.u32 %v12630_v2, 16  ;;  %v460_v22 = vshll.u32 %v12630_v2, 16 }
  0x5b   : > { %11070 = vmatprep.mubr.msk.bf16.mxu1 %vm749_vm3, %v9651_v12  ;;  %v4512_v25 = vrot.slane %v4510_v13, 4  ;;  %v4520_v26 = vor.u32 %v4519_v14, %v4516_v8  ;;  %v453_v27 = vrot.slane %v451_v15, 6  ;;  %v467_v28 = vshrl.u32 %v231_v9, 16  ;;  %v233_v14 = vld [vmem:[%s12425_s25 + $0x68] sm:$0x3] }
  0x5c   : > { %v4511_v29 = vsel %vm12448_vm4, %v4502_v19, %v4510_v13  ;;  %v459_v30 = vrot.slane %v457_v21, 5  ;;  %v462_v18 = vrot.slane %v460_v22, 6  ;;  %v470_v32 = vshll.u32 %v231_v9, 16  ;;  %v12658_v9 = vld [vmem:[%s12425_s25 + $0x64] sm:$0xf] }
  0x5d   : > { %v4521_v37 = vsel %vm12448_vm4, %v4512_v25, %v4520_v26  ;;  %v454_v40 = vor.u32 %v453_v27, %v450_v20  ;;  %v469_v42 = vrot.slane %v467_v28, 5  ;;  %v4523_v44 = vshrl.u32 %v10055_v24, 16  ;;  %v10180_v28 = vld [vmem:[%s12425_s25 + $0x24] sm:$0xc] }
  0x5e   : > { %v10154_v45 = vcombine.low %v4511_v29, %v4521_v37  ;;  %v463_v46 = vor.u32 %v462_v18, %v459_v30  ;;  %v472_v47 = vrot.slane %v470_v32, 6  ;;  %v4526_v49 = vshll.u32 %v10055_v24, 16 }
  0x5f   : > { %v455_v50 = vrot.slane %v454_v40, 4  ;;  %v4525_v51 = vrot.slane %v4523_v44, 5  ;;  %v4532_v53 = vshrl.u32 %v12642_v36, 16  ;;  %v4535_v54 = vshll.u32 %v12642_v36, 16 }
  0x60   : > { %11342 = vmatprep.mubr.msk.bf16.mxu0 %vm749_vm3, %v10154_v45  ;;  %v465_v57 = vrot.slane %v463_v46, 4  ;;  %v473_v60 = vor.u32 %v472_v47, %v469_v42  ;;  %v4528_v61 = vrot.slane %v4526_v49, 6  ;;  %v4542_v62 = vshrl.u32 %v12647_v43, 16  ;;  %v234_v45 = vld [vmem:[%s12425_s25 + $0x6c] sm:$0xe] }
  0x61   : > { %v464_v0 = vsel %vm12448_vm4, %v455_v50, %v463_v46  ;;  %v4534_v17 = vrot.slane %v4532_v53, 5  ;;  %v4537_v5 = vrot.slane %v4535_v54, 6  ;;  %v4545_v8 = vshll.u32 %v12647_v43, 16 }
  0x62   : > { %v474_v10 = vsel %vm12448_vm4, %v465_v57, %v473_v60  ;;  %v4529_v12 = vor.u32 %v4528_v61, %v4525_v51  ;;  %v4544_v13 = vrot.slane %v4542_v62, 5  ;;  %v476_v15 = vshrl.u32 %v232_v55, 16  ;;  %v12680_v60 = vld [vmem:[%s12425_s25 + $0x70] sm:$0xf] }
  0x63   : > { %v9652_v19 = vcombine.low %v464_v0, %v474_v10  ;;  %v4538_v20 = vor.u32 %v4537_v5, %v4534_v17  ;;  %v4547_v21 = vrot.slane %v4545_v8, 6  ;;  %v479_v22 = vshll.u32 %v232_v55, 16  ;;  %v235_v0 = vld [vmem:[%s12425_s25 + $0x74] sm:$0x3] }
  0x64   : > { %v4530_v24 = vrot.slane %v4529_v12, 4  ;;  %v478_v25 = vrot.slane %v476_v15, 5  ;;  %v485_v26 = vshrl.u32 %v12658_v9, 16  ;;  %v488_v27 = vshll.u32 %v12658_v9, 16 }
  0x65   : > { %11071 = vmatmul.mubr.msk.bf16.gmra.mrb[12].mxu1 %vm749_vm3, %v9652_v19  ;;  %v4540_v29 = vrot.slane %v4538_v20, 4  ;;  %v4548_v30 = vor.u32 %v4547_v21, %v4544_v13  ;;  %v481_v18 = vrot.slane %v479_v22, 6  ;;  %v495_v32 = vshrl.u32 %v233_v14, 16  ;;  %v10181_v19 = vld [vmem:[%s12425_s25 + $0x30] sm:$0xc] }
  0x66   : > { %v4539_v37 = vsel %vm12448_vm4, %v4530_v24, %v4538_v20  ;;  %v487_v40 = vrot.slane %v485_v26, 5  ;;  %v490_v42 = vrot.slane %v488_v27, 6  ;;  %v498_v44 = vshll.u32 %v233_v14, 16 }
  0x67   : > { %v4549_v46 = vsel %vm12448_vm4, %v4540_v29, %v4548_v30  ;;  %v482_v47 = vor.u32 %v481_v18, %v478_v25  ;;  %v497_v49 = vrot.slane %v495_v32, 5  ;;  %v16415_v50 = vmov 0  ;;  %v236_v25 = vld [vmem:[%s12425_s25 + $0x78] sm:$0xe]  ;;  %v12698_v30 = vld [vmem:[%s12425_s25 + $0x7c] sm:$0xf] }
  0x68   : > { %v16416_v50 = vsel %vm12674_vm6, 4294967295, %v16415_v50  ;;  %v10196_v51 = vrot.slane %v10180_v28, 10  ;;  %v10155_v53 = vcombine.low %v4539_v37, %v4549_v46  ;;  %v491_v54 = vor.u32 %v490_v42, %v487_v40 }
  0x69   : > { %16417 = vst [vmem:[#allocation4_spill] sm:$0xff] %v16416_v50  ;;  %v500_v55 = vrot.slane %v498_v44, 6  ;;  %v5118_v57 = vrot.slane %v12432_v16, 6  ;;  %v483_v61 = vrot.slane %v482_v47, 4  ;;  %v5121_v62 = vrot.slane %v12441_v23, 6 }
  0x6a   : > { %v504_v17 = vshrl.u32 %v234_v45, 16  ;;  %v507_v5 = vshll.u32 %v234_v45, 16  ;;  %11343 = vmatmul.mubr.msk.bf16.gmra.mrb[12].mxu0 %vm749_vm3, %v10155_v53  ;;  %v493_v8 = vrot.slane %v491_v54, 4  ;;  %v513_v23 = vshrl.u32 %v12680_v60, 16  ;;  %v10255_v50 = vld [vmem:[%s12425_s25 + $0x60] sm:$0x8] }
  0x6b   : > { %v501_v10 = vor.u32 %v500_v55, %v497_v49  ;;  %v5119_v12 = vsel %vm12674_vm6, %v10196_v51, %v5118_v57  ;;  %v5120_v13 = vrot.slane %v5118_v57, 4  ;;  %v492_v16 = vsel %vm12448_vm4, %v483_v61, %v491_v54  ;;  %v237_v51 = vld [vmem:[%s12425_s25 + $0x80] sm:$0x3] }
  0x6c   : > { %v506_v14 = vrot.slane %v504_v17, 5  ;;  %v509_v15 = vrot.slane %v507_v5, 6  ;;  %v516_v22 = vshll.u32 %v12680_v60, 16  ;;  %v523_v24 = vshrl.u32 %v235_v0, 16 }
  0x6d   : > { %v502_v20 = vsel %vm12448_vm4, %v493_v8, %v501_v10  ;;  %v5122_v21 = vsel %vm12674_vm6, %v5120_v13, %v5121_v62  ;;  %v515_v29 = vrot.slane %v513_v23, 5  ;;  %v526_v37 = vshll.u32 %v235_v0, 16  ;;  %v10182_v0 = vld [vmem:[%s12425_s25 + $0x3c] sm:$0xc] }
  0x6e   : > { %v9653_v26 = vcombine.low %v492_v16, %v502_v20  ;;  %v10213_v27 = vcombine.low %v5119_v12, %v5122_v21  ;;  %v510_v28 = vor.u32 %v509_v15, %v506_v14  ;;  %v518_v18 = vrot.slane %v516_v22, 6  ;;  %v238_v14 = vld [vmem:[%s12425_s25 + $0x84] sm:$0xe]  ;;  %v12719_v21 = vld [vmem:[%s12425_s25 + $0x88] sm:$0xf] }
  0x6f   : > { %v525_v32 = vrot.slane %v523_v24, 5  ;;  %v10197_v40 = vrot.slane %v10181_v19, 10  ;;  %v5125_v44 = vrot.slane %v12470_v6, 6  ;;  %v532_v45 = vshrl.u32 %v236_v25, 16 }
  0x70   : > { %11074 = vmatprep.mubr.msk.bf16.mxu1 %vm749_vm3, %v9653_v26  ;;  %11364 = vmatprep.mubr.msk.bf16.mxu0 %vm749_vm3, %v10213_v27  ;;  %v511_v42 = vrot.slane %v510_v28, 4  ;;  %v535_v46 = vshll.u32 %v236_v25, 16  ;;  %v519_v47 = vor.u32 %v518_v18, %v515_v29  ;;  %v528_v49 = vrot.slane %v526_v37, 6  ;;  %v239_v29 = vld [vmem:[%s12425_s25 + $0x8c] sm:$0x3] }
  0x71   : > { %v541_v53 = vshrl.u32 %v12698_v30, 16  ;;  %v544_v54 = vshll.u32 %v12698_v30, 16  ;;  %v5126_v55 = vsel %vm12674_vm6, %v10197_v40, %v5125_v44  ;;  %v5127_v57 = vrot.slane %v5125_v44, 4  ;;  %v10183_v44 = vld [vmem:[%s12425_s25 + $0x48] sm:$0xc] }
  0x72   : > { %v534_v61 = vrot.slane %v532_v45, 5  ;;  %v537_v62 = vrot.slane %v535_v46, 6  ;;  %v520_v6 = vsel %vm12448_vm4, %v511_v42, %v519_v47  ;;  %v521_v17 = vrot.slane %v519_v47, 4 }
  0x73   : > { %v529_v5 = vor.u32 %v528_v49, %v525_v32  ;;  %v543_v8 = vrot.slane %v541_v53, 5  ;;  %v5129_v10 = vsel %vm12674_vm6, %v5127_v57, %v5128_v34  ;;  %v546_v13 = vrot.slane %v544_v54, 6  ;;  %v12724_v34 = vld [vmem:[%s16336_s1 + $0x16] sm:$0x3] }
  0x74   : > { %v538_v12 = vor.u32 %v537_v62, %v534_v61  ;;  %v551_v16 = vshrl.u32 %v237_v51, 16  ;;  %v10214_v23 = vcombine.low %v5126_v55, %v5129_v10  ;;  %v554_v19 = vshll.u32 %v237_v51, 16  ;;  %v240_v61 = vld [vmem:[%s12425_s25 + $0x90] sm:$0xe] }
  0x75   : > { %v530_v15 = vsel %vm12448_vm4, %v521_v17, %v529_v5  ;;  %v10198_v20 = vrot.slane %v10182_v0, 10  ;;  %v547_v11 = vor.u32 %v546_v13, %v543_v8  ;;  %v5132_v27 = vrot.slane %v12500_v59, 6  ;;  %v12747_v5 = vld [vmem:[%s12425_s25 + $0x94] sm:$0xf] }
  0x76   : > { %v9654_v22 = vcombine.low %v520_v6, %v530_v15  ;;  %v539_v24 = vrot.slane %v538_v12, 4  ;;  %v553_v25 = vrot.slane %v551_v16, 5  ;;  %11365 = vmatmul.mubr.msk.bf16.vlgmr.msra.gmra.mrb[0].mxu0 %vm749_vm3, %v10214_v23  ;;  %v556_v26 = vrot.slane %v554_v19, 6  ;;  %16418 = vst [vmem:[#allocation5_spill] sm:$0xff] %v12747_v5  ;;  %v241_v15 = vld [vmem:[%s12425_s25 + $0x98] sm:$0x3] }
  0x77   : > { %v5135_v28 = vrot.slane %v12505_v63, 6  ;;  %v560_v18 = vshrl.u32 %v238_v14, 16  ;;  %11397 = vmatpush3.bf16.msra.mxu0 %v12474_v7  ;;  %v549_v37 = vrot.slane %v547_v11, 4  ;;  %v563_v40 = vshll.u32 %v238_v14, 16 }
  0x78   : > { %11075 = vmatmul.mubr.msk.bf16.gmra.mrb[16].mxu1 %vm749_vm3, %v9654_v22  ;;  %v548_v32 = vsel %vm12448_vm4, %v539_v24, %v547_v11  ;;  %v569_v42 = vshrl.u32 %v12719_v21, 16  ;;  %v557_v45 = vor.u32 %v556_v26, %v553_v25  ;;  %v5133_v59 = vsel %vm12674_vm6, %v10198_v20, %v5132_v27  ;;  %12160 = vmatprep.subr.msk.bf16.mxu0 %vm798_vm0, %v12724_v34 }
  0x79   : > { %v5134_v63 = vrot.slane %v5132_v27, 4  ;;  %v562_v46 = vrot.slane %v560_v18, 5  ;;  %v565_v7 = vrot.slane %v563_v40, 6  ;;  %v572_v49 = vshll.u32 %v12719_v21, 16  ;;  %v10184_v27 = vld [vmem:[%s12425_s25 + $0x54] sm:$0xc] }
  0x7a   : > { %v571_v47 = vrot.slane %v569_v42, 5  ;;  %v579_v51 = vshrl.u32 %v239_v29, 16  ;;  %v558_v53 = vsel %vm12448_vm4, %v549_v37, %v557_v45  ;;  %v582_v55 = vshll.u32 %v239_v29, 16  ;;  %v12766_v45 = vld [vmem:[%s12425_s25 + $0xa0] sm:$0xf] }
  0x7b   : > { %v5136_v54 = vsel %vm12674_vm6, %v5134_v63, %v5135_v28  ;;  %v10199_v57 = vrot.slane %v10183_v44, 10  ;;  %v9655_v62 = vcombine.low %v548_v32, %v558_v53  ;;  %v566_v6 = vor.u32 %v565_v7, %v562_v46  ;;  %16419 = vst [vmem:[#allocation6_spill] sm:$0xff] %v12766_v45 }
  0x7c   : > { %v10215_v0 = vcombine.low %v5133_v59, %v5136_v54  ;;  %v574_v17 = vrot.slane %v572_v49, 6  ;;  %v581_v8 = vrot.slane %v579_v51, 5  ;;  %v584_v10 = vrot.slane %v582_v55, 6  ;;  %v242_v59 = vld [vmem:[%s12425_s25 + $0x9c] sm:$0xe] }
  0x7d   : > { %v5139_v12 = vrot.slane %v12527_v48, 6  ;;  %v5142_v13 = vrot.slane %v12532_v52, 6  ;;  %11078 = vmatprep.mubr.msk.bf16.mxu1 %vm749_vm3, %v9655_v62  ;;  %v567_v16 = vrot.slane %v566_v6, 4  ;;  %v588_v23 = vshrl.u32 %v240_v61, 16 }
  0x7e   : > { %11368 = vmatprep.mubr.msk.bf16.mxu0 %vm749_vm3, %v10215_v0  ;;  %v575_v14 = vor.u32 %v574_v17, %v571_v47  ;;  %v591_v19 = vshll.u32 %v240_v61, 16  ;;  %v585_v20 = vor.u32 %v584_v10, %v581_v8  ;;  %v597_v48 = vshrl.u32 %v12747_v5, 16 }
  0x7f   : > { %v5140_v22 = vsel %vm12674_vm6, %v10199_v57, %v5139_v12  ;;  %v5141_v24 = vrot.slane %v5139_v12, 4  ;;  %v590_v25 = vrot.slane %v588_v23, 5  ;;  %v600_v18 = vshll.u32 %v12747_v5, 16  ;;  %v243_v57 = vld [vmem:[%s12425_s25 + $0xa4] sm:$0x3] }
  0x80   : > { %v576_v52 = vsel %vm12448_vm4, %v567_v16, %v575_v14  ;;  %v577_v11 = vrot.slane %v575_v14, 4  ;;  %v593_v26 = vrot.slane %v591_v19, 6  ;;  %v599_v29 = vrot.slane %v597_v48, 5  ;;  %v10185_v16 = vld [vmem:[%s12425_s25 + $0x60] sm:$0xc] }
  0x81   : > { %v5143_v28 = vsel %vm12674_vm6, %v5141_v24, %v5142_v13  ;;  %v607_v32 = vshrl.u32 %v241_v15, 16  ;;  %v610_v44 = vshll.u32 %v241_v15, 16  ;;  %v602_v46 = vrot.slane %v600_v18, 6  ;;  %v10258_v5 = vld [vmem:[%s12425_s25 + $0x74] sm:$0x7] }
  0x82   : > { %v586_v37 = vsel %vm12448_vm4, %v577_v11, %v585_v20  ;;  %v10216_v40 = vcombine.low %v5140_v22, %v5143_v28  ;;  %v594_v42 = vor.u32 %v593_v26, %v590_v25  ;;  %v10200_v47 = vrot.slane %v10184_v27, 10  ;;  %v244_v11 = vld [vmem:[%s12425_s25 + $0xa8] sm:$0xe] }
  0x83   : > { %v9656_v63 = vcombine.low %v576_v52, %v586_v37  ;;  %v609_v7 = vrot.slane %v607_v32, 5  ;;  %v612_v51 = vrot.slane %v610_v44, 6  ;;  %v5146_v53 = vrot.slane %v12551_v41, 6  ;;  %v12786_v52 = vld [vmem:[%s12425_s25 + $0xac] sm:$0xf] }
  0x84   : > { %11369 = vmatmul.mubr.msk.bf16.gmra.mrb[4].mxu0 %vm749_vm3, %v10216_v40  ;;  %v595_v49 = vrot.slane %v594_v42, 4  ;;  %v5149_v54 = vrot.slane %v12556_v56, 6  ;;  %v603_v55 = vor.u32 %v602_v46, %v599_v29  ;;  %v616_v61 = vshrl.u32 %v242_v59, 16  ;;  %v245_v42 = vld [vmem:[%s12425_s25 + $0xb0] sm:$0x3] }
  0x85   : > { %11079 = vmatmul.mubr.msk.bf16.gmra.mrb[20].mxu1 %vm749_vm3, %v9656_v63  ;;  %v619_v62 = vshll.u32 %v242_v59, 16  ;;  %v625_v0 = vshrl.u32 %v12766_v45, 16  ;;  %v613_v6 = vor.u32 %v612_v51, %v609_v7  ;;  %v5147_v17 = vsel %vm12674_vm6, %v10200_v47, %v5146_v53 }
  0x86   : > { %v5148_v8 = vrot.slane %v5146_v53, 4  ;;  %v628_v41 = vshll.u32 %v12766_v45, 16  ;;  %v604_v56 = vsel %vm12448_vm4, %v595_v49, %v603_v55  ;;  %v605_v10 = vrot.slane %v603_v55, 4  ;;  %v10259_v45 = vld [vmem:[%s12425_s25 + $0x78] sm:$0x8] }
  0x87   : > { %v618_v12 = vrot.slane %v616_v61, 5  ;;  %v621_v13 = vrot.slane %v619_v62, 6  ;;  %v627_v15 = vrot.slane %v625_v0, 5  ;;  %v635_v19 = vshrl.u32 %v243_v57, 16  ;;  %v246_v0 = vld [vmem:[%s12425_s25 + $0xb4] sm:$0xe] }
  0x88   : > { %v5150_v14 = vsel %vm12674_vm6, %v5148_v8, %v5149_v54  ;;  %v630_v23 = vrot.slane %v628_v41, 6  ;;  %v614_v20 = vsel %vm12448_vm4, %v605_v10, %v613_v6  ;;  %v638_v48 = vshll.u32 %v243_v57, 16  ;;  %v10186_v54 = vld [vmem:[%s12425_s25 + $0x6c] sm:$0xc] }
  0x89   : > { %v10217_v22 = vcombine.low %v5147_v17, %v5150_v14  ;;  %v622_v24 = vor.u32 %v621_v13, %v618_v12  ;;  %v9657_v25 = vcombine.low %v604_v56, %v614_v20  ;;  %v637_v27 = vrot.slane %v635_v19, 5  ;;  %v247_v19 = vld [vmem:[%s12425_s25 + $0xbc] sm:$0x3] }
  0x8a   : > { %v631_v26 = vor.u32 %v630_v23, %v627_v15  ;;  %v10201_v28 = vrot.slane %v10185_v16, 10  ;;  %v640_v18 = vrot.slane %v638_v48, 6  ;;  %v5153_v32 = vrot.slane %v12579_v35, 6  ;;  %v12808_v16 = vld [vmem:[%s12425_s25 + $0xb8] sm:$0xf] }
  0x8b   : > { %11372 = vmatprep.mubr.msk.bf16.mxu0 %vm749_vm3, %v10217_v22  ;;  %v623_v29 = vrot.slane %v622_v24, 4  ;;  %v5156_v37 = vrot.slane %v12584_v39, 6  ;;  %11082 = vmatprep.mubr.msk.bf16.mxu1 %vm749_vm3, %v9657_v25  ;;  %v644_v44 = vshrl.u32 %v244_v11, 16  ;;  %v647_v59 = vshll.u32 %v244_v11, 16 }
  0x8c   : > { %v633_v40 = vrot.slane %v631_v26, 4  ;;  %v653_v63 = vshrl.u32 %v12786_v52, 16  ;;  %v641_v7 = vor.u32 %v640_v18, %v637_v27  ;;  %v5154_v47 = vsel %vm12674_vm6, %v10201_v28, %v5153_v32 }
  0x8d   : > { %v632_v46 = vsel %vm12448_vm4, %v623_v29, %v631_v26  ;;  %v5155_v35 = vrot.slane %v5153_v32, 4  ;;  %v646_v49 = vrot.slane %v644_v44, 5  ;;  %v649_v51 = vrot.slane %v647_v59, 6  ;;  %v10187_v32 = vld [vmem:[%s12425_s25 + $0x78] sm:$0xc] }
  0x8e   : > { %v655_v39 = vrot.slane %v653_v63, 5  ;;  %v656_v53 = vshll.u32 %v12786_v52, 16  ;;  %v642_v55 = vsel %vm12448_vm4, %v633_v40, %v641_v7  ;;  %v663_v61 = vshrl.u32 %v245_v42, 16  ;;  %v10188_v59 = vld [vmem:[%s12425_s25 + $0x84] sm:$0xc] }
  0x8f   : > { %v5157_v57 = vsel %vm12674_vm6, %v5155_v35, %v5156_v37  ;;  %v666_v62 = vshll.u32 %v245_v42, 16  ;;  %v9658_v6 = vcombine.low %v632_v46, %v642_v55  ;;  %v650_v8 = vor.u32 %v649_v51, %v646_v49  ;;  %v12827_v35 = vld [vmem:[%s12425_s25 + $0x88] sm:$0xf] }
  0x90   : > { %v10218_v17 = vcombine.low %v5154_v47, %v5157_v57  ;;  %v658_v41 = vrot.slane %v656_v53, 6  ;;  %v665_v56 = vrot.slane %v663_v61, 5  ;;  %v10202_v12 = vrot.slane %v10186_v54, 10  ;;  %v10139_v54 = vld [vmem:[%s12425_s25 + $0x8c] sm:$0x3] }
  0x91   : > { %v668_v10 = vrot.slane %v666_v62, 6  ;;  %v5160_v13 = vrot.slane %v12614_v31, 6  ;;  %11083 = vmatmul.mubr.msk.bf16.gmra.mrb[24].mxu1 %vm749_vm3, %v9658_v6  ;;  %v651_v14 = vrot.slane %v650_v8, 4  ;;  %v5163_v23 = vrot.slane %v12619_v38, 6  ;;  %v183_v61 = vld [vmem:[%s12425_s25] sm:$0xf] }
  0x92   : > { %11373 = vmatmul.mubr.msk.bf16.gmra.mrb[8].mxu0 %vm749_vm3, %v10218_v17  ;;  %v659_v15 = vor.u32 %v658_v41, %v655_v39  ;;  %v672_v20 = vshrl.u32 %v246_v0, 16  ;;  %v675_v31 = vshll.u32 %v246_v0, 16  ;;  %v681_v27 = vshrl.u32 %v12808_v16, 16  ;;  %v12842_v41 = vld [vmem:[%s12425_s25 + $0x94] sm:$0xf] }
  0x93   : > { %v669_v22 = vor.u32 %v668_v10, %v665_v56  ;;  %v5161_v24 = vsel %vm12674_vm6, %v10202_v12, %v5160_v13  ;;  %v5162_v48 = vrot.slane %v5160_v13, 4  ;;  %v684_v29 = vshll.u32 %v12808_v16, 16  ;;  %v10140_v13 = vld [vmem:[%s12425_s25 + $0x98] sm:$0x3] }
  0x94   : > { %v660_v11 = vsel %vm12448_vm4, %v651_v14, %v659_v15  ;;  %v661_v25 = vrot.slane %v659_v15, 4  ;;  %v674_v26 = vrot.slane %v672_v20, 5  ;;  %v677_v28 = vrot.slane %v675_v31, 6  ;;  %v10189_v14 = vld [vmem:[%s12425_s25 + $0x90] sm:$0xc] }
  0x95   : > { %v5164_v38 = vsel %vm12674_vm6, %v5162_v48, %v5163_v23  ;;  %v691_v18 = vshrl.u32 %v247_v19, 16  ;;  %v683_v42 = vrot.slane %v681_v27, 5  ;;  %v694_v44 = vshll.u32 %v247_v19, 16  ;;  %v12853_v20 = vld [vmem:[%s12425_s25 + $0x18] sm:$0xf] }
  0x96   : > { %v670_v37 = vsel %vm12448_vm4, %v661_v25, %v669_v22  ;;  %v10219_v40 = vcombine.low %v5161_v24, %v5164_v38  ;;  %v678_v46 = vor.u32 %v677_v28, %v674_v26  ;;  %v686_v7 = vrot.slane %v684_v29, 6  ;;  %v12856_v22 = vld [vmem:[%s12425_s25 + $0xa0] sm:$0xf]  ;;  %v10141_v24 = vld [vmem:[%s12425_s25 + $0xa4] sm:$0x3] }
  0x97   : > { %v9659_v63 = vcombine.low %v660_v11, %v670_v37  ;;  %v693_v47 = vrot.slane %v691_v18, 5  ;;  %v696_v49 = vrot.slane %v694_v44, 6  ;;  %v10203_v51 = vrot.slane %v10187_v32, 10  ;;  %v12862_v11 = vld [vmem:[%s12425_s25 + $0x4] sm:$0xf] }
  0x98   : > { %11376 = vmatprep.mubr.msk.bf16.mxu0 %vm749_vm3, %v10219_v40  ;;  %v5167_v39 = vrot.slane %v12642_v36, 6  ;;  %v5170_v53 = vrot.slane %v12647_v43, 6  ;;  %v679_v55 = vrot.slane %v678_v46, 4  ;;  %v687_v57 = vor.u32 %v686_v7, %v683_v42  ;;  %v12839_v43 = vld [vmem:[%s12425_s25 + $0xc] sm:$0xf] }
  0x99   : > { %11086 = vmatprep.mubr.msk.bf16.mxu1 %vm749_vm3, %v9659_v63  ;;  %v10204_v62 = vrot.slane %v10188_v59, 10  ;;  %v697_v0 = vor.u32 %v696_v49, %v693_v47  ;;  %v5174_v8 = vrot.slane %v12827_v35, 6  ;;  %v5177_v12 = vrot.slane %v10139_v54, 6  ;;  %v10190_v26 = vld [vmem:[%s12425_s25 + $0x9c] sm:$0xc] }
  0x9a   : > { %v5168_v6 = vsel %vm12674_vm6, %v10203_v51, %v5167_v39  ;;  %v5169_v17 = vrot.slane %v5167_v39, 4  ;;  %v688_v56 = vsel %vm12448_vm4, %v679_v55, %v687_v57  ;;  %v689_v10 = vrot.slane %v687_v57, 4  ;;  %v12867_v27 = vld [vmem:[%s12425_s25 + $0x24] sm:$0xf]  ;;  %v12870_v38 = vld [vmem:[%s12425_s25 + $0xac] sm:$0xf] }
  0x9b   : > { %v5175_v23 = vsel %vm12674_vm6, %v10204_v62, %v5174_v8  ;;  %v5176_v19 = vrot.slane %v5174_v8, 4  ;;  %v9677_v25 = vcombine.low %v183_v61, %v12862_v11  ;;  %v10205_v18 = vrot.slane %v10189_v14, 10  ;;  %v10142_v37 = vld [vmem:[%s12425_s25 + $0xb0] sm:$0x3]  ;;  %v10191_v40 = vld [vmem:[%s12425_s25 + $0xa8] sm:$0xc] }
  0x9c   : > { %v5171_v15 = vsel %vm12674_vm6, %v5169_v17, %v5170_v53  ;;  %v698_v48 = vsel %vm12448_vm4, %v689_v10, %v697_v0  ;;  %v5181_v32 = vrot.slane %v12842_v41, 6  ;;  %v12879_v44 = vld [vmem:[%s12425_s25 + $0x10] sm:$0xf]  ;;  %v5184_v63 = vrot.slane %v10140_v13, 6  ;;  %v12887_v7 = vld [vmem:[%s12425_s25 + $0xb8] sm:$0xf] }
  0x9d   : > { %v10220_v31 = vcombine.low %v5168_v6, %v5171_v15  ;;  %v9660_v28 = vcombine.low %v688_v56, %v698_v48  ;;  %v5178_v29 = vsel %vm12674_vm6, %v5176_v19, %v5177_v12  ;;  %v9678_v59 = vcombine.low %v12839_v43, %v12879_v44  ;;  %v12884_v46 = vld [vmem:[%s12425_s25 + $0x30] sm:$0xf]  ;;  %v10143_v53 = vld [vmem:[%s12425_s25 + $0xbc] sm:$0x3]  ;;  %v12904_v61 = vld [vmem:[%s12425_s25 + $0x28] sm:$0xf] }
  0x9e   : > { %v10221_v42 = vcombine.low %v5175_v23, %v5178_v29  ;;  %v1533_v47 = vsel %vm798_vm0, %v12600_v1, 0  ;;  %v5182_v49 = vsel %vm12674_vm6, %v10205_v18, %v5181_v32  ;;  %v5183_v51 = vrot.slane %v5181_v32, 4  ;;  %v12898_v54 = vld [vmem:[%s12425_s25 + $0x1c] sm:$0xf]  ;;  %v10192_v0 = vld [vmem:[%s12425_s25 + $0xb4] sm:$0xc] }
  0x9f   : > { %11377 = vmatmul.mubr.msk.bf16.gmra.mrb[12].mxu0 %vm749_vm3, %v10220_v31  ;;  %11087 = vmatmul.mubr.msk.bf16.gmra.mrb[28].mxu1 %vm749_vm3, %v9660_v28  ;;  %v10206_v39 = vrot.slane %v10190_v26, 10  ;;  %v9679_v55 = vcombine.low %v12853_v20, %v12898_v54  ;;  %v5188_v1 = vrot.slane %v12856_v22, 6  ;;  %v5191_v57 = vrot.slane %v10141_v24, 6  ;;  %v12910_v6 = vld [vmem:[%s12425_s25 + $0x3c] sm:$0xf] }
  0xa0   : > { %11092 = vmatprep.mubr.msk.bf16.mxu1 %vm749_vm3, %v9677_v25  ;;  %11380 = vmatprep.mubr.msk.bf16.mxu0 %vm749_vm3, %v10221_v42  ;;  %v9680_v62 = vcombine.low %v12867_v27, %v12904_v61  ;;  %v5185_v17 = vsel %vm12674_vm6, %v5183_v51, %v5184_v63  ;;  %v10207_v8 = vrot.slane %v10191_v40, 10  ;;  %v5195_v43 = vrot.slane %v12870_v38, 6  ;;  %v12916_v10 = vld [vmem:[%s12425_s25 + $0xc4] sm:$0xf]  ;;  %v10144_v12 = vld [vmem:[%s12425_s25 + $0xc8] sm:$0x3] }
  0xa1   : > { %v5198_v56 = vrot.slane %v10142_v37, 6  ;;  %v10193_v13 = vld [vmem:[%s12425_s25 + $0xc0] sm:$0xc]  ;;  %v10222_v14 = vcombine.low %v5182_v49, %v5185_v17  ;;  %v5189_v15 = vsel %vm12674_vm6, %v10206_v39, %v5188_v1  ;;  %v5190_v23 = vrot.slane %v5188_v1, 4  ;;  %v12923_v19 = vld [vmem:[%s12425_s25 + $0x34] sm:$0xf] }
  0xa2   : > { %v9681_v20 = vcombine.low %v12884_v46, %v12923_v19  ;;  %v12928_v24 = vld [vmem:[%s12425_s25 + $0x48] sm:$0xf]  ;;  %v12931_v48 = vld [vmem:[%s12425_s25 + $0xd0] sm:$0xf]  ;;  %v12935_v31 = vsel %vm12674_vm6, %v10207_v8, %v5195_v43  ;;  %v5197_v25 = vrot.slane %v5195_v43, 4  ;;  %v10208_v26 = vrot.slane %v10192_v0, 10 }
  0xa3   : > { %16420 = vst [vmem:[#allocation7_spill] sm:$0xff] %v12931_v48  ;;  %v5202_v28 = vrot.slane %v12887_v7, 6  ;;  %v10145_v29 = vld [vmem:[%s12425_s25 + $0xd4] sm:$0x3]  ;;  %v5192_v18 = vsel %vm12674_vm6, %v5190_v23, %v5191_v57  ;;  %v5205_v32 = vrot.slane %v10143_v53, 6  ;;  %v10209_v40 = vrot.slane %v10193_v13, 10 }
  0xa4   : > { %v10194_v42 = vld [vmem:[%s12425_s25 + $0xcc] sm:$0xc]  ;;  %v12945_v63 = vld [vmem:[%s12425_s25 + $0x54] sm:$0xf]  ;;  %v10223_v49 = vcombine.low %v5189_v15, %v5192_v18  ;;  %v5199_v51 = vsel %vm12674_vm6, %v5197_v25, %v5198_v56  ;;  %v12954_v57 = vld [vmem:[%s12425_s25 + $0xdc] sm:$0xf] }
  0xa5   : > { %v12951_v39 = vsel %vm12674_vm6, %v10208_v26, %v5202_v28  ;;  %v5204_v1 = vrot.slane %v5202_v28, 4  ;;  %16421 = vst [vmem:[#allocation8_spill] sm:$0xff] %v12954_v57  ;;  %v10146_v53 = vld [vmem:[%s12425_s25 + $0xe0] sm:$0x3]  ;;  %v10224_v0 = vcombine.low %v12935_v31, %v5199_v51  ;;  %v5209_v17 = vrot.slane %v12916_v10, 6 }
  0xa6   : > { %v5212_v8 = vrot.slane %v10144_v12, 6  ;;  %v10195_v56 = vld [vmem:[%s12425_s25 + $0xd8] sm:$0xc]  ;;  %v12966_v13 = vld [vmem:[%s16336_s1 + $0x6] sm:$0x3]  ;;  %v10210_v15 = vrot.slane %v10194_v42, 10 }
  0xa7   : > { %11381 = vmatmul.mubr.msk.bf16.gmra.mrb[16].mxu0 %vm749_vm3, %v10222_v14  ;;  %11093 = vmatmul.mubr.msk.bf16.vlgmr.msra.gmra.mrb[0].mxu1 %vm749_vm3, %v9678_v59  ;;  %v5206_v14 = vsel %vm12674_vm6, %v5204_v1, %v5205_v32  ;;  %v5216_v12 = vrot.slane %v12931_v48, 6  ;;  %v5219_v23 = vrot.slane %v10145_v29, 6  ;;  %v12974_v31 = vld [vmem:[%s12425_s25 + $0x60] sm:$0xf]  ;;  %v12980_v59 = vsel %vm12674_vm6, %v10209_v40, %v5209_v17  ;;  %v10245_v18 = vld [vmem:[%s12425_s25 + $0x24] sm:$0x8] }
  0xa8   : > { %11384 = vmatprep.mubr.msk.bf16.mxu0 %vm749_vm3, %v10223_v49  ;;  %11125 = vmatpush3.bf16.msra.mxu1 %v1533_v47  ;;  %v10225_v25 = vcombine.low %v12951_v39, %v5206_v14  ;;  %v5211_v26 = vrot.slane %v5209_v17, 4  ;;  %v5223_v32 = vrot.slane %v12954_v57, 6  ;;  %v10246_v42 = vld [vmem:[%s12425_s25 + $0x2c] sm:$0x7]  ;;  %v5226_v49 = vrot.slane %v10146_v53, 6 }
  0xa9   : > { %11096 = vmatprep.mubr.msk.bf16.mxu1 %vm749_vm3, %v9679_v55  ;;  %v12987_v29 = vsel %vm12674_vm6, %v10210_v15, %v5216_v12  ;;  %v5218_v47 = vrot.slane %v5216_v12, 4  ;;  %v10211_v55 = vrot.slane %v10195_v56, 10  ;;  %12151 = vmatprep.subr.msk.bf16.mxu1 %vm798_vm0, %v12966_v13  ;;  %v13000_v39 = vld [vmem:[%s12425_s25 + $0x6c] sm:$0xf]  ;;  %v10247_v1 = vld [vmem:[%s12425_s25 + $0x30] sm:$0x8] }
  0xaa   : > { %v12995_v40 = vsel %vm12674_vm6, %v5211_v26, %v5212_v8  ;;  %v5225_v53 = vrot.slane %v5223_v32, 4  ;;  %v10248_v14 = vld [vmem:[%s12425_s25 + $0x38] sm:$0x7]  ;;  %v10277_v26 = vrot.slane %v10245_v18, 11  ;;  %v12228_v51 = vld [vmem:[%s12425_s25 + $0x28] sm:$0xf] }
  0xab   : > { %v13007_v56 = vsel %vm12674_vm6, %v5218_v47, %v5219_v23  ;;  %v13011_v8 = vsel %vm12674_vm6, %v10211_v55, %v5223_v32  ;;  %v13015_v15 = vld [vmem:[%s12425_s25 + $0x78] sm:$0xf]  ;;  %v5588_v23 = vrot.slane %v12228_v51, 7  ;;  %v10249_v47 = vld [vmem:[%s12425_s25 + $0x3c] sm:$0x8]  ;;  %v16422_v55 = vmov 0 }
  0xac   : > { %v13023_v28 = vsel %vm12674_vm6, %v5225_v53, %v5226_v49  ;;  %v16423_v55 = vsel %vm13026_vm9, 4294967295, %v16422_v55  ;;  %v5591_v32 = vrot.slane %v10246_v42, 7  ;;  %v10278_v12 = vrot.slane %v10247_v1, 11  ;;  %v10250_v18 = vld [vmem:[%s12425_s25 + $0x44] sm:$0x7] }
  0xad   : > { %16424 = vst [vmem:[#allocation9_spill] sm:$0xff] %v16423_v55  ;;  %v13038_v49 = vsel %vm13026_vm9, %v10277_v26, %v5588_v23  ;;  %v5590_v53 = vrot.slane %v5588_v23, 4  ;;  %v12229_v37 = vld [vmem:[%s12425_s25 + $0x34] sm:$0xf]  ;;  %v13042_v42 = vld [vmem:[%s12425_s25 + $0x84] sm:$0xf] }
  0xae   : > { %v5595_v17 = vrot.slane %v12229_v37, 7  ;;  %v10251_v1 = vld [vmem:[%s12425_s25 + $0x48] sm:$0x8]  ;;  %v13052_v26 = vsel %vm798_vm0, %v12724_v34, 0  ;;  %v10279_v23 = vrot.slane %v10249_v47, 11 }
  0xaf   : > { %11385 = vmatmul.mubr.msk.bf16.gmra.mrb[20].mxu0 %vm749_vm3, %v10224_v0  ;;  %11097 = vmatmul.mubr.msk.bf16.gmra.mrb[4].mxu1 %vm749_vm3, %v9680_v62  ;;  %v5598_v0 = vrot.slane %v10248_v14, 7  ;;  %v10252_v43 = vld [vmem:[%s12425_s25 + $0x50] sm:$0x7]  ;;  %v13063_v27 = vsel %vm13026_vm9, %v5590_v53, %v5591_v32  ;;  %v10253_v37 = vld [vmem:[%s12425_s25 + $0x54] sm:$0x8]  ;;  %v10280_v53 = vrot.slane %v10251_v1, 11 }
  0xb0   : > { %11388 = vmatprep.mubr.msk.bf16.mxu0 %vm749_vm3, %v10225_v25  ;;  %11100 = vmatprep.mubr.msk.bf16.mxu1 %vm749_vm3, %v9681_v20  ;;  %v13067_v34 = vsel %vm13026_vm9, %v10278_v12, %v5595_v17  ;;  %v5597_v62 = vrot.slane %v5595_v17, 4  ;;  %v12230_v25 = vld [vmem:[%s12425_s25 + $0x40] sm:$0xf]  ;;  %v13071_v47 = vld [vmem:[%s12425_s25 + $0x90] sm:$0xf]  ;;  %v5605_v20 = vrot.slane %v10250_v18, 7 }
  0xb1   : > { %v5602_v14 = vrot.slane %v12230_v25, 7  ;;  %v10254_v51 = vld [vmem:[%s12425_s25 + $0x5c] sm:$0x7]  ;;  %v12231_v46 = vld [vmem:[%s12425_s25 + $0x4c] sm:$0xf]  ;;  %v5612_v32 = vrot.slane %v10252_v43, 7 }
  0xb2   : > { %v13081_v17 = vsel %vm13026_vm9, %v5597_v62, %v5598_v0  ;;  %v5609_v3 = vrot.slane %v12231_v46, 7  ;;  %v13089_v18 = vld [vmem:[%s12425_s25 + $0x9c] sm:$0xf]  ;;  %v10281_v62 = vrot.slane %v10253_v37, 11  ;;  %v12232_v57 = vld [vmem:[%s12425_s25 + $0x58] sm:$0xf] }
  0xb3   : > { %v13085_v12 = vsel %vm13026_vm9, %v10279_v23, %v5602_v14  ;;  %v5604_v25 = vrot.slane %v5602_v14, 4  ;;  %v5616_v1 = vrot.slane %v12232_v57, 7  ;;  %v13107_v43 = vld [vmem:[%s12425_s25 + $0xa8] sm:$0xf]  ;;  %v10257_v48 = vld [vmem:[%s12425_s25 + $0x6c] sm:$0x8] }
  0xb4   : > { %v13103_v14 = vsel %vm13026_vm9, %v10280_v53, %v5609_v3  ;;  %v5611_v46 = vrot.slane %v5609_v3, 4  ;;  %v5619_v0 = vrot.slane %v10254_v51, 7  ;;  %v16425_v53 = vcombine.low %v12980_v59, %v12995_v40  ;;  %v12233_v37 = vld [vmem:[%s12425_s25 + $0x64] sm:$0xf] }
  0xb5   : > { %v13099_v23 = vsel %vm13026_vm9, %v5604_v25, %v5605_v20  ;;  %v10282_v25 = vrot.slane %v10255_v50, 11  ;;  %v13125_v57 = vsel %vm13026_vm9, %v10281_v62, %v5616_v1  ;;  %v5618_v51 = vrot.slane %v5616_v1, 4  ;;  %v13129_v50 = vld [vmem:[%s12425_s25 + $0xb4] sm:$0xf]  ;;  %v10262_v62 = vld [vmem:[%s12425_s25 + $0x8c] sm:$0x7] }
  0xb6   : > { %v13121_v3 = vsel %vm13026_vm9, %v5611_v46, %v5612_v32  ;;  %v5623_v20 = vrot.slane %v12233_v37, 7  ;;  %v16426_v59 = vcombine.low %v12910_v6, %v12567_v4  ;;  %v16427_v40 = vcombine.low %v12987_v29, %v13007_v56  ;;  %v12234_v29 = vld [vmem:[%s12425_s25 + $0x70] sm:$0xf]  ;;  %v1257_v32 = vld [vmem:[%s12425_s25 + $0xc] sm:$0x8] }
  0xb7   : > { %11389 = vmatmul.mubr.msk.bf16.gmra.mrb[24].mxu0 %vm749_vm3, %v16425_v53  ;;  %v5626_v1 = vrot.slane %v10256_v33, 7  ;;  %v10283_v46 = vrot.slane %v10257_v48, 11  ;;  %v16428_v37 = vcombine.low %v12928_v24, %v12592_v58  ;;  %v13150_v4 = vsel %vm13026_vm9, %v5618_v51, %v5619_v0  ;;  %v10260_v53 = vld [vmem:[%s12425_s25 + $0x80] sm:$0x7]  ;;  %v1255_v48 = vld [vmem:[%s12425_s25] sm:$0x8] }
  0xb8   : > { %11101 = vmatmul.mubr.msk.bf16.gmra.mrb[8].mxu1 %vm749_vm3, %v16426_v59  ;;  %11392 = vmatprep.mubr.msk.bf16.mxu0 %vm749_vm3, %v16427_v40  ;;  %v13154_v6 = vsel %vm13026_vm9, %v10282_v25, %v5623_v20  ;;  %v5625_v33 = vrot.slane %v5623_v20, 4  ;;  %v5630_v56 = vrot.slane %v12234_v29, 7  ;;  %v5633_v24 = vrot.slane %v10258_v5, 7  ;;  %v1256_v59 = vld [vmem:[%s12425_s25 + $0x8] sm:$0x7] }
  0xb9   : > { %11104 = vmatprep.mubr.msk.bf16.mxu1 %vm749_vm3, %v16428_v37  ;;  %v10284_v51 = vrot.slane %v10259_v45, 11  ;;  %v5637_v37 = vrot.slane %v12642_v36, 7  ;;  %v10261_v29 = vld [vmem:[%s12425_s25 + $0x84] sm:$0x8]  ;;  %v5640_v0 = vrot.slane %v10260_v53, 7  ;;  %v9709_v45 = vrot.slane %v1255_v48, 11 }
  0xba   : > { %v13166_v25 = vsel %vm13026_vm9, %v5625_v33, %v5626_v1  ;;  %v13170_v20 = vsel %vm13026_vm9, %v10283_v46, %v5630_v56  ;;  %v5632_v40 = vrot.slane %v5630_v56, 4  ;;  %v1324_v58 = vrot.slane %v12862_v11, 7  ;;  %v1258_v56 = vld [vmem:[%s12425_s25 + $0x14] sm:$0x7]  ;;  %v10263_v5 = vld [vmem:[%s12425_s25 + $0x90] sm:$0x8] }
  0xbb   : > { %v13185_v46 = vsel %vm13026_vm9, %v10284_v51, %v5637_v37  ;;  %v5639_v36 = vrot.slane %v5637_v37, 4  ;;  %v1327_v33 = vrot.slane %v1256_v59, 7  ;;  %v10285_v48 = vrot.slane %v10261_v29, 11  ;;  %v1260_v29 = vld [vmem:[%s12425_s25 + $0x20] sm:$0x7] }
  0xbc   : > { %v13181_v1 = vsel %vm13026_vm9, %v5632_v40, %v5633_v24  ;;  %v13192_v11 = vsel %vm13026_vm9, %v9709_v45, %v1324_v58  ;;  %v1326_v53 = vrot.slane %v1324_v58, 4  ;;  %v16429_v24 = vcombine.low %v13011_v8, %v13023_v28  ;;  %v10264_v58 = vld [vmem:[%s12425_s25 + $0x98] sm:$0x7]  ;;  %v10355_v55 = vld [vmem:[%s12425_s25 + $0xa4] sm:$0x1] }
  0xbd   : > { %v13200_v51 = vsel %vm13026_vm9, %v5639_v36, %v5640_v0  ;;  %v5644_v59 = vrot.slane %v12827_v35, 7  ;;  %v5647_v40 = vrot.slane %v10262_v62, 7  ;;  %v9710_v37 = vrot.slane %v1257_v32, 11 }
  0xbe   : > { %v16430_v45 = vcombine.low %v12945_v63, %v12630_v2  ;;  %v16431_v28 = vcombine.low %v13038_v49, %v13063_v27  ;;  %v13216_v35 = vsel %vm13026_vm9, %v1326_v53, %v1327_v33  ;;  %v1331_v32 = vrot.slane %v12879_v44, 7  ;;  %v1259_v2 = vld [vmem:[%s12425_s25 + $0x18] sm:$0x8] }
  0xbf   : > { %11393 = vmatmul.mubr.msk.bf16.gmra.mrb[28].mxu0 %vm749_vm3, %v16429_v24  ;;  %v1334_v62 = vrot.slane %v1258_v56, 7  ;;  %v16432_v63 = vcombine.low %v12974_v31, %v12658_v9  ;;  %v13229_v27 = vsel %vm13026_vm9, %v10285_v48, %v5644_v59  ;;  %v5646_v0 = vrot.slane %v5644_v59, 4  ;;  %v10265_v56 = vld [vmem:[%s12425_s25 + $0x9c] sm:$0x8]  ;;  %v10266_v59 = vld [vmem:[%s12425_s25 + $0xa4] sm:$0x7] }
  0xc0   : > { %11105 = vmatmul.mubr.msk.bf16.gmra.mrb[12].mxu1 %vm749_vm3, %v16430_v45  ;;  %11398 = vmatprep.mubr.msk.bf16.mxu0 %vm749_vm3, %v16431_v28  ;;  %v13233_v44 = vsel %vm798_vm0, %v12966_v13, 0  ;;  %v13238_v9 = vsel %vm13026_vm9, %v9710_v37, %v1331_v32  ;;  %v1333_v31 = vrot.slane %v1331_v32, 4  ;;  %v10286_v36 = vrot.slane %v10263_v5, 11  ;;  %v13512_v37 = vld [vmem:[%s12425_s25 + $0x48] sm:$0xe] }
  0xc1   : > { %11108 = vmatprep.mubr.msk.bf16.mxu1 %vm749_vm3, %v16432_v63  ;;  %v5651_v33 = vrot.slane %v12842_v41, 7  ;;  %v13244_v53 = vsel %vm13026_vm9, %v5646_v0, %v5647_v40  ;;  %v5654_v48 = vrot.slane %v10264_v58, 7  ;;  %v9711_v13 = vrot.slane %v1259_v2, 11  ;;  %v1261_v40 = vld [vmem:[%s12425_s25 + $0x24] sm:$0x8]  ;;  %16455 = vst [vmem:[#allocation10_spill] sm:$0xff] %v13512_v37 }
  0xc2   : > { %v1338_v24 = vrot.slane %v12898_v54, 7  ;;  %v13252_v5 = vsel %vm13026_vm9, %v1333_v31, %v1334_v62  ;;  %v1341_v58 = vrot.slane %v1260_v29, 7  ;;  %v1262_v2 = vld [vmem:[%s12425_s25 + $0x2c] sm:$0x7]  ;;  %v10267_v63 = vld [vmem:[%s12425_s25 + $0xa8] sm:$0x8]  ;;  %v16433_v28 = vcombine.low %v13067_v34, %v13081_v17 }
  0xc3   : > { %v13256_v41 = vsel %vm13026_vm9, %v10286_v36, %v5651_v33  ;;  %v5653_v45 = vrot.slane %v5651_v33, 4  ;;  %v10287_v0 = vrot.slane %v10265_v56, 11  ;;  %v5658_v31 = vrot.slane %v12856_v22, 7  ;;  %v10268_v33 = vld [vmem:[%s12425_s25 + $0xb0] sm:$0x7] }
  0xc4   : > { %v13263_v54 = vsel %vm13026_vm9, %v9711_v13, %v1338_v24  ;;  %v1340_v32 = vrot.slane %v1338_v24, 4  ;;  %v5661_v36 = vrot.slane %v10266_v59, 7  ;;  %v1345_v56 = vrot.slane %v12904_v61, 7  ;;  %v1263_v22 = vld [vmem:[%s12425_s25 + $0x30] sm:$0x8] }
  0xc5   : > { %v13269_v62 = vsel %vm13026_vm9, %v5653_v45, %v5654_v48  ;;  %v9712_v48 = vrot.slane %v1261_v40, 11  ;;  %v13288_v24 = vld [vmem:[%s16336_s1 + $0x18] sm:$0x3]  ;;  %v16434_v34 = vcombine.low %v13000_v39, %v12680_v60  ;;  %v13299_v61 = vsel %vm13026_vm9, %v10287_v0, %v5658_v31  ;;  %v10270_v0 = vld [vmem:[%s12425_s25 + $0xbc] sm:$0x7] }
  0xc6   : > { %v13281_v13 = vsel %vm13026_vm9, %v1340_v32, %v1341_v58  ;;  %v5660_v59 = vrot.slane %v5658_v31, 4  ;;  %v1348_v45 = vrot.slane %v1262_v2, 7  ;;  %v1264_v40 = vld [vmem:[%s12425_s25 + $0x38] sm:$0x7]  ;;  %v16435_v32 = vcombine.low %v13015_v15, %v12698_v30  ;;  %v1265_v31 = vld [vmem:[%s12425_s25 + $0x3c] sm:$0x8] }
  0xc7   : > { %11399 = vmatmul.mubr.msk.bf16.vlgmr.msra.gmra.mrb[0].mxu0 %vm749_vm3, %v16433_v28  ;;  %v10269_v28 = vld [vmem:[%s12425_s25 + $0xb4] sm:$0x8]  ;;  %v16436_v60 = vcombine.low %v13085_v12, %v13099_v23  ;;  %v13313_v39 = vsel %vm13026_vm9, %v9712_v48, %v1345_v56  ;;  %v10288_v58 = vrot.slane %v10267_v63, 11  ;;  %v5665_v2 = vrot.slane %v12870_v38, 7  ;;  %v1266_v48 = vld [vmem:[%s12425_s25 + $0x44] sm:$0x7] }
  0xc8   : > { %11109 = vmatmul.mubr.msk.bf16.gmra.mrb[16].mxu1 %vm749_vm3, %v16434_v34  ;;  %11431 = vmatpush3.bf16.msra.mxu0 %v13052_v26  ;;  %v1347_v26 = vrot.slane %v1345_v56, 4  ;;  %v13319_v30 = vsel %vm13026_vm9, %v5660_v59, %v5661_v36  ;;  %v5668_v15 = vrot.slane %v10268_v33, 7  ;;  %v9713_v12 = vrot.slane %v1263_v22, 11  ;;  %v1268_v63 = vld [vmem:[%s12425_s25 + $0x50] sm:$0x7] }
  0xc9   : > { %11112 = vmatprep.mubr.msk.bf16.mxu1 %vm749_vm3, %v16435_v32  ;;  %11402 = vmatprep.mubr.msk.bf16.mxu0 %vm749_vm3, %v16436_v60  ;;  %v1352_v23 = vrot.slane %v12923_v19, 7  ;;  %v13333_v36 = vsel %vm13026_vm9, %v10288_v58, %v5665_v2  ;;  %v5667_v33 = vrot.slane %v5665_v2, 4  ;;  %v10271_v19 = vld [vmem:[%s12425_s25 + $0xc0] sm:$0x8]  ;;  %v1355_v59 = vrot.slane %v1264_v40, 7 }
  0xca   : > { %12161 = vmatprep.subr.msk.bf16.mxu0 %vm798_vm0, %v13288_v24  ;;  %v13329_v38 = vsel %vm13026_vm9, %v1347_v26, %v1348_v45  ;;  %v10272_v45 = vld [vmem:[%s12425_s25 + $0xc8] sm:$0x7]  ;;  %v10289_v60 = vrot.slane %v10269_v28, 11  ;;  %v5672_v26 = vrot.slane %v12887_v7, 7  ;;  %v5675_v58 = vrot.slane %v10270_v0, 7 }
  0xcb   : > { %v13341_v22 = vsel %vm13026_vm9, %v9713_v12, %v1352_v23  ;;  %v1354_v34 = vrot.slane %v1352_v23, 4  ;;  %v13346_v32 = vsel %vm13026_vm9, %v5667_v33, %v5668_v15  ;;  %v1267_v2 = vld [vmem:[%s12425_s25 + $0x48] sm:$0x8]  ;;  %v9714_v23 = vrot.slane %v1265_v31, 11  ;;  %v12235_v40 = vld [vmem:[%s12425_s25 + $0x40] sm:$0xf] }
  0xcc   : > { %v1359_v17 = vrot.slane %v12235_v40, 7  ;;  %v16437_v15 = vcombine.low %v13103_v14, %v13121_v3  ;;  %v13366_v28 = vsel %vm13026_vm9, %v10289_v60, %v5672_v26  ;;  %v5674_v0 = vrot.slane %v5672_v26, 4  ;;  %v10273_v33 = vld [vmem:[%s12425_s25 + $0xcc] sm:$0x8]  ;;  %v10274_v26 = vld [vmem:[%s12425_s25 + $0xd4] sm:$0x7] }
  0xcd   : > { %v13354_v12 = vsel %vm13026_vm9, %v1354_v34, %v1355_v59  ;;  %v1362_v31 = vrot.slane %v1266_v48, 7  ;;  %v16438_v34 = vcombine.low %v13042_v42, %v12719_v21  ;;  %v16439_v14 = vcombine.low %v13125_v57, %v13150_v4  ;;  %v16440_v21 = vld [vmem:[#allocation5_spill] sm:$0xff]  ;;  %v12236_v40 = vld [vmem:[%s12425_s25 + $0x4c] sm:$0xf]  ;;  %v1272_v56 = vld [vmem:[%s12425_s25 + $0x68] sm:$0x7] }
  0xce   : > { %v13379_v3 = vsel %vm13026_vm9, %v9714_v23, %v1359_v17  ;;  %v1361_v59 = vrot.slane %v1359_v17, 4  ;;  %v10290_v60 = vrot.slane %v10271_v19, 11  ;;  %v5679_v48 = vrot.slane %v12916_v10, 7 }
  0xcf   : > { %11403 = vmatmul.mubr.msk.bf16.gmra.mrb[4].mxu0 %vm749_vm3, %v16437_v15  ;;  %v16441_v42 = vcombine.low %v13071_v47, %v16440_v21  ;;  %v13389_v57 = vsel %vm13026_vm9, %v5674_v0, %v5675_v58  ;;  %v5682_v4 = vrot.slane %v10272_v45, 7  ;;  %v9715_v23 = vrot.slane %v1267_v2, 11  ;;  %v1269_v15 = vld [vmem:[%s12425_s25 + $0x54] sm:$0x8]  ;;  %v1270_v0 = vld [vmem:[%s12425_s25 + $0x5c] sm:$0x7] }
  0xd0   : > { %11113 = vmatmul.mubr.msk.bf16.gmra.mrb[20].mxu1 %vm749_vm3, %v16438_v34  ;;  %11406 = vmatprep.mubr.msk.bf16.mxu0 %vm749_vm3, %v16439_v14  ;;  %v1366_v17 = vrot.slane %v12236_v40, 7  ;;  %v13397_v19 = vsel %vm13026_vm9, %v1361_v59, %v1362_v31  ;;  %v13401_v47 = vsel %vm13026_vm9, %v10290_v60, %v5679_v48  ;;  %v5681_v58 = vrot.slane %v5679_v48, 4  ;;  %v10275_v45 = vld [vmem:[%s12425_s25 + $0xd8] sm:$0x8]  ;;  %v10276_v31 = vld [vmem:[%s12425_s25 + $0xe0] sm:$0x7] }
  0xd1   : > { %11116 = vmatprep.mubr.msk.bf16.mxu1 %vm749_vm3, %v16441_v42  ;;  %v1369_v21 = vrot.slane %v1268_v63, 7  ;;  %v1271_v59 = vld [vmem:[%s12425_s25 + $0x60] sm:$0x8]  ;;  %v10291_v48 = vrot.slane %v10273_v33, 11  ;;  %v16442_v42 = vld [vmem:[#allocation7_spill] sm:$0xff]  ;;  %v5689_v7 = vrot.slane %v10274_v26, 7 }
  0xd2   : > { %v13409_v34 = vsel %vm13026_vm9, %v9715_v23, %v1366_v17  ;;  %v1368_v14 = vrot.slane %v1366_v17, 4  ;;  %v13415_v60 = vsel %vm13026_vm9, %v5681_v58, %v5682_v4  ;;  %v5686_v40 = vrot.slane %v16442_v42, 7  ;;  %v12237_v17 = vld [vmem:[%s12425_s25 + $0x58] sm:$0xf]  ;;  %v13433_v42 = vld [vmem:[%s12425_s25 + $0x30] sm:$0xe] }
  0xd3   : > { %v9716_v63 = vrot.slane %v1269_v15, 11  ;;  %v1373_v10 = vrot.slane %v12237_v17, 7  ;;  %v1376_v58 = vrot.slane %v1270_v0, 7  ;;  %16443 = vst [vmem:[#allocation5_spill] sm:$0xff] %v13433_v42  ;;  %v10292_v17 = vrot.slane %v10275_v45, 11  ;;  %v16445_v4 = vld [vmem:[#allocation8_spill] sm:$0xff] }
  0xd4   : > { %v13422_v23 = vsel %vm13026_vm9, %v1368_v14, %v1369_v21  ;;  %v13430_v33 = vsel %vm13026_vm9, %v10291_v48, %v5686_v40  ;;  %v5688_v26 = vrot.slane %v5686_v40, 4  ;;  %v16444_v14 = vcombine.low %v13154_v6, %v13166_v25  ;;  %v13445_v2 = vld [vmem:[%s12425_s25 + $0x34] sm:$0xf]  ;;  %v10328_v0 = vld [vmem:[%s12425_s25 + $0x38] sm:$0x1]  ;;  %v16447_v40 = vld [vmem:[#allocation6_spill] sm:$0xff] }
  0xd5   : > { %v13441_v15 = vsel %vm13026_vm9, %v9716_v63, %v1373_v10  ;;  %v1375_v21 = vrot.slane %v1373_v10, 4  ;;  %v5693_v48 = vrot.slane %v16445_v4, 7  ;;  %16446 = vst [vmem:[#allocation7_spill] sm:$0xff] %v13445_v2  ;;  %v16448_v29 = vcombine.low %v13089_v18, %v16447_v40  ;;  %v12238_v63 = vld [vmem:[%s12425_s25 + $0x64] sm:$0xf] }
  0xd6   : > { %v16449_v6 = vcombine.low %v13170_v20, %v13181_v1  ;;  %v13458_v25 = vsel %vm13026_vm9, %v5688_v26, %v5689_v7  ;;  %v5696_v10 = vrot.slane %v10276_v31, 7  ;;  %v9717_v45 = vrot.slane %v1271_v59, 11  ;;  %v1274_v31 = vld [vmem:[%s12425_s25 + $0x74] sm:$0x7]  ;;  %v13478_v59 = vld [vmem:[%s12425_s25 + $0x3c] sm:$0xe] }
  0xd7   : > { %11407 = vmatmul.mubr.msk.bf16.gmra.mrb[8].mxu0 %vm749_vm3, %v16444_v14  ;;  %v1380_v4 = vrot.slane %v12238_v63, 7  ;;  %v1273_v14 = vld [vmem:[%s12425_s25 + $0x6c] sm:$0x8]  ;;  %v16450_v18 = vcombine.low %v13107_v43, %v12786_v52  ;;  %v13470_v1 = vsel %vm13026_vm9, %v1375_v21, %v1376_v58  ;;  %v5695_v7 = vrot.slane %v5693_v48, 4  ;;  %16451 = vst [vmem:[#allocation8_spill] sm:$0xff] %v13478_v59 }
  0xd8   : > { %11117 = vmatmul.mubr.msk.bf16.gmra.mrb[24].mxu1 %vm749_vm3, %v16448_v29  ;;  %11410 = vmatprep.mubr.msk.bf16.mxu0 %vm749_vm3, %v16449_v6  ;;  %v13474_v29 = vsel %vm13026_vm9, %v10292_v17, %v5693_v48  ;;  %v1383_v40 = vrot.slane %v1272_v56, 7  ;;  %v13487_v58 = vld [vmem:[%s12425_s25 + $0x40] sm:$0xf]  ;;  %v10331_v21 = vld [vmem:[%s12425_s25 + $0x44] sm:$0x1]  ;;  %v10374_v48 = vrot.slane %v13433_v42, 9 }
  0xd9   : > { %11120 = vmatprep.mubr.msk.bf16.mxu1 %vm749_vm3, %v16450_v18  ;;  %v13484_v43 = vsel %vm13026_vm9, %v9717_v45, %v1380_v4  ;;  %v1382_v26 = vrot.slane %v1380_v4, 4  ;;  %16452 = vst [vmem:[#allocation6_spill] sm:$0xff] %v13487_v58  ;;  %v13492_v17 = vsel %vm13026_vm9, %v5695_v7, %v5696_v10  ;;  %v1275_v6 = vld [vmem:[%s12425_s25 + $0x78] sm:$0x8]  ;;  %v6091_v10 = vrot.slane %v13445_v2, 5 }
  0xda   : > { %v6094_v4 = vrot.slane %v10328_v0, 5  ;;  %v1276_v18 = vld [vmem:[%s12425_s25 + $0x80] sm:$0x7]  ;;  %v9718_v52 = vrot.slane %v1273_v14, 11  ;;  %v12239_v20 = vld [vmem:[%s12425_s25 + $0x70] sm:$0xf] }
  0xdb   : > { %v13500_v56 = vsel %vm13026_vm9, %v1382_v26, %v1383_v40  ;;  %v1387_v45 = vrot.slane %v12239_v20, 7  ;;  %v1390_v49 = vrot.slane %v1274_v31, 7  ;;  %v13515_v26 = vld [vmem:[%s12425_s25 + $0x4c] sm:$0xf]  ;;  %v13519_v40 = vsel %vm13502_vm12, %v10374_v48, %v6091_v10  ;;  %v10334_v14 = vld [vmem:[%s12425_s25 + $0x50] sm:$0x1] }
  0xdc   : > { %16456 = vst [vmem:[#allocation11_spill] sm:$0xff] %v13515_v26  ;;  %v6093_v8 = vrot.slane %v6091_v10, 4  ;;  %v10375_v0 = vrot.slane %v13478_v59, 9  ;;  %v6098_v7 = vrot.slane %v13487_v58, 5  ;;  %v16457_v20 = vcombine.low %v13185_v46, %v13200_v51  ;;  %v1277_v59 = vld [vmem:[%s12425_s25 + $0x84] sm:$0x8] }
  0xdd   : > { %v13530_v31 = vsel %vm13026_vm9, %v9718_v52, %v1387_v45  ;;  %v1389_v48 = vrot.slane %v1387_v45, 4  ;;  %v6101_v2 = vrot.slane %v10331_v21, 5  ;;  %v13534_v10 = vsel %vm798_vm0, %v13288_v24, 0  ;;  %v1278_v45 = vld [vmem:[%s12425_s25 + $0x8c] sm:$0x7] }
  0xde   : > { %v16458_v58 = vcombine.low %v13129_v50, %v12808_v16  ;;  %v16459_v46 = vcombine.low %v13229_v27, %v13244_v53  ;;  %v13547_v51 = vsel %vm13502_vm12, %v6093_v8, %v6094_v4  ;;  %v13551_v24 = vsel %vm13502_vm12, %v10375_v0, %v6098_v7  ;;  %v13555_v16 = vld [vmem:[%s12425_s25 + $0x54] sm:$0xe]  ;;  %v12240_v53 = vld [vmem:[%s12425_s25 + $0x7c] sm:$0xf]  ;;  %v13569_v4 = vld [vmem:[%s12425_s25 + $0x58] sm:$0xf] }
  0xdf   : > { %11411 = vmatmul.mubr.msk.bf16.gmra.mrb[12].mxu0 %vm749_vm3, %v16457_v20  ;;  %v6100_v52 = vrot.slane %v6098_v7, 4  ;;  %v9719_v21 = vrot.slane %v1275_v6, 11  ;;  %16460 = vst [vmem:[#allocation12_spill] sm:$0xff] %v13555_v16  ;;  %v16461_v50 = vcombine.low %v13192_v11, %v13216_v35  ;;  %v13565_v27 = vsel %vm13026_vm9, %v1389_v48, %v1390_v49  ;;  %16462 = vst [vmem:[#allocation13_spill] sm:$0xff] %v13569_v4  ;;  %v10337_v0 = vld [vmem:[%s12425_s25 + $0x5c] sm:$0x1] }
  0xe0   : > { %11121 = vmatmul.mubr.msk.bf16.gmra.mrb[28].mxu1 %vm749_vm3, %v16458_v58  ;;  %11414 = vmatprep.mubr.msk.bf16.mxu0 %vm749_vm3, %v16459_v46  ;;  %v1394_v58 = vrot.slane %v12240_v53, 7  ;;  %v1397_v6 = vrot.slane %v1276_v18, 7  ;;  %v10376_v7 = vrot.slane %v13512_v37, 9  ;;  %v6105_v49 = vrot.slane %v13515_v26, 5  ;;  %v1280_v53 = vld [vmem:[%s12425_s25 + $0x98] sm:$0x7] }
  0xe1   : > { %11126 = vmatprep.mubr.msk.bf16.mxu1 %vm749_vm3, %v16461_v50  ;;  %v13575_v35 = vsel %vm13502_vm12, %v6100_v52, %v6101_v2  ;;  %v6108_v46 = vrot.slane %v10334_v14, 5  ;;  %v1279_v50 = vld [vmem:[%s12425_s25 + $0x90] sm:$0x8]  ;;  %v9720_v11 = vrot.slane %v1277_v59, 11  ;;  %v12241_v8 = vld [vmem:[%s12425_s25 + $0x88] sm:$0xf]  ;;  %v16466_v59 = vcombine.low %v13256_v41, %v13269_v62 }
  0xe2   : > { %v13584_v20 = vsel %vm13026_vm9, %v9719_v21, %v1394_v58  ;;  %v1396_v48 = vrot.slane %v1394_v58, 4  ;;  %v13590_v2 = vsel %vm13502_vm12, %v10376_v7, %v6105_v49  ;;  %v6107_v52 = vrot.slane %v6105_v49, 4  ;;  %v13594_v37 = vld [vmem:[%s12425_s25 + $0x60] sm:$0xe]  ;;  %v13597_v18 = vld [vmem:[%s12425_s25 + $0x64] sm:$0xf] }
  0xe3   : > { %v1401_v26 = vrot.slane %v12241_v8, 7  ;;  %16463 = vst [vmem:[#allocation14_spill] sm:$0xff] %v13594_v37  ;;  %16464 = vst [vmem:[#allocation15_spill] sm:$0xff] %v13597_v18  ;;  %v1404_v14 = vrot.slane %v1278_v45, 7  ;;  %v10377_v58 = vrot.slane %v13555_v16, 9  ;;  %v6112_v7 = vrot.slane %v13569_v4, 5 }
  0xe4   : > { %v13601_v21 = vsel %vm13026_vm9, %v1396_v48, %v1397_v6  ;;  %v10340_v42 = vld [vmem:[%s12425_s25 + $0x68] sm:$0x1]  ;;  %v13610_v8 = vsel %vm13502_vm12, %v6107_v52, %v6108_v46  ;;  %v1281_v45 = vld [vmem:[%s12425_s25 + $0x9c] sm:$0x8]  ;;  %v6115_v52 = vrot.slane %v10337_v0, 5  ;;  %v16469_v41 = vcombine.low %v13299_v61, %v13319_v30 }
  0xe5   : > { %16465 = vst [vmem:[#allocation16_spill] sm:$0xff] %v13601_v21  ;;  %v13614_v6 = vsel %vm13026_vm9, %v9720_v11, %v1401_v26  ;;  %v1403_v49 = vrot.slane %v1401_v26, 4  ;;  %v13620_v48 = vld [vmem:[%s16336_s1 + $0x8] sm:$0x3]  ;;  %v13630_v11 = vsel %vm13502_vm12, %v10377_v58, %v6112_v7  ;;  %v6114_v26 = vrot.slane %v6112_v7, 4 }
  0xe6   : > { %v1282_v4 = vld [vmem:[%s12425_s25 + $0xa4] sm:$0x7]  ;;  %v13634_v16 = vld [vmem:[%s12425_s25 + $0x6c] sm:$0xe]  ;;  %v16468_v21 = vcombine.low %v13238_v9, %v13252_v5  ;;  %v9721_v58 = vrot.slane %v1279_v50, 11  ;;  %v16471_v9 = vcombine.low %v13263_v54, %v13281_v13  ;;  %v10378_v30 = vrot.slane %v13594_v37, 9 }
  0xe7   : > { %11415 = vmatmul.mubr.msk.bf16.gmra.mrb[16].mxu0 %vm749_vm3, %v16466_v59  ;;  %16467 = vst [vmem:[#allocation17_spill] sm:$0xff] %v13634_v16  ;;  %v13646_v62 = vsel %vm13026_vm9, %v1403_v49, %v1404_v14  ;;  %v12242_v0 = vld [vmem:[%s12425_s25 + $0x94] sm:$0xf]  ;;  %v1411_v59 = vrot.slane %v1280_v53, 7  ;;  %v13650_v46 = vld [vmem:[%s12425_s25 + $0x70] sm:$0xf]  ;;  %v13661_v61 = vsel %vm13502_vm12, %v6114_v26, %v6115_v52 }
  0xe8   : > { %11127 = vmatmul.mubr.msk.bf16.vlgmr.msra.gmra.mrb[0].mxu1 %vm749_vm3, %v16468_v21  ;;  %11418 = vmatprep.mubr.msk.bf16.mxu0 %vm749_vm3, %v16469_v41  ;;  %v1408_v7 = vrot.slane %v12242_v0, 7  ;;  %16470 = vst [vmem:[#allocation18_spill] sm:$0xff] %v13650_v46  ;;  %v6119_v50 = vrot.slane %v13597_v18, 5  ;;  %v6122_v21 = vrot.slane %v10340_v42, 5  ;;  %v1283_v14 = vld [vmem:[%s12425_s25 + $0xa8] sm:$0x8] }
  0xe9   : > { %11159 = vmatpush3.bf16.msra.mxu1 %v13233_v44  ;;  %11130 = vmatprep.mubr.msk.bf16.mxu1 %vm749_vm3, %v16471_v9  ;;  %v10343_v44 = vld [vmem:[%s12425_s25 + $0x74] sm:$0x1]  ;;  %v1284_v49 = vld [vmem:[%s12425_s25 + $0xb0] sm:$0x7]  ;;  %v9722_v41 = vrot.slane %v1281_v45, 11  ;;  %v6126_v54 = vrot.slane %v13650_v46, 5 }
  0xea   : > { %v13670_v13 = vsel %vm13026_vm9, %v9721_v58, %v1408_v7  ;;  %v1410_v53 = vrot.slane %v1408_v7, 4  ;;  %12152 = vmatprep.subr.msk.bf16.mxu1 %vm798_vm0, %v13620_v48  ;;  %v13678_v26 = vsel %vm13502_vm12, %v10378_v30, %v6119_v50  ;;  %v6121_v52 = vrot.slane %v6119_v50, 4  ;;  %v12243_v0 = vld [vmem:[%s12425_s25 + $0xa0] sm:$0xf]  ;;  %v13682_v5 = vld [vmem:[%s12425_s25 + $0x78] sm:$0xe] }
  0xeb   : > { %v1415_v9 = vrot.slane %v12243_v0, 7  ;;  %16472 = vst [vmem:[#allocation19_spill] sm:$0xff] %v13682_v5  ;;  %v13685_v58 = vld [vmem:[%s12425_s25 + $0x7c] sm:$0xf]  ;;  %v1418_v7 = vrot.slane %v1282_v4, 7  ;;  %v10379_v30 = vrot.slane %v13634_v16, 9  ;;  %v16478_v4 = vcombine.low %v13313_v39, %v13329_v38 }
  0xec   : > { %16473 = vst [vmem:[#allocation20_spill] sm:$0xff] %v13685_v58  ;;  %v13689_v42 = vsel %vm13026_vm9, %v1410_v53, %v1411_v59  ;;  %v10346_v50 = vld [vmem:[%s12425_s25 + $0x80] sm:$0x1]  ;;  %v13698_v0 = vsel %vm13502_vm12, %v6121_v52, %v6122_v21  ;;  %v1285_v53 = vld [vmem:[%s12425_s25 + $0xb4] sm:$0x8]  ;;  %v6128_v16 = vrot.slane %v6126_v54, 4  ;;  %v16477_v52 = vcombine.low %v13333_v36, %v13346_v32 }
  0xed   : > { %16474 = vst [vmem:[#allocation21_spill] sm:$0xff] %v13689_v42  ;;  %v13702_v18 = vsel %vm13026_vm9, %v9722_v41, %v1415_v9  ;;  %v1417_v59 = vrot.slane %v1415_v9, 4  ;;  %v13709_v46 = vsel %vm13502_vm12, %v10379_v30, %v6126_v54  ;;  %v6129_v37 = vrot.slane %v10343_v44, 5  ;;  %v1286_v45 = vld [vmem:[%s12425_s25 + $0xbc] sm:$0x7] }
  0xee   : > { %v13713_v42 = vld [vmem:[%s12425_s25 + $0x84] sm:$0xe]  ;;  %v13716_v21 = vld [vmem:[%s12425_s25 + $0x88] sm:$0xf]  ;;  %v9723_v9 = vrot.slane %v1283_v14, 11  ;;  %v1425_v54 = vrot.slane %v1284_v49, 7  ;;  %v16479_v36 = vcombine.low %v13366_v28, %v13389_v57  ;;  %v16480_v28 = vcombine.low %v13341_v22, %v13354_v12 }
  0xef   : > { %16475 = vst [vmem:[#allocation22_spill] sm:$0xff] %v13713_v42  ;;  %16476 = vst [vmem:[#allocation23_spill] sm:$0xff] %v13716_v21  ;;  %11419 = vmatmul.mubr.msk.bf16.gmra.mrb[20].mxu0 %vm749_vm3, %v16477_v52  ;;  %v13724_v41 = vsel %vm13026_vm9, %v1417_v59, %v1418_v7  ;;  %v12244_v30 = vld [vmem:[%s12425_s25 + $0xac] sm:$0xf]  ;;  %v13739_v14 = vsel %vm13502_vm12, %v6128_v16, %v6129_v37  ;;  %v10380_v49 = vrot.slane %v13682_v5, 9  ;;  %v6133_v39 = vrot.slane %v13685_v58, 5 }
  0xf0   : > { %v1422_v44 = vrot.slane %v12244_v30, 7  ;;  %11131 = vmatmul.mubr.msk.bf16.gmra.mrb[4].mxu1 %vm749_vm3, %v16478_v4  ;;  %11422 = vmatprep.mubr.msk.bf16.mxu0 %vm749_vm3, %v16479_v36  ;;  %v10349_v38 = vld [vmem:[%s12425_s25 + $0x8c] sm:$0x1]  ;;  %v6136_v16 = vrot.slane %v10346_v50, 5  ;;  %v13755_v59 = vld [vmem:[%s12425_s25 + $0x18] sm:$0xe] }
  0xf1   : > { %11134 = vmatprep.mubr.msk.bf16.mxu1 %vm749_vm3, %v16480_v28  ;;  %16482 = vst [vmem:[#allocation25_spill] sm:$0xff] %v13755_v59  ;;  %v13758_v4 = vld [vmem:[%s12425_s25 + $0x1c] sm:$0xf]  ;;  %v9760_v52 = vld [vmem:[%s12425_s25 + $0x20] sm:$0x1]  ;;  %v13763_v22 = vsel %vm13502_vm12, %v10380_v49, %v6133_v39  ;;  %v6135_v12 = vrot.slane %v6133_v39, 4 }
  0xf2   : > { %v13752_v7 = vsel %vm13026_vm9, %v9723_v9, %v1422_v44  ;;  %v1424_v37 = vrot.slane %v1422_v44, 4  ;;  %16483 = vst [vmem:[#allocation26_spill] sm:$0xff] %v13758_v4  ;;  %v9724_v30 = vrot.slane %v1285_v53, 11  ;;  %v12245_v36 = vld [vmem:[%s12425_s25 + $0xb8] sm:$0xf]  ;;  %v1432_v44 = vrot.slane %v1286_v45, 7 }
  0xf3   : > { %16481 = vst [vmem:[#allocation24_spill] sm:$0xff] %v13752_v7  ;;  %v1429_v28 = vrot.slane %v12245_v36, 7  ;;  %v10350_v9 = vld [vmem:[%s12425_s25 + $0x90] sm:$0xe]  ;;  %v10351_v32 = vld [vmem:[%s12425_s25 + $0x94] sm:$0xf]  ;;  %v13779_v53 = vsel %vm13502_vm12, %v6135_v12, %v6136_v16  ;;  %v16485_v7 = vcombine.low %v13401_v47, %v13415_v60  ;;  %v16486_v47 = vcombine.low %v13379_v3, %v13397_v19 }
  0xf4   : > { %v13770_v50 = vsel %vm13026_vm9, %v1424_v37, %v1425_v54  ;;  %v10381_v57 = vrot.slane %v13713_v42, 9  ;;  %v6140_v49 = vrot.slane %v13716_v21, 5  ;;  %v10352_v58 = vld [vmem:[%s12425_s25 + $0x98] sm:$0x1]  ;;  %v9761_v37 = vld [vmem:[%s12425_s25 + $0x24] sm:$0xe]  ;;  %v16487_v60 = vcombine.low %v13430_v33, %v13458_v25 }
  0xf5   : > { %16484 = vst [vmem:[#allocation27_spill] sm:$0xff] %v13770_v50  ;;  %v13783_v36 = vsel %vm13026_vm9, %v9724_v30, %v1429_v28  ;;  %v1431_v54 = vrot.slane %v1429_v28, 4  ;;  %v9762_v5 = vld [vmem:[%s12425_s25 + $0x28] sm:$0xf]  ;;  %v6143_v16 = vrot.slane %v10349_v38, 5  ;;  %v9806_v28 = vrot.slane %v13755_v59, 9 }
  0xf6   : > { %v13791_v21 = vsel %vm13502_vm12, %v10381_v57, %v6140_v49  ;;  %v6142_v39 = vrot.slane %v6140_v49, 4  ;;  %v9763_v12 = vld [vmem:[%s12425_s25 + $0x2c] sm:$0x1]  ;;  %v10353_v42 = vld [vmem:[%s12425_s25 + $0x9c] sm:$0xe]  ;;  %v1830_v50 = vrot.slane %v13758_v4, 5 }
  0xf7   : > { %v13797_v30 = vsel %vm13026_vm9, %v1431_v54, %v1432_v44  ;;  %v1833_v45 = vrot.slane %v9760_v52, 5  ;;  %11423 = vmatmul.mubr.msk.bf16.gmra.mrb[24].mxu0 %vm749_vm3, %v16485_v7  ;;  %v10382_v44 = vrot.slane %v10350_v9, 9  ;;  %v6147_v49 = vrot.slane %v10351_v32, 5  ;;  %v10354_v54 = vld [vmem:[%s12425_s25 + $0xa0] sm:$0xf] }
  0xf8   : > { %v13809_v57 = vsel %vm13502_vm12, %v6142_v39, %v6143_v16  ;;  %v9764_v52 = vld [vmem:[%s12425_s25 + $0x30] sm:$0xe]  ;;  %11135 = vmatmul.mubr.msk.bf16.gmra.mrb[8].mxu1 %vm749_vm3, %v16486_v47  ;;  %11426 = vmatprep.mubr.msk.bf16.mxu0 %vm749_vm3, %v16487_v60  ;;  %v13826_v32 = vsel %vm13502_vm12, %v9806_v28, %v1830_v50  ;;  %v1832_v9 = vrot.slane %v1830_v50, 4  ;;  %v6150_v39 = vrot.slane %v10352_v58, 5  ;;  %v9765_v16 = vld [vmem:[%s12425_s25 + $0x34] sm:$0xf] }
  0xf9   : > { %v9766_v3 = vld [vmem:[%s12425_s25 + $0x38] sm:$0x1]  ;;  %v10356_v19 = vld [vmem:[%s12425_s25 + $0xa8] sm:$0xe]  ;;  %v16488_v47 = vcombine.low %v13409_v34, %v13422_v23  ;;  %v13837_v33 = vsel %vm13502_vm12, %v10382_v44, %v6147_v49  ;;  %v6149_v25 = vrot.slane %v6147_v49, 4  ;;  %v9807_v28 = vrot.slane %v9761_v37, 9 }
  0xfa   : > { %v1837_v60 = vrot.slane %v9762_v5, 5  ;;  %v10357_v38 = vld [vmem:[%s12425_s25 + $0xac] sm:$0xf]  ;;  %v13842_v58 = vsel %vm13502_vm12, %v1832_v9, %v1833_v45  ;;  %v1840_v50 = vrot.slane %v9763_v12, 5  ;;  %v13846_v34 = vsel %vm798_vm0, %v13620_v48, 0 }
  0xfb   : > { %11138 = vmatprep.mubr.msk.bf16.mxu1 %vm749_vm3, %v16488_v47  ;;  %16489 = vst [vmem:[#allocation28_spill] sm:$0xff] %v13846_v34  ;;  %v10383_v23 = vrot.slane %v10353_v42, 9  ;;  %v10358_v47 = vld [vmem:[%s12425_s25 + $0xb0] sm:$0x1]  ;;  %v9767_v7 = vld [vmem:[%s12425_s25 + $0x3c] sm:$0xe]  ;;  %v13854_v5 = vsel %vm13502_vm12, %v6149_v25, %v6150_v39 }
  0xfc   : > { %v13858_v37 = vsel %vm13502_vm12, %v9807_v28, %v1837_v60  ;;  %v1839_v45 = vrot.slane %v1837_v60, 4  ;;  %v9768_v12 = vld [vmem:[%s12425_s25 + $0x40] sm:$0xf]  ;;  %v6154_v42 = vrot.slane %v10354_v54, 5  ;;  %v6157_v49 = vrot.slane %v10355_v55, 5 }
  0xfd   : > { %v9808_v9 = vrot.slane %v9764_v52, 9  ;;  %v9769_v44 = vld [vmem:[%s12425_s25 + $0x44] sm:$0x1]  ;;  %v10359_v4 = vld [vmem:[%s12425_s25 + $0xb4] sm:$0xe]  ;;  %v1844_v25 = vrot.slane %v9765_v16, 5  ;;  %v16491_v16 = vcombine.low %v13474_v29, %v13492_v17  ;;  %v16493_v29 = vcombine.low %v13519_v40, %v13547_v51 }
  0xfe   : > { %v13867_v39 = vsel %vm13502_vm12, %v1839_v45, %v1840_v50  ;;  %v1847_v28 = vrot.slane %v9766_v3, 5  ;;  %v10384_v60 = vrot.slane %v10356_v19, 9  ;;  %v13873_v54 = vsel %vm13502_vm12, %v10383_v23, %v6154_v42  ;;  %v10360_v48 = vld [vmem:[%s12425_s25 + $0xb8] sm:$0xf]  ;;  %v10361_v34 = vld [vmem:[%s12425_s25 + $0xbc] sm:$0x1] }
  0xff   : > { %16490 = vst [vmem:[#allocation29_spill] sm:$0xff] %v13867_v39  ;;  %v6156_v55 = vrot.slane %v6154_v42, 4  ;;  %v6161_v52 = vrot.slane %v10357_v38, 5  ;;  %v9770_v50 = vld [vmem:[%s12425_s25 + $0x48] sm:$0xe]  ;;  %11427 = vmatmul.mubr.msk.bf16.gmra.mrb[28].mxu0 %vm749_vm3, %v16491_v16  ;;  %v13884_v3 = vsel %vm13502_vm12, %v9808_v9, %v1844_v25  ;;  %v1846_v19 = vrot.slane %v1844_v25, 4 }
 0x100   : > { %v6164_v45 = vrot.slane %v10358_v47, 5  ;;  %v9809_v59 = vrot.slane %v9767_v7, 9  ;;  %v9771_v23 = vld [vmem:[%s12425_s25 + $0x4c] sm:$0xf]  ;;  %v9772_v38 = vld [vmem:[%s12425_s25 + $0x50] sm:$0x1]  ;;  %v16492_v39 = vcombine.low %v13441_v15, %v13470_v1  ;;  %11432 = vmatprep.mubr.msk.bf16.mxu0 %vm749_vm3, %v16493_v29  ;;  %v16494_v15 = vcombine.low %v13484_v43, %v13500_v56 }
 0x101   : > { %v10362_v42 = vld [vmem:[%s12425_s25 + $0xc0] sm:$0xe]  ;;  %v13899_v17 = vsel %vm13502_vm12, %v6156_v55, %v6157_v49  ;;  %v13903_v7 = vsel %vm13502_vm12, %v10384_v60, %v6161_v52  ;;  %v6163_v47 = vrot.slane %v6161_v52, 4  ;;  %v1851_v9 = vrot.slane %v9768_v12, 5  ;;  %v10363_v25 = vld [vmem:[%s12425_s25 + $0xc4] sm:$0xf] }
 0x102   : > { %11139 = vmatmul.mubr.msk.bf16.gmra.mrb[12].mxu1 %vm749_vm3, %v16492_v39  ;;  %v13914_v40 = vsel %vm13502_vm12, %v1846_v19, %v1847_v28  ;;  %v1854_v51 = vrot.slane %v9769_v44, 5  ;;  %v10385_v49 = vrot.slane %v10359_v4, 9  ;;  %v10364_v39 = vld [vmem:[%s12425_s25 + $0xc8] sm:$0x1]  ;;  %v9773_v60 = vld [vmem:[%s12425_s25 + $0x54] sm:$0xe] }
 0x103   : > { %11142 = vmatprep.mubr.msk.bf16.mxu1 %vm749_vm3, %v16494_v15  ;;  %v13922_v43 = vsel %vm13502_vm12, %v6163_v47, %v6164_v45  ;;  %v13926_v56 = vsel %vm13502_vm12, %v9809_v59, %v1851_v9  ;;  %v1853_v55 = vrot.slane %v1851_v9, 4  ;;  %v9774_v52 = vld [vmem:[%s12425_s25 + $0x58] sm:$0xf]  ;;  %v6168_v44 = vrot.slane %v10360_v48, 5  ;;  %v9775_v19 = vld [vmem:[%s12425_s25 + $0x5c] sm:$0x1] }
 0x104   : > { %v6171_v28 = vrot.slane %v10361_v34, 5  ;;  %v9810_v16 = vrot.slane %v9770_v50, 9  ;;  %v10365_v29 = vld [vmem:[%s12425_s25 + $0xcc] sm:$0xe]  ;;  %v1858_v59 = vrot.slane %v9771_v23, 5  ;;  %v1861_v47 = vrot.slane %v9772_v38, 5 }
 0x105   : > { %v13935_v45 = vsel %vm13502_vm12, %v1853_v55, %v1854_v51  ;;  %v10386_v9 = vrot.slane %v10362_v42, 9  ;;  %v13941_v12 = vsel %vm13502_vm12, %v10385_v49, %v6168_v44  ;;  %v6170_v34 = vrot.slane %v6168_v44, 4  ;;  %v10366_v50 = vld [vmem:[%s12425_s25 + $0xd0] sm:$0xf]  ;;  %v10367_v4 = vld [vmem:[%s12425_s25 + $0xd4] sm:$0x1] }
 0x106   : > { %v6175_v48 = vrot.slane %v10363_v25, 5  ;;  %v9776_v1 = vld [vmem:[%s12425_s25 + $0x60] sm:$0xe]  ;;  %v13949_v51 = vld [vmem:[%s16336_s1 + $0x1a] sm:$0x3]  ;;  %v13953_v23 = vsel %vm13502_vm12, %v9810_v16, %v1858_v59  ;;  %v1860_v38 = vrot.slane %v1858_v59, 4  ;;  %v16495_v25 = vcombine.low %v13551_v24, %v13575_v35 }
 0x107   : > { %v6178_v42 = vrot.slane %v10364_v39, 5  ;;  %v9811_v49 = vrot.slane %v9773_v60, 9  ;;  %v9777_v55 = vld [vmem:[%s12425_s25 + $0x64] sm:$0xf]  ;;  %v9778_v44 = vld [vmem:[%s12425_s25 + $0x68] sm:$0x1]  ;;  %v13963_v15 = vsel %vm13502_vm12, %v6170_v34, %v6171_v28  ;;  %v16496_v60 = vcombine.low %v13530_v31, %v13565_v27 }
 0x108   : > { %11433 = vmatmul.mubr.msk.bf16.vlgmr.msra.gmra.mrb[0].mxu0 %vm749_vm3, %v16495_v25  ;;  %v13967_v16 = vsel %vm13502_vm12, %v10386_v9, %v6175_v48  ;;  %v6177_v59 = vrot.slane %v6175_v48, 4  ;;  %v1865_v39 = vrot.slane %v9774_v52, 5  ;;  %v13978_v35 = vsel %vm13502_vm12, %v1860_v38, %v1861_v47  ;;  %v10368_v34 = vld [vmem:[%s12425_s25 + $0xd8] sm:$0xe]  ;;  %v10369_v48 = vld [vmem:[%s12425_s25 + $0xdc] sm:$0xf] }
 0x109   : > { %11465 = vmatpush3.bf16.msra.mxu0 %v13534_v10  ;;  %v1868_v28 = vrot.slane %v9775_v19, 5  ;;  %v10387_v9 = vrot.slane %v10365_v29, 9  ;;  %v16497_v52 = vld [vmem:[#allocation16_spill] sm:$0xff]  ;;  %v16499_v31 = vcombine.low %v13590_v2, %v13610_v8  ;;  %v10370_v29 = vld [vmem:[%s12425_s25 + $0xe0] sm:$0x1]  ;;  %v6182_v8 = vrot.slane %v10366_v50, 5 }
 0x10a   : > { %11143 = vmatmul.mubr.msk.bf16.gmra.mrb[16].mxu1 %vm749_vm3, %v16496_v60  ;;  %v16498_v25 = vcombine.low %v13584_v20, %v16497_v52  ;;  %v13994_v27 = vsel %vm13502_vm12, %v6177_v59, %v6178_v42  ;;  %v13998_v19 = vsel %vm13502_vm12, %v9811_v49, %v1865_v39  ;;  %v1867_v20 = vrot.slane %v1865_v39, 4  ;;  %v9779_v60 = vld [vmem:[%s12425_s25 + $0x6c] sm:$0xe]  ;;  %12162 = vmatprep.subr.msk.bf16.mxu0 %vm798_vm0, %v13949_v51  ;;  %v9780_v52 = vld [vmem:[%s12425_s25 + $0x70] sm:$0xf] }
 0x10b   : > { %11436 = vmatprep.mubr.msk.bf16.mxu0 %vm749_vm3, %v16499_v31  ;;  %v6185_v47 = vrot.slane %v10367_v4, 5  ;;  %v9812_v38 = vrot.slane %v9776_v1, 9  ;;  %v1872_v49 = vrot.slane %v9777_v55, 5  ;;  %v1875_v59 = vrot.slane %v9778_v44, 5  ;;  %v9781_v31 = vld [vmem:[%s12425_s25 + $0x74] sm:$0x1] }
 0x10c   : > { %11146 = vmatprep.mubr.msk.bf16.mxu1 %vm749_vm3, %v16498_v25  ;;  %v14008_v42 = vsel %vm13502_vm12, %v1867_v20, %v1868_v28  ;;  %v10388_v39 = vrot.slane %v10368_v34, 9  ;;  %v14015_v1 = vsel %vm13502_vm12, %v10387_v9, %v6182_v8  ;;  %v6184_v4 = vrot.slane %v6182_v8, 4  ;;  %v10371_v10 = vld [vmem:[%s12425_s25 + $0xe4] sm:$0xe]  ;;  %v10372_v20 = vld [vmem:[%s12425_s25 + $0xe8] sm:$0xf] }
 0x10d   : > { %v6189_v50 = vrot.slane %v10369_v48, 5  ;;  %v14021_v28 = vsel %vm13502_vm12, %v9812_v38, %v1872_v49  ;;  %v1874_v55 = vrot.slane %v1872_v49, 4  ;;  %v6192_v44 = vrot.slane %v10370_v29, 5  ;;  %v10373_v2 = vld [vmem:[%s12425_s25 + $0xec] sm:$0x1] }
 0x10e   : > { %v9813_v34 = vrot.slane %v9779_v60, 9  ;;  %v14026_v25 = vsel %vm13502_vm12, %v6184_v4, %v6185_v47  ;;  %v1879_v8 = vrot.slane %v9780_v52, 5  ;;  %v9782_v24 = vld [vmem:[%s12425_s25 + $0x78] sm:$0xe]  ;;  %v16500_v38 = vcombine.low %v13630_v11, %v13661_v61  ;;  %v9784_v4 = vld [vmem:[%s12425_s25 + $0x80] sm:$0x1] }
 0x10f   : > { %v14030_v9 = vsel %vm13502_vm12, %v10388_v39, %v6189_v50  ;;  %v6191_v48 = vrot.slane %v6189_v50, 4  ;;  %v14042_v47 = vsel %vm13502_vm12, %v1874_v55, %v1875_v59  ;;  %v1882_v60 = vrot.slane %v9781_v31, 5  ;;  %v9783_v39 = vld [vmem:[%s12425_s25 + $0x7c] sm:$0xf] }
 0x110   : > { %11437 = vmatmul.mubr.msk.bf16.gmra.mrb[4].mxu0 %vm749_vm3, %v16500_v38  ;;  %v10389_v49 = vrot.slane %v10371_v10, 9  ;;  %v16501_v52 = vcombine.low %v13614_v6, %v13646_v62  ;;  %v16502_v11 = vcombine.low %v13678_v26, %v13698_v0  ;;  %v14062_v10 = vsel %vm13502_vm12, %v9813_v34, %v1879_v8  ;;  %v16503_v62 = vld [vmem:[#allocation21_spill] sm:$0xff]  ;;  %v9787_v26 = vld [vmem:[%s12425_s25 + $0x8c] sm:$0x1] }
 0x111   : > { %v14058_v59 = vsel %vm13502_vm12, %v6191_v48, %v6192_v44  ;;  %v1881_v6 = vrot.slane %v1879_v8, 4  ;;  %v16504_v50 = vcombine.low %v13670_v13, %v16503_v62  ;;  %v6196_v0 = vrot.slane %v10372_v20, 5  ;;  %v10423_v38 = vld [vmem:[%s12425_s25 + $0x38] sm:$0x3]  ;;  %v9785_v20 = vld [vmem:[%s12425_s25 + $0x84] sm:$0xe] }
 0x112   : > { %11147 = vmatmul.mubr.msk.bf16.gmra.mrb[20].mxu1 %vm749_vm3, %v16501_v52  ;;  %11440 = vmatprep.mubr.msk.bf16.mxu0 %vm749_vm3, %v16502_v11  ;;  %v6199_v31 = vrot.slane %v10373_v2, 5  ;;  %v9814_v55 = vrot.slane %v9782_v24, 9  ;;  %v1886_v34 = vrot.slane %v9783_v39, 5  ;;  %v1889_v48 = vrot.slane %v9784_v4, 5  ;;  %v16505_v8 = vld [vmem:[#allocation5_spill] sm:$0xff] }
 0x113   : > { %11150 = vmatprep.mubr.msk.bf16.mxu1 %vm749_vm3, %v16504_v50  ;;  %v14072_v44 = vsel %vm13502_vm12, %v1881_v6, %v1882_v60  ;;  %v6512_v52 = vshrl.u32 %v16505_v8, 16  ;;  %v14080_v11 = vsel %vm13502_vm12, %v10389_v49, %v6196_v0  ;;  %v6198_v2 = vrot.slane %v6196_v0, 4  ;;  %v16506_v6 = vld [vmem:[#allocation7_spill] sm:$0xff] }
 0x114   : > { %v6515_v24 = vshll.u32 %v16505_v8, 16  ;;  %v14086_v60 = vsel %vm13502_vm12, %v9814_v55, %v1886_v34  ;;  %v1888_v39 = vrot.slane %v1886_v34, 4  ;;  %v6521_v62 = vshrl.u32 %v16506_v6, 16  ;;  %v9786_v50 = vld [vmem:[%s12425_s25 + $0x88] sm:$0xf] }
 0x115   : > { %v6514_v4 = vrot.slane %v6512_v52, 5  ;;  %v14092_v13 = vsel %vm13502_vm12, %v6198_v2, %v6199_v31  ;;  %v6524_v49 = vshll.u32 %v16506_v6, 16  ;;  %v6531_v0 = vshrl.u32 %v10423_v38, 16 }
 0x116   : > { %v6517_v61 = vrot.slane %v6515_v24, 6  ;;  %v14100_v55 = vsel %vm13502_vm12, %v1888_v39, %v1889_v48  ;;  %v6523_v34 = vrot.slane %v6521_v62, 5  ;;  %v6534_v52 = vshll.u32 %v10423_v38, 16  ;;  %v16510_v39 = vld [vmem:[#allocation24_spill] sm:$0xff]  ;;  %v16511_v62 = vld [vmem:[#allocation27_spill] sm:$0xff] }
 0x117   : > { %v16507_v29 = vcombine.low %v13709_v46, %v13739_v14  ;;  %v6526_v24 = vrot.slane %v6524_v49, 6  ;;  %v6533_v6 = vrot.slane %v6531_v0, 5  ;;  %v16508_v8 = vcombine.low %v13702_v18, %v13724_v41  ;;  %v10424_v18 = vld [vmem:[%s12425_s25 + $0x44] sm:$0x3]  ;;  %v16513_v41 = vld [vmem:[#allocation8_spill] sm:$0xff] }
 0x118   : > { %v6518_v2 = vor.u32 %v6517_v61, %v6514_v4  ;;  %v16509_v48 = vcombine.low %v13763_v22, %v13779_v53  ;;  %v6536_v38 = vrot.slane %v6534_v52, 6  ;;  %v9815_v46 = vrot.slane %v9785_v20, 9 }
 0x119   : > { %11441 = vmatmul.mubr.msk.bf16.gmra.mrb[8].mxu0 %vm749_vm3, %v16507_v29  ;;  %v1893_v14 = vrot.slane %v9786_v50, 5  ;;  %v1896_v29 = vrot.slane %v9787_v26, 5  ;;  %v16512_v61 = vcombine.low %v16510_v39, %v16511_v62  ;;  %v6527_v49 = vor.u32 %v6526_v24, %v6523_v34  ;;  %v16514_v26 = vld [vmem:[#allocation6_spill] sm:$0xff]  ;;  %v9789_v39 = vld [vmem:[%s12425_s25 + $0x94] sm:$0xf] }
 0x11a   : > { %11151 = vmatmul.mubr.msk.bf16.gmra.mrb[24].mxu1 %vm749_vm3, %v16508_v8  ;;  %11444 = vmatprep.mubr.msk.bf16.mxu0 %vm749_vm3, %v16509_v48  ;;  %v6519_v4 = vrot.slane %v6518_v2, 4  ;;  %v6540_v0 = vshrl.u32 %v16513_v41, 16  ;;  %v6543_v22 = vshll.u32 %v16513_v41, 16  ;;  %v6537_v53 = vor.u32 %v6536_v38, %v6533_v6 }
 0x11b   : > { %11154 = vmatprep.mubr.msk.bf16.mxu1 %vm749_vm3, %v16512_v61  ;;  %v14125_v20 = vsel %vm13502_vm12, %v9815_v46, %v1893_v14  ;;  %v1895_v50 = vrot.slane %v1893_v14, 4  ;;  %v6549_v8 = vshrl.u32 %v16514_v26, 16  ;;  %v6529_v2 = vrot.slane %v6527_v49, 4  ;;  %v9788_v61 = vld [vmem:[%s12425_s25 + $0x90] sm:$0xe] }
 0x11c   : > { %v6528_v48 = vsel %vm12448_vm4, %v6519_v4, %v6527_v49  ;;  %v6542_v34 = vrot.slane %v6540_v0, 5  ;;  %v6545_v24 = vrot.slane %v6543_v22, 6  ;;  %v6552_v38 = vshll.u32 %v16514_v26, 16  ;;  %v9790_v0 = vld [vmem:[%s12425_s25 + $0x98] sm:$0x1] }
 0x11d   : > { %v14133_v62 = vsel %vm13502_vm12, %v1895_v50, %v1896_v29  ;;  %v6551_v6 = vrot.slane %v6549_v8, 5  ;;  %v6559_v46 = vshrl.u32 %v10424_v18, 16  ;;  %v6538_v14 = vsel %vm12448_vm4, %v6529_v2, %v6537_v53 }
 0x11e   : > { %v9832_v41 = vcombine.low %v14125_v20, %v14133_v62  ;;  %v6546_v4 = vor.u32 %v6545_v24, %v6542_v34  ;;  %v6562_v49 = vshll.u32 %v10424_v18, 16  ;;  %v14142_v22 = vcombine.low %v6528_v48, %v6538_v14  ;;  %v16519_v24 = vld [vmem:[#allocation10_spill] sm:$0xff] }
 0x11f   : > { %v6554_v31 = vrot.slane %v6552_v38, 6  ;;  %v6561_v29 = vrot.slane %v6559_v46, 5  ;;  %v14146_v50 = vsel %vm798_vm0, %v13949_v51, 0  ;;  %v16516_v26 = vcombine.low %v13791_v21, %v13809_v57  ;;  %v10425_v57 = vld [vmem:[%s12425_s25 + $0x50] sm:$0x3] }
 0x120   : > { %v6547_v53 = vrot.slane %v6546_v4, 4  ;;  %v6564_v8 = vrot.slane %v6562_v49, 6  ;;  %v9816_v2 = vrot.slane %v9788_v61, 9  ;;  %v1900_v34 = vrot.slane %v9789_v39, 5 }
 0x121   : > { %11445 = vmatmul.mubr.msk.bf16.gmra.mrb[12].mxu0 %vm749_vm3, %v16516_v26  ;;  %v16517_v18 = vcombine.low %v13783_v36, %v13797_v30  ;;  %v16518_v48 = vcombine.low %v13837_v33, %v13854_v5  ;;  %v6555_v51 = vor.u32 %v6554_v31, %v6551_v6  ;;  %v1903_v21 = vrot.slane %v9790_v0, 5  ;;  %v16521_v5 = vld [vmem:[#allocation11_spill] sm:$0xff]  ;;  %v9791_v6 = vld [vmem:[%s12425_s25 + $0x9c] sm:$0xe]  ;;  %v9792_v0 = vld [vmem:[%s12425_s25 + $0xa0] sm:$0xf] }
 0x122   : > { %v6568_v38 = vshrl.u32 %v16519_v24, 16  ;;  %v6571_v46 = vshll.u32 %v16519_v24, 16  ;;  %v16520_v39 = vcombine.low %v13826_v32, %v13842_v58  ;;  %v6565_v36 = vor.u32 %v6564_v8, %v6561_v29  ;;  %v9793_v8 = vld [vmem:[%s12425_s25 + $0xa4] sm:$0x1] }
 0x123   : > { %11155 = vmatmul.mubr.msk.bf16.gmra.mrb[28].mxu1 %vm749_vm3, %v16517_v18  ;;  %11448 = vmatprep.mubr.msk.bf16.mxu0 %vm749_vm3, %v16518_v48  ;;  %v14169_v30 = vsel %vm13502_vm12, %v9816_v2, %v1900_v34  ;;  %v1902_v33 = vrot.slane %v1900_v34, 4  ;;  %v6577_v31 = vshrl.u32 %v16521_v5, 16  ;;  %v6556_v61 = vsel %vm12448_vm4, %v6547_v53, %v6555_v51 }
 0x124   : > { %11160 = vmatprep.mubr.msk.bf16.mxu1 %vm749_vm3, %v16520_v39  ;;  %v6557_v14 = vrot.slane %v6555_v51, 4  ;;  %v6570_v4 = vrot.slane %v6568_v38, 5  ;;  %v6573_v49 = vrot.slane %v6571_v46, 6  ;;  %v6580_v29 = vshll.u32 %v16521_v5, 16  ;;  %v10426_v5 = vld [vmem:[%s12425_s25 + $0x5c] sm:$0x3] }
 0x125   : > { %v14178_v32 = vsel %vm13502_vm12, %v1902_v33, %v1903_v21  ;;  %v6579_v58 = vrot.slane %v6577_v31, 5  ;;  %v6587_v26 = vshrl.u32 %v10425_v57, 16  ;;  %v6590_v18 = vshll.u32 %v10425_v57, 16 }
 0x126   : > { %v6566_v2 = vsel %vm12448_vm4, %v6557_v14, %v6565_v36  ;;  %v9833_v53 = vcombine.low %v14169_v30, %v14178_v32  ;;  %v6574_v34 = vor.u32 %v6573_v49, %v6570_v4  ;;  %v6582_v51 = vrot.slane %v6580_v29, 6  ;;  %v16523_v14 = vld [vmem:[#allocation12_spill] sm:$0xff] }
 0x127   : > { %v14186_v48 = vcombine.low %v6556_v61, %v6566_v2  ;;  %v6589_v24 = vrot.slane %v6587_v26, 5  ;;  %v9817_v21 = vrot.slane %v9791_v6, 9  ;;  %v6592_v46 = vrot.slane %v6590_v18, 6  ;;  %v16524_v61 = vld [vmem:[#allocation13_spill] sm:$0xff]  ;;  %v14199_v6 = vld [vmem:[%s16336_s1 + $0xa] sm:$0x3] }
 0x128   : > { %v6575_v38 = vrot.slane %v6574_v34, 4  ;;  %v1907_v39 = vrot.slane %v9792_v0, 5  ;;  %v1910_v33 = vrot.slane %v9793_v8, 5  ;;  %v16522_v31 = vcombine.low %v13873_v54, %v13899_v17  ;;  %v16525_v0 = vld [vmem:[#allocation29_spill] sm:$0xff]  ;;  %v9795_v2 = vld [vmem:[%s12425_s25 + $0xac] sm:$0xf] }
 0x129   : > { %v6583_v36 = vor.u32 %v6582_v51, %v6579_v58  ;;  %v6596_v4 = vshrl.u32 %v16523_v14, 16  ;;  %v6599_v57 = vshll.u32 %v16523_v14, 16  ;;  %v6605_v49 = vshrl.u32 %v16524_v61, 16  ;;  %v16528_v34 = vld [vmem:[#allocation28_spill] sm:$0xff] }
 0x12a   : > { %11449 = vmatmul.mubr.msk.bf16.gmra.mrb[16].mxu0 %vm749_vm3, %v16522_v31  ;;  %v16526_v29 = vcombine.low %v13858_v37, %v16525_v0  ;;  %v16527_v54 = vcombine.low %v13903_v7, %v13922_v43  ;;  %v6593_v17 = vor.u32 %v6592_v46, %v6589_v24  ;;  %v14211_v58 = vsel %vm13502_vm12, %v9817_v21, %v1907_v39  ;;  %v9794_v24 = vld [vmem:[%s12425_s25 + $0xa8] sm:$0xe]  ;;  %v9796_v14 = vld [vmem:[%s12425_s25 + $0xb0] sm:$0x1] }
 0x12b   : > { %v1909_v26 = vrot.slane %v1907_v39, 4  ;;  %v6608_v8 = vshll.u32 %v16524_v61, 16  ;;  %v16529_v37 = vcombine.low %v13884_v3, %v13914_v40  ;;  %v6584_v7 = vsel %vm12448_vm4, %v6575_v38, %v6583_v36 }
 0x12c   : > { %11161 = vmatmul.mubr.msk.bf16.vlgmr.msra.gmra.mrb[0].mxu1 %vm749_vm3, %v16526_v29  ;;  %11452 = vmatprep.mubr.msk.bf16.mxu0 %vm749_vm3, %v16527_v54  ;;  %v6585_v43 = vrot.slane %v6583_v36, 4  ;;  %v6598_v18 = vrot.slane %v6596_v4, 5  ;;  %v6601_v51 = vrot.slane %v6599_v57, 6  ;;  %v6607_v46 = vrot.slane %v6605_v49, 5 }
 0x12d   : > { %11193 = vmatpush3.bf16.msra.mxu1 %v16528_v34  ;;  %11164 = vmatprep.mubr.msk.bf16.mxu1 %vm749_vm3, %v16529_v37  ;;  %v14225_v21 = vsel %vm13502_vm12, %v1909_v26, %v1910_v33  ;;  %v6610_v39 = vrot.slane %v6608_v8, 6  ;;  %v6615_v31 = vshrl.u32 %v10426_v5, 16  ;;  %v6618_v36 = vshll.u32 %v10426_v5, 16  ;;  %v10427_v8 = vld [vmem:[%s12425_s25 + $0x68] sm:$0x3]  ;;  %v16530_v34 = vld [vmem:[#allocation14_spill] sm:$0xff] }
 0x12e   : > { %12153 = vmatprep.subr.msk.bf16.mxu1 %vm798_vm0, %v14199_v6  ;;  %v6594_v3 = vsel %vm12448_vm4, %v6585_v43, %v6593_v17  ;;  %v9834_v40 = vcombine.low %v14211_v58, %v14225_v21  ;;  %v6602_v38 = vor.u32 %v6601_v51, %v6598_v18  ;;  %v9818_v61 = vrot.slane %v9794_v24, 9  ;;  %v16531_v43 = vld [vmem:[#allocation15_spill] sm:$0xff] }
 0x12f   : > { %v14234_v4 = vcombine.low %v6584_v7, %v6594_v3  ;;  %v6611_v33 = vor.u32 %v6610_v39, %v6607_v46  ;;  %v6617_v57 = vrot.slane %v6615_v31, 5  ;;  %v6620_v0 = vrot.slane %v6618_v36, 6  ;;  %v9797_v46 = vld [vmem:[%s12425_s25 + $0xb4] sm:$0xe] }
 0x130   : > { %v6603_v49 = vrot.slane %v6602_v38, 4  ;;  %v1914_v29 = vrot.slane %v9795_v2, 5  ;;  %v1917_v54 = vrot.slane %v9796_v14, 5  ;;  %v6624_v17 = vshrl.u32 %v16530_v34, 16  ;;  %v9798_v38 = vld [vmem:[%s12425_s25 + $0xb8] sm:$0xf] }
 0x131   : > { %v6613_v26 = vrot.slane %v6611_v33, 4  ;;  %v6627_v37 = vshll.u32 %v16530_v34, 16  ;;  %v6633_v18 = vshrl.u32 %v16531_v43, 16  ;;  %v16532_v5 = vcombine.low %v13941_v12, %v13963_v15 }
 0x132   : > { %v6612_v7 = vsel %vm12448_vm4, %v6603_v49, %v6611_v33  ;;  %v6621_v51 = vor.u32 %v6620_v0, %v6617_v57  ;;  %v14248_v2 = vsel %vm13502_vm12, %v9818_v61, %v1914_v29  ;;  %v1916_v24 = vrot.slane %v1914_v29, 4  ;;  %v9799_v33 = vld [vmem:[%s12425_s25 + $0xbc] sm:$0x1] }
 0x133   : > { %11453 = vmatmul.mubr.msk.bf16.gmra.mrb[20].mxu0 %vm749_vm3, %v16532_v5  ;;  %v16533_v39 = vcombine.low %v13926_v56, %v13935_v45  ;;  %v16534_v12 = vcombine.low %v13967_v16, %v13994_v27  ;;  %v6626_v15 = vrot.slane %v6624_v17, 5  ;;  %v6629_v31 = vrot.slane %v6627_v37, 6  ;;  %v10428_v37 = vld [vmem:[%s12425_s25 + $0x74] sm:$0x3] }
 0x134   : > { %v6635_v14 = vrot.slane %v6633_v18, 5  ;;  %v6636_v3 = vshll.u32 %v16531_v43, 16  ;;  %v16535_v36 = vcombine.low %v13953_v23, %v13978_v35  ;;  %v6622_v56 = vsel %vm12448_vm4, %v6613_v26, %v6621_v51  ;;  %v16536_v43 = vld [vmem:[#allocation17_spill] sm:$0xff] }
 0x135   : > { %11165 = vmatmul.mubr.msk.bf16.gmra.mrb[4].mxu1 %vm749_vm3, %v16533_v39  ;;  %11456 = vmatprep.mubr.msk.bf16.mxu0 %vm749_vm3, %v16534_v12  ;;  %v14269_v45 = vsel %vm13502_vm12, %v1916_v24, %v1917_v54  ;;  %v6643_v16 = vshrl.u32 %v10427_v8, 16  ;;  %v6646_v27 = vshll.u32 %v10427_v8, 16  ;;  %v14272_v57 = vcombine.low %v6612_v7, %v6622_v56  ;;  %v9801_v24 = vld [vmem:[%s12425_s25 + $0xc4] sm:$0xf] }
 0x136   : > { %11168 = vmatprep.mubr.msk.bf16.mxu1 %vm749_vm3, %v16535_v36  ;;  %v9835_v61 = vcombine.low %v14248_v2, %v14269_v45  ;;  %v6630_v23 = vor.u32 %v6629_v31, %v6626_v15  ;;  %v6638_v35 = vrot.slane %v6636_v3, 6  ;;  %v9819_v29 = vrot.slane %v9797_v46, 9  ;;  %v16537_v15 = vld [vmem:[#allocation18_spill] sm:$0xff] }
 0x137   : > { %v6645_v49 = vrot.slane %v6643_v16, 5  ;;  %v6648_v0 = vrot.slane %v6646_v27, 6  ;;  %v1921_v26 = vrot.slane %v9798_v38, 5  ;;  %v1924_v54 = vrot.slane %v9799_v33, 5  ;;  %v9802_v27 = vld [vmem:[%s12425_s25 + $0xc8] sm:$0x1] }
 0x138   : > { %v6631_v34 = vrot.slane %v6630_v23, 4  ;;  %v6639_v17 = vor.u32 %v6638_v35, %v6635_v14  ;;  %v6652_v8 = vshrl.u32 %v16536_v43, 16  ;;  %v6655_v51 = vshll.u32 %v16536_v43, 16  ;;  %v9800_v14 = vld [vmem:[%s12425_s25 + $0xc0] sm:$0xe] }
 0x139   : > { %v6649_v18 = vor.u32 %v6648_v0, %v6645_v49  ;;  %v14280_v5 = vsel %vm13502_vm12, %v9819_v29, %v1921_v26  ;;  %v1923_v7 = vrot.slane %v1921_v26, 4  ;;  %v6661_v31 = vshrl.u32 %v16537_v15, 16 }
 0x13a   : > { %v6640_v46 = vsel %vm12448_vm4, %v6631_v34, %v6639_v17  ;;  %v6641_v39 = vrot.slane %v6639_v17, 4  ;;  %v6654_v12 = vrot.slane %v6652_v8, 5  ;;  %v16538_v3 = vcombine.low %v14015_v1, %v14026_v25  ;;  %v10429_v8 = vld [vmem:[%s12425_s25 + $0x80] sm:$0x3] }
 0x13b   : > { %v14294_v38 = vsel %vm13502_vm12, %v1923_v7, %v1924_v54  ;;  %v6657_v36 = vrot.slane %v6655_v51, 6  ;;  %v6664_v56 = vshll.u32 %v16537_v15, 16  ;;  %v6671_v16 = vshrl.u32 %v10428_v37, 16 }
 0x13c   : > { %11457 = vmatmul.mubr.msk.bf16.gmra.mrb[24].mxu0 %vm749_vm3, %v16538_v3  ;;  %v16539_v33 = vcombine.low %v13998_v19, %v14008_v42  ;;  %v16540_v23 = vcombine.low %v14030_v9, %v14058_v59  ;;  %v6650_v25 = vsel %vm12448_vm4, %v6641_v39, %v6649_v18  ;;  %v9836_v1 = vcombine.low %v14280_v5, %v14294_v38  ;;  %v9804_v3 = vld [vmem:[%s12425_s25 + $0xd0] sm:$0xf] }
 0x13d   : > { %v6663_v35 = vrot.slane %v6661_v31, 5  ;;  %v6674_v49 = vshll.u32 %v10428_v37, 16  ;;  %v16541_v0 = vcombine.low %v14021_v28, %v14042_v47  ;;  %v14314_v19 = vcombine.low %v6640_v46, %v6650_v25  ;;  %v16542_v37 = vld [vmem:[#allocation19_spill] sm:$0xff]  ;;  %v16543_v46 = vld [vmem:[#allocation20_spill] sm:$0xff] }
 0x13e   : > { %11169 = vmatmul.mubr.msk.bf16.gmra.mrb[8].mxu1 %vm749_vm3, %v16539_v33  ;;  %11460 = vmatprep.mubr.msk.bf16.mxu0 %vm749_vm3, %v16540_v23  ;;  %v6658_v42 = vor.u32 %v6657_v36, %v6654_v12  ;;  %v6666_v9 = vrot.slane %v6664_v56, 6  ;;  %v6673_v59 = vrot.slane %v6671_v16, 5  ;;  %v9820_v26 = vrot.slane %v9800_v14, 9  ;;  %v9803_v12 = vld [vmem:[%s12425_s25 + $0xcc] sm:$0xe] }
 0x13f   : > { %11172 = vmatprep.mubr.msk.bf16.mxu1 %vm749_vm3, %v16541_v0  ;;  %v6676_v29 = vrot.slane %v6674_v49, 6  ;;  %v1928_v34 = vrot.slane %v9801_v24, 5  ;;  %v1931_v17 = vrot.slane %v9802_v27, 5  ;;  %v6680_v18 = vshrl.u32 %v16542_v37, 16  ;;  %v9805_v33 = vld [vmem:[%s12425_s25 + $0xd4] sm:$0x1] }
 0x140   : > { %v6659_v54 = vrot.slane %v6658_v42, 4  ;;  %v6667_v43 = vor.u32 %v6666_v9, %v6663_v35  ;;  %v6683_v28 = vshll.u32 %v16542_v37, 16  ;;  %v6689_v39 = vshrl.u32 %v16543_v46, 16  ;;  %v16548_v37 = vld [vmem:[#allocation23_spill] sm:$0xff] }
 0x141   : > { %v6677_v47 = vor.u32 %v6676_v29, %v6673_v59  ;;  %v14321_v7 = vsel %vm13502_vm12, %v9820_v26, %v1928_v34  ;;  %v1930_v51 = vrot.slane %v1928_v34, 4  ;;  %v6682_v31 = vrot.slane %v6680_v18, 5 }
 0x142   : > { %v6668_v24 = vsel %vm12448_vm4, %v6659_v54, %v6667_v43  ;;  %v6669_v15 = vrot.slane %v6667_v43, 4  ;;  %v6685_v14 = vrot.slane %v6683_v28, 6  ;;  %v6691_v56 = vrot.slane %v6689_v39, 5  ;;  %v16547_v43 = vld [vmem:[#allocation22_spill] sm:$0xff] }
 0x143   : > { %v14330_v36 = vsel %vm13502_vm12, %v1930_v51, %v1931_v17  ;;  %v6692_v16 = vshll.u32 %v16543_v46, 16  ;;  %v6699_v27 = vshrl.u32 %v10429_v8, 16  ;;  %v16544_v23 = vcombine.low %v14080_v11, %v14092_v13 }
 0x144   : > { %v6678_v25 = vsel %vm12448_vm4, %v6669_v15, %v6677_v47  ;;  %v9837_v35 = vcombine.low %v14321_v7, %v14330_v36  ;;  %v6686_v49 = vor.u32 %v6685_v14, %v6682_v31  ;;  %v6702_v0 = vshll.u32 %v10429_v8, 16  ;;  %v9857_v7 = vld [vmem:[%s12425_s25 + $0x38] sm:$0x3] }
 0x145   : > { %11461 = vmatmul.mubr.msk.bf16.gmra.mrb[28].mxu0 %vm749_vm3, %v16544_v23  ;;  %v16545_v42 = vcombine.low %v14062_v10, %v14072_v44  ;;  %v14348_v13 = vcombine.low %v6668_v24, %v6678_v25  ;;  %v6694_v11 = vrot.slane %v6692_v16, 6  ;;  %v6701_v9 = vrot.slane %v6699_v27, 5  ;;  %v10430_v44 = vld [vmem:[%s12425_s25 + $0x8c] sm:$0x3] }
 0x146   : > { %11466 = vmatprep.mubr.msk.bf16.mxu0 %vm749_vm3, %v14142_v22  ;;  %v9821_v59 = vrot.slane %v9803_v12, 9  ;;  %v16546_v29 = vcombine.low %v14086_v60, %v14100_v55  ;;  %v6687_v26 = vrot.slane %v6686_v49, 4  ;;  %v6704_v34 = vrot.slane %v6702_v0, 6  ;;  %v16549_v0 = vld [vmem:[#allocation25_spill] sm:$0xff] }
 0x147   : > { %11173 = vmatmul.mubr.msk.bf16.gmra.mrb[12].mxu1 %vm749_vm3, %v16545_v42  ;;  %v1935_v17 = vrot.slane %v9804_v3, 5  ;;  %v1938_v54 = vrot.slane %v9805_v33, 5  ;;  %v6695_v10 = vor.u32 %v6694_v11, %v6691_v56  ;;  %v6708_v8 = vshrl.u32 %v16547_v43, 16  ;;  %v9855_v33 = vld [vmem:[%s12425_s25 + $0x20] sm:$0x3] }
 0x148   : > { %11176 = vmatprep.mubr.msk.bf16.mxu1 %vm749_vm3, %v16546_v29  ;;  %v6711_v22 = vshll.u32 %v16547_v43, 16  ;;  %v6717_v18 = vshrl.u32 %v16548_v37, 16  ;;  %v6705_v28 = vor.u32 %v6704_v34, %v6701_v9  ;;  %v6720_v55 = vshll.u32 %v16548_v37, 16  ;;  %v14382_v11 = vld [vmem:[%s16336_s1 + $0x1c] sm:$0x3]  ;;  %v16550_v29 = vld [vmem:[#allocation26_spill] sm:$0xff] }
 0x149   : > { %v14360_v47 = vsel %vm13502_vm12, %v9821_v59, %v1935_v17  ;;  %v1937_v60 = vrot.slane %v1935_v17, 4  ;;  %v6696_v51 = vsel %vm12448_vm4, %v6687_v26, %v6695_v10  ;;  %v6697_v46 = vrot.slane %v6695_v10, 4  ;;  %v10431_v37 = vld [vmem:[%s12425_s25 + $0x98] sm:$0x3] }
 0x14a   : > { %v6710_v39 = vrot.slane %v6708_v8, 5  ;;  %v6713_v12 = vrot.slane %v6711_v22, 6  ;;  %v6719_v15 = vrot.slane %v6717_v18, 5  ;;  %v6722_v31 = vrot.slane %v6720_v55, 6 }
 0x14b   : > { %v14367_v24 = vsel %vm13502_vm12, %v1937_v60, %v1938_v54  ;;  %v6727_v14 = vshrl.u32 %v10430_v44, 16  ;;  %v6706_v3 = vsel %vm12448_vm4, %v6697_v46, %v6705_v28  ;;  %v6730_v27 = vshll.u32 %v10430_v44, 16  ;;  %v12248_v28 = vld [vmem:[%s12425_s25 + $0x94] sm:$0xf] }
 0x14c   : > { %v9838_v56 = vcombine.low %v14360_v47, %v14367_v24  ;;  %v6714_v16 = vor.u32 %v6713_v12, %v6710_v39  ;;  %v14376_v23 = vcombine.low %v6696_v51, %v6706_v3  ;;  %v6723_v25 = vor.u32 %v6722_v31, %v6719_v15 }
 0x14d   : > { %11467 = vmatmul.mubr.msk.bf16.vlgmr.msra.gmra.mrb[0].mxu0 %vm749_vm3, %v14186_v48  ;;  %v6729_v49 = vrot.slane %v6727_v14, 5  ;;  %v2251_v42 = vshrl.u32 %v16549_v0, 16  ;;  %v6732_v9 = vrot.slane %v6730_v27, 6  ;;  %v2254_v59 = vshll.u32 %v16549_v0, 16 }
 0x14e   : > { %11499 = vmatpush3.bf16.msra.mxu0 %v14146_v50  ;;  %v6715_v48 = vrot.slane %v6714_v16, 4  ;;  %v2260_v26 = vshrl.u32 %v16550_v29, 16  ;;  %11470 = vmatprep.mubr.msk.bf16.mxu0 %vm749_vm3, %v14234_v4  ;;  %v6725_v20 = vrot.slane %v6723_v25, 4  ;;  %v2270_v34 = vshrl.u32 %v9855_v33, 16  ;;  %v12247_v4 = vld [vmem:[%s12425_s25 + $0x90] sm:$0xe] }
 0x14f   : > { %11177 = vmatmul.mubr.msk.bf16.gmra.mrb[16].mxu1 %vm749_vm3, %v9832_v41  ;;  %v2253_v62 = vrot.slane %v2251_v42, 5  ;;  %v12246_v41 = vld [vmem:[%s12425_s25 + $0x1c] sm:$0xf]  ;;  %v6733_v54 = vor.u32 %v6732_v9, %v6729_v49  ;;  %v2256_v10 = vrot.slane %v2254_v59, 6  ;;  %12163 = vmatprep.subr.msk.bf16.mxu0 %vm798_vm0, %v14382_v11  ;;  %v6736_v43 = vshrl.u32 %v12247_v4, 16 }
 0x150   : > { %11180 = vmatprep.mubr.msk.bf16.mxu1 %vm749_vm3, %v9833_v53  ;;  %v2263_v50 = vshll.u32 %v12246_v41, 16  ;;  %v6724_v17 = vsel %vm12448_vm4, %v6715_v48, %v6723_v25  ;;  %v2262_v44 = vrot.slane %v2260_v26, 5  ;;  %v2272_v32 = vrot.slane %v2270_v34, 5  ;;  %v9856_v48 = vld [vmem:[%s12425_s25 + $0x2c] sm:$0x3] }
 0x151   : > { %v2273_v53 = vshll.u32 %v9855_v33, 16  ;;  %v6734_v8 = vsel %vm12448_vm4, %v6725_v20, %v6733_v54  ;;  %v2257_v22 = vor.u32 %v2256_v10, %v2253_v62  ;;  %v6739_v18 = vshll.u32 %v12247_v4, 16  ;;  %v12250_v41 = vld [vmem:[%s12425_s25 + $0x28] sm:$0xf] }
 0x152   : > { %v2265_v30 = vrot.slane %v2263_v50, 6  ;;  %v6745_v60 = vshrl.u32 %v12248_v28, 16  ;;  %v14407_v55 = vcombine.low %v6724_v17, %v6734_v8  ;;  %v6738_v39 = vrot.slane %v6736_v43, 5  ;;  %v10432_v43 = vld [vmem:[%s12425_s25 + $0xa4] sm:$0x3] }
 0x153   : > { %v2275_v46 = vrot.slane %v2273_v53, 6  ;;  %v2258_v12 = vrot.slane %v2257_v22, 4  ;;  %v6741_v15 = vrot.slane %v6739_v18, 6  ;;  %v6748_v14 = vshll.u32 %v12248_v28, 16  ;;  %v12251_v8 = vld [vmem:[%s12425_s25 + $0x9c] sm:$0xe] }
 0x154   : > { %v2266_v51 = vor.u32 %v2265_v30, %v2262_v44  ;;  %v6747_v31 = vrot.slane %v6745_v60, 5  ;;  %v6755_v27 = vshrl.u32 %v10431_v37, 16  ;;  %v6758_v33 = vshll.u32 %v10431_v37, 16 }
 0x155   : > { %11471 = vmatmul.mubr.msk.bf16.gmra.mrb[4].mxu0 %vm749_vm3, %v14272_v57  ;;  %v2276_v16 = vor.u32 %v2275_v46, %v2272_v32  ;;  %v6742_v49 = vor.u32 %v6741_v15, %v6738_v39  ;;  %v6750_v0 = vrot.slane %v6748_v14, 6  ;;  %v12249_v57 = vld [vmem:[%s12425_s25 + $0x24] sm:$0xe]  ;;  %v2288_v2 = vshrl.u32 %v12250_v41, 16  ;;  %v12252_v46 = vld [vmem:[%s12425_s25 + $0xa0] sm:$0xf] }
 0x156   : > { %v2268_v3 = vrot.slane %v2266_v51, 4  ;;  %11474 = vmatprep.mubr.msk.bf16.mxu0 %vm749_vm3, %v14314_v19  ;;  %v2267_v25 = vsel %vm12448_vm4, %v2258_v12, %v2266_v51  ;;  %v2279_v42 = vshrl.u32 %v12249_v57, 16  ;;  %v6757_v21 = vrot.slane %v6755_v27, 5  ;;  %v12253_v14 = vld [vmem:[%s12425_s25 + $0x30] sm:$0xe] }
 0x157   : > { %11181 = vmatmul.mubr.msk.bf16.gmra.mrb[20].mxu1 %vm749_vm3, %v9834_v40  ;;  %v6760_v40 = vrot.slane %v6758_v33, 6  ;;  %v2282_v19 = vshll.u32 %v12249_v57, 16  ;;  %v6743_v59 = vrot.slane %v6742_v49, 4  ;;  %v6751_v29 = vor.u32 %v6750_v0, %v6747_v31 }
 0x158   : > { %11184 = vmatprep.mubr.msk.bf16.mxu1 %vm749_vm3, %v9835_v61  ;;  %v2277_v58 = vsel %vm12448_vm4, %v2268_v3, %v2276_v16  ;;  %v2281_v26 = vrot.slane %v2279_v42, 5  ;;  %v2291_v45 = vshll.u32 %v12250_v41, 16  ;;  %v2298_v34 = vshrl.u32 %v9856_v48, 16 }
 0x159   : > { %v14427_v9 = vcombine.low %v2267_v25, %v2277_v58  ;;  %v6761_v20 = vor.u32 %v6760_v40, %v6757_v21  ;;  %v2284_v62 = vrot.slane %v2282_v19, 6  ;;  %v6752_v61 = vsel %vm12448_vm4, %v6743_v59, %v6751_v29  ;;  %v12254_v58 = vld [vmem:[%s12425_s25 + $0x34] sm:$0xf] }
 0x15a   : > { %v6753_v50 = vrot.slane %v6751_v29, 4  ;;  %v2301_v17 = vshll.u32 %v9856_v48, 16  ;;  %v2290_v10 = vrot.slane %v2288_v2, 5  ;;  %v2293_v44 = vrot.slane %v2291_v45, 6 }
 0x15b   : > { %v2285_v54 = vor.u32 %v2284_v62, %v2281_v26  ;;  %v14434_v30 = vsel %vm798_vm0, %v14199_v6, 0  ;;  %v2300_v53 = vrot.slane %v2298_v34, 5  ;;  %v6764_v22 = vshrl.u32 %v12251_v8, 16 }
 0x15c   : > { %v6762_v32 = vsel %vm12448_vm4, %v6753_v50, %v6761_v20  ;;  %v2303_v4 = vrot.slane %v2301_v17, 6  ;;  %v2294_v28 = vor.u32 %v2293_v44, %v2290_v10  ;;  %v6767_v60 = vshll.u32 %v12251_v8, 16  ;;  %v12255_v50 = vld [vmem:[%s12425_s25 + $0xa8] sm:$0xe]  ;;  %v12256_v44 = vld [vmem:[%s12425_s25 + $0xac] sm:$0xf] }
 0x15d   : > { %11475 = vmatmul.mubr.msk.bf16.gmra.mrb[8].mxu0 %vm749_vm3, %v14348_v13  ;;  %v10448_v37 = vcombine.low %v6752_v61, %v6762_v32  ;;  %v2286_v18 = vrot.slane %v2285_v54, 4  ;;  %v6766_v51 = vrot.slane %v6764_v22, 5  ;;  %v6773_v39 = vshrl.u32 %v12252_v46, 16 }
 0x15e   : > { %11478 = vmatprep.mubr.msk.bf16.mxu0 %vm749_vm3, %v14376_v23  ;;  %v2304_v6 = vor.u32 %v2303_v4, %v2300_v53  ;;  %v6776_v12 = vshll.u32 %v12252_v46, 16  ;;  %v2296_v38 = vrot.slane %v2294_v28, 4  ;;  %v6769_v13 = vrot.slane %v6767_v60, 6 }
 0x15f   : > { %11185 = vmatmul.mubr.msk.bf16.gmra.mrb[24].mxu1 %vm749_vm3, %v9836_v1  ;;  %v2295_v5 = vsel %vm12448_vm4, %v2286_v18, %v2294_v28  ;;  %v6783_v1 = vshrl.u32 %v10432_v43, 16  ;;  %v6775_v15 = vrot.slane %v6773_v39, 5  ;;  %v6786_v31 = vshll.u32 %v10432_v43, 16  ;;  %v12257_v28 = vld [vmem:[%s12425_s25 + $0x3c] sm:$0xe] }
 0x160   : > { %11188 = vmatprep.mubr.msk.bf16.mxu1 %vm749_vm3, %v9837_v35  ;;  %v6778_v23 = vrot.slane %v6776_v12, 6  ;;  %v2307_v3 = vshrl.u32 %v12253_v14, 16  ;;  %v2305_v16 = vsel %vm12448_vm4, %v2296_v38, %v2304_v6  ;;  %v6770_v27 = vor.u32 %v6769_v13, %v6766_v51  ;;  %v9858_v39 = vld [vmem:[%s12425_s25 + $0x44] sm:$0x3] }
 0x161   : > { %v6785_v33 = vrot.slane %v6783_v1, 5  ;;  %v2310_v36 = vshll.u32 %v12253_v14, 16  ;;  %v9873_v35 = vcombine.low %v2295_v5, %v2305_v16  ;;  %v6788_v49 = vrot.slane %v6786_v31, 6  ;;  %v12258_v31 = vld [vmem:[%s12425_s25 + $0x40] sm:$0xf] }
 0x162   : > { %v6779_v25 = vor.u32 %v6778_v23, %v6775_v15  ;;  %v2309_v0 = vrot.slane %v2307_v3, 5  ;;  %v6771_v57 = vrot.slane %v6770_v27, 4  ;;  %v2316_v21 = vshrl.u32 %v12254_v58, 16  ;;  %v14487_v16 = vld [vmem:[%s16336_s1 + $0xc] sm:$0x3] }
 0x163   : > { %v2312_v42 = vrot.slane %v2310_v36, 6  ;;  %v2319_v40 = vshll.u32 %v12254_v58, 16  ;;  %v6789_v19 = vor.u32 %v6788_v49, %v6785_v33  ;;  %v2326_v59 = vshrl.u32 %v9857_v7, 16 }
 0x164   : > { %v6781_v48 = vrot.slane %v6779_v25, 4  ;;  %v2329_v29 = vshll.u32 %v9857_v7, 16  ;;  %v6780_v26 = vsel %vm12448_vm4, %v6771_v57, %v6779_v25  ;;  %v2318_v62 = vrot.slane %v2316_v21, 5  ;;  %v10434_v21 = vld [vmem:[%s12425_s25 + $0xbc] sm:$0x3] }
 0x165   : > { %11479 = vmatmul.mubr.msk.bf16.gmra.mrb[12].mxu0 %vm749_vm3, %v14407_v55  ;;  %v2313_v20 = vor.u32 %v2312_v42, %v2309_v0  ;;  %v2321_v41 = vrot.slane %v2319_v40, 6  ;;  %v2328_v45 = vrot.slane %v2326_v59, 5  ;;  %v10433_v55 = vld [vmem:[%s12425_s25 + $0xb0] sm:$0x3]  ;;  %v6792_v34 = vshrl.u32 %v12255_v50, 16 }
 0x166   : > { %11482 = vmatprep.mubr.msk.bf16.mxu0 %vm749_vm3, %v10448_v37  ;;  %v6790_v2 = vsel %vm12448_vm4, %v6781_v48, %v6789_v19  ;;  %v2331_v61 = vrot.slane %v2329_v29, 6  ;;  %v6795_v24 = vshll.u32 %v12255_v50, 16  ;;  %v6801_v32 = vshrl.u32 %v12256_v44, 16  ;;  %v12259_v40 = vld [vmem:[%s12425_s25 + $0xb4] sm:$0xe] }
 0x167   : > { %11189 = vmatmul.mubr.msk.bf16.gmra.mrb[28].mxu1 %vm749_vm3, %v9838_v56  ;;  %v10449_v17 = vcombine.low %v6780_v26, %v6790_v2  ;;  %v2314_v54 = vrot.slane %v2313_v20, 4  ;;  %v2322_v47 = vor.u32 %v2321_v41, %v2318_v62  ;;  %v6794_v56 = vrot.slane %v6792_v34, 5  ;;  %v14501_v62 = vld [vmem:[%s12425_s25 + $0xb8] sm:$0xf] }
 0x168   : > { %11194 = vmatprep.mubr.msk.bf16.mxu1 %vm749_vm3, %v14427_v9  ;;  %v2332_v10 = vor.u32 %v2331_v61, %v2328_v45  ;;  %v6804_v53 = vshll.u32 %v12256_v44, 16  ;;  %v6797_v8 = vrot.slane %v6795_v24, 6  ;;  %v6811_v22 = vshrl.u32 %v10433_v55, 16 }
 0x169   : > { %v2323_v4 = vsel %vm12448_vm4, %v2314_v54, %v2322_v47  ;;  %v2324_v43 = vrot.slane %v2322_v47, 4  ;;  %v6803_v37 = vrot.slane %v6801_v32, 5  ;;  %v6814_v9 = vshll.u32 %v10433_v55, 16  ;;  %v12261_v47 = vld [vmem:[%s12425_s25 + $0x48] sm:$0xe] }
 0x16a   : > { %v6806_v18 = vrot.slane %v6804_v53, 6  ;;  %v2335_v60 = vshrl.u32 %v12257_v28, 16  ;;  %v6798_v51 = vor.u32 %v6797_v8, %v6794_v56  ;;  %v6813_v46 = vrot.slane %v6811_v22, 5  ;;  %v14512_v32 = vld [vmem:[%s12425_s25 + $0x50] sm:$0x3] }
 0x16b   : > { %v2333_v6 = vsel %vm12448_vm4, %v2324_v43, %v2332_v10  ;;  %v2338_v12 = vshll.u32 %v12257_v28, 16  ;;  %v6816_v13 = vrot.slane %v6814_v9, 6  ;;  %v2344_v14 = vshrl.u32 %v12258_v31, 16  ;;  %v14515_v9 = vld [vmem:[%s12425_s25 + $0x4c] sm:$0xf] }
 0x16c   : > { %v9874_v5 = vcombine.low %v2323_v4, %v2333_v6  ;;  %v6807_v38 = vor.u32 %v6806_v18, %v6803_v37  ;;  %v2337_v1 = vrot.slane %v2335_v60, 5  ;;  %v6799_v15 = vrot.slane %v6798_v51, 4 }
 0x16d   : > { %11483 = vmatmul.mubr.msk.bf16.gmra.mrb[16].mxu0 %vm749_vm3, %v10449_v17  ;;  %v2340_v23 = vrot.slane %v2338_v12, 6  ;;  %v2347_v3 = vshll.u32 %v12258_v31, 16  ;;  %v6817_v33 = vor.u32 %v6816_v13, %v6813_v46  ;;  %v2354_v7 = vshrl.u32 %v9858_v39, 16  ;;  %v14527_v31 = vld [vmem:[%s12425_s25 + $0xc8] sm:$0x3] }
 0x16e   : > { %v6809_v27 = vrot.slane %v6807_v38, 4  ;;  %v2357_v36 = vshll.u32 %v9858_v39, 16  ;;  %v6808_v25 = vsel %vm12448_vm4, %v6799_v15, %v6807_v38  ;;  %v2346_v0 = vrot.slane %v2344_v14, 5  ;;  %v12263_v14 = vld [vmem:[%s12425_s25 + $0xc0] sm:$0xe] }
 0x16f   : > { %11195 = vmatmul.mubr.msk.bf16.vlgmr.msra.gmra.mrb[0].mxu1 %vm749_vm3, %v9873_v35  ;;  %v2341_v49 = vor.u32 %v2340_v23, %v2337_v1  ;;  %v2349_v57 = vrot.slane %v2347_v3, 6  ;;  %v2356_v58 = vrot.slane %v2354_v7, 5  ;;  %v6820_v48 = vshrl.u32 %v12259_v40, 16 }
 0x170   : > { %11227 = vmatpush3.bf16.msra.mxu1 %v14434_v30  ;;  %11198 = vmatprep.mubr.msk.bf16.mxu1 %vm749_vm3, %v9874_v5  ;;  %v6818_v42 = vsel %vm12448_vm4, %v6809_v27, %v6817_v33  ;;  %v2359_v35 = vrot.slane %v2357_v36, 6  ;;  %v6823_v29 = vshll.u32 %v12259_v40, 16  ;;  %v6829_v41 = vshrl.u32 %v14501_v62, 16 }
 0x171   : > { %12154 = vmatprep.subr.msk.bf16.mxu1 %vm798_vm0, %v14487_v16  ;;  %v10450_v30 = vcombine.low %v6808_v25, %v6818_v42  ;;  %v2342_v19 = vrot.slane %v2341_v49, 4  ;;  %v2350_v59 = vor.u32 %v2349_v57, %v2346_v0  ;;  %v6822_v20 = vrot.slane %v6820_v48, 5  ;;  %v14531_v0 = vld [vmem:[%s12425_s25 + $0xc4] sm:$0xf] }
 0x172   : > { %v2360_v26 = vor.u32 %v2359_v35, %v2356_v58  ;;  %v6832_v2 = vshll.u32 %v14501_v62, 16  ;;  %v6825_v55 = vrot.slane %v6823_v29, 6  ;;  %v6839_v50 = vshrl.u32 %v10434_v21, 16 }
 0x173   : > { %11486 = vmatprep.mubr.msk.bf16.mxu0 %vm749_vm3, %v10450_v30  ;;  %v2351_v45 = vsel %vm12448_vm4, %v2342_v19, %v2350_v59  ;;  %v2352_v61 = vrot.slane %v2350_v59, 4  ;;  %v6831_v34 = vrot.slane %v6829_v41, 5  ;;  %v6842_v54 = vshll.u32 %v10434_v21, 16  ;;  %v12265_v59 = vld [vmem:[%s12425_s25 + $0x54] sm:$0xe] }
 0x174   : > { %v6834_v17 = vrot.slane %v6832_v2, 6  ;;  %v2363_v24 = vshrl.u32 %v12261_v47, 16  ;;  %v6826_v56 = vor.u32 %v6825_v55, %v6822_v20  ;;  %v6841_v44 = vrot.slane %v6839_v50, 5  ;;  %v14544_v2 = vld [vmem:[%s12425_s25 + $0x5c] sm:$0x3] }
 0x175   : > { %v2361_v10 = vsel %vm12448_vm4, %v2352_v61, %v2360_v26  ;;  %v2366_v53 = vshll.u32 %v12261_v47, 16  ;;  %v6844_v8 = vrot.slane %v6842_v54, 6  ;;  %v2372_v28 = vshrl.u32 %v14515_v9, 16  ;;  %v14547_v47 = vld [vmem:[%s12425_s25 + $0x58] sm:$0xf] }
 0x176   : > { %v9875_v4 = vcombine.low %v2351_v45, %v2361_v10  ;;  %v6835_v43 = vor.u32 %v6834_v17, %v6831_v34  ;;  %v2365_v22 = vrot.slane %v2363_v24, 5  ;;  %v6827_v37 = vrot.slane %v6826_v56, 4 }
 0x177   : > { %v2368_v18 = vrot.slane %v2366_v53, 6  ;;  %v2375_v60 = vshll.u32 %v14515_v9, 16  ;;  %v6845_v51 = vor.u32 %v6844_v8, %v6841_v44  ;;  %v2382_v46 = vshrl.u32 %v14512_v32, 16 }
 0x178   : > { %11199 = vmatmul.mubr.msk.bf16.gmra.mrb[4].mxu1 %vm749_vm3, %v9875_v4  ;;  %v6837_v6 = vrot.slane %v6835_v43, 4  ;;  %v2385_v39 = vshll.u32 %v14512_v32, 16  ;;  %v6836_v12 = vsel %vm12448_vm4, %v6827_v37, %v6835_v43  ;;  %v2374_v38 = vrot.slane %v2372_v28, 5 }
 0x179   : > { %v2369_v5 = vor.u32 %v2368_v18, %v2365_v22  ;;  %v2377_v13 = vrot.slane %v2375_v60, 6  ;;  %v2384_v15 = vrot.slane %v2382_v46, 5  ;;  %v6848_v3 = vshrl.u32 %v12263_v14, 16 }
 0x17a   : > { %v6846_v1 = vsel %vm12448_vm4, %v6837_v6, %v6845_v51  ;;  %v2387_v23 = vrot.slane %v2385_v39, 6  ;;  %v6851_v36 = vshll.u32 %v12263_v14, 16  ;;  %v6857_v57 = vshrl.u32 %v14531_v0, 16  ;;  %v14559_v6 = vld [vmem:[%s12425_s25 + $0xd4] sm:$0x3] }
 0x17b   : > { %v10451_v27 = vcombine.low %v6836_v12, %v6846_v1  ;;  %v2370_v33 = vrot.slane %v2369_v5, 4  ;;  %v2378_v7 = vor.u32 %v2377_v13, %v2374_v38  ;;  %v6850_v49 = vrot.slane %v6848_v3, 5  ;;  %v12267_v51 = vld [vmem:[%s12425_s25 + $0xcc] sm:$0xe] }
 0x17c   : > { %v2388_v25 = vor.u32 %v2387_v23, %v2384_v15  ;;  %v6860_v42 = vshll.u32 %v14531_v0, 16  ;;  %v6853_v21 = vrot.slane %v6851_v36, 6  ;;  %v6867_v40 = vshrl.u32 %v14527_v31, 16  ;;  %v14563_v15 = vld [vmem:[%s12425_s25 + $0xd0] sm:$0xf] }
 0x17d   : > { %11487 = vmatmul.mubr.msk.bf16.gmra.mrb[20].mxu0 %vm749_vm3, %v10451_v27  ;;  %v2379_v58 = vsel %vm12448_vm4, %v2370_v33, %v2378_v7  ;;  %v2380_v35 = vrot.slane %v2378_v7, 4  ;;  %v6859_v48 = vrot.slane %v6857_v57, 5  ;;  %v6870_v19 = vshll.u32 %v14527_v31, 16  ;;  %v12269_v57 = vld [vmem:[%s12425_s25 + $0x60] sm:$0xe] }
 0x17e   : > { %v6862_v30 = vrot.slane %v6860_v42, 6  ;;  %v2391_v29 = vshrl.u32 %v12265_v59, 16  ;;  %v6854_v20 = vor.u32 %v6853_v21, %v6850_v49  ;;  %v6869_v41 = vrot.slane %v6867_v40, 5  ;;  %v14576_v40 = vld [vmem:[%s12425_s25 + $0x68] sm:$0x3] }
 0x17f   : > { %v2389_v26 = vsel %vm12448_vm4, %v2380_v35, %v2388_v25  ;;  %v2394_v45 = vshll.u32 %v12265_v59, 16  ;;  %v6872_v50 = vrot.slane %v6870_v19, 6  ;;  %v2400_v24 = vshrl.u32 %v14547_v47, 16 }
 0x180   : > { %v9876_v61 = vcombine.low %v2379_v58, %v2389_v26  ;;  %v6863_v55 = vor.u32 %v6862_v30, %v6859_v48  ;;  %v2393_v34 = vrot.slane %v2391_v29, 5  ;;  %v6855_v17 = vrot.slane %v6854_v20, 4 }
 0x181   : > { %v2396_v54 = vrot.slane %v2394_v45, 6  ;;  %v2403_v10 = vshll.u32 %v14547_v47, 16  ;;  %v6873_v44 = vor.u32 %v6872_v50, %v6869_v41  ;;  %v2410_v53 = vshrl.u32 %v14544_v2, 16  ;;  %v14579_v41 = vld [vmem:[%s12425_s25 + $0x64] sm:$0xf] }
 0x182   : > { %11202 = vmatprep.mubr.msk.bf16.mxu1 %vm749_vm3, %v9876_v61  ;;  %v6865_v56 = vrot.slane %v6863_v55, 4  ;;  %v2413_v4 = vshll.u32 %v14544_v2, 16  ;;  %v6864_v43 = vsel %vm12448_vm4, %v6855_v17, %v6863_v55  ;;  %v2402_v22 = vrot.slane %v2400_v24, 5 }
 0x183   : > { %v2397_v8 = vor.u32 %v2396_v54, %v2393_v34  ;;  %v2405_v37 = vrot.slane %v2403_v10, 6  ;;  %v2412_v28 = vrot.slane %v2410_v53, 5  ;;  %v6876_v46 = vshrl.u32 %v12267_v51, 16 }
 0x184   : > { %v6874_v18 = vsel %vm12448_vm4, %v6865_v56, %v6873_v44  ;;  %v2415_v60 = vrot.slane %v2413_v4, 6  ;;  %v6879_v38 = vshll.u32 %v12267_v51, 16  ;;  %v6885_v23 = vshrl.u32 %v14563_v15, 16 }
 0x185   : > { %v10452_v39 = vcombine.low %v6864_v43, %v6874_v18  ;;  %v2398_v12 = vrot.slane %v2397_v8, 4  ;;  %v2406_v5 = vor.u32 %v2405_v37, %v2402_v22  ;;  %v6878_v1 = vrot.slane %v6876_v46, 5  ;;  %v14591_v43 = vld [vmem:[%s12425_s25 + $0xe0] sm:$0x3]  ;;  %v12271_v8 = vld [vmem:[%s12425_s25 + $0xd8] sm:$0xe] }
 0x186   : > { %v2416_v13 = vor.u32 %v2415_v60, %v2412_v28  ;;  %v6888_v14 = vshll.u32 %v14563_v15, 16  ;;  %v6881_v33 = vrot.slane %v6879_v38, 6  ;;  %v6895_v7 = vshrl.u32 %v14559_v6, 16 }
 0x187   : > { %11490 = vmatprep.mubr.msk.bf16.mxu0 %vm749_vm3, %v10452_v39  ;;  %v2407_v3 = vsel %vm12448_vm4, %v2398_v12, %v2406_v5  ;;  %v2408_v27 = vrot.slane %v2406_v5, 4  ;;  %v6887_v36 = vrot.slane %v6885_v23, 5  ;;  %v6898_v49 = vshll.u32 %v14559_v6, 16  ;;  %v14595_v39 = vld [vmem:[%s12425_s25 + $0xdc] sm:$0xf] }
 0x188   : > { %v6890_v25 = vrot.slane %v6888_v14, 6  ;;  %v2419_v42 = vshrl.u32 %v12269_v57, 16  ;;  %v6882_v35 = vor.u32 %v6881_v33, %v6878_v1  ;;  %v6897_v21 = vrot.slane %v6895_v7, 5  ;;  %v12273_v33 = vld [vmem:[%s12425_s25 + $0x6c] sm:$0xe] }
 0x189   : > { %v2417_v58 = vsel %vm12448_vm4, %v2408_v27, %v2416_v13  ;;  %v2422_v48 = vshll.u32 %v12269_v57, 16  ;;  %v6900_v59 = vrot.slane %v6898_v49, 6  ;;  %v2428_v45 = vshrl.u32 %v14579_v41, 16  ;;  %v14608_v57 = vld [vmem:[%s12425_s25 + $0x74] sm:$0x3] }
 0x18a   : > { %v9877_v30 = vcombine.low %v2407_v3, %v2417_v58  ;;  %v6891_v19 = vor.u32 %v6890_v25, %v6887_v36  ;;  %v2421_v29 = vrot.slane %v2419_v42, 5  ;;  %v6883_v26 = vrot.slane %v6882_v35, 4 }
 0x18b   : > { %v2424_v20 = vrot.slane %v2422_v48, 6  ;;  %v2431_v61 = vshll.u32 %v14579_v41, 16  ;;  %v6901_v50 = vor.u32 %v6900_v59, %v6897_v21  ;;  %v2438_v34 = vshrl.u32 %v14576_v40, 16  ;;  %v14611_v59 = vld [vmem:[%s12425_s25 + $0x70] sm:$0xf] }
 0x18c   : > { %11203 = vmatmul.mubr.msk.bf16.gmra.mrb[8].mxu1 %vm749_vm3, %v9877_v30  ;;  %v6893_v55 = vrot.slane %v6891_v19, 4  ;;  %v2441_v17 = vshll.u32 %v14576_v40, 16  ;;  %v6892_v54 = vsel %vm12448_vm4, %v6883_v26, %v6891_v19  ;;  %v2430_v10 = vrot.slane %v2428_v45, 5 }
 0x18d   : > { %v2425_v24 = vor.u32 %v2424_v20, %v2421_v29  ;;  %v2433_v56 = vrot.slane %v2431_v61, 6  ;;  %v2440_v53 = vrot.slane %v2438_v34, 5  ;;  %v6904_v22 = vshrl.u32 %v12271_v8, 16 }
 0x18e   : > { %v6902_v44 = vsel %vm12448_vm4, %v6893_v55, %v6901_v50  ;;  %v2443_v4 = vrot.slane %v2441_v17, 6  ;;  %v6907_v60 = vshll.u32 %v12271_v8, 16  ;;  %v6913_v12 = vshrl.u32 %v14595_v39, 16 }
 0x18f   : > { %v10453_v37 = vcombine.low %v6892_v54, %v6902_v44  ;;  %v2426_v18 = vrot.slane %v2425_v24, 4  ;;  %v2434_v28 = vor.u32 %v2433_v56, %v2430_v10  ;;  %v6906_v46 = vrot.slane %v6904_v22, 5  ;;  %v14623_v44 = vld [vmem:[%s12425_s25 + $0xec] sm:$0x3] }
 0x190   : > { %v2444_v51 = vor.u32 %v2443_v4, %v2440_v53  ;;  %v6916_v5 = vshll.u32 %v14595_v39, 16  ;;  %v6909_v1 = vrot.slane %v6907_v60, 6  ;;  %v6923_v23 = vshrl.u32 %v14591_v43, 16  ;;  %v12275_v53 = vld [vmem:[%s12425_s25 + $0xe4] sm:$0xe] }
 0x191   : > { %11491 = vmatmul.mubr.msk.bf16.gmra.mrb[24].mxu0 %vm749_vm3, %v10453_v37  ;;  %v2435_v38 = vsel %vm12448_vm4, %v2426_v18, %v2434_v28  ;;  %v2436_v13 = vrot.slane %v2434_v28, 4  ;;  %v6915_v14 = vrot.slane %v6913_v12, 5  ;;  %v6926_v27 = vshll.u32 %v14591_v43, 16 }
 0x192   : > { %v6918_v3 = vrot.slane %v6916_v5, 6  ;;  %v2447_v7 = vshrl.u32 %v12273_v33, 16  ;;  %v6910_v25 = vor.u32 %v6909_v1, %v6906_v46  ;;  %v6925_v49 = vrot.slane %v6923_v23, 5 }
 0x193   : > { %v2445_v36 = vsel %vm12448_vm4, %v2436_v13, %v2444_v51  ;;  %v2450_v42 = vshll.u32 %v12273_v33, 16  ;;  %v6928_v21 = vrot.slane %v6926_v27, 6  ;;  %v2456_v29 = vshrl.u32 %v14611_v59, 16  ;;  %v14627_v51 = vld [vmem:[%s12425_s25 + $0xe8] sm:$0xf] }
 0x194   : > { %v9878_v58 = vcombine.low %v2435_v38, %v2445_v36  ;;  %v6919_v35 = vor.u32 %v6918_v3, %v6915_v14  ;;  %v2449_v48 = vrot.slane %v2447_v7, 5  ;;  %v6911_v30 = vrot.slane %v6910_v25, 4  ;;  %v12277_v27 = vld [vmem:[%s12425_s25 + $0x78] sm:$0xe] }
 0x195   : > { %v2452_v19 = vrot.slane %v2450_v42, 6  ;;  %v2459_v26 = vshll.u32 %v14611_v59, 16  ;;  %v6929_v45 = vor.u32 %v6928_v21, %v6925_v49  ;;  %v2466_v61 = vshrl.u32 %v14608_v57, 16  ;;  %v14640_v49 = vld [vmem:[%s12425_s25 + $0x80] sm:$0x3] }
 0x196   : > { %11206 = vmatprep.mubr.msk.bf16.mxu1 %vm749_vm3, %v9878_v58  ;;  %v6921_v20 = vrot.slane %v6919_v35, 4  ;;  %v2469_v55 = vshll.u32 %v14608_v57, 16  ;;  %v6920_v50 = vsel %vm12448_vm4, %v6911_v30, %v6919_v35  ;;  %v2458_v17 = vrot.slane %v2456_v29, 5  ;;  %v14643_v29 = vld [vmem:[%s12425_s25 + $0x7c] sm:$0xf] }
 0x197   : > { %v2453_v34 = vor.u32 %v2452_v19, %v2449_v48  ;;  %v2461_v54 = vrot.slane %v2459_v26, 6  ;;  %v2468_v10 = vrot.slane %v2466_v61, 5  ;;  %v6932_v4 = vshrl.u32 %v12275_v53, 16 }
 0x198   : > { %v6930_v24 = vsel %vm12448_vm4, %v6921_v20, %v6929_v45  ;;  %v2471_v56 = vrot.slane %v2469_v55, 6  ;;  %v6935_v18 = vshll.u32 %v12275_v53, 16  ;;  %v6941_v46 = vshrl.u32 %v14627_v51, 16  ;;  %v10472_v45 = vld [vmem:[%s12425_s25 + $0x30] sm:$0xc] }
 0x199   : > { %v10454_v8 = vcombine.low %v6920_v50, %v6930_v24  ;;  %v2454_v22 = vrot.slane %v2453_v34, 4  ;;  %v2462_v37 = vor.u32 %v2461_v54, %v2458_v17  ;;  %v6934_v60 = vrot.slane %v6932_v4, 5 }
 0x19a   : > { %v2472_v28 = vor.u32 %v2471_v56, %v2468_v10  ;;  %v6944_v12 = vshll.u32 %v14627_v51, 16  ;;  %v6937_v13 = vrot.slane %v6935_v18, 6  ;;  %v6951_v1 = vshrl.u32 %v14623_v44, 16 }
 0x19b   : > { %11494 = vmatprep.mubr.msk.bf16.mxu0 %vm749_vm3, %v10454_v8  ;;  %v2463_v5 = vsel %vm12448_vm4, %v2454_v22, %v2462_v37  ;;  %v2464_v38 = vrot.slane %v2462_v37, 4  ;;  %v6943_v23 = vrot.slane %v6941_v46, 5  ;;  %v6954_v3 = vshll.u32 %v14623_v44, 16 }
 0x19c   : > { %v6946_v14 = vrot.slane %v6944_v12, 6  ;;  %v2475_v33 = vshrl.u32 %v12277_v27, 16  ;;  %v6938_v36 = vor.u32 %v6937_v13, %v6934_v60  ;;  %v6953_v25 = vrot.slane %v6951_v1, 5  ;;  %v12280_v12 = vld [vmem:[%s12425_s25 + $0x38] sm:$0x3] }
 0x19d   : > { %v2473_v7 = vsel %vm12448_vm4, %v2464_v38, %v2472_v28  ;;  %v2478_v42 = vshll.u32 %v12277_v27, 16  ;;  %v6956_v21 = vrot.slane %v6954_v3, 6  ;;  %v2484_v26 = vshrl.u32 %v14643_v29, 16  ;;  %v12279_v28 = vld [vmem:[%s12425_s25 + $0x34] sm:$0xf] }
 0x19e   : > { %v9879_v58 = vcombine.low %v2463_v5, %v2473_v7  ;;  %v6947_v35 = vor.u32 %v6946_v14, %v6943_v23  ;;  %v2477_v48 = vrot.slane %v2475_v33, 5  ;;  %v6939_v30 = vrot.slane %v6938_v36, 4  ;;  %v14658_v38 = vld [vmem:[%s12425_s25 + $0x8c] sm:$0x3]  ;;  %v12281_v13 = vld [vmem:[%s12425_s25 + $0x84] sm:$0xe] }
 0x19f   : > { %v2480_v19 = vrot.slane %v2478_v42, 6  ;;  %v2487_v20 = vshll.u32 %v14643_v29, 16  ;;  %v6957_v55 = vor.u32 %v6956_v21, %v6953_v25  ;;  %v2494_v50 = vshrl.u32 %v14640_v49, 16  ;;  %v14667_v42 = vld [vmem:[%s12425_s25 + $0x88] sm:$0xf] }
 0x1a0   : > { %11207 = vmatmul.mubr.msk.bf16.gmra.mrb[12].mxu1 %vm749_vm3, %v9879_v58  ;;  %v6949_v61 = vrot.slane %v6947_v35, 4  ;;  %v2497_v34 = vshll.u32 %v14640_v49, 16  ;;  %v6948_v17 = vsel %vm12448_vm4, %v6939_v30, %v6947_v35  ;;  %v2486_v24 = vrot.slane %v2484_v26, 5  ;;  %v10473_v21 = vld [vmem:[%s12425_s25 + $0x3c] sm:$0xc] }
 0x1a1   : > { %v2481_v54 = vor.u32 %v2480_v19, %v2477_v48  ;;  %v2489_v10 = vrot.slane %v2487_v20, 6  ;;  %v2496_v53 = vrot.slane %v2494_v50, 5  ;;  %v10488_v8 = vrot.slane %v10472_v45, 10 }
 0x1a2   : > { %v6958_v56 = vsel %vm12448_vm4, %v6949_v61, %v6957_v55  ;;  %v2499_v4 = vrot.slane %v2497_v34, 6  ;;  %v7303_v60 = vrot.slane %v12279_v28, 6  ;;  %v7306_v5 = vrot.slane %v12280_v12, 6  ;;  %v12285_v28 = vld [vmem:[%s12425_s25 + $0x90] sm:$0xe] }
 0x1a3   : > { %v10455_v22 = vcombine.low %v6948_v17, %v6958_v56  ;;  %v2482_v37 = vrot.slane %v2481_v54, 4  ;;  %v2490_v18 = vor.u32 %v2489_v10, %v2486_v24  ;;  %v2503_v1 = vshrl.u32 %v12281_v13, 16  ;;  %v12283_v10 = vld [vmem:[%s12425_s25 + $0x40] sm:$0xf] }
 0x1a4   : > { %v2500_v46 = vor.u32 %v2499_v4, %v2496_v53  ;;  %v2506_v23 = vshll.u32 %v12281_v13, 16  ;;  %v7304_v33 = vsel %vm12674_vm6, %v10488_v8, %v7303_v60  ;;  %v7305_v7 = vrot.slane %v7303_v60, 4  ;;  %v12284_v53 = vld [vmem:[%s12425_s25 + $0x44] sm:$0x3]  ;;  %v14691_v13 = vld [vmem:[%s12425_s25 + $0x94] sm:$0xf] }
 0x1a5   : > { %11495 = vmatmul.mubr.msk.bf16.gmra.mrb[28].mxu0 %vm749_vm3, %v10455_v22  ;;  %v2491_v14 = vsel %vm12448_vm4, %v2482_v37, %v2490_v18  ;;  %v2492_v3 = vrot.slane %v2490_v18, 4  ;;  %v2505_v36 = vrot.slane %v2503_v1, 5  ;;  %v2512_v58 = vshrl.u32 %v14667_v42, 16  ;;  %v14685_v18 = vld [vmem:[%s12425_s25 + $0x98] sm:$0x3] }
 0x1a6   : > { %v2508_v25 = vrot.slane %v2506_v23, 6  ;;  %v2515_v35 = vshll.u32 %v14667_v42, 16  ;;  %v7307_v30 = vsel %vm12674_vm6, %v7305_v7, %v7306_v5  ;;  %v2522_v19 = vshrl.u32 %v14658_v38, 16  ;;  %v10474_v7 = vld [vmem:[%s12425_s25 + $0x48] sm:$0xc] }
 0x1a7   : > { %v2501_v48 = vsel %vm12448_vm4, %v2492_v3, %v2500_v46  ;;  %v2525_v26 = vshll.u32 %v14658_v38, 16  ;;  %v10505_v45 = vcombine.low %v7304_v33, %v7307_v30  ;;  %v2514_v55 = vrot.slane %v2512_v58, 5 }
 0x1a8   : > { %v9880_v20 = vcombine.low %v2491_v14, %v2501_v48  ;;  %v2509_v61 = vor.u32 %v2508_v25, %v2505_v36  ;;  %v2517_v50 = vrot.slane %v2515_v35, 6  ;;  %v2524_v34 = vrot.slane %v2522_v19, 5 }
 0x1a9   : > { %v2527_v17 = vrot.slane %v2525_v26, 6  ;;  %v10489_v54 = vrot.slane %v10473_v21, 10  ;;  %11500 = vmatprep.mubr.msk.bf16.mxu0 %vm749_vm3, %v10505_v45  ;;  %v7310_v56 = vrot.slane %v12283_v10, 6  ;;  %v7313_v4 = vrot.slane %v12284_v53, 6  ;;  %v14714_v53 = vld [vmem:[%s12425_s25 + $0xa4] sm:$0x3] }
 0x1aa   : > { %11210 = vmatprep.mubr.msk.bf16.mxu1 %vm749_vm3, %v9880_v20  ;;  %v2510_v24 = vrot.slane %v2509_v61, 4  ;;  %v7871_v8 = vsel %vm798_vm0, %v14382_v11, 0  ;;  %v2518_v22 = vor.u32 %v2517_v50, %v2514_v55  ;;  %v2531_v60 = vshrl.u32 %v12285_v28, 16  ;;  %v14707_v55 = vld [vmem:[%s16336_s1 + $0x1e] sm:$0x3] }
 0x1ab   : > { %v2528_v37 = vor.u32 %v2527_v17, %v2524_v34  ;;  %v2534_v46 = vshll.u32 %v12285_v28, 16  ;;  %v7311_v12 = vsel %vm12674_vm6, %v10489_v54, %v7310_v56  ;;  %v7312_v5 = vrot.slane %v7310_v56, 4  ;;  %v12287_v17 = vld [vmem:[%s12425_s25 + $0x4c] sm:$0xf]  ;;  %v14718_v28 = vld [vmem:[%s12425_s25 + $0xa0] sm:$0xf] }
 0x1ac   : > { %v2540_v1 = vshrl.u32 %v14691_v13, 16  ;;  %v2543_v23 = vshll.u32 %v14691_v13, 16  ;;  %v2519_v11 = vsel %vm12448_vm4, %v2510_v24, %v2518_v22  ;;  %v2520_v14 = vrot.slane %v2518_v22, 4  ;;  %v12288_v24 = vld [vmem:[%s12425_s25 + $0x50] sm:$0x3] }
 0x1ad   : > { %v2533_v3 = vrot.slane %v2531_v60, 5  ;;  %v2536_v33 = vrot.slane %v2534_v46, 6  ;;  %v7314_v36 = vsel %vm12674_vm6, %v7312_v5, %v7313_v4  ;;  %v2550_v35 = vshrl.u32 %v14685_v18, 16  ;;  %v12289_v4 = vld [vmem:[%s12425_s25 + $0x9c] sm:$0xe] }
 0x1ae   : > { %v2542_v25 = vrot.slane %v2540_v1, 5  ;;  %v2545_v58 = vrot.slane %v2543_v23, 6  ;;  %v2529_v21 = vsel %vm12448_vm4, %v2520_v14, %v2528_v37  ;;  %v10506_v48 = vcombine.low %v7311_v12, %v7314_v36 }
 0x1af   : > { %v2537_v30 = vor.u32 %v2536_v33, %v2533_v3  ;;  %v2553_v19 = vshll.u32 %v14685_v18, 16  ;;  %v9881_v26 = vcombine.low %v2519_v11, %v2529_v21  ;;  %v2552_v45 = vrot.slane %v2550_v35, 5  ;;  %v10475_v3 = vld [vmem:[%s12425_s25 + $0x54] sm:$0xc] }
 0x1b0   : > { %v2546_v20 = vor.u32 %v2545_v58, %v2542_v25  ;;  %v10490_v61 = vrot.slane %v10474_v7, 10  ;;  %11501 = vmatmul.mubr.msk.bf16.vlgmr.msra.gmra.mrb[0].mxu0 %vm749_vm3, %v10506_v48  ;;  %v7317_v54 = vrot.slane %v12287_v17, 6  ;;  %v7320_v10 = vrot.slane %v12288_v24, 6  ;;  %v12293_v24 = vld [vmem:[%s12425_s25 + $0xa8] sm:$0xe] }
 0x1b1   : > { %v2538_v50 = vrot.slane %v2537_v30, 4  ;;  %v2555_v34 = vrot.slane %v2553_v19, 6  ;;  %11211 = vmatmul.mubr.msk.bf16.gmra.mrb[16].mxu1 %vm749_vm3, %v9881_v26  ;;  %11533 = vmatpush3.bf16.msra.mxu0 %v7871_v8  ;;  %v2559_v22 = vshrl.u32 %v12289_v4, 16  ;;  %v2562_v37 = vshll.u32 %v12289_v4, 16 }
 0x1b2   : > { %v2548_v56 = vrot.slane %v2546_v20, 4  ;;  %v2568_v60 = vshrl.u32 %v14718_v28, 16  ;;  %v7318_v5 = vsel %vm12674_vm6, %v10490_v61, %v7317_v54  ;;  %v7319_v1 = vrot.slane %v7317_v54, 4  ;;  %12164 = vmatprep.subr.msk.bf16.mxu0 %vm798_vm0, %v14707_v55  ;;  %v14740_v54 = vld [vmem:[%s12425_s25 + $0xb0] sm:$0x3] }
 0x1b3   : > { %v2547_v46 = vsel %vm12448_vm4, %v2538_v50, %v2546_v20  ;;  %v2556_v12 = vor.u32 %v2555_v34, %v2552_v45  ;;  %v2561_v8 = vrot.slane %v2559_v22, 5  ;;  %v2564_v23 = vrot.slane %v2562_v37, 6  ;;  %v12291_v20 = vld [vmem:[%s12425_s25 + $0x58] sm:$0xf]  ;;  %v12292_v34 = vld [vmem:[%s12425_s25 + $0x5c] sm:$0x3] }
 0x1b4   : > { %v2570_v11 = vrot.slane %v2568_v60, 5  ;;  %v2571_v14 = vshll.u32 %v14718_v28, 16  ;;  %v7321_v7 = vsel %vm12674_vm6, %v7319_v1, %v7320_v10  ;;  %v2578_v36 = vshrl.u32 %v14714_v53, 16 }
 0x1b5   : > { %v2557_v33 = vsel %vm12448_vm4, %v2548_v56, %v2556_v12  ;;  %v2581_v25 = vshll.u32 %v14714_v53, 16  ;;  %v10507_v35 = vcombine.low %v7318_v5, %v7321_v7  ;;  %v2565_v21 = vor.u32 %v2564_v23, %v2561_v8  ;;  %v14748_v5 = vld [vmem:[%s12425_s25 + $0xac] sm:$0xf] }
 0x1b6   : > { %v9882_v58 = vcombine.low %v2547_v46, %v2557_v33  ;;  %v2573_v48 = vrot.slane %v2571_v14, 6  ;;  %v2580_v30 = vrot.slane %v2578_v36, 5  ;;  %v10491_v26 = vrot.slane %v10475_v3, 10  ;;  %v10476_v3 = vld [vmem:[%s12425_s25 + $0x60] sm:$0xc] }
 0x1b7   : > { %v2583_v19 = vrot.slane %v2581_v25, 6  ;;  %v7324_v45 = vrot.slane %v12291_v20, 6  ;;  %11504 = vmatprep.mubr.msk.bf16.mxu0 %vm749_vm3, %v10507_v35  ;;  %v2566_v61 = vrot.slane %v2565_v21, 4  ;;  %v7327_v17 = vrot.slane %v12292_v34, 6 }
 0x1b8   : > { %11214 = vmatprep.mubr.msk.bf16.mxu1 %vm749_vm3, %v9882_v58  ;;  %v2574_v50 = vor.u32 %v2573_v48, %v2570_v11  ;;  %v2587_v10 = vshrl.u32 %v12293_v24, 16  ;;  %v2590_v37 = vshll.u32 %v12293_v24, 16  ;;  %v2596_v1 = vshrl.u32 %v14748_v5, 16  ;;  %v12297_v24 = vld [vmem:[%s12425_s25 + $0xb4] sm:$0xe] }
 0x1b9   : > { %v2584_v56 = vor.u32 %v2583_v19, %v2580_v30  ;;  %v7325_v4 = vsel %vm12674_vm6, %v10491_v26, %v7324_v45  ;;  %v7326_v22 = vrot.slane %v7324_v45, 4  ;;  %v2599_v11 = vshll.u32 %v14748_v5, 16  ;;  %v12295_v26 = vld [vmem:[%s12425_s25 + $0x64] sm:$0xf]  ;;  %v12296_v45 = vld [vmem:[%s12425_s25 + $0x68] sm:$0x3] }
 0x1ba   : > { %v2575_v60 = vsel %vm12448_vm4, %v2566_v61, %v2574_v50  ;;  %v2576_v46 = vrot.slane %v2574_v50, 4  ;;  %v2589_v12 = vrot.slane %v2587_v10, 5  ;;  %v2592_v23 = vrot.slane %v2590_v37, 6 }
 0x1bb   : > { %v7328_v8 = vsel %vm12674_vm6, %v7326_v22, %v7327_v17  ;;  %v2606_v14 = vshrl.u32 %v14740_v54, 16  ;;  %v2598_v36 = vrot.slane %v2596_v1, 5  ;;  %v2609_v25 = vshll.u32 %v14740_v54, 16  ;;  %v14764_v17 = vld [vmem:[%s12425_s25 + $0xbc] sm:$0x3] }
 0x1bc   : > { %v2585_v33 = vsel %vm12448_vm4, %v2576_v46, %v2584_v56  ;;  %v10508_v7 = vcombine.low %v7325_v4, %v7328_v8  ;;  %v2593_v35 = vor.u32 %v2592_v23, %v2589_v12  ;;  %v2601_v21 = vrot.slane %v2599_v11, 6  ;;  %v10477_v11 = vld [vmem:[%s12425_s25 + $0x6c] sm:$0xc] }
 0x1bd   : > { %v9883_v58 = vcombine.low %v2575_v60, %v2585_v33  ;;  %v2608_v48 = vrot.slane %v2606_v14, 5  ;;  %v2611_v30 = vrot.slane %v2609_v25, 6  ;;  %v10492_v19 = vrot.slane %v10476_v3, 10  ;;  %v14770_v60 = vld [vmem:[%s12425_s25 + $0xb8] sm:$0xf] }
 0x1be   : > { %11505 = vmatmul.mubr.msk.bf16.gmra.mrb[4].mxu0 %vm749_vm3, %v10508_v7  ;;  %v7331_v20 = vrot.slane %v12295_v26, 6  ;;  %v7334_v61 = vrot.slane %v12296_v45, 6  ;;  %v2594_v50 = vrot.slane %v2593_v35, 4  ;;  %v2602_v34 = vor.u32 %v2601_v21, %v2598_v36  ;;  %v12299_v45 = vld [vmem:[%s12425_s25 + $0x70] sm:$0xf] }
 0x1bf   : > { %11215 = vmatmul.mubr.msk.bf16.gmra.mrb[20].mxu1 %vm749_vm3, %v9883_v58  ;;  %v2615_v10 = vshrl.u32 %v12297_v24, 16  ;;  %v2618_v56 = vshll.u32 %v12297_v24, 16  ;;  %v2612_v4 = vor.u32 %v2611_v30, %v2608_v48  ;;  %v2624_v46 = vshrl.u32 %v14770_v60, 16 }
 0x1c0   : > { %v7332_v22 = vsel %vm12674_vm6, %v10492_v19, %v7331_v20  ;;  %v7333_v37 = vrot.slane %v7331_v20, 4  ;;  %v2603_v12 = vsel %vm12448_vm4, %v2594_v50, %v2602_v34  ;;  %v2604_v1 = vrot.slane %v2602_v34, 4  ;;  %v12300_v50 = vld [vmem:[%s12425_s25 + $0x74] sm:$0x3] }
 0x1c1   : > { %v2617_v8 = vrot.slane %v2615_v10, 5  ;;  %v2620_v23 = vrot.slane %v2618_v56, 6  ;;  %v2626_v3 = vrot.slane %v2624_v46, 5  ;;  %v2627_v33 = vshll.u32 %v14770_v60, 16  ;;  %v14788_v10 = vld [vmem:[%s12425_s25 + $0xc8] sm:$0x3] }
 0x1c2   : > { %v7335_v14 = vsel %vm12674_vm6, %v7333_v37, %v7334_v61  ;;  %v2634_v7 = vshrl.u32 %v14764_v17, 16  ;;  %v2613_v36 = vsel %vm12448_vm4, %v2604_v1, %v2612_v4  ;;  %v2637_v35 = vshll.u32 %v14764_v17, 16  ;;  %v12301_v56 = vld [vmem:[%s12425_s25 + $0xc0] sm:$0xe]  ;;  %v14792_v37 = vld [vmem:[%s12425_s25 + $0xc4] sm:$0xf] }
 0x1c3   : > { %v10509_v25 = vcombine.low %v7332_v22, %v7335_v14  ;;  %v2621_v58 = vor.u32 %v2620_v23, %v2617_v8  ;;  %v9884_v21 = vcombine.low %v2603_v12, %v2613_v36  ;;  %v2629_v48 = vrot.slane %v2627_v33, 6 }
 0x1c4   : > { %v2636_v30 = vrot.slane %v2634_v7, 5  ;;  %v10493_v19 = vrot.slane %v10477_v11, 10  ;;  %v2639_v20 = vrot.slane %v2637_v35, 6  ;;  %v7338_v61 = vrot.slane %v12299_v45, 6  ;;  %v10478_v7 = vld [vmem:[%s12425_s25 + $0x78] sm:$0xc] }
 0x1c5   : > { %11508 = vmatprep.mubr.msk.bf16.mxu0 %vm749_vm3, %v10509_v25  ;;  %v2622_v26 = vrot.slane %v2621_v58, 4  ;;  %v7341_v34 = vrot.slane %v12300_v50, 6  ;;  %11218 = vmatprep.mubr.msk.bf16.mxu1 %vm749_vm3, %v9884_v21  ;;  %v2630_v24 = vor.u32 %v2629_v48, %v2626_v3  ;;  %v2643_v4 = vshrl.u32 %v12301_v56, 16 }
 0x1c6   : > { %v2646_v22 = vshll.u32 %v12301_v56, 16  ;;  %v2652_v46 = vshrl.u32 %v14792_v37, 16  ;;  %v2640_v12 = vor.u32 %v2639_v20, %v2636_v30  ;;  %v7339_v1 = vsel %vm12674_vm6, %v10493_v19, %v7338_v61 }
 0x1c7   : > { %v7340_v8 = vrot.slane %v7338_v61, 4  ;;  %v2655_v23 = vshll.u32 %v14792_v37, 16  ;;  %v2631_v11 = vsel %vm12448_vm4, %v2622_v26, %v2630_v24  ;;  %v2632_v14 = vrot.slane %v2630_v24, 4  ;;  %v12303_v24 = vld [vmem:[%s12425_s25 + $0x7c] sm:$0xf] }
 0x1c8   : > { %v2645_v3 = vrot.slane %v2643_v4, 5  ;;  %v2648_v33 = vrot.slane %v2646_v22, 6  ;;  %v2654_v25 = vrot.slane %v2652_v46, 5  ;;  %v2662_v35 = vshrl.u32 %v14788_v10, 16  ;;  %v12304_v4 = vld [vmem:[%s12425_s25 + $0x80] sm:$0x3] }
 0x1c9   : > { %v7342_v36 = vsel %vm12674_vm6, %v7340_v8, %v7341_v34  ;;  %v2657_v58 = vrot.slane %v2655_v23, 6  ;;  %v2641_v21 = vsel %vm12448_vm4, %v2632_v14, %v2640_v12  ;;  %v2665_v19 = vshll.u32 %v14788_v10, 16  ;;  %v14812_v12 = vld [vmem:[%s12425_s25 + $0xd4] sm:$0x3] }
 0x1ca   : > { %v10510_v48 = vcombine.low %v7339_v1, %v7342_v36  ;;  %v2649_v30 = vor.u32 %v2648_v33, %v2645_v3  ;;  %v9885_v26 = vcombine.low %v2631_v11, %v2641_v21  ;;  %v2664_v45 = vrot.slane %v2662_v35, 5  ;;  %v12305_v1 = vld [vmem:[%s12425_s25 + $0xcc] sm:$0xe]  ;;  %v14816_v11 = vld [vmem:[%s12425_s25 + $0xd0] sm:$0xf] }
 0x1cb   : > { %v2658_v20 = vor.u32 %v2657_v58, %v2654_v25  ;;  %v10494_v61 = vrot.slane %v10478_v7, 10  ;;  %v2667_v34 = vrot.slane %v2665_v19, 6  ;;  %v7345_v56 = vrot.slane %v12303_v24, 6 }
 0x1cc   : > { %11509 = vmatmul.mubr.msk.bf16.gmra.mrb[8].mxu0 %vm749_vm3, %v10510_v48  ;;  %v2650_v50 = vrot.slane %v2649_v30, 4  ;;  %v7348_v22 = vrot.slane %v12304_v4, 6  ;;  %11219 = vmatmul.mubr.msk.bf16.gmra.mrb[24].mxu1 %vm749_vm3, %v9885_v26  ;;  %v2671_v8 = vshrl.u32 %v12305_v1, 16  ;;  %v2674_v23 = vshll.u32 %v12305_v1, 16  ;;  %v10479_v48 = vld [vmem:[%s12425_s25 + $0x84] sm:$0xc] }
 0x1cd   : > { %v2660_v46 = vrot.slane %v2658_v20, 4  ;;  %v2680_v14 = vshrl.u32 %v14816_v11, 16  ;;  %v2668_v33 = vor.u32 %v2667_v34, %v2664_v45  ;;  %v7346_v7 = vsel %vm12674_vm6, %v10494_v61, %v7345_v56  ;;  %v9904_v45 = vld [vmem:[%s12425_s25 + $0x18] sm:$0xc] }
 0x1ce   : > { %v2659_v3 = vsel %vm12448_vm4, %v2650_v50, %v2658_v20  ;;  %v7347_v36 = vrot.slane %v7345_v56, 4  ;;  %v2673_v25 = vrot.slane %v2671_v8, 5  ;;  %v2676_v58 = vrot.slane %v2674_v23, 6  ;;  %v12307_v8 = vld [vmem:[%s12425_s25 + $0x88] sm:$0xf] }
 0x1cf   : > { %v2682_v35 = vrot.slane %v2680_v14, 5  ;;  %v2683_v21 = vshll.u32 %v14816_v11, 16  ;;  %v2669_v30 = vsel %vm12448_vm4, %v2660_v46, %v2668_v33  ;;  %v2690_v26 = vshrl.u32 %v14812_v12, 16  ;;  %v10480_v23 = vld [vmem:[%s12425_s25 + $0x90] sm:$0xc] }
 0x1d0   : > { %v7349_v19 = vsel %vm12674_vm6, %v7347_v36, %v7348_v22  ;;  %v2693_v20 = vshll.u32 %v14812_v12, 16  ;;  %v9886_v61 = vcombine.low %v2659_v3, %v2669_v30  ;;  %v2677_v34 = vor.u32 %v2676_v58, %v2673_v25  ;;  %v12308_v33 = vld [vmem:[%s12425_s25 + $0x8c] sm:$0x3]  ;;  %v9905_v30 = vld [vmem:[%s12425_s25 + $0x24] sm:$0xc] }
 0x1d1   : > { %v10511_v50 = vcombine.low %v7346_v7, %v7349_v19  ;;  %v2685_v24 = vrot.slane %v2683_v21, 6  ;;  %v2692_v56 = vrot.slane %v2690_v26, 5  ;;  %v10495_v1 = vrot.slane %v10479_v48, 10  ;;  %v12309_v21 = vld [vmem:[%s12425_s25 + $0x1c] sm:$0xf] }
 0x1d2   : > { %v2695_v4 = vrot.slane %v2693_v20, 6  ;;  %v7352_v46 = vrot.slane %v12307_v8, 6  ;;  %11222 = vmatprep.mubr.msk.bf16.mxu1 %vm749_vm3, %v9886_v61  ;;  %v2678_v22 = vrot.slane %v2677_v34, 4  ;;  %v7355_v3 = vrot.slane %v12308_v33, 6  ;;  %v12310_v20 = vld [vmem:[%s12425_s25 + $0x20] sm:$0x3] }
 0x1d3   : > { %11512 = vmatprep.mubr.msk.bf16.mxu0 %vm749_vm3, %v10511_v50  ;;  %v2686_v14 = vor.u32 %v2685_v24, %v2682_v35  ;;  %v9920_v7 = vrot.slane %v9904_v45, 10  ;;  %v3045_v48 = vrot.slane %v12309_v21, 6  ;;  %v3048_v35 = vrot.slane %v12310_v20, 6  ;;  %v12311_v24 = vld [vmem:[%s12425_s25 + $0x94] sm:$0xf] }
 0x1d4   : > { %v2696_v36 = vor.u32 %v2695_v4, %v2692_v56  ;;  %v7353_v25 = vsel %vm12674_vm6, %v10495_v1, %v7352_v46  ;;  %v7354_v58 = vrot.slane %v7352_v46, 4  ;;  %v10496_v61 = vrot.slane %v10480_v23, 10  ;;  %v12312_v8 = vld [vmem:[%s12425_s25 + $0x98] sm:$0x3]  ;;  %v10481_v23 = vld [vmem:[%s12425_s25 + $0x9c] sm:$0xc] }
 0x1d5   : > { %v2687_v19 = vsel %vm12448_vm4, %v2678_v22, %v2686_v14  ;;  %v2688_v26 = vrot.slane %v2686_v14, 4  ;;  %v3046_v50 = vsel %vm12674_vm6, %v9920_v7, %v3045_v48  ;;  %v3047_v34 = vrot.slane %v3045_v48, 4  ;;  %v12314_v48 = vld [vmem:[%s12425_s25 + $0x2c] sm:$0x3] }
 0x1d6   : > { %v7356_v45 = vsel %vm12674_vm6, %v7354_v58, %v7355_v3  ;;  %v7359_v56 = vrot.slane %v12311_v24, 6  ;;  %v7362_v46 = vrot.slane %v12312_v8, 6  ;;  %v9921_v22 = vrot.slane %v9905_v30, 10  ;;  %v9906_v58 = vld [vmem:[%s12425_s25 + $0x30] sm:$0xc] }
 0x1d7   : > { %v2697_v4 = vsel %vm12448_vm4, %v2688_v26, %v2696_v36  ;;  %v10512_v1 = vcombine.low %v7353_v25, %v7356_v45  ;;  %v3049_v33 = vsel %vm12674_vm6, %v3047_v34, %v3048_v35  ;;  %v12313_v25 = vld [vmem:[%s12425_s25 + $0x28] sm:$0xf]  ;;  %v3055_v30 = vrot.slane %v12314_v48, 6  ;;  %v12315_v35 = vld [vmem:[%s12425_s25 + $0xa0] sm:$0xf] }
 0x1d8   : > { %v9887_v14 = vcombine.low %v2687_v19, %v2697_v4  ;;  %v7360_v3 = vsel %vm12674_vm6, %v10496_v61, %v7359_v56  ;;  %v7361_v7 = vrot.slane %v7359_v56, 4  ;;  %v9937_v36 = vcombine.low %v3046_v50, %v3049_v33  ;;  %v12316_v45 = vld [vmem:[%s12425_s25 + $0xa4] sm:$0x3]  ;;  %v10482_v34 = vld [vmem:[%s12425_s25 + $0xa8] sm:$0xc] }
 0x1d9   : > { %11513 = vmatmul.mubr.msk.bf16.gmra.mrb[12].mxu0 %vm749_vm3, %v10512_v1  ;;  %v3052_v21 = vrot.slane %v12313_v25, 6  ;;  %v3613_v19 = vsel %vm798_vm0, %v14487_v16, 0  ;;  %v10497_v20 = vrot.slane %v10481_v23, 10  ;;  %v7366_v61 = vrot.slane %v12315_v35, 6  ;;  %v10483_v48 = vld [vmem:[%s12425_s25 + $0xb4] sm:$0xc] }
 0x1da   : > { %11223 = vmatmul.mubr.msk.bf16.gmra.mrb[28].mxu1 %vm749_vm3, %v9887_v14  ;;  %v7363_v26 = vsel %vm12674_vm6, %v7361_v7, %v7362_v46  ;;  %v7369_v50 = vrot.slane %v12316_v45, 6  ;;  %v9922_v4 = vrot.slane %v9906_v58, 10  ;;  %v12317_v46 = vld [vmem:[%s12425_s25 + $0x34] sm:$0xf]  ;;  %v12318_v14 = vld [vmem:[%s12425_s25 + $0x38] sm:$0x3] }
 0x1db   : > { %11228 = vmatprep.mubr.msk.bf16.mxu1 %vm749_vm3, %v9937_v36  ;;  %v10513_v24 = vcombine.low %v7360_v3, %v7363_v26  ;;  %v3053_v16 = vsel %vm12674_vm6, %v9921_v22, %v3052_v21  ;;  %v3054_v56 = vrot.slane %v3052_v21, 4  ;;  %v7367_v1 = vsel %vm12674_vm6, %v10497_v20, %v7366_v61  ;;  %v9907_v7 = vld [vmem:[%s12425_s25 + $0x3c] sm:$0xc]  ;;  %v12319_v22 = vld [vmem:[%s12425_s25 + $0xac] sm:$0xf] }
 0x1dc   : > { %v7368_v8 = vrot.slane %v7366_v61, 4  ;;  %v3059_v23 = vrot.slane %v12317_v46, 6  ;;  %v3062_v33 = vrot.slane %v12318_v14, 6  ;;  %v10498_v36 = vrot.slane %v10482_v34, 10  ;;  %v12320_v58 = vld [vmem:[%s12425_s25 + $0xb0] sm:$0x3] }
 0x1dd   : > { %11516 = vmatprep.mubr.msk.bf16.mxu0 %vm749_vm3, %v10513_v24  ;;  %v3056_v3 = vsel %vm12674_vm6, %v3054_v56, %v3055_v30  ;;  %v7373_v25 = vrot.slane %v12319_v22, 6  ;;  %v7376_v21 = vrot.slane %v12320_v58, 6  ;;  %v9923_v24 = vrot.slane %v9907_v7, 10  ;;  %v9908_v56 = vld [vmem:[%s12425_s25 + $0x48] sm:$0xc] }
 0x1de   : > { %v9938_v26 = vcombine.low %v3053_v16, %v3056_v3  ;;  %v7370_v20 = vsel %vm12674_vm6, %v7368_v8, %v7369_v50  ;;  %v3060_v35 = vsel %vm12674_vm6, %v9922_v4, %v3059_v23  ;;  %v3061_v61 = vrot.slane %v3059_v23, 4  ;;  %v12321_v16 = vld [vmem:[%s12425_s25 + $0x40] sm:$0xf]  ;;  %v12322_v3 = vld [vmem:[%s12425_s25 + $0x44] sm:$0x3] }
 0x1df   : > { %v10514_v45 = vcombine.low %v7367_v1, %v7370_v20  ;;  %v7374_v30 = vsel %vm12674_vm6, %v10498_v36, %v7373_v25  ;;  %v7375_v34 = vrot.slane %v7373_v25, 4  ;;  %v3066_v14 = vrot.slane %v12321_v16, 6  ;;  %v12323_v36 = vld [vmem:[%s12425_s25 + $0xbc] sm:$0x3]  ;;  %v10484_v22 = vld [vmem:[%s12425_s25 + $0xc0] sm:$0xc] }
 0x1e0   : > { %v3063_v46 = vsel %vm12674_vm6, %v3061_v61, %v3062_v33  ;;  %v3069_v50 = vrot.slane %v12322_v3, 6  ;;  %v10499_v8 = vrot.slane %v10483_v48, 10  ;;  %v7380_v23 = vrot.slane %v14501_v62, 6  ;;  %v14903_v33 = vld [vmem:[%s16336_s1 + $0xe] sm:$0x3] }
 0x1e1   : > { %11517 = vmatmul.mubr.msk.bf16.gmra.mrb[16].mxu0 %vm749_vm3, %v10514_v45  ;;  %v9939_v4 = vcombine.low %v3060_v35, %v3063_v46  ;;  %v7377_v1 = vsel %vm12674_vm6, %v7375_v34, %v7376_v21  ;;  %v7383_v7 = vrot.slane %v12323_v36, 6  ;;  %v3067_v58 = vsel %vm12674_vm6, %v9923_v24, %v3066_v14  ;;  %v9909_v45 = vld [vmem:[%s12425_s25 + $0x54] sm:$0xc]  ;;  %v10485_v24 = vld [vmem:[%s12425_s25 + $0xcc] sm:$0xc] }
 0x1e2   : > { %11229 = vmatmul.mubr.msk.bf16.vlgmr.msra.gmra.mrb[0].mxu1 %vm749_vm3, %v9938_v26  ;;  %v10515_v25 = vcombine.low %v7374_v30, %v7377_v1  ;;  %v3068_v48 = vrot.slane %v3066_v14, 4  ;;  %v9924_v21 = vrot.slane %v9908_v56, 10  ;;  %v7381_v62 = vsel %vm12674_vm6, %v10499_v8, %v7380_v23 }
 0x1e3   : > { %11261 = vmatpush3.bf16.msra.mxu1 %v3613_v19  ;;  %11232 = vmatprep.mubr.msk.bf16.mxu1 %vm749_vm3, %v9939_v4  ;;  %v7382_v20 = vrot.slane %v7380_v23, 4  ;;  %v3073_v35 = vrot.slane %v14515_v9, 6  ;;  %v3076_v61 = vrot.slane %v14512_v32, 6  ;;  %v10500_v30 = vrot.slane %v10484_v22, 10 }
 0x1e4   : > { %11520 = vmatprep.mubr.msk.bf16.mxu0 %vm749_vm3, %v10515_v25  ;;  %v3070_v26 = vsel %vm12674_vm6, %v3068_v48, %v3069_v50  ;;  %v7387_v19 = vrot.slane %v14531_v0, 6  ;;  %v7390_v34 = vrot.slane %v14527_v31, 6  ;;  %12155 = vmatprep.subr.msk.bf16.mxu1 %vm798_vm0, %v14903_v33  ;;  %v9925_v3 = vrot.slane %v9909_v45, 10  ;;  %v9910_v31 = vld [vmem:[%s12425_s25 + $0x60] sm:$0xc] }
 0x1e5   : > { %v9940_v56 = vcombine.low %v3067_v58, %v3070_v26  ;;  %v7384_v32 = vsel %vm12674_vm6, %v7382_v20, %v7383_v7  ;;  %v3074_v9 = vsel %vm12674_vm6, %v9924_v21, %v3073_v35  ;;  %v3075_v46 = vrot.slane %v3073_v35, 4  ;;  %v10486_v25 = vld [vmem:[%s12425_s25 + $0xd8] sm:$0xc]  ;;  %v9911_v20 = vld [vmem:[%s12425_s25 + $0x6c] sm:$0xc] }
 0x1e6   : > { %v10516_v16 = vcombine.low %v7381_v62, %v7384_v32  ;;  %v7388_v14 = vsel %vm12674_vm6, %v10500_v30, %v7387_v19  ;;  %v7389_v0 = vrot.slane %v7387_v19, 4  ;;  %v3080_v8 = vrot.slane %v14547_v47, 6  ;;  %v10487_v30 = vld [vmem:[%s12425_s25 + $0xe4] sm:$0xc] }
 0x1e7   : > { %v3077_v50 = vsel %vm12674_vm6, %v3075_v46, %v3076_v61  ;;  %v3083_v4 = vrot.slane %v14544_v2, 6  ;;  %v10501_v1 = vrot.slane %v10485_v24, 10  ;;  %v7394_v7 = vrot.slane %v14563_v15, 6  ;;  %v9912_v46 = vld [vmem:[%s12425_s25 + $0x78] sm:$0xc] }
 0x1e8   : > { %v9941_v23 = vcombine.low %v3074_v9, %v3077_v50  ;;  %v7391_v36 = vsel %vm12674_vm6, %v7389_v0, %v7390_v34  ;;  %v7397_v22 = vrot.slane %v14559_v6, 6  ;;  %v3081_v47 = vsel %vm12674_vm6, %v9925_v3, %v3080_v8 }
 0x1e9   : > { %11521 = vmatmul.mubr.msk.bf16.gmra.mrb[20].mxu0 %vm749_vm3, %v10516_v16  ;;  %v10517_v58 = vcombine.low %v7388_v14, %v7391_v36  ;;  %v3082_v48 = vrot.slane %v3080_v8, 4  ;;  %v9926_v2 = vrot.slane %v9910_v31, 10  ;;  %v7395_v21 = vsel %vm12674_vm6, %v10501_v1, %v7394_v7  ;;  %v12324_v8 = vld [vmem:[%s12425_s25 + $0x98] sm:$0x3] }
 0x1ea   : > { %11233 = vmatmul.mubr.msk.bf16.gmra.mrb[4].mxu1 %vm749_vm3, %v9940_v56  ;;  %v7396_v62 = vrot.slane %v7394_v7, 4  ;;  %v3087_v15 = vrot.slane %v14579_v41, 6  ;;  %v3090_v6 = vrot.slane %v14576_v40, 6  ;;  %v10502_v61 = vrot.slane %v10486_v25, 10  ;;  %v14975_v25 = vld [vmem:[%s12425_s25 + $0x30] sm:$0xe] }
 0x1eb   : > { %11236 = vmatprep.mubr.msk.bf16.mxu1 %vm749_vm3, %v9941_v23  ;;  %11524 = vmatprep.mubr.msk.bf16.mxu0 %vm749_vm3, %v10517_v58  ;;  %v3084_v35 = vsel %vm12674_vm6, %v3082_v48, %v3083_v4  ;;  %v7401_v45 = vrot.slane %v14595_v39, 6  ;;  %v7404_v26 = vrot.slane %v14591_v43, 6  ;;  %v9927_v9 = vrot.slane %v9911_v20, 10  ;;  %v9915_v20 = vld [vmem:[%s12425_s25 + $0x9c] sm:$0xc] }
 0x1ec   : > { %v9942_v19 = vcombine.low %v3081_v47, %v3084_v35  ;;  %v7398_v41 = vsel %vm12674_vm6, %v7396_v62, %v7397_v22  ;;  %v3088_v40 = vsel %vm12674_vm6, %v9926_v2, %v3087_v15  ;;  %v3089_v34 = vrot.slane %v3087_v15, 4  ;;  %v9913_v22 = vld [vmem:[%s12425_s25 + $0x84] sm:$0xc] }
 0x1ed   : > { %v10518_v24 = vcombine.low %v7395_v21, %v7398_v41  ;;  %v7402_v56 = vsel %vm12674_vm6, %v10502_v61, %v7401_v45  ;;  %v7403_v32 = vrot.slane %v7401_v45, 4  ;;  %v3094_v39 = vrot.slane %v14611_v59, 6  ;;  %v9914_v21 = vld [vmem:[%s12425_s25 + $0x90] sm:$0xc]  ;;  %v12191_v41 = vld [vmem:[%s12425_s25 + $0x48] sm:$0xff]  }
 0x1ee   : > { %v3091_v43 = vsel %vm12674_vm6, %v3089_v34, %v3090_v6  ;;  %v3097_v16 = vrot.slane %v14608_v57, 6  ;;  %v10503_v14 = vrot.slane %v10487_v30, 10  ;;  %v7408_v31 = vrot.slane %v14627_v51, 6  ;;  %v9916_v30 = vld [vmem:[%s12425_s25 + $0xa8] sm:$0xc] }
 0x1ef   : > { %v9943_v0 = vcombine.low %v3088_v40, %v3091_v43  ;;  %v7405_v3 = vsel %vm12674_vm6, %v7403_v32, %v7404_v26  ;;  %v7411_v50 = vrot.slane %v14623_v44, 6  ;;  %v4598_v4 = vshrl.u32 %v12324_v8, 16 }
 0x1f0   : > { %v10519_v1 = vcombine.low %v7402_v56, %v7405_v3  ;;  %v3096_v23 = vrot.slane %v3094_v39, 4  ;;  %v9928_v36 = vrot.slane %v9912_v46, 10  ;;  %v7410_v59 = vrot.slane %v7408_v31, 4  ;;  %v9917_v46 = vld [vmem:[%s12425_s25 + $0xb4] sm:$0xc] }
 0x1f1   : > { %11525 = vmatmul.mubr.msk.bf16.gmra.mrb[24].mxu0 %vm749_vm3, %v10518_v24  ;;  %v3101_v57 = vrot.slane %v14643_v29, 6  ;;  %v3104_v7 = vrot.slane %v14640_v49, 6  ;;  %v10083_v51 = vrot.slane %v14975_v25, 9  ;;  %v4601_v44 = vshll.u32 %v12324_v8, 16  ;;  %v15355_v25 = vld [vmem:[%s12425_s25 + $0xc4] sm:$0xf] }
 0x1f2   : > { %11237 = vmatmul.mubr.msk.bf16.gmra.mrb[8].mxu1 %vm749_vm3, %v9942_v19  ;;  %11528 = vmatprep.mubr.msk.bf16.mxu0 %vm749_vm3, %v10519_v1  ;;  %v7409_v58 = vsel %vm12674_vm6, %v10503_v14, %v7408_v31  ;;  %v3108_v47 = vrot.slane %v14667_v42, 6  ;;  %v3095_v49 = vsel %vm12674_vm6, %v9927_v9, %v3094_v39  ;;  %v3098_v29 = vsel %vm12674_vm6, %v3096_v23, %v3097_v16 }
 0x1f3   : > { %11240 = vmatprep.mubr.msk.bf16.mxu1 %vm749_vm3, %v9943_v0  ;;  %v7412_v48 = vsel %vm12674_vm6, %v7410_v59, %v7411_v50  ;;  %v3103_v2 = vrot.slane %v3101_v57, 4  ;;  %v14991_v62 = vrot.slane %v4598_v4, 5  ;;  %v3102_v42 = vsel %vm12674_vm6, %v9928_v36, %v3101_v57  ;;  %v9919_v57 = vld [vmem:[%s12425_s25 + $0xcc] sm:$0xc] }
 0x1f4   : > { %v9929_v15 = vrot.slane %v9913_v22, 10  ;;  %v3111_v6 = vrot.slane %v14658_v38, 6  ;;  %v10520_v35 = vcombine.low %v7409_v58, %v7412_v48  ;;  %v3110_v45 = vrot.slane %v3108_v47, 4 }
 0x1f5   : > { %v3105_v61 = vsel %vm12674_vm6, %v3103_v2, %v3104_v7  ;;  %v3115_v26 = vrot.slane %v14691_v13, 6  ;;  %v9944_v19 = vcombine.low %v3095_v49, %v3098_v29  ;;  %v9930_v40 = vrot.slane %v9914_v21, 10  ;;  %v10602_v7 = vld [vmem:[%s12425_s25 + $0x48] sm:$0xe]  ;;  %v10603_v49 = vld [vmem:[%s12425_s25 + $0x4c] sm:$0xf] }
 0x1f6   : > { %v3118_v34 = vrot.slane %v14685_v18, 6  ;;  %v3122_v24 = vrot.slane %v14718_v28, 6  ;;  %v9945_v56 = vcombine.low %v3102_v42, %v3105_v61  ;;  %v9931_v32 = vrot.slane %v9915_v20, 10  ;;  %v10604_v42 = vld [vmem:[%s12425_s25 + $0x50] sm:$0x3] }
 0x1f7   : > { %v3117_v38 = vrot.slane %v3115_v26, 4  ;;  %v3125_v9 = vrot.slane %v14714_v53, 6  ;;  %v15006_v43 = vrot.slane %v4601_v44, 6  ;;  %v9932_v16 = vrot.slane %v9916_v30, 10  ;;  %v9918_v53 = vld [vmem:[%s12425_s25 + $0xc0] sm:$0xc] }
 0x1f8   : > { %v3124_v39 = vrot.slane %v3122_v24, 4  ;;  %v3129_v13 = vrot.slane %v14748_v5, 6  ;;  %v3109_v18 = vsel %vm12674_vm6, %v9929_v15, %v3108_v47  ;;  %v3112_v28 = vsel %vm12674_vm6, %v3110_v45, %v3111_v6  ;;  %v12192_v44 = vld [vmem:[%s12425_s25 + $0x54] sm:$0xff]   ;;  %v12193_v15 = vld [vmem:[%s12425_s25 + $0x60] sm:$0xff]  }
 0x1f9   : > { %11529 = vmatmul.mubr.msk.bf16.gmra.mrb[28].mxu0 %vm749_vm3, %v10520_v35  ;;  %v3132_v14 = vrot.slane %v14740_v54, 6  ;;  %v3136_v0 = vrot.slane %v14770_v60, 6  ;;  %v3116_v5 = vsel %vm12674_vm6, %v9930_v40, %v3115_v26  ;;  %v3119_v3 = vsel %vm12674_vm6, %v3117_v38, %v3118_v34  ;;  %v10605_v35 = vld [vmem:[%s12425_s25 + $0x54] sm:$0xe]  ;;  %v15077_v34 = vld [vmem:[%s16336_s1 + $0x20] sm:$0x3] }
 0x1fa   : > { %11241 = vmatmul.mubr.msk.bf16.gmra.mrb[12].mxu1 %vm749_vm3, %v9944_v19  ;;  %11534 = vmatprep.mubr.msk.bf16.mxu0 %vm749_vm3, %v12191_v41  ;;  %v3131_v31 = vrot.slane %v3129_v13, 4  ;;  %v9933_v50 = vrot.slane %v9917_v46, 10  ;;  %v15026_v54 = vsel %vm12674_vm6, %v9931_v32, %v3122_v24  ;;  %v15030_v60 = vsel %vm12674_vm6, %v3124_v39, %v3125_v9  ;;  %v10607_v46 = vld [vmem:[%s12425_s25 + $0x5c] sm:$0x3] }
 0x1fb   : > { %11244 = vmatprep.mubr.msk.bf16.mxu1 %vm749_vm3, %v9945_v56  ;;  %v3138_v8 = vrot.slane %v3136_v0, 4  ;;  %v3139_v4 = vrot.slane %v14764_v17, 6  ;;  %v15037_v23 = vsel %vm12674_vm6, %v9932_v16, %v3129_v13  ;;  %v9934_v59 = vrot.slane %v9918_v53, 10 }
 0x1fc   : > { %v15041_v36 = vsel %vm12674_vm6, %v3131_v31, %v3132_v14  ;;  %v9946_v22 = vcombine.low %v3109_v18, %v3112_v28  ;;  %v8661_v17 = vsel %vm798_vm0, %v14707_v55, 0  ;;  %v9947_v58 = vcombine.low %v3116_v5, %v3119_v3 }
 0x1fd   : > { %v3143_v47 = vrot.slane %v14792_v37, 6  ;;  %v9948_v29 = vcombine.low %v15026_v54, %v15030_v60  ;;  %v15054_v48 = vsel %vm12674_vm6, %v9933_v50, %v3136_v0  ;;  %v3146_v2 = vrot.slane %v14788_v10, 6  ;;  %v12194_v0 = vld [vmem:[%s12425_s25 + $0x6c] sm:$0xff]   ;;  %v10608_v50 = vld [vmem:[%s12425_s25 + $0x60] sm:$0xe] }
 0x1fe   : > { %v3150_v21 = vrot.slane %v14816_v11, 6  ;;  %v9949_v55 = vcombine.low %v15037_v23, %v15041_v36  ;;  %v15064_v37 = vsel %vm12674_vm6, %v3138_v8, %v3139_v4  ;;  %v9935_v6 = vrot.slane %v9919_v57, 10  ;;  %v10606_v11 = vld [vmem:[%s12425_s25 + $0x58] sm:$0xf]  ;;  %v10613_v36 = vld [vmem:[%s12425_s25 + $0x74] sm:$0x3] }
 0x1ff   : > { %v8115_v20 = vshrl.u32 %v10602_v7, 16  ;;  %v15069_v61 = vsel %vm12674_vm6, %v9934_v59, %v3143_v47  ;;  %v8118_v45 = vshll.u32 %v10602_v7, 16  ;;  %v8124_v10 = vshrl.u32 %v10603_v49, 16  ;;  %v12195_v8 = vld [vmem:[%s12425_s25 + $0x78] sm:$0xff]  }
 0x200   : > { %v8127_v26 = vshll.u32 %v10603_v49, 16  ;;  %v3145_v30 = vrot.slane %v3143_v47, 4  ;;  %v3153_v19 = vrot.slane %v14812_v12, 6  ;;  %v8134_v40 = vshrl.u32 %v10604_v42, 16  ;;  %v10609_v47 = vld [vmem:[%s12425_s25 + $0x64] sm:$0xf] }
 0x201   : > { %11535 = vmatmul.mubr.msk.bf16.vlgmr.msra.gmra.mrb[0].mxu0 %vm749_vm3, %v12192_v44  ;;  %v8117_v41 = vrot.slane %v8115_v20, 5  ;;  %v3152_v24 = vrot.slane %v3150_v21, 4  ;;  %v8120_v56 = vrot.slane %v8118_v45, 6  ;;  %v8126_v38 = vrot.slane %v8124_v10, 5  ;;  %v10610_v20 = vld [vmem:[%s12425_s25 + $0x68] sm:$0x3] }
 0x202   : > { %11245 = vmatmul.mubr.msk.bf16.gmra.mrb[16].mxu1 %vm749_vm3, %v9946_v22  ;;  %11567 = vmatpush3.bf16.msra.mxu0 %v8661_v17  ;;  %v8129_v32 = vrot.slane %v8127_v26, 6  ;;  %v8136_v12 = vrot.slane %v8134_v40, 5  ;;  %v8137_v9 = vshll.u32 %v10604_v42, 16  ;;  %v8143_v39 = vshrl.u32 %v10605_v35, 16  ;;  %v10611_v45 = vld [vmem:[%s12425_s25 + $0x6c] sm:$0xe] }
 0x203   : > { %11248 = vmatprep.mubr.msk.bf16.mxu1 %vm749_vm3, %v9947_v58  ;;  %11538 = vmatprep.mubr.msk.bf16.mxu0 %vm749_vm3, %v12193_v15  ;;  %v8146_v16 = vshll.u32 %v10605_v35, 16  ;;  %v8121_v13 = vor.u32 %v8120_v56, %v8117_v41  ;;  %v8152_v28 = vshrl.u32 %v10606_v11, 16  ;;  %v8155_v14 = vshll.u32 %v10606_v11, 16  ;;  %v12196_v40 = vld [vmem:[%s12425_s25 + $0x84] sm:$0xff]  }
 0x204   : > { %v15083_v18 = vor.u32 %v8129_v32, %v8126_v38  ;;  %12165 = vmatprep.subr.msk.bf16.mxu0 %vm798_vm0, %v15077_v34  ;;  %v15090_v53 = vsel %vm12674_vm6, %v3145_v30, %v3146_v2  ;;  %v8139_v5 = vrot.slane %v8137_v9, 6  ;;  %v8145_v3 = vrot.slane %v8143_v39, 5  ;;  %v12197_v38 = vld [vmem:[%s12425_s25 + $0x90] sm:$0xff]  }
 0x205   : > { %v8148_v31 = vrot.slane %v8146_v16, 6  ;;  %v15096_v4 = vsel %vm12674_vm6, %v9935_v6, %v3150_v21  ;;  %v15100_v59 = vsel %vm12674_vm6, %v3152_v24, %v3153_v19  ;;  %v8122_v57 = vrot.slane %v8121_v13, 4  ;;  %v10612_v19 = vld [vmem:[%s12425_s25 + $0x70] sm:$0xf] }
 0x206   : > { %v8162_v7 = vshrl.u32 %v10607_v46, 16  ;;  %v8132_v22 = vrot.slane %v15083_v18, 4  ;;  %v8140_v44 = vor.u32 %v8139_v5, %v8136_v12  ;;  %v8154_v17 = vrot.slane %v8152_v28, 5  ;;  %v10614_v28 = vld [vmem:[%s12425_s25 + $0x78] sm:$0xe] }
 0x207   : > { %v8157_v58 = vrot.slane %v8155_v14, 6  ;;  %v9950_v49 = vcombine.low %v15054_v48, %v15064_v37  ;;  %v9951_v2 = vcombine.low %v15069_v61, %v15090_v53  ;;  %v15110_v27 = vsel %vm798_vm0, %v14903_v33, 0 }
 0x208   : > { %v8171_v21 = vshrl.u32 %v10608_v50, 16  ;;  %v9952_v42 = vcombine.low %v15096_v4, %v15100_v59  ;;  %v8149_v15 = vor.u32 %v8148_v31, %v8145_v3  ;;  %v8165_v6 = vshll.u32 %v10607_v46, 16 }
 0x209   : > { %11539 = vmatmul.mubr.msk.bf16.gmra.mrb[4].mxu0 %vm749_vm3, %v12194_v0  ;;  %v8174_v35 = vshll.u32 %v10608_v50, 16  ;;  %v8131_v33 = vsel %vm12448_vm4, %v8122_v57, %v15083_v18  ;;  %v8164_v48 = vrot.slane %v8162_v7, 5  ;;  %v8180_v61 = vshrl.u32 %v10609_v47, 16 }
 0x20a   : > { %11249 = vmatmul.mubr.msk.bf16.gmra.mrb[20].mxu1 %vm749_vm3, %v9948_v29  ;;  %11542 = vmatprep.mubr.msk.bf16.mxu0 %vm749_vm3, %v12195_v8  ;;  %v8173_v37 = vrot.slane %v8171_v21, 5  ;;  %v8141_v54 = vsel %vm12448_vm4, %v8132_v22, %v8140_v44  ;;  %v15131_v60 = vor.u32 %v8157_v58, %v8154_v17  ;;  %v8183_v10 = vshll.u32 %v10609_v47, 16  ;;  %v10615_v8 = vld [vmem:[%s12425_s25 + $0x7c] sm:$0xf]  ;;  %v10616_v44 = vld [vmem:[%s12425_s25 + $0x80] sm:$0x3] }
 0x20b   : > { %11252 = vmatprep.mubr.msk.bf16.mxu1 %vm749_vm3, %v9949_v55  ;;  %v8176_v29 = vrot.slane %v8174_v35, 6  ;;  %v8182_v26 = vrot.slane %v8180_v61, 5  ;;  %v8190_v11 = vshrl.u32 %v10610_v20, 16  ;;  %v8193_v30 = vshll.u32 %v10610_v20, 16 }
 0x20c   : > { %v8199_v41 = vshrl.u32 %v10611_v45, 16  ;;  %v8167_v24 = vrot.slane %v8165_v6, 6  ;;  %v8185_v23 = vrot.slane %v8183_v10, 6  ;;  %v8202_v55 = vshll.u32 %v10611_v45, 16  ;;  %v10617_v6 = vld [vmem:[%s12425_s25 + $0x84] sm:$0xe] }
 0x20d   : > { %v8177_v56 = vor.u32 %v8176_v29, %v8173_v37  ;;  %v15137_v32 = vrot.slane %v8149_v15, 4  ;;  %v15141_v12 = vsel %vm798_vm0, %v15077_v34, 0  ;;  %v8192_v9 = vrot.slane %v8190_v11, 5  ;;  %v12200_v29 = vld [vmem:[%s12425_s25 + $0xa8] sm:$0xff]  }
 0x20e   : > { %v8195_v46 = vrot.slane %v8193_v30, 6  ;;  %v15143_v39 = vor.u32 %v8185_v23, %v8182_v26  ;;  %v8201_v16 = vrot.slane %v8199_v41, 5  ;;  %v8204_v13 = vrot.slane %v8202_v55, 6  ;;  %v12199_v30 = vld [vmem:[%s12425_s25 + $0x24] sm:$0xff]  }
 0x20f   : > { %v8208_v18 = vshrl.u32 %v10612_v19, 16  ;;  %v15146_v14 = vcombine.low %v8131_v33, %v8141_v54  ;;  %v8211_v0 = vshll.u32 %v10612_v19, 16  ;;  %v8218_v53 = vshrl.u32 %v10613_v36, 16  ;;  %v12198_v33 = vld [vmem:[%s12425_s25 + $0x9c] sm:$0xff]   ;;  %v15167_v54 = vld [vmem:[%s12425_s25 + $0x88] sm:$0xf] }
 0x210   : > { %v8221_v5 = vshll.u32 %v10613_v36, 16  ;;  %v8160_v34 = vrot.slane %v15131_v60, 4  ;;  %v8168_v3 = vor.u32 %v8167_v24, %v8164_v48  ;;  %v8178_v31 = vrot.slane %v8177_v56, 4  ;;  %v10619_v24 = vld [vmem:[%s12425_s25 + $0x8c] sm:$0x3] }
 0x211   : > { %11543 = vmatmul.mubr.msk.bf16.gmra.mrb[8].mxu0 %vm749_vm3, %v12196_v40  ;;  %v8210_v50 = vrot.slane %v8208_v18, 5  ;;  %v8188_v57 = vrot.slane %v15143_v39, 4  ;;  %v8196_v7 = vor.u32 %v8195_v46, %v8192_v9  ;;  %v8213_v22 = vrot.slane %v8211_v0, 6 }
 0x212   : > { %11253 = vmatmul.mubr.msk.bf16.gmra.mrb[24].mxu1 %vm749_vm3, %v9950_v49  ;;  %11546 = vmatprep.mubr.msk.bf16.mxu0 %vm749_vm3, %v12197_v38  ;;  %v8227_v17 = vshrl.u32 %v10614_v28, 16  ;;  %v8205_v58 = vor.u32 %v8204_v13, %v8201_v16  ;;  %v8220_v47 = vrot.slane %v8218_v53, 5  ;;  %v8223_v21 = vrot.slane %v8221_v5, 6  ;;  %v10620_v16 = vld [vmem:[%s12425_s25 + $0x90] sm:$0xe] }
 0x213   : > { %11256 = vmatprep.mubr.msk.bf16.mxu1 %vm749_vm3, %v9951_v2  ;;  %v8230_v15 = vshll.u32 %v10614_v28, 16  ;;  %v8159_v49 = vsel %vm12448_vm4, %v15137_v32, %v15131_v60  ;;  %v15161_v20 = vor.u32 %v8213_v22, %v8210_v50  ;;  %v8236_v45 = vshrl.u32 %v10615_v8, 16  ;;  %v15198_v53 = vld [vmem:[%s12425_s25 + $0x94] sm:$0xf]  ;;  %v12204_v22 = vld [vmem:[%s12425_s25 + $0xc0] sm:$0xff]  }
 0x214   : > { %v8229_v35 = vrot.slane %v8227_v17, 5  ;;  %v8169_v2 = vsel %vm12448_vm4, %v8160_v34, %v8168_v3  ;;  %v8239_v37 = vshll.u32 %v10615_v8, 16  ;;  %v8246_v61 = vshrl.u32 %v10616_v44, 16 }
 0x215   : > { %v8232_v48 = vrot.slane %v8230_v15, 6  ;;  %v8187_v10 = vsel %vm12448_vm4, %v8178_v31, %v15143_v39  ;;  %v8197_v60 = vsel %vm12448_vm4, %v8188_v57, %v8196_v7  ;;  %v8249_v26 = vshll.u32 %v10616_v44, 16  ;;  %v10622_v31 = vld [vmem:[%s12425_s25 + $0x98] sm:$0x3]  ;;  %v12201_v57 = vld [vmem:[%s12425_s25 + $0x30] sm:$0xff]  }
 0x216   : > { %v8255_v11 = vshrl.u32 %v10617_v6, 16  ;;  %v15176_v19 = vrot.slane %v8205_v58, 4  ;;  %v8224_v41 = vor.u32 %v8223_v21, %v8220_v47  ;;  %v8258_v56 = vshll.u32 %v10617_v6, 16  ;;  %v12202_v7 = vld [vmem:[%s12425_s25 + $0xb4] sm:$0xff]  }
 0x217   : > { %v8233_v40 = vor.u32 %v8232_v48, %v8229_v35  ;;  %v8216_v23 = vrot.slane %v15161_v20, 4  ;;  %v8238_v36 = vrot.slane %v8236_v45, 5  ;;  %v8241_v55 = vrot.slane %v8239_v37, 6  ;;  %v10623_v35 = vld [vmem:[%s12425_s25 + $0x9c] sm:$0xe] }
 0x218   : > { %v8264_v38 = vshrl.u32 %v15167_v54, 16  ;;  %v15182_v32 = vrot.slane %v8246_v61, 5  ;;  %v15184_v9 = vrot.slane %v8249_v26, 6  ;;  %v8257_v46 = vrot.slane %v8255_v11, 5  ;;  %v12203_v45 = vld [vmem:[%s12425_s25 + $0x3c] sm:$0xff]  }
 0x219   : > { %11547 = vmatmul.mubr.msk.bf16.gmra.mrb[12].mxu0 %vm749_vm3, %v12198_v33  ;;  %v8260_v39 = vrot.slane %v8258_v56, 6  ;;  %v15192_v13 = vcombine.low %v8159_v49, %v8169_v2  ;;  %v15194_v18 = vcombine.low %v8187_v10, %v8197_v60  ;;  %v8267_v28 = vshll.u32 %v15167_v54, 16  ;;  %v15226_v61 = vld [vmem:[%s12425_s25 + $0xa0] sm:$0xf] }
 0x21a   : > { %11257 = vmatmul.mubr.msk.bf16.gmra.mrb[28].mxu1 %vm749_vm3, %v9952_v42  ;;  %11550 = vmatprep.mubr.msk.bf16.mxu0 %vm749_vm3, %v12200_v29  ;;  %v8274_v0 = vshrl.u32 %v10619_v24, 16  ;;  %v8215_v4 = vsel %vm12448_vm4, %v15176_v19, %v15161_v20  ;;  %v15205_v59 = vrot.slane %v8233_v40, 4  ;;  %v8266_v42 = vrot.slane %v8264_v38, 5  ;;  %v10039_v19 = vld [vmem:[%s12425_s25 + $0x38] sm:$0x1] }
 0x21b   : > { %11262 = vmatprep.mubr.msk.bf16.mxu1 %vm749_vm3, %v12199_v30  ;;  %v8277_v5 = vshll.u32 %v10619_v24, 16  ;;  %v15207_v34 = vor.u32 %v8241_v55, %v8238_v36  ;;  %v8269_v3 = vrot.slane %v8267_v28, 6  ;;  %v8283_v50 = vshrl.u32 %v10620_v16, 16  ;;  %v12208_v28 = vld [vmem:[%s12425_s25 + $0xd8] sm:$0xff]  }
 0x21c   : > { %v8286_v8 = vshll.u32 %v10620_v16, 16  ;;  %v15215_v44 = vsel %vm12448_vm4, %v8216_v23, %v8224_v41  ;;  %v8252_v17 = vor.u32 %v15184_v9, %v15182_v32  ;;  %v8261_v58 = vor.u32 %v8260_v39, %v8257_v46  ;;  %v10625_v41 = vld [vmem:[%s12425_s25 + $0xa4] sm:$0x3]  ;;  %v12205_v39 = vld [vmem:[%s12425_s25 + $0x48] sm:$0xff]  }
 0x21d   : > { %v8292_v47 = vshrl.u32 %v15198_v53, 16  ;;  %v8276_v21 = vrot.slane %v8274_v0, 5  ;;  %v8279_v15 = vrot.slane %v8277_v5, 6  ;;  %v8285_v6 = vrot.slane %v8283_v50, 5  ;;  %v12206_v16 = vld [vmem:[%s12425_s25 + $0xcc] sm:$0xff]  }
 0x21e   : > { %v8288_v49 = vrot.slane %v8286_v8, 6  ;;  %v15222_v33 = vor.u32 %v8269_v3, %v8266_v42  ;;  %v8295_v48 = vshll.u32 %v15198_v53, 16  ;;  %v8302_v37 = vshrl.u32 %v10622_v31, 16  ;;  %v12326_v3 = vld [vmem:[%s16336_s1 + $0x10] sm:$0x3] }
 0x21f   : > { %v8294_v2 = vrot.slane %v8292_v47, 5  ;;  %v8243_v29 = vsel %vm12448_vm4, %v15205_v59, %v15207_v34  ;;  %v8244_v10 = vrot.slane %v15207_v34, 4  ;;  %v8305_v26 = vshll.u32 %v10622_v31, 16 }
 0x220   : > { %v8289_v60 = vor.u32 %v8288_v49, %v8285_v6  ;;  %v8297_v11 = vrot.slane %v8295_v48, 6  ;;  %v8304_v30 = vrot.slane %v8302_v37, 5  ;;  %v8311_v40 = vshrl.u32 %v10623_v35, 16  ;;  %v12328_v6 = vld [vmem:[%s12425_s25 + $0x28] sm:$0xf] }
 0x221   : > { %11551 = vmatmul.mubr.msk.bf16.gmra.mrb[16].mxu0 %vm749_vm3, %v12202_v7  ;;  %v8314_v24 = vshll.u32 %v10623_v35, 16  ;;  %v15237_v56 = vrot.slane %v8261_v58, 4  ;;  %v8280_v23 = vor.u32 %v8279_v15, %v8276_v21  ;;  %v8307_v36 = vrot.slane %v8305_v26, 6  ;;  %v10036_v7 = vld [vmem:[%s12425_s25 + $0x2c] sm:$0x1] }
 0x222   : > { %11263 = vmatmul.mubr.msk.bf16.vlgmr.msra.gmra.mrb[0].mxu1 %vm749_vm3, %v12201_v57  ;;  %11554 = vmatprep.mubr.msk.bf16.mxu0 %vm749_vm3, %v12204_v22  ;;  %v8320_v55 = vshrl.u32 %v15226_v61, 16  ;;  %v8272_v38 = vrot.slane %v15222_v33, 4  ;;  %v15243_v32 = vor.u32 %v8297_v11, %v8294_v2  ;;  %v8313_v9 = vrot.slane %v8311_v40, 5  ;;  %v10626_v22 = vld [vmem:[%s12425_s25 + $0xa8] sm:$0xe] }
 0x223   : > { %11295 = vmatpush3.bf16.msra.mxu1 %v15110_v27  ;;  %11266 = vmatprep.mubr.msk.bf16.mxu1 %vm749_vm3, %v12203_v45  ;;  %v8316_v46 = vrot.slane %v8314_v24, 6  ;;  %v8290_v0 = vrot.slane %v8289_v60, 4  ;;  %v8323_v5 = vshll.u32 %v15226_v61, 16  ;;  %v8330_v27 = vshrl.u32 %v10625_v41, 16  ;;  %v12327_v21 = vld [vmem:[%s12425_s25 + $0x24] sm:$0xe] }
 0x224   : > { %v8322_v42 = vrot.slane %v8320_v55, 5  ;;  %12157 = vmatprep.subr.msk.bf16.mxu1 %vm798_vm0, %v12326_v3  ;;  %v8300_v31 = vrot.slane %v15243_v32, 4  ;;  %v8308_v50 = vor.u32 %v8307_v36, %v8304_v30  ;;  %v8333_v57 = vshll.u32 %v10625_v41, 16  ;;  %v15259_v35 = vld [vmem:[%s12425_s25 + $0xac] sm:$0xf]  ;;  %v12207_v45 = vld [vmem:[%s12425_s25 + $0x54] sm:$0xff]  }
 0x225   : > { %v8317_v8 = vor.u32 %v8316_v46, %v8313_v9  ;;  %v8325_v58 = vrot.slane %v8323_v5, 6  ;;  %v8332_v47 = vrot.slane %v8330_v27, 5  ;;  %v10082_v15 = vrot.slane %v12327_v21, 9  ;;  %v12210_v5 = vld [vmem:[%s12425_s25 + $0xe4] sm:$0xff]   ;;  %v10631_v21 = vld [vmem:[%s12425_s25 + $0xbc] sm:$0x3] }
 0x226   : > { %v3906_v49 = vrot.slane %v12328_v6, 5  ;;  %v8253_v2 = vsel %vm12448_vm4, %v8244_v10, %v8252_v17  ;;  %v8271_v48 = vsel %vm12448_vm4, %v15237_v56, %v15222_v33  ;;  %v8281_v37 = vsel %vm12448_vm4, %v8272_v38, %v8280_v23  ;;  %v10628_v10 = vld [vmem:[%s12425_s25 + $0xb0] sm:$0x3] }
 0x227   : > { %v8335_v60 = vrot.slane %v8333_v57, 6  ;;  %v8299_v26 = vsel %vm12448_vm4, %v8290_v0, %v15243_v32  ;;  %v15273_v11 = vor.u32 %v8325_v58, %v8322_v42  ;;  %v3909_v41 = vrot.slane %v10036_v7, 5  ;;  %v12209_v57 = vld [vmem:[%s12425_s25 + $0x60] sm:$0xff]   ;;  %v12212_v7 = vld [vmem:[%s12425_s25 + $0xf0] sm:$0xff]  }
 0x228   : > { %v3908_v30 = vrot.slane %v3906_v49, 4  ;;  %v8309_v17 = vsel %vm12448_vm4, %v8300_v31, %v8308_v50  ;;  %v8339_v33 = vshrl.u32 %v10626_v22, 16  ;;  %v8342_v40 = vshll.u32 %v10626_v22, 16 }
 0x229   : > { %11555 = vmatmul.mubr.msk.bf16.gmra.mrb[20].mxu0 %vm749_vm3, %v12206_v16  ;;  %v8348_v24 = vshrl.u32 %v15259_v35, 16  ;;  %v15282_v56 = vrot.slane %v8317_v8, 4  ;;  %v8336_v23 = vor.u32 %v8335_v60, %v8332_v47  ;;  %v15286_v36 = vsel %vm13502_vm12, %v10082_v15, %v3906_v49  ;;  %v15315_v8 = vld [vmem:[%s12425_s25 + $0xb8] sm:$0xf] }
 0x22a   : > { %11267 = vmatmul.mubr.msk.bf16.gmra.mrb[4].mxu1 %vm749_vm3, %v12205_v39  ;;  %11558 = vmatprep.mubr.msk.bf16.mxu0 %vm749_vm3, %v12208_v28  ;;  %v8351_v55 = vshll.u32 %v15259_v35, 16  ;;  %v8328_v38 = vrot.slane %v15273_v11, 4  ;;  %v8341_v32 = vrot.slane %v8339_v33, 5  ;;  %v8344_v9 = vrot.slane %v8342_v40, 6  ;;  %v10629_v39 = vld [vmem:[%s12425_s25 + $0xb4] sm:$0xe] }
 0x22b   : > { %11270 = vmatprep.mubr.msk.bf16.mxu1 %vm749_vm3, %v12207_v45  ;;  %v8350_v46 = vrot.slane %v8348_v24, 5  ;;  %v15294_v16 = vsel %vm13502_vm12, %v3908_v30, %v3909_v41  ;;  %v8358_v0 = vshrl.u32 %v10628_v10, 16  ;;  %v8361_v42 = vshll.u32 %v10628_v10, 16  ;;  %v10632_v30 = vld [vmem:[%s12425_s25 + $0xc0] sm:$0xe] }
 0x22c   : > { %v8353_v28 = vrot.slane %v8351_v55, 6  ;;  %v15303_v27 = vcombine.low %v8215_v4, %v15215_v44  ;;  %v15310_v3 = vcombine.low %v8243_v29, %v8253_v2  ;;  %v15312_v31 = vcombine.low %v8271_v48, %v8281_v37  ;;  %v12329_v4 = vld [vmem:[%s12425_s25 + $0x34] sm:$0xf]  ;;  %v12211_v44 = vld [vmem:[%s12425_s25 + $0x6c] sm:$0xff]   ;;  %v10042_v40 = vld [vmem:[%s12425_s25 + $0x44] sm:$0x1] }
 0x22d   : > { %v8345_v50 = vor.u32 %v8344_v9, %v8341_v32  ;;  %v15319_v22 = vcombine.low %v8299_v26, %v8309_v17  ;;  %v8327_v20 = vsel %vm12448_vm4, %v15282_v56, %v15273_v11  ;;  %v3913_v59 = vrot.slane %v12329_v4, 5 }
 0x22e   : > { %v8367_v34 = vshrl.u32 %v10629_v39, 16  ;;  %v15330_v29 = vsel %vm12448_vm4, %v8328_v38, %v8336_v23  ;;  %v10099_v58 = vcombine.low %v15286_v36, %v15294_v16  ;;  %v15334_v47 = vor.u32 %v8353_v28, %v8350_v46 }
 0x22f   : > { %v8370_v15 = vshll.u32 %v10629_v39, 16  ;;  %v8360_v6 = vrot.slane %v8358_v0, 5  ;;  %v8363_v49 = vrot.slane %v8361_v42, 6  ;;  %v8376_v2 = vshrl.u32 %v15315_v8, 16  ;;  %v12331_v39 = vld [vmem:[%s12425_s25 + $0x40] sm:$0xf] }
 0x230   : > { %v8369_v45 = vrot.slane %v8367_v34, 5  ;;  %v15339_v48 = vrot.slane %v8345_v50, 4  ;;  %v3916_v37 = vrot.slane %v10039_v19, 5  ;;  %v8379_v26 = vshll.u32 %v15315_v8, 16  ;;  %v12213_v0 = vld [vmem:[%s12425_s25 + $0x78] sm:$0xff]  }
 0x231   : > { %11559 = vmatmul.mubr.msk.bf16.gmra.mrb[24].mxu0 %vm749_vm3, %v12210_v5  ;;  %v8372_v60 = vrot.slane %v8370_v15, 6  ;;  %v15349_v41 = vsel %vm13502_vm12, %v10083_v51, %v3913_v59  ;;  %v3915_v17 = vrot.slane %v3913_v59, 4  ;;  %v8378_v10 = vrot.slane %v8376_v2, 5  ;;  %v12330_v51 = vld [vmem:[%s12425_s25 + $0x3c] sm:$0xe] }
 0x232   : > { %11271 = vmatmul.mubr.msk.bf16.gmra.mrb[8].mxu1 %vm749_vm3, %v12209_v57  ;;  %11562 = vmatprep.mubr.msk.bf16.mxu0 %vm749_vm3, %v12212_v7  ;;  %v8386_v33 = vshrl.u32 %v10631_v21, 16  ;;  %v8356_v24 = vrot.slane %v15334_v47, 4  ;;  %v8381_v55 = vrot.slane %v8379_v26, 6  ;;  %v8389_v38 = vshll.u32 %v10631_v21, 16  ;;  %v12214_v42 = vld [vmem:[%s12425_s25 + $0xfc] sm:$0xff]   ;;  %v12215_v21 = vld [vmem:[%s12425_s25 + $0x84] sm:$0xff]  }
 0x233   : > { %11274 = vmatprep.mubr.msk.bf16.mxu1 %vm749_vm3, %v12211_v44  ;;  %v8373_v23 = vor.u32 %v8372_v60, %v8369_v45  ;;  %v8364_v32 = vor.u32 %v8363_v49, %v8360_v6  ;;  %v10084_v46 = vrot.slane %v12330_v51, 9  ;;  %v3920_v28 = vrot.slane %v12331_v39, 5  ;;  %v10634_v59 = vld [vmem:[%s12425_s25 + $0xc8] sm:$0x3]  ;;  %v12332_v51 = vld [vmem:[%s12425_s25 + $0x4c] sm:$0xf] }
 0x234   : > { %v8388_v9 = vrot.slane %v8386_v33, 5  ;;  %v15361_v5 = vor.u32 %v8381_v55, %v8378_v10  ;;  %v8391_v50 = vrot.slane %v8389_v38, 6  ;;  %v3923_v57 = vrot.slane %v10042_v40, 5  ;;  %v10045_v55 = vld [vmem:[%s12425_s25 + $0x50] sm:$0x1] }
 0x235   : > { %v8395_v7 = vshrl.u32 %v10632_v30, 16  ;;  %v8374_v19 = vrot.slane %v8373_v23, 4  ;;  %v3922_v4 = vrot.slane %v3920_v28, 4  ;;  %v8398_v34 = vshll.u32 %v10632_v30, 16  ;;  %v15396_v38 = vld [vmem:[%s12425_s25 + $0xd0] sm:$0xf] }
 0x236   : > { %v8404_v44 = vshrl.u32 %v15355_v25, 16  ;;  %v8355_v15 = vsel %vm12448_vm4, %v15339_v48, %v15334_v47  ;;  %v8384_v6 = vrot.slane %v15361_v5, 4  ;;  %v8392_v49 = vor.u32 %v8391_v50, %v8388_v9  ;;  %16552 = vst [vmem:[#allocation16_spill] sm:$0xff] %v15396_v38 }
 0x237   : > { %v8397_v45 = vrot.slane %v8395_v7, 5  ;;  %v15373_v2 = vsel %vm13502_vm12, %v3915_v17, %v3916_v37  ;;  %v8400_v60 = vrot.slane %v8398_v34, 6  ;;  %v8407_v30 = vshll.u32 %v15355_v25, 16  ;;  %v10635_v37 = vld [vmem:[%s12425_s25 + $0xcc] sm:$0xe] }
 0x238   : > { %v8406_v26 = vrot.slane %v8404_v44, 5  ;;  %v8365_v10 = vsel %vm12448_vm4, %v8356_v24, %v8364_v32  ;;  %v15381_v47 = vsel %vm13502_vm12, %v10084_v46, %v3920_v28  ;;  %v8414_v48 = vshrl.u32 %v10634_v59, 16  ;;  %v12333_v28 = vld [vmem:[%s12425_s25 + $0x48] sm:$0xe] }
 0x239   : > { %11563 = vmatmul.mubr.msk.bf16.gmra.mrb[28].mxu0 %vm749_vm3, %v12214_v42  ;;  %v8417_v33 = vshll.u32 %v10634_v59, 16  ;;  %v8383_v17 = vsel %vm12448_vm4, %v8374_v19, %v15361_v5  ;;  %v15392_v40 = vsel %vm13502_vm12, %v3922_v4, %v3923_v57  ;;  %v8401_v24 = vor.u32 %v8400_v60, %v8397_v45  ;;  %v10637_v42 = vld [vmem:[%s12425_s25 + $0xd4] sm:$0x3] }
 0x23a   : > { %11275 = vmatmul.mubr.msk.bf16.gmra.mrb[12].mxu1 %vm749_vm3, %v12213_v0  ;;  %11568 = vmatprep.mubr.msk.bf16.mxu0 %vm749_vm3, %v15146_v14  ;;  %v8409_v23 = vrot.slane %v8407_v30, 6  ;;  %v8393_v14 = vsel %vm12448_vm4, %v8384_v6, %v8392_v49  ;;  %v8416_v32 = vrot.slane %v8414_v48, 5  ;;  %v3927_v46 = vrot.slane %v12332_v51, 5  ;;  %v12216_v59 = vld [vmem:[%s12425_s25 + $0x90] sm:$0xff]   ;;  %v12217_v49 = vld [vmem:[%s12425_s25 + $0x9c] sm:$0xff]  }
 0x23b   : > { %11278 = vmatprep.mubr.msk.bf16.mxu1 %vm749_vm3, %v12215_v21  ;;  %v8419_v9 = vrot.slane %v8417_v33, 6  ;;  %v10085_v0 = vrot.slane %v12333_v28, 9  ;;  %v8423_v5 = vshrl.u32 %v10635_v37, 16  ;;  %v8426_v50 = vshll.u32 %v10635_v37, 16 }
 0x23c   : > { %v8410_v39 = vor.u32 %v8409_v23, %v8406_v26  ;;  %v8402_v57 = vrot.slane %v8401_v24, 4  ;;  %v3930_v19 = vrot.slane %v10045_v55, 5  ;;  %v8432_v4 = vshrl.u32 %v15396_v38, 16  ;;  %v10638_v23 = vld [vmem:[%s12425_s25 + $0xd8] sm:$0xe] }
 0x23d   : > { %v8420_v7 = vor.u32 %v8419_v9, %v8416_v32  ;;  %v3929_v44 = vrot.slane %v3927_v46, 4  ;;  %v8425_v21 = vrot.slane %v8423_v5, 5  ;;  %v8428_v6 = vrot.slane %v8426_v50, 6  ;;  %v15424_v55 = vld [vmem:[%s12425_s25 + $0xdc] sm:$0xf] }
 0x23e   : > { %v8412_v34 = vrot.slane %v8410_v39, 4  ;;  %v15413_v45 = vcombine.low %v8327_v20, %v15330_v29  ;;  %v10100_v60 = vcombine.low %v15349_v41, %v15373_v2  ;;  %v8435_v26 = vshll.u32 %v15396_v38, 16  ;;  %16553 = vst [vmem:[#allocation21_spill] sm:$0xff] %v15424_v55  ;;  %v10640_v9 = vld [vmem:[%s12425_s25 + $0xe0] sm:$0x3] }
 0x23f   : > { %v8442_v30 = vshrl.u32 %v10637_v42, 16  ;;  %v15418_v48 = vcombine.low %v8355_v15, %v8365_v10  ;;  %v10101_v33 = vcombine.low %v15381_v47, %v15392_v40  ;;  %v8429_v37 = vor.u32 %v8428_v6, %v8425_v21  ;;  %v12219_v6 = vld [vmem:[%s12425_s25 + $0xb4] sm:$0xff]   ;;  %v15769_v38 = vld [vmem:[%s12425_s25 + $0xc4] sm:$0xf] }
 0x240   : > { %v8445_v24 = vshll.u32 %v10637_v42, 16  ;;  %v15428_v11 = vcombine.low %v8383_v17, %v8393_v14  ;;  %v15432_v56 = vsel %vm13502_vm12, %v10085_v0, %v3927_v46  ;;  %v8434_v20 = vrot.slane %v8432_v4, 5  ;;  %v10048_v17 = vld [vmem:[%s12425_s25 + $0x5c] sm:$0x1]  ;;  %v12334_v14 = vld [vmem:[%s12425_s25 + $0x58] sm:$0xf] }
 0x241   : > { %11569 = vmatmul.mubr.msk.bf16.vlgmr.msra.gmra.mrb[0].mxu0 %vm749_vm3, %v15192_v13  ;;  %v8437_v29 = vrot.slane %v8435_v26, 6  ;;  %v8411_v15 = vsel %vm12448_vm4, %v8402_v57, %v8410_v39  ;;  %v8421_v13 = vsel %vm12448_vm4, %v8412_v34, %v8420_v7  ;;  %v15442_v10 = vsel %vm13502_vm12, %v3929_v44, %v3930_v19  ;;  %v12335_v42 = vld [vmem:[%s12425_s25 + $0x54] sm:$0xe]  ;;  %v12218_v4 = vld [vmem:[%s12425_s25 + $0xa8] sm:$0xff]  }
 0x242   : > { %11279 = vmatmul.mubr.msk.bf16.gmra.mrb[16].mxu1 %vm749_vm3, %v12216_v59  ;;  %11601 = vmatpush3.bf16.msra.mxu0 %v15141_v12  ;;  %v3934_v32 = vrot.slane %v12334_v14, 5  ;;  %v8444_v12 = vrot.slane %v8442_v30, 5  ;;  %v8451_v51 = vshrl.u32 %v10638_v23, 16  ;;  %v8454_v46 = vshll.u32 %v10638_v23, 16  ;;  %v15465_v23 = vld [vmem:[%s12425_s25 + $0xe8] sm:$0xf] }
 0x243   : > { %11282 = vmatprep.mubr.msk.bf16.mxu1 %vm749_vm3, %v12217_v49  ;;  %11572 = vmatprep.mubr.msk.bf16.mxu0 %vm749_vm3, %v15194_v18  ;;  %v8460_v39 = vshrl.u32 %v15424_v55, 16  ;;  %v15451_v28 = vrot.slane %v8429_v37, 4  ;;  %v8447_v0 = vrot.slane %v8445_v24, 6  ;;  %v10086_v5 = vrot.slane %v12335_v42, 9  ;;  %v10641_v24 = vld [vmem:[%s12425_s25 + $0xe4] sm:$0xe] }
 0x244   : > { %v8463_v50 = vshll.u32 %v15424_v55, 16  ;;  %v15455_v57 = vor.u32 %v8437_v29, %v8434_v20  ;;  %v3937_v7 = vrot.slane %v10048_v17, 5  ;;  %v8453_v18 = vrot.slane %v8451_v51, 5  ;;  %16554 = vst [vmem:[#allocation5_spill] sm:$0xff] %v15465_v23 }
 0x245   : > { %v8456_v19 = vrot.slane %v8454_v46, 6  ;;  %v3936_v59 = vrot.slane %v3934_v32, 4  ;;  %v8462_v34 = vrot.slane %v8460_v39, 5  ;;  %v8470_v21 = vshrl.u32 %v10640_v9, 16  ;;  %v10643_v46 = vld [vmem:[%s12425_s25 + $0xec] sm:$0x3] }
 0x246   : > { %v8465_v44 = vrot.slane %v8463_v50, 6  ;;  %v15459_v49 = vcombine.low %v8411_v15, %v8421_v13  ;;  %v8473_v37 = vshll.u32 %v10640_v9, 16  ;;  %v8448_v20 = vor.u32 %v8447_v0, %v8444_v12  ;;  %v12336_v12 = vld [vmem:[%s12425_s25 + $0x64] sm:$0xf] }
 0x247   : > { %v8457_v30 = vor.u32 %v8456_v19, %v8453_v18  ;;  %v15469_v29 = vsel %vm13502_vm12, %v10086_v5, %v3934_v32  ;;  %v8472_v14 = vrot.slane %v8470_v21, 5  ;;  %v8439_v15 = vsel %vm12448_vm4, %v15451_v28, %v15455_v57  ;;  %v10051_v32 = vld [vmem:[%s12425_s25 + $0x68] sm:$0x1] }
 0x248   : > { %v15471_v17 = vor.u32 %v8465_v44, %v8462_v34  ;;  %v8440_v13 = vrot.slane %v15455_v57, 4  ;;  %v8475_v9 = vrot.slane %v8473_v37, 6  ;;  %v3941_v51 = vrot.slane %v12336_v12, 5  ;;  %v12337_v57 = vld [vmem:[%s12425_s25 + $0x60] sm:$0xe]  ;;  %v12221_v12 = vld [vmem:[%s12425_s25 + $0xcc] sm:$0xff]  }
 0x249   : > { %11573 = vmatmul.mubr.msk.bf16.gmra.mrb[4].mxu0 %vm749_vm3, %v15303_v27  ;;  %v15487_v27 = vsel %vm13502_vm12, %v3936_v59, %v3937_v7  ;;  %v8479_v39 = vshrl.u32 %v10641_v24, 16  ;;  %v8482_v0 = vshll.u32 %v10641_v24, 16  ;;  %v8488_v28 = vshrl.u32 %v15465_v23, 16 }
 0x24a   : > { %11283 = vmatmul.mubr.msk.bf16.gmra.mrb[20].mxu1 %vm749_vm3, %v12218_v4  ;;  %11576 = vmatprep.mubr.msk.bf16.mxu0 %vm749_vm3, %v15310_v3  ;;  %v8458_v42 = vrot.slane %v8457_v30, 4  ;;  %v8468_v5 = vrot.slane %v15471_v17, 4  ;;  %v8476_v50 = vor.u32 %v8475_v9, %v8472_v14  ;;  %v10087_v3 = vrot.slane %v12337_v57, 9  ;;  %v12220_v30 = vld [vmem:[%s12425_s25 + $0xc0] sm:$0xff]  }
 0x24b   : > { %11286 = vmatprep.mubr.msk.bf16.mxu1 %vm749_vm3, %v12219_v6  ;;  %v8481_v18 = vrot.slane %v8479_v39, 5  ;;  %v8484_v19 = vrot.slane %v8482_v0, 6  ;;  %v8490_v7 = vrot.slane %v8488_v28, 5  ;;  %v8491_v4 = vshll.u32 %v15465_v23, 16  ;;  %v10644_v6 = vld [vmem:[%s12425_s25 + $0xf0] sm:$0xe] }
 0x24c   : > { %v3943_v59 = vrot.slane %v3941_v51, 4  ;;  %v3944_v34 = vrot.slane %v10051_v32, 5  ;;  %v8498_v44 = vshrl.u32 %v10643_v46, 16  ;;  %v8501_v21 = vshll.u32 %v10643_v46, 16  ;;  %v10054_v0 = vld [vmem:[%s12425_s25 + $0x74] sm:$0x1] }
 0x24d   : > { %v8449_v37 = vsel %vm12448_vm4, %v8440_v13, %v8448_v20  ;;  %v8485_v14 = vor.u32 %v8484_v19, %v8481_v18  ;;  %v8493_v9 = vrot.slane %v8491_v4, 6  ;;  %v8467_v32 = vsel %vm12448_vm4, %v8458_v42, %v15471_v17  ;;  %v12338_v20 = vld [vmem:[%s12425_s25 + $0x70] sm:$0xf]  ;;  %v15514_v28 = vld [vmem:[%s12425_s25 + $0xf4] sm:$0xf] }
 0x24e   : > { %v8477_v46 = vsel %vm12448_vm4, %v8468_v5, %v8476_v50  ;;  %v15509_v39 = vsel %vm13502_vm12, %v10087_v3, %v3941_v51  ;;  %v3948_v13 = vrot.slane %v12338_v20, 5  ;;  %16555 = vst [vmem:[#allocation7_spill] sm:$0xff] %v15514_v28  ;;  %v8500_v18 = vrot.slane %v8498_v44, 5  ;;  %v10646_v4 = vld [vmem:[%s12425_s25 + $0xf8] sm:$0x3] }
 0x24f   : > { %v15516_v57 = vor.u32 %v8493_v9, %v8490_v7  ;;  %v8503_v19 = vrot.slane %v8501_v21, 6  ;;  %v8507_v1 = vshrl.u32 %v10644_v6, 16  ;;  %v15523_v17 = vsel %vm13502_vm12, %v3943_v59, %v3944_v34  ;;  %v12339_v42 = vld [vmem:[%s12425_s25 + $0x6c] sm:$0xe]  ;;  %v15547_v20 = vld [vmem:[%s12425_s25 + $0x100] sm:$0xf] }
 0x250   : > { %v15525_v51 = vrot.slane %v8485_v14, 4  ;;  %v10088_v5 = vrot.slane %v12339_v42, 9  ;;  %v8510_v50 = vshll.u32 %v10644_v6, 16  ;;  %v3950_v3 = vrot.slane %v3948_v13, 4  ;;  %16556 = vst [vmem:[#allocation24_spill] sm:$0xff] %v15547_v20  ;;  %v12222_v42 = vld [vmem:[%s12425_s25 + $0xd8] sm:$0xff]  }
 0x251   : > { %11577 = vmatmul.mubr.msk.bf16.gmra.mrb[8].mxu0 %vm749_vm3, %v15312_v31  ;;  %v3951_v7 = vrot.slane %v10054_v0, 5  ;;  %v8509_v44 = vrot.slane %v8507_v1, 5  ;;  %v8516_v31 = vshrl.u32 %v15514_v28, 16  ;;  %v15533_v59 = vcombine.low %v8439_v15, %v8449_v37  ;;  %v10647_v1 = vld [vmem:[%s12425_s25 + $0xfc] sm:$0xe] }
 0x252   : > { %11287 = vmatmul.mubr.msk.bf16.gmra.mrb[24].mxu1 %vm749_vm3, %v12220_v30  ;;  %11580 = vmatprep.mubr.msk.bf16.mxu0 %vm749_vm3, %v15319_v22  ;;  %v8512_v34 = vrot.slane %v8510_v50, 6  ;;  %v8519_v21 = vshll.u32 %v15514_v28, 16  ;;  %v8526_v6 = vshrl.u32 %v10646_v4, 16  ;;  %v8496_v30 = vrot.slane %v15516_v57, 4  ;;  %v10075_v23 = vld [vmem:[%s12425_s25 + $0xc8] sm:$0x1] }
 0x253   : > { %11290 = vmatprep.mubr.msk.bf16.mxu1 %vm749_vm3, %v12221_v12  ;;  %v8504_v22 = vor.u32 %v8503_v19, %v8500_v18  ;;  %v8518_v14 = vrot.slane %v8516_v31, 5  ;;  %v8529_v9 = vshll.u32 %v10646_v4, 16  ;;  %v15538_v0 = vcombine.low %v8467_v32, %v8477_v46  ;;  %v10057_v19 = vld [vmem:[%s12425_s25 + $0x80] sm:$0x1]  ;;  %v12340_v4 = vld [vmem:[%s12425_s25 + $0x7c] sm:$0xf] }
 0x254   : > { %v15544_v15 = vsel %vm13502_vm12, %v10088_v5, %v3948_v13  ;;  %v8521_v37 = vrot.slane %v8519_v21, 6  ;;  %v8495_v18 = vsel %vm12448_vm4, %v15525_v51, %v15516_v57  ;;  %v15556_v32 = vsel %vm13502_vm12, %v3950_v3, %v3951_v7  ;;  %v10649_v31 = vld [vmem:[%s12425_s25 + $0x104] sm:$0x3]  ;;  %v12341_v57 = vld [vmem:[%s12425_s25 + $0x78] sm:$0xe] }
 0x255   : > { %v8513_v46 = vor.u32 %v8512_v34, %v8509_v44  ;;  %v3955_v50 = vrot.slane %v12340_v4, 5  ;;  %v8528_v13 = vrot.slane %v8526_v6, 5  ;;  %v8531_v5 = vrot.slane %v8529_v9, 6 }
 0x256   : > { %v8535_v21 = vshrl.u32 %v10647_v1, 16  ;;  %v8538_v12 = vshll.u32 %v10647_v1, 16  ;;  %v8505_v24 = vsel %vm12448_vm4, %v8496_v30, %v8504_v22  ;;  %v15563_v26 = vor.u32 %v8521_v37, %v8518_v14  ;;  %v15576_v1 = vld [vmem:[%s12425_s25 + $0x84] sm:$0xe]  ;;  %v10066_v30 = vld [vmem:[%s12425_s25 + $0xa4] sm:$0x1] }
 0x257   : > { %v10089_v51 = vrot.slane %v12341_v57, 9  ;;  %v8544_v3 = vshrl.u32 %v15547_v20, 16  ;;  %v3957_v7 = vrot.slane %v3955_v50, 4  ;;  %v3958_v44 = vrot.slane %v10057_v19, 5  ;;  %v10060_v57 = vld [vmem:[%s12425_s25 + $0x8c] sm:$0x1] }
 0x258   : > { %v8537_v34 = vrot.slane %v8535_v21, 5  ;;  %v8540_v6 = vrot.slane %v8538_v12, 6  ;;  %v8547_v14 = vshll.u32 %v15547_v20, 16  ;;  %v8554_v9 = vshrl.u32 %v10649_v31, 16  ;;  %v10691_v20 = vld [vmem:[%s12425_s25 + $0x78] sm:$0x8] }
 0x259   : > { %11581 = vmatmul.mubr.msk.bf16.gmra.mrb[12].mxu0 %vm749_vm3, %v15413_v45  ;;  %v8546_v22 = vrot.slane %v8544_v3, 5  ;;  %v8514_v45 = vrot.slane %v8513_v46, 4  ;;  %v8532_v12 = vor.u32 %v8531_v5, %v8528_v13  ;;  %v15585_v19 = vsel %vm13502_vm12, %v10089_v51, %v3955_v50  ;;  %v15594_v46 = vld [vmem:[%s12425_s25 + $0x88] sm:$0xf]  ;;  %v10684_v3 = vld [vmem:[%s12425_s25 + $0x50] sm:$0x7] }
 0x25a   : > { %11291 = vmatmul.mubr.msk.bf16.gmra.mrb[28].mxu1 %vm749_vm3, %v12222_v42  ;;  %11584 = vmatprep.mubr.msk.bf16.mxu0 %vm749_vm3, %v15418_v48  ;;  %v8541_v37 = vor.u32 %v8540_v6, %v8537_v34  ;;  %v8557_v48 = vshll.u32 %v10649_v31, 16  ;;  %v8524_v42 = vrot.slane %v15563_v26, 4  ;;  %v8549_v4 = vrot.slane %v8547_v14, 6  ;;  %v10683_v5 = vld [vmem:[%s12425_s25 + $0x48] sm:$0x8] }
 0x25b   : > { %11296 = vmatprep.mubr.msk.bf16.mxu1 %vm749_vm3, %v10099_v58  ;;  %v8556_v21 = vrot.slane %v8554_v9, 5  ;;  %v15590_v36 = vsel %vm13502_vm12, %v3957_v7, %v3958_v44  ;;  %v10090_v58 = vrot.slane %v15576_v1, 9  ;;  %v3962_v13 = vrot.slane %v15594_v46, 5  ;;  %v12343_v34 = vld [vmem:[%s12425_s25 + $0x4c] sm:$0xf] }
 0x25c   : > { %v8559_v16 = vrot.slane %v8557_v48, 6  ;;  %v15598_v31 = vcombine.low %v8495_v18, %v8505_v24  ;;  %v8542_v50 = vrot.slane %v8541_v37, 4  ;;  %v8550_v51 = vor.u32 %v8549_v4, %v8546_v22  ;;  %v10061_v48 = vld [vmem:[%s12425_s25 + $0x90] sm:$0xe]  ;;  %v10063_v4 = vld [vmem:[%s12425_s25 + $0x98] sm:$0x1] }
 0x25d   : > { %v8938_v7 = vrot.slane %v12343_v34, 7  ;;  %v8523_v44 = vsel %vm12448_vm4, %v8514_v45, %v15563_v26  ;;  %v3964_v14 = vrot.slane %v3962_v13, 4  ;;  %v3965_v9 = vrot.slane %v10060_v57, 5  ;;  %v10685_v34 = vld [vmem:[%s12425_s25 + $0x54] sm:$0x8] }
 0x25e   : > { %v8560_v6 = vor.u32 %v8559_v16, %v8556_v21  ;;  %v8533_v24 = vsel %vm12448_vm4, %v8524_v42, %v8532_v12  ;;  %v8552_v22 = vrot.slane %v8550_v51, 4  ;;  %v10715_v37 = vrot.slane %v10683_v5, 11  ;;  %v15619_v21 = vld [vmem:[%s12425_s25 + $0x94] sm:$0xf]  ;;  %v10686_v57 = vld [vmem:[%s12425_s25 + $0x5c] sm:$0x7] }
 0x25f   : > { %v15616_v26 = vsel %vm13502_vm12, %v10090_v58, %v3962_v13  ;;  %v8941_v45 = vrot.slane %v10684_v3, 7  ;;  %v3969_v12 = vrot.slane %v15619_v21, 5  ;;  %v4579_v42 = vshrl.u32 %v10061_v48, 16  ;;  %v15632_v5 = vld [vmem:[%s12425_s25 + $0x9c] sm:$0xe]  ;;  %v16557_v3 = vld [vmem:[#allocation2_spill] sm:$0xff] }
 0x260   : > { %v8940_v16 = vrot.slane %v8938_v7, 4  ;;  %v10091_v58 = vrot.slane %v10061_v48, 9  ;;  %v4582_v13 = vshll.u32 %v10061_v48, 16  ;;  %v8561_v41 = vsel %vm12448_vm4, %v8552_v22, %v8560_v6  ;;  %v12345_v18 = vld [vmem:[%s12425_s25 + $0x58] sm:$0xf] }
 0x261   : > { %11585 = vmatmul.mubr.msk.bf16.gmra.mrb[16].mxu0 %vm749_vm3, %v15428_v11  ;;  %v8551_v11 = vsel %vm12448_vm4, %v8542_v50, %v8550_v51  ;;  %v15643_v2 = vsel %vm13502_vm12, %v3964_v14, %v3965_v9  ;;  %v4581_v50 = vrot.slane %v4579_v42, 5  ;;  %v10716_v48 = vrot.slane %v10685_v34, 11  ;;  %v15651_v6 = vld [vmem:[%s12425_s25 + $0xa0] sm:$0xf]  ;;  %v10688_v9 = vld [vmem:[%s12425_s25 + $0x68] sm:$0x7] }
 0x262   : > { %11297 = vmatmul.mubr.msk.bf16.vlgmr.msra.gmra.mrb[0].mxu1 %vm749_vm3, %v10100_v60  ;;  %11588 = vmatprep.mubr.msk.bf16.mxu0 %vm749_vm3, %v15459_v49  ;;  %v3971_v60 = vrot.slane %v3969_v12, 4  ;;  %v3972_v49 = vrot.slane %v10063_v4, 5  ;;  %v4584_v51 = vrot.slane %v4582_v13, 6  ;;  %v15647_v47 = vcombine.low %v8523_v44, %v8533_v24  ;;  %v10687_v4 = vld [vmem:[%s12425_s25 + $0x60] sm:$0x8] }
 0x263   : > { %11635 = vmatpush3.bf16.msra.mxu1 %v16557_v3  ;;  %11300 = vmatprep.mubr.msk.bf16.mxu1 %vm749_vm3, %v10101_v33  ;;  %v8945_v3 = vrot.slane %v12345_v18, 7  ;;  %v8948_v40 = vrot.slane %v10686_v57, 7  ;;  %v10092_v33 = vrot.slane %v15632_v5, 9  ;;  %v3976_v14 = vrot.slane %v15651_v6, 5 }
 0x264   : > { %v15658_v18 = vsel %vm13026_vm9, %v10715_v37, %v8938_v7  ;;  %v15662_v44 = vsel %vm13026_vm9, %v8940_v16, %v8941_v45  ;;  %v15665_v34 = vcombine.low %v8551_v11, %v8561_v41  ;;  %v15669_v42 = vsel %vm13502_vm12, %v10091_v58, %v3969_v12  ;;  %v15673_v7 = vld [vmem:[%s12425_s25 + $0xa8] sm:$0xe]  ;;  %v12347_v16 = vld [vmem:[%s12425_s25 + $0x64] sm:$0xf]  ;;  %v10069_v12 = vld [vmem:[%s12425_s25 + $0xb0] sm:$0x1] }
 0x265   : > { %v8947_v24 = vrot.slane %v8945_v3, 4  ;;  %v3978_v57 = vrot.slane %v3976_v14, 4  ;;  %v3979_v13 = vrot.slane %v10066_v30, 5  ;;  %16559 = vst [vmem:[#allocation27_spill] sm:$0xff] %v15673_v7  ;;  %v15677_v37 = vsel %vm13502_vm12, %v3971_v60, %v3972_v49  ;;  %v10689_v58 = vld [vmem:[%s12425_s25 + $0x6c] sm:$0x8] }
 0x266   : > { %v4585_v45 = vor.u32 %v4584_v51, %v4581_v50  ;;  %v15681_v11 = vsel %vm13026_vm9, %v10716_v48, %v8945_v3  ;;  %v8952_v41 = vrot.slane %v12347_v16, 7  ;;  %v15694_v60 = vsel %vm13502_vm12, %v10092_v33, %v3976_v14  ;;  %v15697_v50 = vld [vmem:[%s12425_s25 + $0xac] sm:$0xf]  ;;  %v10690_v48 = vld [vmem:[%s12425_s25 + $0x74] sm:$0x7] }
 0x267   : > { %v15690_v30 = vsel %vm13026_vm9, %v8947_v24, %v8948_v40  ;;  %v10717_v49 = vrot.slane %v10687_v4, 11  ;;  %16560 = vst [vmem:[#allocation8_spill] sm:$0xff] %v15697_v50  ;;  %v3983_v51 = vrot.slane %v15697_v50, 5  ;;  %v16561_v3 = vcombine.low %v15432_v56, %v15442_v10 }
 0x268   : > { %v8954_v40 = vrot.slane %v8952_v41, 4  ;;  %v8955_v33 = vrot.slane %v10688_v9, 7  ;;  %v10093_v14 = vrot.slane %v15673_v7, 9  ;;  %v16562_v24 = vcombine.low %v15469_v29, %v15487_v27  ;;  %v10072_v27 = vld [vmem:[%s12425_s25 + $0xbc] sm:$0x1] }
 0x269   : > { %11589 = vmatmul.mubr.msk.bf16.gmra.mrb[20].mxu0 %vm749_vm3, %v15533_v59  ;;  %v15709_v59 = vsel %vm13502_vm12, %v3978_v57, %v3979_v13  ;;  %v3985_v56 = vrot.slane %v3983_v51, 4  ;;  %v3986_v10 = vrot.slane %v10069_v12, 5  ;;  %v10718_v4 = vrot.slane %v10689_v58, 11  ;;  %v15726_v13 = vld [vmem:[%s12425_s25 + $0xb8] sm:$0xf] }
 0x26a   : > { %11301 = vmatmul.mubr.msk.bf16.gmra.mrb[4].mxu1 %vm749_vm3, %v16561_v3  ;;  %11592 = vmatprep.mubr.msk.bf16.mxu0 %vm749_vm3, %v15538_v0  ;;  %v12349_v0 = vld [vmem:[%s12425_s25 + $0x70] sm:$0xf]  ;;  %v15718_v3 = vld [vmem:[%s12425_s25 + $0xb4] sm:$0xe]  ;;  %v8962_v29 = vrot.slane %v10690_v48, 7  ;;  %16564 = vst [vmem:[#allocation3_spill] sm:$0xff] %v15726_v13  ;;  %v15739_v48 = vsel %vm13026_vm9, %v10717_v49, %v8952_v41  ;;  %v15743_v28 = vsel %vm13026_vm9, %v8954_v40, %v8955_v33 }
 0x26b   : > { %11304 = vmatprep.mubr.msk.bf16.mxu1 %vm749_vm3, %v16562_v24  ;;  %v8959_v16 = vrot.slane %v12349_v0, 7  ;;  %16563 = vst [vmem:[#allocation6_spill] sm:$0xff] %v15718_v3  ;;  %v3990_v12 = vrot.slane %v15726_v13, 5  ;;  %v15729_v58 = vrot.slane %v4585_v45, 4  ;;  %v10692_v9 = vld [vmem:[%s12425_s25 + $0x80] sm:$0x7]  ;;  %v15747_v45 = vsel %vm13502_vm12, %v10093_v14, %v3983_v51 }
 0x26c   : > { %v10094_v24 = vrot.slane %v15718_v3, 9  ;;  %v15751_v0 = vld [vmem:[%s12425_s25 + $0xc0] sm:$0xe]  ;;  %v15756_v55 = vsel %vm13502_vm12, %v3985_v56, %v3986_v10  ;;  %v12351_v40 = vld [vmem:[%s12425_s25 + $0x7c] sm:$0xf]  ;;  %v3993_v14 = vrot.slane %v10072_v27, 5 }
 0x26d   : > { %v8961_v57 = vrot.slane %v8959_v16, 4  ;;  %v15760_v41 = vsel %vm13026_vm9, %v10718_v4, %v8959_v16  ;;  %v3992_v49 = vrot.slane %v3990_v12, 4  ;;  %v8966_v33 = vrot.slane %v12351_v40, 7  ;;  %v10693_v13 = vld [vmem:[%s12425_s25 + $0x84] sm:$0x8] }
 0x26e   : > { %v10719_v3 = vrot.slane %v10691_v20, 11  ;;  %v3997_v56 = vrot.slane %v15769_v38, 5  ;;  %v10694_v10 = vld [vmem:[%s12425_s25 + $0x8c] sm:$0x7]  ;;  %v8969_v16 = vrot.slane %v10692_v9, 7  ;;  %v10095_v40 = vrot.slane %v15751_v0, 9 }
 0x26f   : > { %v15766_v51 = vsel %vm13026_vm9, %v8961_v57, %v8962_v29  ;;  %v8968_v4 = vrot.slane %v8966_v33, 4  ;;  %v4000_v50 = vrot.slane %v10075_v23, 5  ;;  %v15777_v7 = vld [vmem:[%s12425_s25 + $0xcc] sm:$0xe]  ;;  %v16566_v20 = vcombine.low %v15509_v39, %v15523_v17  ;;  %v10078_v27 = vld [vmem:[%s12425_s25 + $0xd4] sm:$0x1] }
 0x270   : > { %16565 = vst [vmem:[#allocation10_spill] sm:$0xff] %v15777_v7  ;;  %v3999_v57 = vrot.slane %v3997_v56, 4  ;;  %v10720_v9 = vrot.slane %v10693_v13, 11  ;;  %v8973_v29 = vrot.slane %v15167_v54, 7  ;;  %v16567_v23 = vcombine.low %v15544_v15, %v15556_v32 }
 0x271   : > { %11593 = vmatmul.mubr.msk.bf16.gmra.mrb[24].mxu0 %vm749_vm3, %v15598_v31  ;;  %v15796_v17 = vsel %vm13502_vm12, %v10094_v24, %v3990_v12  ;;  %v15807_v15 = vsel %vm13502_vm12, %v3992_v49, %v3993_v14  ;;  %v10695_v12 = vld [vmem:[%s12425_s25 + $0x90] sm:$0x8]  ;;  %v15812_v24 = vld [vmem:[%s12425_s25 + $0xd8] sm:$0xe]  ;;  %v15820_v39 = vsel %vm13026_vm9, %v8968_v4, %v8969_v16  ;;  %v15824_v49 = vsel %vm13502_vm12, %v10095_v40, %v3997_v56  ;;  %v10081_v31 = vld [vmem:[%s12425_s25 + $0xe0] sm:$0x1] }
 0x272   : > { %11305 = vmatmul.mubr.msk.bf16.gmra.mrb[8].mxu1 %vm749_vm3, %v16566_v20  ;;  %11596 = vmatprep.mubr.msk.bf16.mxu0 %vm749_vm3, %v15647_v47  ;;  %v8976_v47 = vrot.slane %v10694_v10, 7  ;;  %v15800_v20 = vld [vmem:[%s12425_s25 + $0xd0] sm:$0xf]  ;;  %v8975_v32 = vrot.slane %v8973_v29, 4  ;;  %16569 = vst [vmem:[#allocation12_spill] sm:$0xff] %v15812_v24  ;;  %v15816_v10 = vsel %vm13026_vm9, %v10719_v3, %v8966_v33  ;;  %v15828_v14 = vsel %vm13502_vm12, %v3999_v57, %v4000_v50 }
 0x273   : > { %11308 = vmatprep.mubr.msk.bf16.mxu1 %vm749_vm3, %v16567_v23  ;;  %16568 = vst [vmem:[#allocation11_spill] sm:$0xff] %v15800_v20  ;;  %v4004_v13 = vrot.slane %v15800_v20, 5  ;;  %v10096_v23 = vrot.slane %v15777_v7, 9  ;;  %v15832_v54 = vsel %vm13026_vm9, %v10720_v9, %v8973_v29  ;;  %v10696_v4 = vld [vmem:[%s12425_s25 + $0x98] sm:$0x7]  ;;  %v8980_v16 = vrot.slane %v15198_v53, 7 }
 0x274   : > { %v15836_v3 = vsel %vm13026_vm9, %v8975_v32, %v8976_v47  ;;  %v4007_v56 = vrot.slane %v10078_v27, 5  ;;  %v10721_v40 = vrot.slane %v10695_v12, 11  ;;  %v10097_v50 = vrot.slane %v15812_v24, 9  ;;  %v15843_v57 = vld [vmem:[%s12425_s25 + $0xdc] sm:$0xf] }
 0x275   : > { %v4006_v33 = vrot.slane %v4004_v13, 4  ;;  %16570 = vst [vmem:[#allocation13_spill] sm:$0xff] %v15843_v57  ;;  %v4011_v20 = vrot.slane %v15843_v57, 5  ;;  %v15854_v53 = vsel %vm13502_vm12, %v10096_v23, %v4004_v13  ;;  %v10697_v27 = vld [vmem:[%s12425_s25 + $0x9c] sm:$0x8]  ;;  %v8982_v12 = vrot.slane %v8980_v16, 4 }
 0x276   : > { %v8983_v57 = vrot.slane %v10696_v4, 7  ;;  %v10698_v9 = vld [vmem:[%s12425_s25 + $0xa4] sm:$0x7]  ;;  %v8987_v24 = vrot.slane %v15226_v61, 7  ;;  %v16571_v29 = vcombine.low %v15585_v19, %v15590_v36  ;;  %v16572_v13 = vcombine.low %v15658_v18, %v15662_v44  ;;  %v10699_v32 = vld [vmem:[%s12425_s25 + $0xa8] sm:$0x8] }
 0x277   : > { %v4014_v23 = vrot.slane %v10081_v31, 5  ;;  %v4551_v47 = vshrl.u32 %v15576_v1, 16  ;;  %v4554_v4 = vshll.u32 %v15576_v1, 16  ;;  %v16573_v61 = vcombine.low %v15616_v26, %v15643_v2 }
 0x278   : > { %v15879_v19 = vsel %vm13502_vm12, %v4006_v33, %v4007_v56  ;;  %v15883_v36 = vsel %vm13026_vm9, %v10721_v40, %v8980_v16  ;;  %v15887_v18 = vsel %vm13502_vm12, %v10097_v50, %v4011_v20  ;;  %v10722_v44 = vrot.slane %v10697_v27, 11  ;;  %v12355_v33 = vld [vmem:[%s12425_s25 + $0x8c] sm:$0x3] }
 0x279   : > { %11597 = vmatmul.mubr.msk.bf16.gmra.mrb[28].mxu0 %vm749_vm3, %v15665_v34  ;;  %v4013_v34 = vrot.slane %v4011_v20, 4  ;;  %v8990_v1 = vrot.slane %v10698_v9, 7  ;;  %v4553_v31 = vrot.slane %v4551_v47, 5  ;;  %v4560_v26 = vshrl.u32 %v15594_v46, 16  ;;  %v10700_v9 = vld [vmem:[%s12425_s25 + $0xb0] sm:$0x7] }
 0x27a   : > { %11309 = vmatmul.mubr.msk.bf16.gmra.mrb[12].mxu1 %vm749_vm3, %v16571_v29  ;;  %11602 = vmatprep.mubr.msk.bf16.mxu0 %vm749_vm3, %v16572_v13  ;;  %v4556_v29 = vrot.slane %v4554_v4, 6  ;;  %v8989_v2 = vrot.slane %v8987_v24, 4  ;;  %v4563_v13 = vshll.u32 %v15594_v46, 16  ;;  %v4570_v56 = vshrl.u32 %v12355_v33, 16 }
 0x27b   : > { %11312 = vmatprep.mubr.msk.bf16.mxu1 %vm749_vm3, %v16573_v61  ;;  %v4573_v61 = vshll.u32 %v12355_v33, 16  ;;  %v15895_v16 = vsel %vm13026_vm9, %v8982_v12, %v8983_v57  ;;  %v15899_v20 = vsel %vm13502_vm12, %v4013_v34, %v4014_v23  ;;  %v4562_v50 = vrot.slane %v4560_v26, 5 }
 0x27c   : > { %v4557_v40 = vor.u32 %v4556_v29, %v4553_v31  ;;  %v4565_v47 = vrot.slane %v4563_v13, 6  ;;  %v4572_v27 = vrot.slane %v4570_v56, 5  ;;  %v8994_v46 = vrot.slane %v15259_v35, 7  ;;  %v10701_v29 = vld [vmem:[%s12425_s25 + $0xb4] sm:$0x8] }
 0x27d   : > { %v4575_v4 = vrot.slane %v4573_v61, 6  ;;  %v15905_v33 = vsel %vm13026_vm9, %v10722_v44, %v8987_v24  ;;  %v10723_v7 = vrot.slane %v10699_v32, 11  ;;  %v4588_v57 = vshrl.u32 %v15619_v21, 16 }
 0x27e   : > { %v4591_v63 = vshll.u32 %v15619_v21, 16  ;;  %v16574_v12 = vcombine.low %v15681_v11, %v15690_v30  ;;  %v15915_v34 = vsel %vm13026_vm9, %v8989_v2, %v8990_v1  ;;  %v4558_v35 = vrot.slane %v4557_v40, 4 }
 0x27f   : > { %v4566_v23 = vor.u32 %v4565_v47, %v4562_v50  ;;  %v8997_v31 = vrot.slane %v10700_v9, 7  ;;  %v16575_v24 = vcombine.low %v15669_v42, %v15677_v37  ;;  %v16576_v21 = vcombine.low %v15739_v48, %v15743_v28  ;;  %v10702_v28 = vld [vmem:[%s12425_s25 + $0xbc] sm:$0x7] }
 0x280   : > { %v4576_v11 = vor.u32 %v4575_v4, %v4572_v27  ;;  %v8996_v30 = vrot.slane %v8994_v46, 4  ;;  %v4590_v32 = vrot.slane %v4588_v57, 5  ;;  %v4593_v44 = vrot.slane %v4591_v63, 6 }
 0x281   : > { %11603 = vmatmul.mubr.msk.bf16.vlgmr.msra.gmra.mrb[0].mxu0 %vm749_vm3, %v16574_v12  ;;  %v16577_v1 = vcombine.low %v15694_v60, %v15709_v59  ;;  %v10113_v42 = vcombine.low %v15854_v53, %v15879_v19  ;;  %v10738_v37 = vcombine.low %v15883_v36, %v15895_v16  ;;  %v4568_v26 = vrot.slane %v4566_v23, 4  ;;  %v12356_v12 = vld [vmem:[%s12425_s25 + $0xa4] sm:$0x3]  ;;  %v16589_v16 = vld [vmem:[#allocation3_spill] sm:$0xff]  ;;  %v10708_v19 = vld [vmem:[%s12425_s25 + $0xe0] sm:$0x7] }
 0x282   : > { %11313 = vmatmul.mubr.msk.bf16.gmra.mrb[16].mxu1 %vm749_vm3, %v16575_v24  ;;  %11606 = vmatprep.mubr.msk.bf16.mxu0 %vm749_vm3, %v16576_v21  ;;  %v9001_v48 = vrot.slane %v15315_v8, 7  ;;  %v10114_v2 = vcombine.low %v15887_v18, %v15899_v20  ;;  %v10739_v13 = vcombine.low %v15905_v33, %v15915_v34  ;;  %v15942_v60 = vsel %vm13026_vm9, %v10723_v7, %v8994_v46 }
 0x283   : > { %11316 = vmatprep.mubr.msk.bf16.mxu1 %vm749_vm3, %v16577_v1  ;;  %v4594_v59 = vor.u32 %v4593_v44, %v4590_v32  ;;  %v10724_v56 = vrot.slane %v10701_v29, 11  ;;  %v4607_v61 = vshrl.u32 %v15632_v5, 16  ;;  %v4610_v40 = vshll.u32 %v15632_v5, 16 }
 0x284   : > { %v4616_v50 = vshrl.u32 %v15651_v6, 16  ;;  %v4567_v8 = vsel %vm12448_vm4, %v4558_v35, %v4566_v23  ;;  %v4577_v9 = vsel %vm12448_vm4, %v4568_v26, %v4576_v11  ;;  %v15953_v7 = vsel %vm13026_vm9, %v8996_v30, %v8997_v31  ;;  %v10703_v30 = vld [vmem:[%s12425_s25 + $0xc0] sm:$0x8]  ;;  %v10704_v26 = vld [vmem:[%s12425_s25 + $0xc8] sm:$0x7] }
 0x285   : > { %v9004_v47 = vrot.slane %v10702_v28, 7  ;;  %v4596_v27 = vrot.slane %v4594_v59, 4  ;;  %v9003_v4 = vrot.slane %v9001_v48, 4  ;;  %v4609_v46 = vrot.slane %v4607_v61, 5  ;;  %v16584_v61 = vld [vmem:[#allocation8_spill] sm:$0xff] }
 0x286   : > { %v4612_v57 = vrot.slane %v4610_v40, 6  ;;  %v4618_v63 = vrot.slane %v4616_v50, 5  ;;  %v4619_v5 = vshll.u32 %v15651_v6, 16  ;;  %v4626_v24 = vshrl.u32 %v12356_v12, 16  ;;  %v10705_v50 = vld [vmem:[%s12425_s25 + $0xcc] sm:$0x8] }
 0x287   : > { %v4629_v35 = vshll.u32 %v12356_v12, 16  ;;  %v16578_v23 = vcombine.low %v15760_v41, %v15766_v51  ;;  %v15961_v21 = vcombine.low %v4567_v8, %v4577_v9  ;;  %v10740_v31 = vcombine.low %v15942_v60, %v15953_v7 }
 0x288   : > { %v15967_v11 = vsel %vm13026_vm9, %v10724_v56, %v9001_v48  ;;  %v9008_v6 = vrot.slane %v15355_v25, 7  ;;  %v16579_v32 = vcombine.low %v15747_v45, %v15756_v55  ;;  %v16580_v41 = vcombine.low %v15816_v10, %v15820_v39  ;;  %v16583_v10 = vld [vmem:[#allocation27_spill] sm:$0xff] }
 0x289   : > { %11607 = vmatmul.mubr.msk.bf16.gmra.mrb[4].mxu0 %vm749_vm3, %v16578_v23  ;;  %v4613_v51 = vor.u32 %v4612_v57, %v4609_v46  ;;  %v4621_v44 = vrot.slane %v4619_v5, 6  ;;  %v4628_v29 = vrot.slane %v4626_v24, 5  ;;  %v4631_v1 = vrot.slane %v4629_v35, 6  ;;  %v10706_v23 = vld [vmem:[%s12425_s25 + $0xd4] sm:$0x7] }
 0x28a   : > { %11317 = vmatmul.mubr.msk.bf16.gmra.mrb[20].mxu1 %vm749_vm3, %v16579_v32  ;;  %11610 = vmatprep.mubr.msk.bf16.mxu0 %vm749_vm3, %v16580_v41  ;;  %v16581_v28 = vcombine.low %v15796_v17, %v15807_v15  ;;  %v4595_v25 = vsel %vm12448_vm4, %v15729_v58, %v4594_v59  ;;  %v16582_v55 = vor.u32 %v15006_v43, %v14991_v62  ;;  %v4635_v48 = vshrl.u32 %v16583_v10, 16 }
 0x28b   : > { %v15994_v39 = vsel %vm13026_vm9, %v9003_v4, %v9004_v47  ;;  %v15997_v17 = vor.u32 %v4621_v44, %v4618_v63  ;;  %v10725_v15 = vrot.slane %v10703_v30, 11  ;;  %v4638_v56 = vshll.u32 %v16583_v10, 16 }
 0x28c   : > { %11320 = vmatprep.mubr.msk.bf16.mxu1 %vm749_vm3, %v16581_v28  ;;  %v4605_v45 = vsel %vm12448_vm4, %v4596_v27, %v16582_v55  ;;  %v4644_v58 = vshrl.u32 %v16584_v61, 16  ;;  %v9010_v59 = vrot.slane %v9008_v6, 4  ;;  %v9011_v40 = vrot.slane %v10704_v26, 7  ;;  %v12357_v27 = vld [vmem:[%s12425_s25 + $0xb0] sm:$0x3]  ;;  %v16588_v28 = vld [vmem:[#allocation6_spill] sm:$0xff] }
 0x28d   : > { %v4637_v62 = vrot.slane %v4635_v48, 5  ;;  %v4647_v43 = vshll.u32 %v16584_v61, 16  ;;  %v16003_v8 = vrot.slane %v4613_v51, 4  ;;  %v4632_v9 = vor.u32 %v4631_v1, %v4628_v29  ;;  %v16586_v29 = vld [vmem:[#allocation16_spill] sm:$0xff]  ;;  %v10707_v55 = vld [vmem:[%s12425_s25 + $0xd8] sm:$0x8] }
 0x28e   : > { %v4640_v47 = vrot.slane %v4638_v56, 6  ;;  %v4654_v4 = vshrl.u32 %v12357_v27, 16  ;;  %v4624_v46 = vrot.slane %v15997_v17, 4  ;;  %v4646_v57 = vrot.slane %v4644_v58, 5 }
 0x28f   : > { %v4649_v63 = vrot.slane %v4647_v43, 6  ;;  %v4657_v5 = vshll.u32 %v12357_v27, 16  ;;  %v16007_v12 = vcombine.low %v4595_v25, %v4605_v45  ;;  %v10741_v24 = vcombine.low %v15967_v11, %v15994_v39 }
 0x290   : > { %v4641_v35 = vor.u32 %v4640_v47, %v4637_v62  ;;  %v10726_v30 = vrot.slane %v10705_v50, 11  ;;  %v16585_v32 = vcombine.low %v15832_v54, %v15836_v3  ;;  %v16018_v41 = vsel %vm13026_vm9, %v10725_v15, %v9008_v6 }
 0x291   : > { %v16022_v51 = vsel %vm13026_vm9, %v9010_v59, %v9011_v40  ;;  %v16024_v44 = vor.u32 %v4649_v63, %v4646_v57  ;;  %v9015_v1 = vrot.slane %v16586_v29, 7  ;;  %v16587_v26 = vcombine.low %v15824_v49, %v15828_v14  ;;  %v12358_v59 = vld [vmem:[%s12425_s25 + $0xbc] sm:$0x3] }
 0x292   : > { %11611 = vmatmul.mubr.msk.bf16.gmra.mrb[8].mxu0 %vm749_vm3, %v16585_v32  ;;  %v4623_v54 = vsel %vm12448_vm4, %v16003_v8, %v15997_v17  ;;  %v4656_v3 = vrot.slane %v4654_v4, 5  ;;  %v4659_v6 = vrot.slane %v4657_v5, 6  ;;  %v4663_v25 = vshrl.u32 %v16588_v28, 16  ;;  %v16590_v8 = vld [vmem:[#allocation21_spill] sm:$0xff]  ;;  %v10709_v32 = vld [vmem:[%s12425_s25 + $0xe4] sm:$0x8] }
 0x293   : > { %11321 = vmatmul.mubr.msk.bf16.gmra.mrb[24].mxu1 %vm749_vm3, %v16587_v26  ;;  %11614 = vmatprep.mubr.msk.bf16.mxu0 %vm749_vm3, %v10738_v37  ;;  %v4633_v49 = vsel %vm12448_vm4, %v4624_v46, %v4632_v9  ;;  %v9018_v14 = vrot.slane %v10706_v23, 7  ;;  %v4666_v36 = vshll.u32 %v16588_v28, 16  ;;  %v4672_v37 = vshrl.u32 %v16589_v16, 16 }
 0x294   : > { %11324 = vmatprep.mubr.msk.bf16.mxu1 %vm749_vm3, %v10113_v42  ;;  %v4642_v45 = vrot.slane %v4641_v35, 4  ;;  %v16051_v10 = vsel %vm13026_vm9, %v10726_v30, %v9015_v1  ;;  %v4665_v48 = vrot.slane %v4663_v25, 5  ;;  %v4675_v53 = vshll.u32 %v16589_v16, 16 }
 0x295   : > { %v4652_v42 = vrot.slane %v16024_v44, 4  ;;  %v9017_v17 = vrot.slane %v9015_v1, 4  ;;  %v4668_v15 = vrot.slane %v4666_v36, 6  ;;  %v4674_v56 = vrot.slane %v4672_v37, 5  ;;  %v12359_v1 = vld [vmem:[%s12425_s25 + $0xc8] sm:$0x3] }
 0x296   : > { %v4660_v61 = vor.u32 %v4659_v6, %v4656_v3  ;;  %v4677_v58 = vrot.slane %v4675_v53, 6  ;;  %v4682_v40 = vshrl.u32 %v12358_v59, 16  ;;  %v4685_v62 = vshll.u32 %v12358_v59, 16  ;;  %v16592_v37 = vld [vmem:[#allocation5_spill] sm:$0xff] }
 0x297   : > { %v4669_v43 = vor.u32 %v4668_v15, %v4665_v48  ;;  %v10727_v50 = vrot.slane %v10707_v55, 11  ;;  %v9022_v9 = vrot.slane %v16590_v8, 7  ;;  %v9025_v47 = vrot.slane %v10708_v19, 7 }
 0x298   : > { %v4678_v27 = vor.u32 %v4677_v58, %v4674_v56  ;;  %v4684_v4 = vrot.slane %v4682_v40, 5  ;;  %v4687_v46 = vrot.slane %v4685_v62, 6  ;;  %v4691_v57 = vshrl.u32 %v15751_v0, 16  ;;  %v10711_v62 = vld [vmem:[%s12425_s25 + $0xf0] sm:$0x8] }
 0x299   : > { %v4651_v63 = vsel %vm12448_vm4, %v4642_v45, %v16024_v44  ;;  %v16068_v5 = vsel %vm13026_vm9, %v9017_v17, %v9018_v14  ;;  %v9024_v35 = vrot.slane %v9022_v9, 4  ;;  %v4694_v23 = vshll.u32 %v15751_v0, 16  ;;  %v10710_v14 = vld [vmem:[%s12425_s25 + $0xec] sm:$0x7] }
 0x29a   : > { %11615 = vmatmul.mubr.msk.bf16.gmra.mrb[12].mxu0 %vm749_vm3, %v10739_v13  ;;  %v4670_v33 = vrot.slane %v4669_v43, 4  ;;  %v4680_v34 = vrot.slane %v4678_v27, 4  ;;  %v4688_v13 = vor.u32 %v4687_v46, %v4684_v4  ;;  %v4700_v30 = vshrl.u32 %v15769_v38, 16  ;;  %v16594_v46 = vld [vmem:[#allocation7_spill] sm:$0xff] }
 0x29b   : > { %11325 = vmatmul.mubr.msk.bf16.gmra.mrb[28].mxu1 %vm749_vm3, %v10114_v2  ;;  %11618 = vmatprep.mubr.msk.bf16.mxu0 %vm749_vm3, %v10740_v31  ;;  %v4661_v0 = vsel %vm12448_vm4, %v4652_v42, %v4660_v61  ;;  %v4693_v18 = vrot.slane %v4691_v57, 5  ;;  %v4696_v20 = vrot.slane %v4694_v23, 6  ;;  %v4703_v2 = vshll.u32 %v15769_v38, 16 }
 0x29c   : > { %11346 = vmatprep.mubr.msk.bf16.mxu1 %vm749_vm3, %v15961_v21  ;;  %v10742_v60 = vcombine.low %v16018_v41, %v16022_v51  ;;  %v16089_v7 = vsel %vm13026_vm9, %v10727_v50, %v9022_v9  ;;  %v16093_v31 = vsel %vm13026_vm9, %v9024_v35, %v9025_v47  ;;  %v4702_v21 = vrot.slane %v4700_v30, 5  ;;  %v10712_v9 = vld [vmem:[%s12425_s25 + $0xf8] sm:$0x7]  ;;  %v16595_v35 = vld [vmem:[#allocation12_spill] sm:$0xff] }
 0x29d   : > { %v10158_v44 = vcombine.low %v4623_v54, %v4633_v49  ;;  %v4705_v29 = vrot.slane %v4703_v2, 6  ;;  %v4710_v26 = vshrl.u32 %v12359_v1, 16  ;;  %v4713_v3 = vshll.u32 %v12359_v1, 16  ;;  %v16591_v49 = vld [vmem:[#allocation10_spill] sm:$0xff] }
 0x29e   : > { %v10159_v38 = vcombine.low %v4651_v63, %v4661_v0  ;;  %v10743_v41 = vcombine.low %v16051_v10, %v16068_v5  ;;  %v4679_v51 = vsel %vm12448_vm4, %v4670_v33, %v4678_v27  ;;  %v4689_v6 = vsel %vm12448_vm4, %v4680_v34, %v4688_v13  ;;  %v16593_v10 = vld [vmem:[#allocation11_spill] sm:$0xff]  ;;  %v16596_v0 = vld [vmem:[#allocation13_spill] sm:$0xff] }
 0x29f   : > { %v10744_v28 = vcombine.low %v16089_v7, %v16093_v31  ;;  %v4697_v25 = vor.u32 %v4696_v20, %v4693_v18  ;;  %v10728_v54 = vrot.slane %v10709_v32, 11  ;;  %v4719_v36 = vshrl.u32 %v16591_v49, 16 }
 0x2a0   : > { %v16107_v16 = vor.u32 %v4705_v29, %v4702_v21  ;;  %v9029_v55 = vrot.slane %v16592_v37, 7  ;;  %v4722_v45 = vshll.u32 %v16591_v49, 16  ;;  %v4728_v48 = vshrl.u32 %v16593_v10, 16 }
 0x2a1   : > { %v10160_v53 = vcombine.low %v4679_v51, %v4689_v6  ;;  %v4712_v19 = vrot.slane %v4710_v26, 5  ;;  %v4715_v42 = vrot.slane %v4713_v3, 6  ;;  %v4721_v17 = vrot.slane %v4719_v36, 5 }
 0x2a2   : > { %11619 = vmatmul.mubr.msk.bf16.gmra.mrb[16].mxu0 %vm749_vm3, %v10741_v24  ;;  %v9032_v15 = vrot.slane %v10710_v14, 7  ;;  %v4724_v56 = vrot.slane %v4722_v45, 6  ;;  %v4730_v61 = vrot.slane %v4728_v48, 5  ;;  %v4731_v58 = vshll.u32 %v16593_v10, 16  ;;  %v12360_v24 = vld [vmem:[%s12425_s25 + $0xd4] sm:$0x3] }
 0x2a3   : > { %11347 = vmatmul.mubr.msk.bf16.vlgmr.msra.gmra.mrb[16].mxu1 %vm749_vm3, %v16007_v12  ;;  %11622 = vmatprep.mubr.msk.bf16.mxu0 %vm749_vm3, %v10742_v60  ;;  %v4698_v11 = vrot.slane %v4697_v25, 4  ;;  %v9030_v39 = vsel %vm13026_vm9, %v10728_v54, %v9029_v55  ;;  %v4738_v59 = vshrl.u32 %v12360_v24, 16  ;;  %v4741_v40 = vshll.u32 %v12360_v24, 16  ;;  %v10713_v14 = vld [vmem:[%s12425_s25 + $0xfc] sm:$0x8] }
 0x2a4   : > { %11350 = vmatprep.mubr.msk.bf16.mxu1 %vm749_vm3, %v10158_v44  ;;  %v4708_v12 = vrot.slane %v16107_v16, 4  ;;  %v9031_v43 = vrot.slane %v9029_v55, 4  ;;  %v4725_v50 = vor.u32 %v4724_v56, %v4721_v17  ;;  %v4733_v8 = vrot.slane %v4731_v58, 6  ;;  %v12361_v44 = vld [vmem:[%s12425_s25 + $0xe0] sm:$0x3] }
 0x2a5   : > { %v4716_v47 = vor.u32 %v4715_v42, %v4712_v19  ;;  %v4740_v27 = vrot.slane %v4738_v59, 5  ;;  %v4743_v4 = vrot.slane %v4741_v40, 6  ;;  %v9036_v57 = vrot.slane %v16594_v46, 7 }
 0x2a6   : > { %v4734_v63 = vor.u32 %v4733_v8, %v4730_v61  ;;  %v10729_v5 = vrot.slane %v10711_v62, 11  ;;  %v4747_v23 = vshrl.u32 %v16595_v35, 16  ;;  %v4750_v33 = vshll.u32 %v16595_v35, 16 }
 0x2a7   : > { %v4726_v34 = vrot.slane %v4725_v50, 4  ;;  %v9038_v13 = vrot.slane %v9036_v57, 4  ;;  %v9039_v30 = vrot.slane %v10712_v9, 7  ;;  %v4756_v18 = vshrl.u32 %v16596_v0, 16 }
 0x2a8   : > { %v4736_v20 = vrot.slane %v4734_v63, 4  ;;  %v4744_v2 = vor.u32 %v4743_v4, %v4740_v27  ;;  %v4749_v60 = vrot.slane %v4747_v23, 5  ;;  %v4752_v7 = vrot.slane %v4750_v33, 6 }
 0x2a9   : > { %v4707_v31 = vsel %vm12448_vm4, %v4698_v11, %v16107_v16  ;;  %v4758_v21 = vrot.slane %v4756_v18, 5  ;;  %v4759_v32 = vshll.u32 %v16596_v0, 16  ;;  %v4766_v29 = vshrl.u32 %v12361_v44, 16  ;;  %v16597_v16 = vld [vmem:[#allocation24_spill] sm:$0xff] }
 0x2aa   : > { %11623 = vmatmul.mubr.msk.bf16.gmra.mrb[20].mxu0 %vm749_vm3, %v10743_v41  ;;  %v4717_v1 = vsel %vm12448_vm4, %v4708_v12, %v4716_v47  ;;  %v9033_v26 = vsel %vm13026_vm9, %v9031_v43, %v9032_v15  ;;  %v9037_v3 = vsel %vm13026_vm9, %v10729_v5, %v9036_v57  ;;  %v4769_v41 = vshll.u32 %v12361_v44, 16 }
 0x2ab   : > { %11351 = vmatmul.mubr.msk.bf16.gmra.mrb[20].mxu1 %vm749_vm3, %v10159_v38  ;;  %11626 = vmatprep.mubr.msk.bf16.mxu0 %vm749_vm3, %v10744_v28  ;;  %v9040_v51 = vsel %vm13026_vm9, %v9038_v13, %v9039_v30  ;;  %v4753_v6 = vor.u32 %v4752_v7, %v4749_v60  ;;  %v4761_v25 = vrot.slane %v4759_v32, 6  ;;  %v4768_v38 = vrot.slane %v4766_v29, 5  ;;  %v10714_v28 = vld [vmem:[%s12425_s25 + $0x104] sm:$0x7]  ;;  %s10766_s25 = sshll.u32 %s16599_s13, 8 }
 0x2ac   : > { %11354 = vmatprep.mubr.msk.bf16.mxu1 %vm749_vm3, %v10160_v53  ;;  %v4735_v54 = vsel %vm12448_vm4, %v4726_v34, %v4734_v63  ;;  %v4745_v49 = vsel %vm12448_vm4, %v4736_v20, %v4744_v2  ;;  %v4771_v36 = vrot.slane %v4769_v41, 6  ;;  %v9043_v37 = vrot.slane %v16597_v16, 7  ;;  %s16189_s5 = scalar_lea.vmem %s16337_s2, %s10766_s25 }
 0x2ad   : > { %v10161_v55 = vcombine.low %v4707_v31, %v4717_v1  ;;  %v10745_v45 = vcombine.low %v9030_v39, %v9033_v26  ;;  %v4762_v10 = vor.u32 %v4761_v25, %v4758_v21  ;;  %v10746_v48 = vcombine.low %v9037_v3, %v9040_v51 }
 0x2ae   : > { %v10730_v53 = vrot.slane %v10713_v14, 11  ;;  %v9045_v19 = vrot.slane %v9043_v37, 4  ;;  %v9046_v42 = vrot.slane %v10714_v28, 7  ;;  %v10162_v17 = vcombine.low %v4735_v54, %v4745_v49 }
 0x2af   : > { %v4754_v15 = vrot.slane %v4753_v6, 4  ;;  %v4764_v56 = vrot.slane %v4762_v10, 4  ;;  %v4772_v61 = vor.u32 %v4771_v36, %v4768_v38 }
 0x2b0   : > { %v9044_v58 = vsel %vm13026_vm9, %v10730_v53, %v9043_v37  ;;  %v9047_v11 = vsel %vm13026_vm9, %v9045_v19, %v9046_v42 }
 0x2b1   : > { %v4763_v39 = vsel %vm12448_vm4, %v4754_v15, %v4762_v10  ;;  %v4773_v24 = vsel %vm12448_vm4, %v4764_v56, %v4772_v61  ;;  %v10747_v59 = vcombine.low %v9044_v58, %v9047_v11 }
 0x2b2   : > { %11627 = vmatmul.mubr.msk.bf16.gmra.mrb[24].mxu0 %vm749_vm3, %v10745_v45  ;;  %v10163_v40 = vcombine.low %v4763_v39, %v4773_v24 }
 0x2b3   : > { %11355 = vmatmul.mubr.msk.bf16.gmra.mrb[24].mxu1 %vm749_vm3, %v10161_v55  ;;  %11630 = vmatprep.mubr.msk.bf16.mxu0 %vm749_vm3, %v10746_v48 }
 0x2b4   : > { %11358 = vmatprep.mubr.msk.bf16.mxu1 %vm749_vm3, %v10162_v17 }
 0x2ba   : > { %11631 = vmatmul.mubr.msk.bf16.gmra.mrb[28].mxu0 %vm749_vm3, %v10747_v59 }
 0x2bb   : > { %11359 = vmatmul.mubr.msk.bf16.gmra.mrb[28].mxu1 %vm749_vm3, %v10163_v40 }
 0x335   : > { %v11298_v62 = vpop.f32.mrb[0].mxu1 }
 0x336   : > { %v4151_v12 = vpop.f32.mrb[1].mxu1 }
 0x337   : > { %v11299_v43 = vpop.f32.mrb[2].mxu1 }
 0x338   : > { %v4154_v22 = vpop.f32.mrb[3].mxu1 }
 0x33d   : > { %v11302_v50 = vpop.f32.mrb[4].mxu1 }
 0x33e   : > { %v4167_v8 = vpop.f32.mrb[5].mxu1 }
 0x33f   : > { %v11303_v9 = vpop.f32.mrb[6].mxu1 }
 0x340   : > { %v4170_v47 = vpop.f32.mrb[7].mxu1 }
 0x345   : > { %v16169_v27 = vpop.f32.mrb[8].mxu1 }
 0x346   : > { %v16171_v4 = vpop.f32.mrb[9].mxu1 }
 0x347   : > { %v16173_v52 = vpop.f32.mrb[10].mxu1 }
 0x348   : > { %v16175_v46 = vpop.f32.mrb[11].mxu1 }
 0x34d   : > { %v16177_v57 = vpop.f32.mrb[12].mxu1 }
 0x34e   : > { %v16179_v63 = vpop.f32.mrb[13].mxu1 }
 0x34f   : > { %v16181_v5 = vpop.f32.mrb[14].mxu1 }
 0x350   : > { %v16183_v35 = vpop.f32.mrb[15].mxu1 }
 0x354   : > { %v11604_v23 = vpop.f32.mrb[0].mxu0 }
 0x355   : > { %v11636_v33 = vadd.f32 %v11604_v23, %v11298_v62  ;;  %v9183_v34 = vpop.f32.mrb[1].mxu0 }
 0x356   : > { %v11637_v13 = vadd.f32 %v9183_v34, %v4151_v12  ;;  %v11605_v30 = vpop.f32.mrb[2].mxu0 }
 0x357   : > { %9345 = vst.msk [vmem:[%s16189_s5 + $0x10] sm:$0xff] %vm9342_vm13, %v11636_v33  ;;  %v11638_v0 = vadd.f32 %v11605_v30, %v11299_v43  ;;  %v9186_v18 = vpop.f32.mrb[3].mxu0  ;;  %v9446_v60 = vmul.f32 %v11636_v33, %v11636_v33  ;;  %v9378_v29 = vsel %vm9342_vm13, %v11636_v33, 0.0 }
 0x358   : > { %9343 = vst.msk [vmem:[%s16189_s5] sm:$0xff] %vm9342_vm13, %v11637_v13  ;;  %v9444_v20 = vmul.f32 %v11637_v13, %v11637_v13  ;;  %v11639_v2 = vadd.f32 %v9186_v18, %v4154_v22  ;;  %v9375_v7 = vsel %vm9342_vm13, %v11637_v13, 0.0 }
 0x359   : > { %9346 = vst.msk [vmem:[%s16189_s5 + $0x18] sm:$0xff] %vm9342_vm13, %v11638_v0  ;;  %v9447_v32 = vmul.f32 %v11638_v0, %v11638_v0  ;;  %v9479_v38 = vsel %vm9342_vm13, %v9446_v60, 0.0  ;;  %v9380_v14 = vsel %vm9342_vm13, %v11638_v0, 0.0 }
 0x35a   : > { %9344 = vst.msk [vmem:[%s16189_s5 + $0x8] sm:$0xff] %vm9342_vm13, %v11639_v2  ;;  %v9376_v31 = vsel %vm9342_vm13, %v11639_v2, 0.0  ;;  %v9445_v21 = vmul.f32 %v11639_v2, %v11639_v2  ;;  %v9476_v1 = vsel %vm9342_vm13, %v9444_v20, 0.0 }
 0x35b   : > { %v9377_v44 = vadd.f32 %v9376_v31, %v9375_v7  ;;  %v9481_v49 = vsel %vm9342_vm13, %v9447_v32, 0.0 }
 0x35c   : > { %v9477_v26 = vsel %vm9342_vm13, %v9445_v21, 0.0  ;;  %v11608_v3 = vpop.f32.mrb[4].mxu0 }
 0x35d   : > { %v9379_v41 = vadd.f32 %v9378_v29, %v9377_v44  ;;  %v9478_v51 = vadd.f32 %v9477_v26, %v9476_v1  ;;  %v11640_v6 = vadd.f32 %v11608_v3, %v11302_v50  ;;  %v9199_v25 = vpop.f32.mrb[5].mxu0 }
 0x35e   : > { %v11641_v28 = vadd.f32 %v9199_v25, %v4167_v8  ;;  %v11609_v54 = vpop.f32.mrb[6].mxu0 }
 0x35f   : > { %v9480_v36 = vadd.f32 %v9479_v38, %v9478_v51  ;;  %9349 = vst.msk [vmem:[%s16189_s5 + $0x30] sm:$0xff] %vm9342_vm13, %v11640_v6  ;;  %v9381_v16 = vadd.f32 %v9380_v14, %v9379_v41  ;;  %v9202_v37 = vpop.f32.mrb[7].mxu0  ;;  %v11642_v10 = vadd.f32 %v11609_v54, %v11303_v9  ;;  %v9450_v15 = vmul.f32 %v11640_v6, %v11640_v6 }
 0x360   : > { %9347 = vst.msk [vmem:[%s16189_s5 + $0x20] sm:$0xff] %vm9342_vm13, %v11641_v28  ;;  %v9382_v55 = vsel %vm9342_vm13, %v11641_v28, 0.0  ;;  %v9448_v45 = vmul.f32 %v11641_v28, %v11641_v28  ;;  %v11643_v48 = vadd.f32 %v9202_v37, %v4170_v47  ;;  %v9386_v11 = vsel %vm9342_vm13, %v11640_v6, 0.0 }
 0x361   : > { %v9383_v53 = vadd.f32 %v9382_v55, %v9381_v16  ;;  %v9482_v19 = vadd.f32 %v9481_v49, %v9480_v36  ;;  %9350 = vst.msk [vmem:[%s16189_s5 + $0x38] sm:$0xff] %vm9342_vm13, %v11642_v10  ;;  %v9451_v24 = vmul.f32 %v11642_v10, %v11642_v10  ;;  %v9388_v43 = vsel %vm9342_vm13, %v11642_v10, 0.0 }
 0x362   : > { %v9483_v42 = vsel %vm9342_vm13, %v9448_v45, 0.0  ;;  %9348 = vst.msk [vmem:[%s16189_s5 + $0x28] sm:$0xff] %vm9342_vm13, %v11643_v48  ;;  %v9384_v17 = vsel %vm9342_vm13, %v11643_v48, 0.0  ;;  %v9449_v58 = vmul.f32 %v11643_v48, %v11643_v48  ;;  %v9487_v9 = vsel %vm9342_vm13, %v9450_v15, 0.0 }
 0x363   : > { %v9484_v56 = vadd.f32 %v9483_v42, %v9482_v19  ;;  %v9385_v61 = vadd.f32 %v9384_v17, %v9383_v53 }
 0x364   : > { %v9485_v40 = vsel %vm9342_vm13, %v9449_v58, 0.0 }
 0x365   : > { %v11612_v39 = vpop.f32.mrb[8].mxu0  ;;  %v9387_v59 = vadd.f32 %v9386_v11, %v9385_v61  ;;  %v9486_v22 = vadd.f32 %v9485_v40, %v9484_v56 }
 0x366   : > { %v11644_v62 = vadd.f32 %v11612_v39, %v16169_v27  ;;  %v9215_v12 = vpop.f32.mrb[9].mxu0 }
 0x367   : > { %v11645_v50 = vadd.f32 %v9215_v12, %v16171_v4  ;;  %v11613_v8 = vpop.f32.mrb[10].mxu0  ;;  %v9389_v47 = vadd.f32 %v9388_v43, %v9387_v59  ;;  %v9488_v34 = vadd.f32 %v9487_v9, %v9486_v22  ;;  %v9489_v4 = vsel %vm9342_vm13, %v9451_v24, 0.0 }
 0x368   : > { %9353 = vst.msk [vmem:[%s16189_s5 + $0x50] sm:$0xff] %vm9342_vm13, %v11644_v62  ;;  %v11646_v23 = vadd.f32 %v11613_v8, %v16173_v52  ;;  %v9218_v33 = vpop.f32.mrb[11].mxu0  ;;  %v9454_v60 = vmul.f32 %v11644_v62, %v11644_v62  ;;  %v9394_v31 = vsel %vm9342_vm13, %v11644_v62, 0.0 }
 0x369   : > { %9351 = vst.msk [vmem:[%s16189_s5 + $0x40] sm:$0xff] %vm9342_vm13, %v11645_v50  ;;  %v9390_v27 = vsel %vm9342_vm13, %v11645_v50, 0.0  ;;  %v9452_v13 = vmul.f32 %v11645_v50, %v11645_v50  ;;  %v11647_v30 = vadd.f32 %v9218_v33, %v16175_v46  ;;  %v9490_v18 = vadd.f32 %v9489_v4, %v9488_v34 }
 0x36a   : > { %v9391_v0 = vadd.f32 %v9390_v27, %v9389_v47  ;;  %9354 = vst.msk [vmem:[%s16189_s5 + $0x58] sm:$0xff] %vm9342_vm13, %v11646_v23  ;;  %v9455_v44 = vmul.f32 %v11646_v23, %v11646_v23  ;;  %v9396_v3 = vsel %vm9342_vm13, %v11646_v23, 0.0  ;;  %v9495_v25 = vsel %vm9342_vm13, %v9454_v60, 0.0 }
 0x36b   : > { %v9491_v20 = vsel %vm9342_vm13, %v9452_v13, 0.0  ;;  %9352 = vst.msk [vmem:[%s16189_s5 + $0x48] sm:$0xff] %vm9342_vm13, %v11647_v30  ;;  %v9392_v52 = vsel %vm9342_vm13, %v11647_v30, 0.0  ;;  %v9453_v2 = vmul.f32 %v11647_v30, %v11647_v30 }
 0x36c   : > { %v9393_v7 = vadd.f32 %v9392_v52, %v9391_v0  ;;  %v9492_v21 = vadd.f32 %v9491_v20, %v9490_v18 }
 0x36d   : > { %v9493_v46 = vsel %vm9342_vm13, %v9453_v2, 0.0  ;;  %v11616_v32 = vpop.f32.mrb[12].mxu0 }
 0x36e   : > { %v9395_v29 = vadd.f32 %v9394_v31, %v9393_v7  ;;  %v11648_v1 = vadd.f32 %v11616_v32, %v16177_v57  ;;  %v9231_v26 = vpop.f32.mrb[13].mxu0  ;;  %v9494_v41 = vadd.f32 %v9493_v46, %v9492_v21 }
 0x36f   : > { %v11649_v51 = vadd.f32 %v9231_v26, %v16179_v63  ;;  %v11617_v6 = vpop.f32.mrb[14].mxu0  ;;  %v9497_v63 = vsel %vm9342_vm13, %v9455_v44, 0.0 }
 0x370   : > { %9357 = vst.msk [vmem:[%s16189_s5 + $0x70] sm:$0xff] %vm9342_vm13, %v11648_v1  ;;  %v9397_v38 = vadd.f32 %v9396_v3, %v9395_v29  ;;  %v11650_v14 = vadd.f32 %v11617_v6, %v16181_v5  ;;  %v9234_v28 = vpop.f32.mrb[15].mxu0  ;;  %v9496_v54 = vadd.f32 %v9495_v25, %v9494_v41  ;;  %v9458_v10 = vmul.f32 %v11648_v1, %v11648_v1 }
 0x371   : > { %9355 = vst.msk [vmem:[%s16189_s5 + $0x60] sm:$0xff] %vm9342_vm13, %v11649_v51  ;;  %v9398_v57 = vsel %vm9342_vm13, %v11649_v51, 0.0  ;;  %v9456_v49 = vmul.f32 %v11649_v51, %v11649_v51  ;;  %v11651_v36 = vadd.f32 %v9234_v28, %v16183_v35  ;;  %v9402_v53 = vsel %vm9342_vm13, %v11648_v1, 0.0 }
 0x372   : > { %v9399_v16 = vadd.f32 %v9398_v57, %v9397_v38  ;;  %9358 = vst.msk [vmem:[%s16189_s5 + $0x78] sm:$0xff] %vm9342_vm13, %v11650_v14  ;;  %v9498_v37 = vadd.f32 %v9497_v63, %v9496_v54  ;;  %v9459_v17 = vmul.f32 %v11650_v14, %v11650_v14  ;;  %v9404_v58 = vsel %vm9342_vm13, %v11650_v14, 0.0 }
 0x373   : > { %v9499_v55 = vsel %vm9342_vm13, %v9456_v49, 0.0  ;;  %9356 = vst.msk [vmem:[%s16189_s5 + $0x68] sm:$0xff] %vm9342_vm13, %v11651_v36  ;;  %v9400_v5 = vsel %vm9342_vm13, %v11651_v36, 0.0  ;;  %v9457_v45 = vmul.f32 %v11651_v36, %v11651_v36  ;;  %v9503_v40 = vsel %vm9342_vm13, %v9458_v10, 0.0 }
 0x374   : > { %v9401_v48 = vadd.f32 %v9400_v5, %v9399_v16  ;;  %v9500_v19 = vadd.f32 %v9499_v55, %v9498_v37  ;;  %v9505_v47 = vsel %vm9342_vm13, %v9459_v17, 0.0 }
 0x375   : > { %v9501_v35 = vsel %vm9342_vm13, %v9457_v45, 0.0  ;;  %v11620_v42 = vpop.f32.mrb[16].mxu0 }
 0x376   : > { %v9403_v15 = vadd.f32 %v9402_v53, %v9401_v48  ;;  %v11348_v56 = vpop.f32.mrb[16].mxu1  ;;  %v9247_v61 = vpop.f32.mrb[17].mxu0  ;;  %v9502_v11 = vadd.f32 %v9501_v35, %v9500_v19 }
 0x377   : > { %v11652_v39 = vadd.f32 %v11620_v42, %v11348_v56  ;;  %v4973_v24 = vpop.f32.mrb[17].mxu1  ;;  %v11621_v59 = vpop.f32.mrb[18].mxu0 }
 0x378   : > { %v11653_v62 = vadd.f32 %v9247_v61, %v4973_v24  ;;  %v9405_v12 = vadd.f32 %v9404_v58, %v9403_v15  ;;  %v11349_v43 = vpop.f32.mrb[18].mxu1  ;;  %v9250_v22 = vpop.f32.mrb[19].mxu0  ;;  %v9504_v50 = vadd.f32 %v9503_v40, %v9502_v11 }
 0x379   : > { %9361 = vst.msk [vmem:[%s16189_s5 + $0x90] sm:$0xff] %vm9342_vm13, %v11652_v39  ;;  %v11654_v8 = vadd.f32 %v11621_v59, %v11349_v43  ;;  %v4976_v9 = vpop.f32.mrb[19].mxu1  ;;  %v9462_v30 = vmul.f32 %v11652_v39, %v11652_v39  ;;  %v9410_v7 = vsel %vm9342_vm13, %v11652_v39, 0.0 }
 0x37a   : > { %9359 = vst.msk [vmem:[%s16189_s5 + $0x80] sm:$0xff] %vm9342_vm13, %v11653_v62  ;;  %v9406_v23 = vsel %vm9342_vm13, %v11653_v62, 0.0  ;;  %v9460_v33 = vmul.f32 %v11653_v62, %v11653_v62  ;;  %v11655_v34 = vadd.f32 %v9250_v22, %v4976_v9  ;;  %v9506_v13 = vadd.f32 %v9505_v47, %v9504_v50 }
 0x37b   : > { %v9407_v27 = vadd.f32 %v9406_v23, %v9405_v12  ;;  %9362 = vst.msk [vmem:[%s16189_s5 + $0x98] sm:$0xff] %vm9342_vm13, %v11654_v8  ;;  %v9463_v52 = vmul.f32 %v11654_v8, %v11654_v8  ;;  %v9511_v3 = vsel %vm9342_vm13, %v9462_v30, 0.0  ;;  %v9412_v41 = vsel %vm9342_vm13, %v11654_v8, 0.0 }
 0x37c   : > { %v9507_v4 = vsel %vm9342_vm13, %v9460_v33, 0.0  ;;  %9360 = vst.msk [vmem:[%s16189_s5 + $0x88] sm:$0xff] %vm9342_vm13, %v11655_v34  ;;  %v9408_v0 = vsel %vm9342_vm13, %v11655_v34, 0.0  ;;  %v9461_v18 = vmul.f32 %v11655_v34, %v11655_v34 }
 0x37d   : > { %v9508_v20 = vadd.f32 %v9507_v4, %v9506_v13  ;;  %v9409_v2 = vadd.f32 %v9408_v0, %v9407_v27  ;;  %v11624_v60 = vpop.f32.mrb[20].mxu0  ;;  %v9513_v38 = vsel %vm9342_vm13, %v9463_v52, 0.0 }
 0x37e   : > { %v9509_v31 = vsel %vm9342_vm13, %v9461_v18, 0.0  ;;  %v11352_v21 = vpop.f32.mrb[20].mxu1  ;;  %v9263_v46 = vpop.f32.mrb[21].mxu0 }
 0x37f   : > { %v9411_v32 = vadd.f32 %v9410_v7, %v9409_v2  ;;  %v9510_v44 = vadd.f32 %v9509_v31, %v9508_v20  ;;  %v11656_v29 = vadd.f32 %v11624_v60, %v11352_v21  ;;  %v4989_v1 = vpop.f32.mrb[21].mxu1  ;;  %v11625_v26 = vpop.f32.mrb[22].mxu0 }
 0x380   : > { %v11657_v51 = vadd.f32 %v9263_v46, %v4989_v1  ;;  %v11353_v6 = vpop.f32.mrb[22].mxu1  ;;  %v9266_v25 = vpop.f32.mrb[23].mxu0 }
 0x381   : > { %v9512_v14 = vadd.f32 %v9511_v3, %v9510_v44  ;;  %9365 = vst.msk [vmem:[%s16189_s5 + $0xb0] sm:$0xff] %vm9342_vm13, %v11656_v29  ;;  %v9413_v28 = vadd.f32 %v9412_v41, %v9411_v32  ;;  %v4992_v54 = vpop.f32.mrb[23].mxu1  ;;  %v11658_v36 = vadd.f32 %v11625_v26, %v11353_v6  ;;  %v9466_v45 = vmul.f32 %v11656_v29, %v11656_v29 }
 0x382   : > { %9363 = vst.msk [vmem:[%s16189_s5 + $0xa0] sm:$0xff] %vm9342_vm13, %v11657_v51  ;;  %v9414_v57 = vsel %vm9342_vm13, %v11657_v51, 0.0  ;;  %v9464_v49 = vmul.f32 %v11657_v51, %v11657_v51  ;;  %v11659_v63 = vadd.f32 %v9266_v25, %v4992_v54  ;;  %v9418_v35 = vsel %vm9342_vm13, %v11656_v29, 0.0 }
 0x383   : > { %v9415_v16 = vadd.f32 %v9414_v57, %v9413_v28  ;;  %v9514_v37 = vadd.f32 %v9513_v38, %v9512_v14  ;;  %9366 = vst.msk [vmem:[%s16189_s5 + $0xb8] sm:$0xff] %vm9342_vm13, %v11658_v36  ;;  %v9467_v15 = vmul.f32 %v11658_v36, %v11658_v36  ;;  %v9420_v24 = vsel %vm9342_vm13, %v11658_v36, 0.0 }
 0x384   : > { %v9515_v55 = vsel %vm9342_vm13, %v9464_v49, 0.0  ;;  %9364 = vst.msk [vmem:[%s16189_s5 + $0xa8] sm:$0xff] %vm9342_vm13, %v11659_v63  ;;  %v9416_v5 = vsel %vm9342_vm13, %v11659_v63, 0.0  ;;  %v9465_v53 = vmul.f32 %v11659_v63, %v11659_v63  ;;  %v9519_v43 = vsel %vm9342_vm13, %v9466_v45, 0.0 }
 0x385   : > { %v9516_v10 = vadd.f32 %v9515_v55, %v9514_v37  ;;  %v9417_v48 = vadd.f32 %v9416_v5, %v9415_v16  ;;  %v11628_v19 = vpop.f32.mrb[24].mxu0  ;;  %v9521_v34 = vsel %vm9342_vm13, %v9467_v15, 0.0 }
 0x386   : > { %v11356_v42 = vpop.f32.mrb[24].mxu1  ;;  %v9279_v17 = vpop.f32.mrb[25].mxu0  ;;  %v9517_v61 = vsel %vm9342_vm13, %v9465_v53, 0.0 }
 0x387   : > { %v9419_v56 = vadd.f32 %v9418_v35, %v9417_v48  ;;  %v11660_v58 = vadd.f32 %v11628_v19, %v11356_v42  ;;  %v5005_v11 = vpop.f32.mrb[25].mxu1  ;;  %v11629_v39 = vpop.f32.mrb[26].mxu0  ;;  %v9518_v59 = vadd.f32 %v9517_v61, %v9516_v10 }
 0x388   : > { %v11661_v40 = vadd.f32 %v9279_v17, %v5005_v11  ;;  %v11357_v62 = vpop.f32.mrb[26].mxu1  ;;  %v9282_v12 = vpop.f32.mrb[27].mxu0 }
 0x389   : > { %9369 = vst.msk [vmem:[%s16189_s5 + $0xd0] sm:$0xff] %vm9342_vm13, %v11660_v58  ;;  %v9421_v22 = vadd.f32 %v9420_v24, %v9419_v56  ;;  %v11662_v50 = vadd.f32 %v11629_v39, %v11357_v62  ;;  %v5008_v8 = vpop.f32.mrb[27].mxu1  ;;  %v9520_v9 = vadd.f32 %v9519_v43, %v9518_v59  ;;  %v9470_v27 = vmul.f32 %v11660_v58, %v11660_v58 }
 0x38a   : > { %9367 = vst.msk [vmem:[%s16189_s5 + $0xc0] sm:$0xff] %vm9342_vm13, %v11661_v40  ;;  %v9422_v47 = vsel %vm9342_vm13, %v11661_v40, 0.0  ;;  %v9468_v23 = vmul.f32 %v11661_v40, %v11661_v40  ;;  %v11663_v33 = vadd.f32 %v9282_v12, %v5008_v8  ;;  %v9426_v60 = vsel %vm9342_vm13, %v11660_v58, 0.0 }
 0x38b   : > { %v9423_v13 = vadd.f32 %v9422_v47, %v9421_v22  ;;  %9370 = vst.msk [vmem:[%s16189_s5 + $0xd8] sm:$0xff] %vm9342_vm13, %v11662_v50  ;;  %v9471_v30 = vmul.f32 %v11662_v50, %v11662_v50  ;;  %v9522_v4 = vadd.f32 %v9521_v34, %v9520_v9  ;;  %v9527_v32 = vsel %vm9342_vm13, %v9470_v27, 0.0 }
 0x38c   : > { %v9523_v0 = vsel %vm9342_vm13, %v9468_v23, 0.0  ;;  %9368 = vst.msk [vmem:[%s16189_s5 + $0xc8] sm:$0xff] %vm9342_vm13, %v11663_v33  ;;  %v9424_v18 = vsel %vm9342_vm13, %v11663_v33, 0.0  ;;  %v9469_v20 = vmul.f32 %v11663_v33, %v11663_v33  ;;  %v9428_v3 = vsel %vm9342_vm13, %v11662_v50, 0.0 }
 0x38d   : > { %v9425_v52 = vadd.f32 %v9424_v18, %v9423_v13  ;;  %v11632_v2 = vpop.f32.mrb[28].mxu0  ;;  %v9524_v7 = vadd.f32 %v9523_v0, %v9522_v4  ;;  %v9529_v41 = vsel %vm9342_vm13, %v9471_v30, 0.0 }
 0x38e   : > { %v9525_v31 = vsel %vm9342_vm13, %v9469_v20, 0.0  ;;  %v11360_v21 = vpop.f32.mrb[28].mxu1  ;;  %v9295_v46 = vpop.f32.mrb[29].mxu0 }
 0x38f   : > { %v9427_v44 = vadd.f32 %v9426_v60, %v9425_v52  ;;  %v11664_v29 = vadd.f32 %v11632_v2, %v11360_v21  ;;  %v5021_v1 = vpop.f32.mrb[29].mxu1  ;;  %v11633_v26 = vpop.f32.mrb[30].mxu0  ;;  %v9526_v51 = vadd.f32 %v9525_v31, %v9524_v7 }
 0x390   : > { %v11665_v6 = vadd.f32 %v9295_v46, %v5021_v1  ;;  %v11361_v25 = vpop.f32.mrb[30].mxu1  ;;  %v9298_v38 = vpop.f32.mrb[31].mxu0 }
 0x391   : > { %9373 = vst.msk [vmem:[%s16189_s5 + $0xf0] sm:$0xff] %vm9342_vm13, %v11664_v29  ;;  %v9434_v14 = vsel %vm9342_vm13, %v11664_v29, 0.0  ;;  %v9474_v28 = vmul.f32 %v11664_v29, %v11664_v29  ;;  %v9429_v54 = vadd.f32 %v9428_v3, %v9427_v44  ;;  %v11666_v57 = vadd.f32 %v11633_v26, %v11361_v25  ;;  %v5024_v49 = vpop.f32.mrb[31].mxu1 }
 0x392   : > { %v9528_v36 = vadd.f32 %v9527_v32, %v9526_v51  ;;  %9371 = vst.msk [vmem:[%s16189_s5 + $0xe0] sm:$0xff] %vm9342_vm13, %v11665_v6  ;;  %v9430_v63 = vsel %vm9342_vm13, %v11665_v6, 0.0  ;;  %v9472_v16 = vmul.f32 %v11665_v6, %v11665_v6  ;;  %v11667_v37 = vadd.f32 %v9298_v38, %v5024_v49 }
 0x393   : > { %v9535_v55 = vsel %vm9342_vm13, %v9474_v28, 0.0  ;;  %v9431_v5 = vadd.f32 %v9430_v63, %v9429_v54  ;;  %9374 = vst.msk [vmem:[%s16189_s5 + $0xf8] sm:$0xff] %vm9342_vm13, %v11666_v57  ;;  %v9436_v45 = vsel %vm9342_vm13, %v11666_v57, 0.0  ;;  %v9475_v10 = vmul.f32 %v11666_v57, %v11666_v57 }
 0x394   : > { %v9530_v48 = vadd.f32 %v9529_v41, %v9528_v36  ;;  %v9531_v53 = vsel %vm9342_vm13, %v9472_v16, 0.0  ;;  %9372 = vst.msk [vmem:[%s16189_s5 + $0xe8] sm:$0xff] %vm9342_vm13, %v11667_v37  ;;  %v9432_v19 = vsel %vm9342_vm13, %v11667_v37, 0.0  ;;  %v9473_v35 = vmul.f32 %v11667_v37, %v11667_v37 }
 0x395   : > { %v9537_v42 = vsel %vm9342_vm13, %v9475_v10, 0.0  ;;  %v9433_v17 = vadd.f32 %v9432_v19, %v9431_v5 }
 0x396   : > { %v9532_v15 = vadd.f32 %v9531_v53, %v9530_v48  ;;  %v9533_v56 = vsel %vm9342_vm13, %v9473_v35, 0.0 }
 0x397   : > { %v9435_v61 = vadd.f32 %v9434_v14, %v9433_v17 }
 0x398   : > { %v9534_v58 = vadd.f32 %v9533_v56, %v9532_v15 }
 0x399   : > { %v9437_v11 = vadd.f32 %v9436_v45, %v9435_v61 }
 0x39a   : > { %v9536_v39 = vadd.f32 %v9535_v55, %v9534_v58 }
 0x39b   : > { %v9438_v24 = vrot.slane %v9437_v11, 4 }
 0x39c   : > { %v9538_v59 = vadd.f32 %v9537_v42, %v9536_v39 }
 0x39d   : > { %v9439_v40 = vadd.f32 %v9438_v24, %v9437_v11 }
 0x39e   : > { %v9539_v62 = vrot.slane %v9538_v59, 4 }
 0x39f   : > { %v9440_v12 = vrot.slane %v9439_v40, 2 }
 0x3a0   : > { %v9540_v43 = vadd.f32 %v9539_v62, %v9538_v59 }
 0x3a1   : > { %v9441_v22 = vadd.f32 %v9440_v12, %v9439_v40 }
 0x3a2   : > { %v9541_v50 = vrot.slane %v9540_v43, 2 }
 0x3a3   : > { %v9442_v8 = vrot.slane %v9441_v22, 1 }
 0x3a4   : > { %v9542_v9 = vadd.f32 %v9541_v50, %v9540_v43 }
 0x3a5   : > { %v9443_v23 = vadd.f32 %v9442_v8, %v9441_v22 }
 0x3a6   : > { %v9543_v47 = vrot.slane %v9542_v9, 1 }
 0x3a8   : > { %v9544_v33 = vadd.f32 %v9543_v47, %v9542_v9 }
 0x3aa   : > { %v9546_v34 = vsel %vm1319_vm7, %v9443_v23, %v9544_v33 }
 0x3ab   : > { %9548 = vst.msk [vmem:[%s181_s9] sm:$0x3] %vm9547_vm14, %v9546_v34 }
 0x3ac PF: > { %s14_s12 = sadd.s32 1, %s12368_s12  }
 0x3ad   : > { %p11_p4 = scmp.ge.s32.totalorder %s14_s12, 4  }
 0x3af   :  { %13 = sbr.rel (!%p11_p4) target bundleno = 1 (0x1), region = 90 }

</bundles_post_ra>
